<compile_context>
chip_gen: v6e
topology: v6e:2x2x1
jax: 0.10.0
libtpu: 0.0.40
codegen_flags: <defaults>
</compile_context>

<pallas_src>
import numpy as np
import jax
import jax.numpy as jnp
from jax.experimental import pallas as pl
from jax.experimental.pallas import tpu as pltpu

N_NODES = 16          # nodes per graph
H1, D1 = 4, 8         # conv1: heads=4, out_channels=8 -> 32 features
H2, D2 = 8, 8         # conv2: heads=8, out_channels=8 -> 64 features
NEG_INF = -1e30       # additive edge mask (python float literal)


# ---------------------------------------------------------------------------
# Pallas kernel
# ---------------------------------------------------------------------------
def _gat_layer(H, mask_bias, a_bd, exp_dst, exp_src, diag_mask, block_mask,
               bias, ones_mm, heads):
    """One dense multi-head GATConv on projected features H [M, heads*d].

    Heads are packed along lanes: e/p are [M, heads*M].  All cross-node /
    cross-head reductions are MXU matmuls against host-built 0/1 masks.
    """
    f32 = jnp.float32
    # alpha[:, :heads] = <H_h, att_dst_h>,  alpha[:, heads:] = <H_h, att_src_h>
    alpha = jnp.dot(H, a_bd, preferred_element_type=f32)              # [M, 2*heads]
    # e_dst[i, h*M+j] = alpha_dst[i, h]   (MXU broadcast-expand, no lane slices)
    e_dst = jnp.dot(alpha, exp_dst, preferred_element_type=f32)       # [M, heads*M]
    # k[j', h*M+j] = alpha_src[j', h] * (j'==j); column-sum gives alpha_src[j, h]
    k = jnp.dot(alpha, exp_src, preferred_element_type=f32) * diag_mask
    e_src = jnp.dot(ones_mm, k, preferred_element_type=f32)           # [M, heads*M]
    e = e_dst + e_src                       # a_dst[i,h] + a_src[j,h]
    e = jnp.maximum(e, 0.2 * e)             # LeakyReLU(0.2), single vmax
    e = e + mask_bias                       # -1e30 on non-edges / cross-graph
    # No row-max subtraction: logits are small and masked entries exp() to 0.
    p = jnp.exp(e)                                                     # [M, heads*M]
    # Block-diagonal copy of H: h_bd[h*M+j, h'*d+c] = H[j, h'*d+c] * (h==h')
    h_bd = jnp.concatenate([H] * heads, axis=0) * block_mask           # [heads*M, heads*d]
    out = jnp.dot(p, h_bd, preferred_element_type=f32)                 # [M, heads*d]
    denom = jnp.dot(p, block_mask, preferred_element_type=f32)         # rowsums, bcast to d
    y = out * pl.reciprocal(denom, approx=True) + bias
    return jnp.where(y > 0, y, jnp.exp(y) - 1.0)                       # ELU(alpha=1)


def gatnet_kernel(x_ref, mb1_ref, mb2_ref,
                  w1_ref, abd1_ref, ed1_ref, es1_ref, dg1_ref, bm1_ref, b1_ref,
                  w2_ref, abd2_ref, ed2_ref, es2_ref, dg2_ref, bm2_ref, b2_ref,
                  wf_ref, bf_ref, out_ref):
    f32 = jnp.float32
    M = x_ref.shape[0]
    ones_mm = jnp.ones((M, M), f32)          # shared src-broadcast matmul operand

    # conv1 projection: [M,1] @ [1,32] is degenerate -> VPU outer product
    h1 = x_ref[...] * w1_ref[...]                                      # [M, 32]
    x1 = _gat_layer(h1, mb1_ref[...], abd1_ref[...], ed1_ref[...], es1_ref[...],
                    dg1_ref[...], bm1_ref[...], b1_ref[...], ones_mm, H1)

    h2 = jnp.dot(x1, w2_ref[...], preferred_element_type=f32)          # [M, 64]
    x2 = _gat_layer(h2, mb2_ref[...], abd2_ref[...], ed2_ref[...], es2_ref[...],
                    dg2_ref[...], bm2_ref[...], b2_ref[...], ones_mm, H2)

    out_ref[...] = jnp.dot(x2, wf_ref[...], preferred_element_type=f32) + bf_ref[...]


# ---------------------------------------------------------------------------
# Host-side constant builders + wrapper
# ---------------------------------------------------------------------------
def _blockdiag(att):
    """[heads, d] attention vector -> block-diagonal [heads*d, heads] matrix."""
    heads, d = att.shape
    eye = jnp.eye(heads, dtype=att.dtype)
    return (att[:, :, None] * eye[:, None, :]).reshape(heads * d, heads)


def _layer_consts(heads, d, M):
    """Static 0/1 masks for one GAT layer (pure-shape constants)."""
    eye_h = np.eye(heads, dtype=np.float32)
    expand = np.kron(eye_h, np.ones((1, M), np.float32))             # [heads, heads*M]
    zeros = np.zeros_like(expand)
    exp_dst = np.concatenate([expand, zeros], axis=0)                 # [2*heads, heads*M]
    exp_src = np.concatenate([zeros, expand], axis=0)                 # [2*heads, heads*M]
    diag = np.tile(np.eye(M, dtype=np.float32), (1, heads))           # [M, heads*M]
    block = np.kron(eye_h, np.ones((M, d), np.float32))               # [heads*M, heads*d]
    return (jnp.asarray(exp_dst), jnp.asarray(exp_src),
            jnp.asarray(diag), jnp.asarray(block))


@jax.jit
def gatnet_forward_packed(x, adj, params):
    """GatNet forward for a batch of B graphs (shared parameters).

    x:   [B, N, 1]   node features
    adj: [B, N, N]   dense masks, adj[g, i, j] = 1 iff edge j->i (self-loops incl.)
    Graphs are packed along the node axis (M = B*N) into one pallas_call;
    B=1 reproduces the original single-graph module exactly.
    Returns [B, N, 1].
    """
    (w1, as1, ad1, b1, w2, as2, ad2, b2, wf, bf) = params
    B, N, _ = x.shape
    M = B * N
    xf = x.reshape(M, 1)

    # block-diagonal adjacency over the packed batch -> additive mask bias,
    # pre-tiled per head so the kernel does a single add per layer.
    adj_full = (jnp.eye(B, dtype=jnp.float32)[:, None, :, None] *
                adj[:, :, None, :]).reshape(M, M)
    mask = jnp.where(adj_full > 0, 0.0, NEG_INF).astype(jnp.float32)  # [M, M]
    mb1 = jnp.tile(mask, (1, H1))                                     # [M, H1*M]
    mb2 = jnp.tile(mask, (1, H2))                                     # [M, H2*M]

    # fused [heads*d, 2*heads] block-diag attention matrices (dst | src)
    abd1 = jnp.concatenate([_blockdiag(ad1), _blockdiag(as1)], axis=1)
    abd2 = jnp.concatenate([_blockdiag(ad2), _blockdiag(as2)], axis=1)
    ed1, es1, dg1, bm1 = _layer_consts(H1, D1, M)
    ed2, es2, dg2, bm2 = _layer_consts(H2, D2, M)

    ins = (xf, mb1, mb2,
           w1, abd1, ed1, es1, dg1, bm1, b1,
           w2, abd2, ed2, es2, dg2, bm2, b2,
           wf, bf)
    vmem = pl.BlockSpec(memory_space=pltpu.MemorySpace.VMEM)
    out = pl.pallas_call(
        gatnet_kernel,
        out_shape=jax.ShapeDtypeStruct((M, 1), jnp.float32),
        in_specs=[vmem] * len(ins),
        out_specs=vmem,
    )(*ins)
    return out.reshape(B, N, 1)


# ---------------------------------------------------------------------------
# Pure-JAX reference (per graph) for correctness checking
# ---------------------------------------------------------------------------
def _gat_layer_ref(x, adj, w, att_src, att_dst, b, heads, d):
    n = x.shape[0]
    H = (x @ w).reshape(n, heads, d)
    a_src = jnp.einsum('nhd,hd->nh', H, att_src)
    a_dst = jnp.einsum('nhd,hd->nh', H, att_dst)
    e = a_dst[:, None, :] + a_src[None, :, :]            # [i, j, h]
    e = jnp.where(e > 0, e, 0.2 * e)
    e = jnp.where(adj[:, :, None] > 0, e, NEG_INF)
    attn = jax.nn.softmax(e, axis=1)                     # softmax over sources j
    out = jnp.einsum('ijh,jhd->ihd', attn, H).reshape(n, heads * d) + b
    return jax.nn.elu(out)


def gatnet_ref(x, adj, params):
    (w1, as1, ad1, b1, w2, as2, ad2, b2, wf, bf) = params
    x1 = _gat_layer_ref(x, adj, w1, as1, ad1, b1, H1, D1)
    x2 = _gat_layer_ref(x1, adj, w2, as2, ad2, b2, H2, D2)
    return x2 @ wf + bf


# ---------------------------------------------------------------------------
# Demo inputs
# ---------------------------------------------------------------------------
def make_ring_adj(n):
    """Deterministic ring graph (both directions) + self loops, dense mask."""
    src, dst = [], []
    for i in range(n):
        src += [i, (i + 1) % n]
        dst += [(i + 1) % n, i]
    adj = np.zeros((n, n), np.float32)
    adj[np.asarray(dst), np.asarray(src)] = 1.0           # adj[target, source] = 1
    np.fill_diagonal(adj, 1.0)                            # GATConv add_self_loops=True
    return adj


def make_params(key):
    ks = jax.random.split(key, 7)
    s = 0.1
    w1 = s * jax.random.normal(ks[0], (1, H1 * D1), jnp.float32)
    as1 = s * jax.random.normal(ks[1], (H1, D1), jnp.float32)
    ad1 = s * jax.random.normal(ks[2], (H1, D1), jnp.float32)
    b1 = jnp.zeros((1, H1 * D1), jnp.float32)
    w2 = s * jax.random.normal(ks[3], (H1 * D1, H2 * D2), jnp.float32)
    as2 = s * jax.random.normal(ks[4], (H2, D2), jnp.float32)
    ad2 = s * jax.random.normal(ks[5], (H2, D2), jnp.float32)
    b2 = jnp.zeros((1, H2 * D2), jnp.float32)
    wf = s * jax.random.normal(ks[6], (H2 * D2, 1), jnp.float32)
    bf = jnp.zeros((1, 1), jnp.float32)
    return (w1, as1, ad1, b1, w2, as2, ad2, b2, wf, bf)


if __name__ == "__main__":
    key = jax.random.PRNGKey(0)
    k_x, k_p = jax.random.split(key)

    B = 8                                    # 8 graphs -> M = 128 packed nodes
    x = jax.random.normal(k_x, (B, N_NODES, 1), jnp.float32)     # data.x_tmp per graph
    adj = jnp.tile(jnp.asarray(make_ring_adj(N_NODES))[None], (B, 1, 1))
    params = make_params(k_p)

    out = gatnet_forward_packed(x, adj, params)
    out = jax.block_until_ready(out)

    # per-graph pure-JAX reference (exact softmax; kernel uses approx reciprocal,
    # so allow ~1e-2 absolute/relative tolerance)
    ref = jax.vmap(lambda xg, ag: gatnet_ref(xg, ag, params))(x, adj)

    assert out.shape == (B, N_NODES, 1)
    assert bool(jnp.all(jnp.isfinite(out)))
    assert bool(jnp.allclose(out, ref, atol=1e-2, rtol=1e-2)), \
        float(jnp.max(jnp.abs(out - ref)))
    print("KERNEL_OK")
</pallas_src>

<mosaic_0001>
module attributes {stable_mosaic.version = 11 : i64} {
  func.func @gatnet_kernel(%arg0: memref<128x1xf32, #tpu.memory_space<vmem>>, %arg1: memref<128x512xf32, #tpu.memory_space<vmem>>, %arg2: memref<128x1024xf32, #tpu.memory_space<vmem>>, %arg3: memref<1x32xf32, #tpu.memory_space<vmem>>, %arg4: memref<32x8xf32, #tpu.memory_space<vmem>>, %arg5: memref<8x512xf32, #tpu.memory_space<vmem>>, %arg6: memref<8x512xf32, #tpu.memory_space<vmem>>, %arg7: memref<128x512xf32, #tpu.memory_space<vmem>>, %arg8: memref<512x32xf32, #tpu.memory_space<vmem>>, %arg9: memref<1x32xf32, #tpu.memory_space<vmem>>, %arg10: memref<32x64xf32, #tpu.memory_space<vmem>>, %arg11: memref<64x16xf32, #tpu.memory_space<vmem>>, %arg12: memref<16x1024xf32, #tpu.memory_space<vmem>>, %arg13: memref<16x1024xf32, #tpu.memory_space<vmem>>, %arg14: memref<128x1024xf32, #tpu.memory_space<vmem>>, %arg15: memref<1024x64xf32, #tpu.memory_space<vmem>>, %arg16: memref<1x64xf32, #tpu.memory_space<vmem>>, %arg17: memref<64x1xf32, #tpu.memory_space<vmem>>, %arg18: memref<1x1xf32, #tpu.memory_space<vmem>>, %arg19: memref<128x1xf32, #tpu.memory_space<vmem>>) attributes {dimension_semantics = [], scalar_prefetch = 0 : i64, scratch_operands = 0 : i64, tpu.core_type = #tpu.core_type<tc>} {
    %cst = arith.constant 1.000000e+00 : f32
    %0 = vector.broadcast %cst : f32 to vector<128x128xf32>
    %c0 = arith.constant 0 : index
    %c0_0 = arith.constant 0 : index
    %1 = vector.load %arg0[%c0, %c0_0] : memref<128x1xf32, #tpu.memory_space<vmem>>, vector<128x1xf32>
    %c0_1 = arith.constant 0 : index
    %c0_2 = arith.constant 0 : index
    %2 = vector.load %arg3[%c0_1, %c0_2] : memref<1x32xf32, #tpu.memory_space<vmem>>, vector<1x32xf32>
    %3 = vector.broadcast %1 : vector<128x1xf32> to vector<128x32xf32>
    %4 = vector.broadcast %2 : vector<1x32xf32> to vector<128x32xf32>
    %5 = arith.mulf %3, %4 : vector<128x32xf32>
    %c0_3 = arith.constant 0 : index
    %c0_4 = arith.constant 0 : index
    %6 = vector.load %arg1[%c0_3, %c0_4] : memref<128x512xf32, #tpu.memory_space<vmem>>, vector<128x512xf32>
    %c0_5 = arith.constant 0 : index
    %c0_6 = arith.constant 0 : index
    %7 = vector.load %arg4[%c0_5, %c0_6] : memref<32x8xf32, #tpu.memory_space<vmem>>, vector<32x8xf32>
    %c0_7 = arith.constant 0 : index
    %c0_8 = arith.constant 0 : index
    %8 = vector.load %arg5[%c0_7, %c0_8] : memref<8x512xf32, #tpu.memory_space<vmem>>, vector<8x512xf32>
    %c0_9 = arith.constant 0 : index
    %c0_10 = arith.constant 0 : index
    %9 = vector.load %arg6[%c0_9, %c0_10] : memref<8x512xf32, #tpu.memory_space<vmem>>, vector<8x512xf32>
    %c0_11 = arith.constant 0 : index
    %c0_12 = arith.constant 0 : index
    %10 = vector.load %arg7[%c0_11, %c0_12] : memref<128x512xf32, #tpu.memory_space<vmem>>, vector<128x512xf32>
    %c0_13 = arith.constant 0 : index
    %c0_14 = arith.constant 0 : index
    %11 = vector.load %arg8[%c0_13, %c0_14] : memref<512x32xf32, #tpu.memory_space<vmem>>, vector<512x32xf32>
    %c0_15 = arith.constant 0 : index
    %c0_16 = arith.constant 0 : index
    %12 = vector.load %arg9[%c0_15, %c0_16] : memref<1x32xf32, #tpu.memory_space<vmem>>, vector<1x32xf32>
    %cst_17 = arith.constant dense<0.000000e+00> : vector<128x8xf32>
    %13 = tpu.matmul %5, %7, %cst_17 {dimension_numbers = #tpu.dot_dimension_numbers<[1], [0], [0], [1], [0, 0, 1, 1], [], []>} : vector<128x32xf32>, vector<32x8xf32>, vector<128x8xf32> -> vector<128x8xf32>
    %cst_18 = arith.constant dense<0.000000e+00> : vector<128x512xf32>
    %14 = tpu.matmul %13, %8, %cst_18 {dimension_numbers = #tpu.dot_dimension_numbers<[1], [0], [0], [1], [0, 0, 1, 1], [], []>} : vector<128x8xf32>, vector<8x512xf32>, vector<128x512xf32> -> vector<128x512xf32>
    %cst_19 = arith.constant dense<0.000000e+00> : vector<128x512xf32>
    %15 = tpu.matmul %13, %9, %cst_19 {dimension_numbers = #tpu.dot_dimension_numbers<[1], [0], [0], [1], [0, 0, 1, 1], [], []>} : vector<128x8xf32>, vector<8x512xf32>, vector<128x512xf32> -> vector<128x512xf32>
    %16 = arith.mulf %15, %10 : vector<128x512xf32>
    %cst_20 = arith.constant dense<0.000000e+00> : vector<128x512xf32>
    %17 = tpu.matmul %0, %16, %cst_20 {dimension_numbers = #tpu.dot_dimension_numbers<[1], [0], [0], [1], [0, 0, 1, 1], [], []>} : vector<128x128xf32>, vector<128x512xf32>, vector<128x512xf32> -> vector<128x512xf32>
    %18 = arith.addf %14, %17 : vector<128x512xf32>
    %cst_21 = arith.constant 2.000000e-01 : f32
    %19 = vector.broadcast %cst_21 : f32 to vector<128x512xf32>
    %20 = arith.mulf %19, %18 : vector<128x512xf32>
    %21 = arith.maximumf %18, %20 : vector<128x512xf32>
    %22 = arith.addf %21, %6 : vector<128x512xf32>
    %23 = math.exp %22 : vector<128x512xf32>
    %24 = tpu.concatenate %5, %5, %5, %5 in 0 : vector<128x32xf32>, vector<128x32xf32>, vector<128x32xf32>, vector<128x32xf32> -> vector<512x32xf32>
    %25 = arith.mulf %24, %11 : vector<512x32xf32>
    %cst_22 = arith.constant dense<0.000000e+00> : vector<128x32xf32>
    %26 = tpu.matmul %23, %25, %cst_22 {dimension_numbers = #tpu.dot_dimension_numbers<[1], [0], [0], [1], [0, 0, 1, 1], [], []>} : vector<128x512xf32>, vector<512x32xf32>, vector<128x32xf32> -> vector<128x32xf32>
    %cst_23 = arith.constant dense<0.000000e+00> : vector<128x32xf32>
    %27 = tpu.matmul %23, %11, %cst_23 {dimension_numbers = #tpu.dot_dimension_numbers<[1], [0], [0], [1], [0, 0, 1, 1], [], []>} : vector<128x512xf32>, vector<512x32xf32>, vector<128x32xf32> -> vector<128x32xf32>
    %28 = tpu.reciprocal %27 {approx = true} : vector<128x32xf32> -> vector<128x32xf32>
    %29 = arith.mulf %26, %28 : vector<128x32xf32>
    %30 = vector.broadcast %12 : vector<1x32xf32> to vector<128x32xf32>
    %31 = arith.addf %29, %30 : vector<128x32xf32>
    %cst_24 = arith.constant 0.000000e+00 : f32
    %32 = vector.broadcast %cst_24 : f32 to vector<128x32xf32>
    %33 = arith.cmpf ogt, %31, %32 : vector<128x32xf32>
    %34 = math.exp %31 : vector<128x32xf32>
    %cst_25 = arith.constant 1.000000e+00 : f32
    %35 = vector.broadcast %cst_25 : f32 to vector<128x32xf32>
    %36 = arith.subf %34, %35 : vector<128x32xf32>
    %37 = arith.select %33, %31, %36 : vector<128x32xi1>, vector<128x32xf32>
    %c0_26 = arith.constant 0 : index
    %c0_27 = arith.constant 0 : index
    %38 = vector.load %arg10[%c0_26, %c0_27] : memref<32x64xf32, #tpu.memory_space<vmem>>, vector<32x64xf32>
    %cst_28 = arith.constant dense<0.000000e+00> : vector<128x64xf32>
    %39 = tpu.matmul %37, %38, %cst_28 {dimension_numbers = #tpu.dot_dimension_numbers<[1], [0], [0], [1], [0, 0, 1, 1], [], []>} : vector<128x32xf32>, vector<32x64xf32>, vector<128x64xf32> -> vector<128x64xf32>
    %c0_29 = arith.constant 0 : index
    %c0_30 = arith.constant 0 : index
    %40 = vector.load %arg2[%c0_29, %c0_30] : memref<128x1024xf32, #tpu.memory_space<vmem>>, vector<128x1024xf32>
    %c0_31 = arith.constant 0 : index
    %c0_32 = arith.constant 0 : index
    %41 = vector.load %arg11[%c0_31, %c0_32] : memref<64x16xf32, #tpu.memory_space<vmem>>, vector<64x16xf32>
    %c0_33 = arith.constant 0 : index
    %c0_34 = arith.constant 0 : index
    %42 = vector.load %arg12[%c0_33, %c0_34] : memref<16x1024xf32, #tpu.memory_space<vmem>>, vector<16x1024xf32>
    %c0_35 = arith.constant 0 : index
    %c0_36 = arith.constant 0 : index
    %43 = vector.load %arg13[%c0_35, %c0_36] : memref<16x1024xf32, #tpu.memory_space<vmem>>, vector<16x1024xf32>
    %c0_37 = arith.constant 0 : index
    %c0_38 = arith.constant 0 : index
    %44 = vector.load %arg14[%c0_37, %c0_38] : memref<128x1024xf32, #tpu.memory_space<vmem>>, vector<128x1024xf32>
    %c0_39 = arith.constant 0 : index
    %c0_40 = arith.constant 0 : index
    %45 = vector.load %arg15[%c0_39, %c0_40] : memref<1024x64xf32, #tpu.memory_space<vmem>>, vector<1024x64xf32>
    %c0_41 = arith.constant 0 : index
    %c0_42 = arith.constant 0 : index
    %46 = vector.load %arg16[%c0_41, %c0_42] : memref<1x64xf32, #tpu.memory_space<vmem>>, vector<1x64xf32>
    %cst_43 = arith.constant dense<0.000000e+00> : vector<128x16xf32>
    %47 = tpu.matmul %39, %41, %cst_43 {dimension_numbers = #tpu.dot_dimension_numbers<[1], [0], [0], [1], [0, 0, 1, 1], [], []>} : vector<128x64xf32>, vector<64x16xf32>, vector<128x16xf32> -> vector<128x16xf32>
    %cst_44 = arith.constant dense<0.000000e+00> : vector<128x1024xf32>
    %48 = tpu.matmul %47, %42, %cst_44 {dimension_numbers = #tpu.dot_dimension_numbers<[1], [0], [0], [1], [0, 0, 1, 1], [], []>} : vector<128x16xf32>, vector<16x1024xf32>, vector<128x1024xf32> -> vector<128x1024xf32>
    %cst_45 = arith.constant dense<0.000000e+00> : vector<128x1024xf32>
    %49 = tpu.matmul %47, %43, %cst_45 {dimension_numbers = #tpu.dot_dimension_numbers<[1], [0], [0], [1], [0, 0, 1, 1], [], []>} : vector<128x16xf32>, vector<16x1024xf32>, vector<128x1024xf32> -> vector<128x1024xf32>
    %50 = arith.mulf %49, %44 : vector<128x1024xf32>
    %cst_46 = arith.constant dense<0.000000e+00> : vector<128x1024xf32>
    %51 = tpu.matmul %0, %50, %cst_46 {dimension_numbers = #tpu.dot_dimension_numbers<[1], [0], [0], [1], [0, 0, 1, 1], [], []>} : vector<128x128xf32>, vector<128x1024xf32>, vector<128x1024xf32> -> vector<128x1024xf32>
    %52 = arith.addf %48, %51 : vector<128x1024xf32>
    %cst_47 = arith.constant 2.000000e-01 : f32
    %53 = vector.broadcast %cst_47 : f32 to vector<128x1024xf32>
    %54 = arith.mulf %53, %52 : vector<128x1024xf32>
    %55 = arith.maximumf %52, %54 : vector<128x1024xf32>
    %56 = arith.addf %55, %40 : vector<128x1024xf32>
    %57 = math.exp %56 : vector<128x1024xf32>
    %58 = tpu.concatenate %39, %39, %39, %39, %39, %39, %39, %39 in 0 : vector<128x64xf32>, vector<128x64xf32>, vector<128x64xf32>, vector<128x64xf32>, vector<128x64xf32>, vector<128x64xf32>, vector<128x64xf32>, vector<128x64xf32> -> vector<1024x64xf32>
    %59 = arith.mulf %58, %45 : vector<1024x64xf32>
    %cst_48 = arith.constant dense<0.000000e+00> : vector<128x64xf32>
    %60 = tpu.matmul %57, %59, %cst_48 {dimension_numbers = #tpu.dot_dimension_numbers<[1], [0], [0], [1], [0, 0, 1, 1], [], []>} : vector<128x1024xf32>, vector<1024x64xf32>, vector<128x64xf32> -> vector<128x64xf32>
    %cst_49 = arith.constant dense<0.000000e+00> : vector<128x64xf32>
    %61 = tpu.matmul %57, %45, %cst_49 {dimension_numbers = #tpu.dot_dimension_numbers<[1], [0], [0], [1], [0, 0, 1, 1], [], []>} : vector<128x1024xf32>, vector<1024x64xf32>, vector<128x64xf32> -> vector<128x64xf32>
    %62 = tpu.reciprocal %61 {approx = true} : vector<128x64xf32> -> vector<128x64xf32>
    %63 = arith.mulf %60, %62 : vector<128x64xf32>
    %64 = vector.broadcast %46 : vector<1x64xf32> to vector<128x64xf32>
    %65 = arith.addf %63, %64 : vector<128x64xf32>
    %cst_50 = arith.constant 0.000000e+00 : f32
    %66 = vector.broadcast %cst_50 : f32 to vector<128x64xf32>
    %67 = arith.cmpf ogt, %65, %66 : vector<128x64xf32>
    %68 = math.exp %65 : vector<128x64xf32>
    %cst_51 = arith.constant 1.000000e+00 : f32
    %69 = vector.broadcast %cst_51 : f32 to vector<128x64xf32>
    %70 = arith.subf %68, %69 : vector<128x64xf32>
    %71 = arith.select %67, %65, %70 : vector<128x64xi1>, vector<128x64xf32>
    %c0_52 = arith.constant 0 : index
    %c0_53 = arith.constant 0 : index
    %72 = vector.load %arg17[%c0_52, %c0_53] : memref<64x1xf32, #tpu.memory_space<vmem>>, vector<64x1xf32>
    %cst_54 = arith.constant dense<0.000000e+00> : vector<128x1xf32>
    %73 = tpu.matmul %71, %72, %cst_54 {dimension_numbers = #tpu.dot_dimension_numbers<[1], [0], [0], [1], [0, 0, 1, 1], [], []>} : vector<128x64xf32>, vector<64x1xf32>, vector<128x1xf32> -> vector<128x1xf32>
    %c0_55 = arith.constant 0 : index
    %c0_56 = arith.constant 0 : index
    %74 = vector.load %arg18[%c0_55, %c0_56] : memref<1x1xf32, #tpu.memory_space<vmem>>, vector<1x1xf32>
    %75 = vector.broadcast %74 : vector<1x1xf32> to vector<128x1xf32>
    %76 = arith.addf %73, %75 : vector<128x1xf32>
    %c0_57 = arith.constant 0 : index
    %c0_58 = arith.constant 0 : index
    %77 = vector.load %arg19[%c0_57, %c0_58] : memref<128x1xf32, #tpu.memory_space<vmem>>, vector<128x1xf32>
    tpu.vector_store %arg19[%c0_57, %c0_58], %76 {strides = array<i32>} : memref<128x1xf32, #tpu.memory_space<vmem>>, vector<128x1xf32>,
    return
  }
}

</mosaic_0001>

<bundles_post_ra>
// kernel: gatnet_forward_packed.1
= control target key start
LH: loop header
LB: loop body
LE: loop exit
PB: predicated region body
PF: predicated region fallthrough
CT: control target
= control target key end

     0   :  { %v10144_v0 = vmov 0   ;;  %vm388_vm0 = vcmask 261120   ;;  %v16896_v58 = vmov 0.0   ;;  %vm582_vm1 = vcmask 64512   ;;  %s16873_s0 = inlined_call_operand.vmem [shape: f32[128,1], index: 0, kind: input, shape index: {}]   ;;  %s16874_s4 = inlined_call_operand.vmem [shape: f32[32,8], index: 4, kind: input, shape index: {}]   ;;  %s16875_s3 = inlined_call_operand.vmem [shape: f32[1,32], index: 3, kind: input, shape index: {}]   ;;  %s16876_s6 = inlined_call_operand.vmem [shape: f32[8,512], index: 6, kind: input, shape index: {}]   ;;  %s16877_s7 = inlined_call_operand.vmem [shape: f32[128,512], index: 7, kind: input, shape index: {}]   ;;  %s16878_s5 = inlined_call_operand.vmem [shape: f32[8,512], index: 5, kind: input, shape index: {}]   ;;  %s16879_s8 = inlined_call_operand.vmem [shape: f32[512,32], index: 8, kind: input, shape index: {}]   ;;  %s16880_s1 = inlined_call_operand.vmem [shape: f32[128,512], index: 1, kind: input, shape index: {}]   ;;  %s16881_s10 = inlined_call_operand.vmem [shape: f32[32,64], index: 10, kind: input, shape index: {}]   ;;  %s16882_s11 = inlined_call_operand.vmem [shape: f32[64,16], index: 11, kind: input, shape index: {}]   ;;  %s16883_s9 = inlined_call_operand.vmem [shape: f32[1,32], index: 9, kind: input, shape index: {}]   ;;  %s16884_s13 = inlined_call_operand.vmem [shape: f32[16,1024], index: 13, kind: input, shape index: {}]   ;;  %s16885_s14 = inlined_call_operand.vmem [shape: f32[128,1024], index: 14, kind: input, shape index: {}]   ;;  %s16886_s12 = inlined_call_operand.vmem [shape: f32[16,1024], index: 12, kind: input, shape index: {}]   ;;  %s16887_s15 = inlined_call_operand.vmem [shape: f32[1024,64], index: 15, kind: input, shape index: {}]   ;;  %s16888_s2 = inlined_call_operand.vmem [shape: f32[128,1024], index: 2, kind: input, shape index: {}]   ;;  %s16889_s17 = inlined_call_operand.vmem [shape: f32[64,1], index: 17, kind: input, shape index: {}]   ;;  %s16890_s18 = inlined_call_operand.<no memory space> [shape: f32[1,1], index: 18, kind: input, shape index: {}]   ;;  %s16891_s16 = inlined_call_operand.vmem [shape: f32[1,64], index: 16, kind: input, shape index: {}]   ;;  %s16892_s19 = inlined_call_operand.vmem [shape: f32[128,1], index: 19, kind: output, shape index: {}]  }
   0x1   :  { %17120 = sst [smem:[#allocation152_spill]] %s16873_s0  ;;  %9463 = vset.pattern.permute.xlu1 %v10144_v0  ;;  %9462 = vset.pattern.permute.xlu0 %v10144_v0 }
   0x2   :  { %17121 = sst [smem:[#allocation153_spill]] %s16874_s4  ;;  %695 = vmatprep.mubr.f32.mxu1 %v16896_v58 }
   0x3   :  { %17122 = sst [smem:[#allocation154_spill]] %s16875_s3 }
   0x4   :  { %17123 = sst [smem:[#allocation155_spill]] %s16876_s6 }
   0x5   :  { %s17124_s20 = sld [smem:[#allocation152_spill]] }
   0x6   :  { %s17125_s26 = sld [smem:[#allocation153_spill]] }
   0x7   :  { %s17126_s21 = sld [smem:[#allocation154_spill]] }
   0xb   :  { %v66_v1 = vld [vmem:[%s17124_s20 + $0x10] sm:$0xff]  ;;  %v64_v2 = vld [vmem:[%s17124_s20] sm:$0xff]  ;;  %v67_v3 = vld [vmem:[%s17124_s20 + $0x18] sm:$0xff] }
   0xc   :  { %93 = vperm.xlu1 %9463, %v66_v1   ;;  %83 = vperm.xlu0 %9462, %v64_v2   ;;  %v65_v4 = vld [vmem:[%s17124_s20 + $0x8] sm:$0xff]  ;;  %v250_v5 = vld [vmem:[%s17125_s26 + $0x18] sm:$0xff]  ;;  %v68_v7 = vld [vmem:[%s17124_s20 + $0x20] sm:$0xff] }
   0xd   :  { %v69_v6 = vld [vmem:[%s17124_s20 + $0x28] sm:$0xff]  ;;  %9315 = vmatprep.subr.mxu0 %v250_v5  ;;  %v249_v8 = vld [vmem:[%s17125_s26 + $0x10] sm:$0xff]  ;;  %v71_v10 = vld [vmem:[%s17124_s20 + $0x38] sm:$0xff] }
   0xe   :  { %9316 = vmatpush3.msra.mxu0 %v250_v5  ;;  %v248_v9 = vld [vmem:[%s17125_s26 + $0x8] sm:$0xff]  ;;  %v70_v11 = vld [vmem:[%s17124_s20 + $0x30] sm:$0xff]  ;;  %v247_v12 = vld [vmem:[%s17125_s26] sm:$0xff]  ;;  %s17143_s26 = sld [smem:[#allocation155_spill]] }
   0xf   :  { %9317 = vmatprep.subr.mxu0 %v249_v8  ;;  %v73_v13 = vld [vmem:[%s17124_s20 + $0x48] sm:$0xff]  ;;  %v72_v14 = vld [vmem:[%s17124_s20 + $0x40] sm:$0xff]  ;;  %v75_v15 = vld [vmem:[%s17124_s20 + $0x58] sm:$0xff] }
  0x10   :  { %98 = vperm.xlu1 %9463, %v67_v3   ;;  %88 = vperm.xlu0 %9462, %v65_v4   ;;  %v74_v16 = vld [vmem:[%s17124_s20 + $0x50] sm:$0xff]  ;;  %v77_v17 = vld [vmem:[%s17124_s20 + $0x68] sm:$0xff]  ;;  %v76_v18 = vld [vmem:[%s17124_s20 + $0x60] sm:$0xff] }
  0x11   :  { %9318 = vmatpush3.msra.mxu0 %v249_v8  ;;  %v79_v19 = vld [vmem:[%s17124_s20 + $0x78] sm:$0xff]  ;;  %v78_v20 = vld [vmem:[%s17124_s20 + $0x70] sm:$0xff]  ;;  %v7975_v21 = vld [vmem:[%s17126_s21] ss:$0 sm:$0xff] }
  0x12   :  { %9319 = vmatprep.subr.mxu0 %v248_v9 }
  0x13   :  { %9320 = vmatpush3.msra.mxu0 %v248_v9 }
  0x14   :  { %108 = vperm.xlu1 %9463, %v69_v6   ;;  %103 = vperm.xlu0 %9462, %v68_v7   ;;  %v256_v54 = vld [vmem:[%s17143_s26 + $0x8] sm:$0xff]  ;;  %v258_v55 = vld [vmem:[%s17143_s26 + $0x18] sm:$0xff]  ;;  %v255_v56 = vld [vmem:[%s17143_s26] sm:$0xff] }
  0x15   :  { %9321 = vmatprep.subr.mxu0 %v247_v12  ;;  %661 = vmatprep.subr.mxu1 %v256_v54  ;;  %v257_v57 = vld [vmem:[%s17143_s26 + $0x10] sm:$0xff] }
  0x16   :  { %9322 = vmatpush3.msra.mxu0 %v247_v12  ;;  %662 = vmatpush1.msra.mxu1 %v255_v56 }
  0x17   :  { %822 = vmatprep.subr.mxu0 %v258_v55 }
  0x18   :  { %118 = vperm.xlu1 %9463, %v71_v10   ;;  %113 = vperm.xlu0 %9462, %v70_v11  }
  0x1c   :  { %128 = vperm.xlu1 %9463, %v73_v13   ;;  %123 = vperm.xlu0 %9462, %v72_v14  }
  0x20   :  { %138 = vperm.xlu1 %9463, %v75_v15   ;;  %133 = vperm.xlu0 %9462, %v74_v16  }
  0x24   :  { %148 = vperm.xlu1 %9463, %v77_v17   ;;  %143 = vperm.xlu0 %9462, %v76_v18  }
  0x28   :  { %158 = vperm.xlu1 %9463, %v79_v19   ;;  %153 = vperm.xlu0 %9462, %v78_v20  }
  0x87   :  { %v94_v22 = vpop.permute.xlu1 %93  ;;  %v84_v23 = vpop.permute.xlu0 %83 }
  0x88   :  { %v10310_v24 = vmul.f32 %v7975_v21, %v84_v23  ;;  %v10314_v25 = vmul.f32 %v7975_v21, %v94_v22 }
  0x8a   :  { %17127 = vst [vmem:[#allocation3_spill] sm:$0xff] %v10310_v24  ;;  %9323 = vmatprep.mubr.msk.f32.mxu0 %vm388_vm0, %v10310_v24  ;;  %17128 = vst [vmem:[#allocation4_spill] sm:$0xff] %v10314_v25 }
  0x8b   :  { %v99_v26 = vpop.permute.xlu1 %98  ;;  %v89_v27 = vpop.permute.xlu0 %88 }
  0x8c   :  { %v10316_v28 = vmul.f32 %v7975_v21, %v89_v27  ;;  %v10318_v29 = vmul.f32 %v7975_v21, %v99_v26 }
  0x8e   :  { %17129 = vst [vmem:[#allocation5_spill] sm:$0xff] %v10316_v28  ;;  %17130 = vst [vmem:[#allocation6_spill] sm:$0xff] %v10318_v29  ;;  %9324 = vmatmul.mubr.msk.f32.vlgmr.msra.gmra.mxu0 %vm388_vm0, %v10316_v28 }
  0x8f   :  { %v109_v30 = vpop.permute.xlu1 %108  ;;  %v104_v31 = vpop.permute.xlu0 %103  ;;  %9326 = vmatprep.mubr.msk.f32.mxu0 %vm388_vm0, %v10314_v25  ;;  %823 = vmatpush1.msra.mxu0 %v257_v57 }
  0x90   :  { %v10324_v32 = vmul.f32 %v7975_v21, %v104_v31  ;;  %v10330_v35 = vmul.f32 %v7975_v21, %v109_v30 }
  0x92   :  { %17131 = vst [vmem:[#allocation7_spill] sm:$0xff] %v10324_v32  ;;  %9327 = vmatmul.mubr.msk.f32.gmra.mxu0 %vm388_vm0, %v10318_v29  ;;  %17132 = vst [vmem:[#allocation8_spill] sm:$0xff] %v10330_v35 }
  0x93   :  { %v119_v33 = vpop.permute.xlu1 %118  ;;  %9329 = vmatprep.mubr.msk.f32.mxu0 %vm388_vm0, %v10324_v32  ;;  %v114_v34 = vpop.permute.xlu0 %113 }
  0x94   :  { %v10332_v36 = vmul.f32 %v7975_v21, %v114_v34  ;;  %v10338_v39 = vmul.f32 %v7975_v21, %v119_v33 }
  0x96   :  { %17133 = vst [vmem:[#allocation9_spill] sm:$0xff] %v10332_v36  ;;  %9330 = vmatmul.mubr.msk.f32.gmra.mxu0 %vm388_vm0, %v10330_v35  ;;  %17134 = vst [vmem:[#allocation10_spill] sm:$0xff] %v10338_v39 }
  0x97   :  { %v129_v37 = vpop.permute.xlu1 %128  ;;  %9332 = vmatprep.mubr.msk.f32.mxu0 %vm388_vm0, %v10332_v36  ;;  %v124_v38 = vpop.permute.xlu0 %123 }
  0x98   :  { %v10340_v40 = vmul.f32 %v7975_v21, %v124_v38  ;;  %v10346_v43 = vmul.f32 %v7975_v21, %v129_v37 }
  0x9a   :  { %17135 = vst [vmem:[#allocation11_spill] sm:$0xff] %v10340_v40  ;;  %9333 = vmatmul.mubr.msk.f32.gmra.mxu0 %vm388_vm0, %v10338_v39  ;;  %17136 = vst [vmem:[#allocation12_spill] sm:$0xff] %v10346_v43 }
  0x9b   :  { %v139_v41 = vpop.permute.xlu1 %138  ;;  %9335 = vmatprep.mubr.msk.f32.mxu0 %vm388_vm0, %v10340_v40  ;;  %v134_v42 = vpop.permute.xlu0 %133 }
  0x9c   :  { %v10348_v44 = vmul.f32 %v7975_v21, %v134_v42  ;;  %v10354_v47 = vmul.f32 %v7975_v21, %v139_v41 }
  0x9e   :  { %17137 = vst [vmem:[#allocation13_spill] sm:$0xff] %v10348_v44  ;;  %9336 = vmatmul.mubr.msk.f32.gmra.mxu0 %vm388_vm0, %v10346_v43  ;;  %17138 = vst [vmem:[#allocation14_spill] sm:$0xff] %v10354_v47 }
  0x9f   :  { %v149_v45 = vpop.permute.xlu1 %148  ;;  %9338 = vmatprep.mubr.msk.f32.mxu0 %vm388_vm0, %v10348_v44  ;;  %v144_v46 = vpop.permute.xlu0 %143 }
  0xa0   :  { %v10356_v48 = vmul.f32 %v7975_v21, %v144_v46  ;;  %v10362_v50 = vmul.f32 %v7975_v21, %v149_v45 }
  0xa2   :  { %17139 = vst [vmem:[#allocation15_spill] sm:$0xff] %v10356_v48  ;;  %9339 = vmatmul.mubr.msk.f32.gmra.mxu0 %vm388_vm0, %v10354_v47  ;;  %17140 = vst [vmem:[#allocation16_spill] sm:$0xff] %v10362_v50 }
  0xa3   :  { %9341 = vmatprep.mubr.msk.f32.mxu0 %vm388_vm0, %v10356_v48  ;;  %v154_v49 = vpop.permute.xlu0 %153  ;;  %v159_v52 = vpop.permute.xlu1 %158 }
  0xa4   :  { %v10364_v51 = vmul.f32 %v7975_v21, %v154_v49  ;;  %v10370_v53 = vmul.f32 %v7975_v21, %v159_v52 }
  0xa6   :  { %17141 = vst [vmem:[#allocation17_spill] sm:$0xff] %v10364_v51  ;;  %9342 = vmatmul.mubr.msk.f32.gmra.mxu0 %vm388_vm0, %v10362_v50  ;;  %17142 = vst [vmem:[#allocation18_spill] sm:$0xff] %v10370_v53 }
  0xa7   :  { %9344 = vmatprep.mubr.msk.f32.mxu0 %vm388_vm0, %v10364_v51 }
  0xaa   :  { %9345 = vmatmul.mubr.msk.f32.gmra.mxu0 %vm388_vm0, %v10370_v53  ;;  %v322_v53 = vld [vmem:[%s16877_s7 + $0x1f8] sm:$0xff] }
  0xab   :  { %856 = vmatprep.mubr.f32.mxu0 %v16896_v58 }
 0x14e   :  { %v10388_v59 = vpop.f32.mrf.mxu0 }
 0x14f   :  { %17144 = vst [vmem:[#allocation19_spill] sm:$0xff] %v10388_v59 }
 0x150   :  { %v10390_v60 = vpop.f32.mrf.mxu0 }
 0x151   :  { %17145 = vst [vmem:[#allocation20_spill] sm:$0xff] %v10390_v60  ;;  %7992 = vmatmul.mubr.msk.f32.vlgmr.msra.gmra.mxu1 %vm582_vm1, %v10390_v60  ;;  %8008 = vmatmul.mubr.msk.f32.vlgmr.msra.gmra.mxu0 %vm582_vm1, %v10390_v60  ;;  %v320_v60 = vld [vmem:[%s16877_s7 + $0x1e8] sm:$0xff] }
 0x152   :  { %701 = vmatprep.mubr.f32.mxu1 %v16896_v58  ;;  %862 = vmatprep.mubr.f32.mxu0 %v16896_v58  ;;  %v10398_v61 = vpop.f32.mrf.mxu0 }
 0x153   :  { %17146 = vst [vmem:[#allocation21_spill] sm:$0xff] %v10398_v61 }
 0x154   :  { %v10406_v62 = vpop.f32.mrf.mxu0 }
 0x155   :  { %7993 = vmatmul.mubr.msk.f32.gmra.mxu1 %vm582_vm1, %v10388_v59  ;;  %8009 = vmatmul.mubr.msk.f32.gmra.mxu0 %vm582_vm1, %v10388_v59  ;;  %17147 = vst [vmem:[#allocation22_spill] sm:$0xff] %v10406_v62 }
 0x156   :  { %707 = vmatprep.mubr.f32.mxu1 %v16896_v58  ;;  %868 = vmatprep.mubr.f32.mxu0 %v16896_v58  ;;  %v10414_v63 = vpop.f32.mrf.mxu0 }
 0x157   :  { %17148 = vst [vmem:[#allocation23_spill] sm:$0xff] %v10414_v63 }
 0x158   :  { %v10422_v0 = vpop.f32.mrf.mxu0 }
 0x159   :  { %7994 = vmatmul.mubr.msk.f32.gmra.mxu1 %vm582_vm1, %v10406_v62  ;;  %8010 = vmatmul.mubr.msk.f32.gmra.mxu0 %vm582_vm1, %v10406_v62  ;;  %17149 = vst [vmem:[#allocation24_spill] sm:$0xff] %v10422_v0 }
 0x15a   :  { %713 = vmatprep.mubr.f32.mxu1 %v16896_v58  ;;  %874 = vmatprep.mubr.f32.mxu0 %v16896_v58  ;;  %v10430_v1 = vpop.f32.mrf.mxu0 }
 0x15b   :  { %17150 = vst [vmem:[#allocation25_spill] sm:$0xff] %v10430_v1 }
 0x15c   :  { %v10438_v2 = vpop.f32.mrf.mxu0 }
 0x15d   :  { %7995 = vmatmul.mubr.msk.f32.gmra.mxu1 %vm582_vm1, %v10398_v61  ;;  %8011 = vmatmul.mubr.msk.f32.gmra.mxu0 %vm582_vm1, %v10398_v61  ;;  %17151 = vst [vmem:[#allocation26_spill] sm:$0xff] %v10438_v2 }
 0x15e   :  { %719 = vmatprep.mubr.f32.mxu1 %v16896_v58  ;;  %880 = vmatprep.mubr.f32.mxu0 %v16896_v58  ;;  %v10446_v3 = vpop.f32.mrf.mxu0 }
 0x15f   :  { %17152 = vst [vmem:[#allocation27_spill] sm:$0xff] %v10446_v3 }
 0x160   :  { %v10454_v4 = vpop.f32.mrf.mxu0 }
 0x161   :  { %7996 = vmatmul.mubr.msk.f32.gmra.mxu1 %vm582_vm1, %v10422_v0  ;;  %8012 = vmatmul.mubr.msk.f32.gmra.mxu0 %vm582_vm1, %v10422_v0  ;;  %17153 = vst [vmem:[#allocation28_spill] sm:$0xff] %v10454_v4 }
 0x162   :  { %725 = vmatprep.mubr.f32.mxu1 %v16896_v58  ;;  %886 = vmatprep.mubr.f32.mxu0 %v16896_v58  ;;  %v10462_v5 = vpop.f32.mrf.mxu0 }
 0x163   :  { %17154 = vst [vmem:[#allocation29_spill] sm:$0xff] %v10462_v5 }
 0x164   :  { %v10470_v6 = vpop.f32.mrf.mxu0 }
 0x165   :  { %7997 = vmatmul.mubr.msk.f32.gmra.mxu1 %vm582_vm1, %v10414_v63  ;;  %8013 = vmatmul.mubr.msk.f32.gmra.mxu0 %vm582_vm1, %v10414_v63  ;;  %17155 = vst [vmem:[#allocation30_spill] sm:$0xff] %v10470_v6 }
 0x166   :  { %731 = vmatprep.mubr.f32.mxu1 %v16896_v58  ;;  %892 = vmatprep.mubr.f32.mxu0 %v16896_v58  ;;  %v10478_v7 = vpop.f32.mrf.mxu0 }
 0x167   :  { %17156 = vst [vmem:[#allocation31_spill] sm:$0xff] %v10478_v7 }
 0x168   :  { %v10486_v8 = vpop.f32.mrf.mxu0 }
 0x169   :  { %7998 = vmatmul.mubr.msk.f32.gmra.mxu1 %vm582_vm1, %v10438_v2  ;;  %8014 = vmatmul.mubr.msk.f32.gmra.mxu0 %vm582_vm1, %v10438_v2  ;;  %17157 = vst [vmem:[#allocation32_spill] sm:$0xff] %v10486_v8 }
 0x16a   :  { %737 = vmatprep.mubr.f32.mxu1 %v16896_v58  ;;  %898 = vmatprep.mubr.f32.mxu0 %v16896_v58  ;;  %v10494_v9 = vpop.f32.mrf.mxu0 }
 0x16b   :  { %17158 = vst [vmem:[#allocation33_spill] sm:$0xff] %v10494_v9 }
 0x16c   :  { %v10502_v10 = vpop.f32.mrf.mxu0 }
 0x16d   :  { %7999 = vmatmul.mubr.msk.f32.gmra.mxu1 %vm582_vm1, %v10430_v1  ;;  %8015 = vmatmul.mubr.msk.f32.gmra.mxu0 %vm582_vm1, %v10430_v1  ;;  %17159 = vst [vmem:[#allocation34_spill] sm:$0xff] %v10502_v10 }
 0x16e   :  { %743 = vmatprep.mubr.f32.mxu1 %v16896_v58  ;;  %904 = vmatprep.mubr.f32.mxu0 %v16896_v58 }
 0x171   :  { %8000 = vmatmul.mubr.msk.f32.gmra.mxu1 %vm582_vm1, %v10454_v4  ;;  %8016 = vmatmul.mubr.msk.f32.gmra.mxu0 %vm582_vm1, %v10454_v4 }
 0x172   :  { %749 = vmatprep.mubr.f32.mxu1 %v16896_v58  ;;  %910 = vmatprep.mubr.f32.mxu0 %v16896_v58 }
 0x175   :  { %8001 = vmatmul.mubr.msk.f32.gmra.mxu1 %vm582_vm1, %v10446_v3  ;;  %8017 = vmatmul.mubr.msk.f32.gmra.mxu0 %vm582_vm1, %v10446_v3 }
 0x176   :  { %755 = vmatprep.mubr.f32.mxu1 %v16896_v58  ;;  %916 = vmatprep.mubr.f32.mxu0 %v16896_v58 }
 0x179   :  { %8002 = vmatmul.mubr.msk.f32.gmra.mxu1 %vm582_vm1, %v10470_v6  ;;  %8018 = vmatmul.mubr.msk.f32.gmra.mxu0 %vm582_vm1, %v10470_v6 }
 0x17a   :  { %761 = vmatprep.mubr.f32.mxu1 %v16896_v58  ;;  %922 = vmatprep.mubr.f32.mxu0 %v16896_v58 }
 0x17d   :  { %8003 = vmatmul.mubr.msk.f32.gmra.mxu1 %vm582_vm1, %v10462_v5  ;;  %8019 = vmatmul.mubr.msk.f32.gmra.mxu0 %vm582_vm1, %v10462_v5 }
 0x17e   :  { %767 = vmatprep.mubr.f32.mxu1 %v16896_v58  ;;  %928 = vmatprep.mubr.f32.mxu0 %v16896_v58 }
 0x181   :  { %8004 = vmatmul.mubr.msk.f32.gmra.mxu1 %vm582_vm1, %v10486_v8  ;;  %8020 = vmatmul.mubr.msk.f32.gmra.mxu0 %vm582_vm1, %v10486_v8 }
 0x182   :  { %773 = vmatprep.mubr.f32.mxu1 %v16896_v58  ;;  %934 = vmatprep.mubr.f32.mxu0 %v16896_v58 }
 0x185   :  { %8005 = vmatmul.mubr.msk.f32.gmra.mxu1 %vm582_vm1, %v10478_v7  ;;  %8021 = vmatmul.mubr.msk.f32.gmra.mxu0 %vm582_vm1, %v10478_v7 }
 0x186   :  { %779 = vmatprep.mubr.f32.mxu1 %v16896_v58  ;;  %940 = vmatprep.mubr.f32.mxu0 %v16896_v58 }
 0x189   :  { %8006 = vmatmul.mubr.msk.f32.gmra.mxu1 %vm582_vm1, %v10502_v10  ;;  %8022 = vmatmul.mubr.msk.f32.gmra.mxu0 %vm582_vm1, %v10502_v10 }
 0x18a   :  { %785 = vmatprep.mubr.f32.mxu1 %v16896_v58  ;;  %946 = vmatprep.mubr.f32.mxu0 %v16896_v58 }
 0x18d   :  { %8007 = vmatmul.mubr.msk.f32.gmra.mxu1 %vm582_vm1, %v10494_v9  ;;  %8023 = vmatmul.mubr.msk.f32.gmra.mxu0 %vm582_vm1, %v10494_v9 }
 0x18e   :  { %1081 = vmatprep.mubr.f32.mxu1 %v16896_v58  ;;  %1242 = vmatprep.mubr.f32.mxu0 %v16896_v58 }
 0x211   :  { %v10516_v11 = vpop.f32.mrf.mxu1  ;;  %v10518_v12 = vpop.f32.mrf.mxu0 }
 0x212   :  { %17160 = vst [vmem:[#allocation35_spill] sm:$0xff] %v10516_v11  ;;  %17161 = vst [vmem:[#allocation36_spill] sm:$0xff] %v10518_v12  ;;  %v319_v12 = vld [vmem:[%s16877_s7 + $0x1e0] sm:$0xff]  ;;  %v321_v11 = vld [vmem:[%s16877_s7 + $0x1f0] sm:$0xff] }
 0x213   :  { %v10520_v13 = vpop.f32.mrf.mxu1  ;;  %v10522_v14 = vpop.f32.mrf.mxu0 }
 0x214   :  { %17162 = vst [vmem:[#allocation37_spill] sm:$0xff] %v10520_v13  ;;  %17163 = vst [vmem:[#allocation38_spill] sm:$0xff] %v10522_v14  ;;  %v316_v14 = vld [vmem:[%s16877_s7 + $0x1c8] sm:$0xff]  ;;  %v318_v13 = vld [vmem:[%s16877_s7 + $0x1d8] sm:$0xff] }
 0x215   :  { %v10524_v15 = vpop.f32.mrf.mxu1  ;;  %v10526_v16 = vpop.f32.mrf.mxu0 }
 0x216   :  { %17164 = vst [vmem:[#allocation39_spill] sm:$0xff] %v10524_v15  ;;  %17165 = vst [vmem:[#allocation40_spill] sm:$0xff] %v10526_v16 }
 0x217   :  { %v10528_v17 = vpop.f32.mrf.mxu1  ;;  %v10530_v18 = vpop.f32.mrf.mxu0 }
 0x218   :  { %17166 = vst [vmem:[#allocation41_spill] sm:$0xff] %v10528_v17  ;;  %17167 = vst [vmem:[#allocation42_spill] sm:$0xff] %v10530_v18  ;;  %v315_v18 = vld [vmem:[%s16877_s7 + $0x1c0] sm:$0xff]  ;;  %v317_v17 = vld [vmem:[%s16877_s7 + $0x1d0] sm:$0xff] }
 0x219   :  { %v10532_v19 = vpop.f32.mrf.mxu1  ;;  %v10534_v20 = vpop.f32.mrf.mxu0 }
 0x21a   :  { %17168 = vst [vmem:[#allocation43_spill] sm:$0xff] %v10532_v19  ;;  %17169 = vst [vmem:[#allocation44_spill] sm:$0xff] %v10534_v20 }
 0x21b   :  { %v10536_v21 = vpop.f32.mrf.mxu1  ;;  %v10538_v22 = vpop.f32.mrf.mxu0 }
 0x21c   :  { %17170 = vst [vmem:[#allocation45_spill] sm:$0xff] %v10536_v21  ;;  %17171 = vst [vmem:[#allocation46_spill] sm:$0xff] %v10538_v22  ;;  %v312_v22 = vld [vmem:[%s16877_s7 + $0x1a8] sm:$0xff]  ;;  %v314_v21 = vld [vmem:[%s16877_s7 + $0x1b8] sm:$0xff] }
 0x21d   :  { %v10540_v23 = vpop.f32.mrf.mxu1  ;;  %v10542_v26 = vpop.f32.mrf.mxu0 }
 0x21e   :  { %17172 = vst [vmem:[#allocation47_spill] sm:$0xff] %v10540_v23  ;;  %17173 = vst [vmem:[#allocation48_spill] sm:$0xff] %v10542_v26 }
 0x21f   :  { %v10544_v27 = vpop.f32.mrf.mxu1  ;;  %v10546_v30 = vpop.f32.mrf.mxu0 }
 0x220   :  { %17174 = vst [vmem:[#allocation49_spill] sm:$0xff] %v10544_v27  ;;  %17175 = vst [vmem:[#allocation50_spill] sm:$0xff] %v10546_v30  ;;  %v311_v30 = vld [vmem:[%s16877_s7 + $0x1a0] sm:$0xff]  ;;  %v313_v27 = vld [vmem:[%s16877_s7 + $0x1b0] sm:$0xff] }
 0x221   :  { %v10548_v31 = vpop.f32.mrf.mxu1  ;;  %v10550_v33 = vpop.f32.mrf.mxu0 }
 0x223   :  { %v10552_v34 = vpop.f32.mrf.mxu1  ;;  %v10554_v37 = vpop.f32.mrf.mxu0 }
 0x225   :  { %v10556_v38 = vpop.f32.mrf.mxu1  ;;  %v10558_v41 = vpop.f32.mrf.mxu0 }
 0x227   :  { %v10560_v42 = vpop.f32.mrf.mxu1  ;;  %v10562_v45 = vpop.f32.mrf.mxu0 }
 0x229   :  { %v10564_v46 = vpop.f32.mrf.mxu1  ;;  %v10566_v49 = vpop.f32.mrf.mxu0 }
 0x22b   :  { %v10568_v52 = vpop.f32.mrf.mxu1  ;;  %v10570_v54 = vpop.f32.mrf.mxu0 }
 0x22d   :  { %v10572_v55 = vpop.f32.mrf.mxu1  ;;  %v10574_v56 = vpop.f32.mrf.mxu0 }
 0x22f   :  { %v10576_v57 = vpop.f32.mrf.mxu1  ;;  %v10578_v58 = vpop.f32.mrf.mxu0 }
 0x231   :  { %v10580_v9 = vpop.f32.mrf.mxu1  ;;  %v10582_v10 = vpop.f32.mrf.mxu0 }
 0x233   :  { %v10584_v7 = vpop.f32.mrf.mxu1  ;;  %v10586_v8 = vpop.f32.mrf.mxu0 }
 0x235   :  { %v10588_v5 = vpop.f32.mrf.mxu1  ;;  %v10590_v6 = vpop.f32.mrf.mxu0 }
 0x237   :  { %v10592_v3 = vpop.f32.mrf.mxu1  ;;  %v10594_v4 = vpop.f32.mrf.mxu0 }
 0x239   :  { %v10596_v24 = vpop.f32.mrf.mxu1  ;;  %v10598_v1 = vpop.f32.mrf.mxu0 }
 0x23b   :  { %v10600_v28 = vpop.f32.mrf.mxu1  ;;  %v10602_v25 = vpop.f32.mrf.mxu0 }
 0x23d   :  { %v10604_v2 = vpop.f32.mrf.mxu1  ;;  %v10606_v29 = vpop.f32.mrf.mxu0 }
 0x23f   :  { %v10608_v32 = vpop.f32.mrf.mxu1  ;;  %v10610_v63 = vpop.f32.mrf.mxu0 }
 0x241   :  { %v10612_v35 = vpop.f32.mrf.mxu1  ;;  %v10614_v36 = vpop.f32.mrf.mxu0 }
 0x243   :  { %v771_v0 = vpop.f32.mrf.mxu1  ;;  %v932_v39 = vpop.f32.mrf.mxu0 }
 0x245   :  { %v775_v40 = vpop.f32.mrf.mxu1  ;;  %v936_v61 = vpop.f32.mrf.mxu0 }
 0x247   :  { %v777_v43 = vpop.f32.mrf.mxu1  ;;  %v938_v44 = vpop.f32.mrf.mxu0 }
 0x249   :  { %v781_v62 = vpop.f32.mrf.mxu1  ;;  %v942_v47 = vpop.f32.mrf.mxu0 }
 0x24b   :  { %v783_v48 = vpop.f32.mrf.mxu1  ;;  %v944_v59 = vpop.f32.mrf.mxu0 }
 0x24d   :  { %v787_v50 = vpop.f32.mrf.mxu1  ;;  %v948_v51 = vpop.f32.mrf.mxu0 }
 0x24e   :  { %v1013_v26 = vmul.f32 %v787_v50, %v319_v12  ;;  %v1015_v23 = vmul.f32 %v948_v51, %v321_v11  ;;  %v310_v50 = vld [vmem:[%s16877_s7 + $0x198] sm:$0xff]  ;;  %v1009_v51 = vmul.f32 %v781_v62, %v315_v18  ;;  %v1011_v11 = vmul.f32 %v942_v47, %v317_v17  ;;  %v307_v12 = vld [vmem:[%s16877_s7 + $0x180] sm:$0xff] }
 0x24f   :  { %v789_v16 = vpop.f32.mrf.mxu1  ;;  %v950_v15 = vpop.f32.mrf.mxu0  ;;  %v306_v47 = vld [vmem:[%s16877_s7 + $0x178] sm:$0xff]  ;;  %v1005_v62 = vmul.f32 %v775_v40, %v311_v30  ;;  %v303_v17 = vld [vmem:[%s16877_s7 + $0x160] sm:$0xff]  ;;  %v1004_v18 = vmul.f32 %v932_v39, %v310_v50 }
 0x250   :  { %v1014_v20 = vmul.f32 %v789_v16, %v320_v60  ;;  %v1016_v19 = vmul.f32 %v950_v15, %v322_v53  ;;  %v1010_v60 = vmul.f32 %v783_v48, %v316_v14  ;;  %v1012_v53 = vmul.f32 %v944_v59, %v318_v13  ;;  %v308_v15 = vld [vmem:[%s16877_s7 + $0x188] sm:$0xff]  ;;  %v309_v48 = vld [vmem:[%s16877_s7 + $0x190] sm:$0xff]  ;;  %v302_v40 = vld [vmem:[%s16877_s7 + $0x158] sm:$0xff] }
 0x251   :  { %v1006_v59 = vmul.f32 %v777_v43, %v312_v22  ;;  %v1008_v13 = vmul.f32 %v938_v44, %v314_v21  ;;  %v304_v14 = vld [vmem:[%s16877_s7 + $0x168] sm:$0xff]  ;;  %v1007_v16 = vmul.f32 %v936_v61, %v313_v27  ;;  %v305_v43 = vld [vmem:[%s16877_s7 + $0x170] sm:$0xff]  ;;  %v1002_v44 = vmul.f32 %v771_v0, %v308_v15  ;;  %v299_v39 = vld [vmem:[%s16877_s7 + $0x140] sm:$0xff] }
 0x252   :  { %1017 = vmatprep.subr.mxu1 %v1014_v20  ;;  %1178 = vmatprep.subr.mxu0 %v1016_v19  ;;  %v300_v19 = vld [vmem:[%s16877_s7 + $0x148] sm:$0xff]  ;;  %v1001_v61 = vmul.f32 %v10612_v35, %v307_v12  ;;  %v1003_v20 = vmul.f32 %v10614_v36, %v309_v48  ;;  %v301_v0 = vld [vmem:[%s16877_s7 + $0x150] sm:$0xff]  ;;  %v998_v21 = vmul.f32 %v10608_v32, %v304_v14  ;;  %v298_v36 = vld [vmem:[%s16877_s7 + $0x138] sm:$0xff] }
 0x253   :  { %1018 = vmatpush1.msra.mxu1 %v1013_v26  ;;  %1179 = vmatpush1.msra.mxu0 %v1015_v23  ;;  %v1000_v22 = vmul.f32 %v10610_v63, %v306_v47  ;;  %v296_v35 = vld [vmem:[%s16877_s7 + $0x128] sm:$0xff]  ;;  %v997_v23 = vmul.f32 %v10604_v2, %v303_v17  ;;  %v999_v26 = vmul.f32 %v10606_v29, %v305_v43  ;;  %v295_v32 = vld [vmem:[%s16877_s7 + $0x120] sm:$0xff]  ;;  %v297_v63 = vld [vmem:[%s16877_s7 + $0x130] sm:$0xff] }
 0x254   :  { %1019 = vmatprep.subr.mxu1 %v1010_v60  ;;  %1180 = vmatprep.subr.mxu0 %v1012_v53  ;;  %v994_v27 = vmul.f32 %v10600_v28, %v300_v19  ;;  %v996_v30 = vmul.f32 %v10602_v25, %v302_v40  ;;  %v292_v29 = vld [vmem:[%s16877_s7 + $0x108] sm:$0xff]  ;;  %v294_v2 = vld [vmem:[%s16877_s7 + $0x118] sm:$0xff]  ;;  %v993_v60 = vmul.f32 %v10596_v24, %v299_v39  ;;  %v291_v25 = vld [vmem:[%s16877_s7 + $0x100] sm:$0xff] }
 0x255   :  { %1020 = vmatpush1.msra.mxu1 %v1009_v51  ;;  %1181 = vmatpush1.msra.mxu0 %v1011_v11  ;;  %v995_v53 = vmul.f32 %v10598_v1, %v301_v0  ;;  %v293_v28 = vld [vmem:[%s16877_s7 + $0x110] sm:$0xff]  ;;  %v990_v15 = vmul.f32 %v10592_v3, %v296_v35  ;;  %v992_v50 = vmul.f32 %v10594_v4, %v298_v36  ;;  %v288_v24 = vld [vmem:[%s16877_s7 + $0xe8] sm:$0xff]  ;;  %v290_v1 = vld [vmem:[%s16877_s7 + $0xf8] sm:$0xff] }
 0x256   :  { %1021 = vmatprep.subr.mxu1 %v1006_v59  ;;  %1182 = vmatprep.subr.mxu0 %v1008_v13  ;;  %v989_v51 = vmul.f32 %v10588_v5, %v295_v32  ;;  %v991_v11 = vmul.f32 %v10590_v6, %v297_v63  ;;  %v287_v3 = vld [vmem:[%s16877_s7 + $0xe0] sm:$0xff]  ;;  %v289_v4 = vld [vmem:[%s16877_s7 + $0xf0] sm:$0xff]  ;;  %v986_v12 = vmul.f32 %v10584_v7, %v292_v29  ;;  %v284_v5 = vld [vmem:[%s16877_s7 + $0xc8] sm:$0xff] }
 0x257   :  { %1022 = vmatpush1.msra.mxu1 %v1005_v62  ;;  %1183 = vmatpush1.msra.mxu0 %v1007_v16  ;;  %v988_v48 = vmul.f32 %v10586_v8, %v294_v2  ;;  %v286_v6 = vld [vmem:[%s16877_s7 + $0xd8] sm:$0xff]  ;;  %v985_v59 = vmul.f32 %v10580_v9, %v291_v25  ;;  %v987_v13 = vmul.f32 %v10582_v10, %v293_v28  ;;  %v283_v7 = vld [vmem:[%s16877_s7 + $0xc0] sm:$0xff]  ;;  %v285_v8 = vld [vmem:[%s16877_s7 + $0xd0] sm:$0xff] }
 0x258   :  { %1023 = vmatprep.subr.mxu1 %v1002_v44  ;;  %1184 = vmatprep.subr.mxu0 %v1004_v18  ;;  %v982_v14 = vmul.f32 %v10576_v57, %v288_v24  ;;  %v984_v47 = vmul.f32 %v10578_v58, %v290_v1  ;;  %v280_v9 = vld [vmem:[%s16877_s7 + $0xa8] sm:$0xff]  ;;  %v282_v10 = vld [vmem:[%s16877_s7 + $0xb8] sm:$0xff]  ;;  %v981_v62 = vmul.f32 %v10572_v55, %v287_v3  ;;  %v279_v58 = vld [vmem:[%s16877_s7 + $0xa0] sm:$0xff] }
 0x259   :  { %1024 = vmatpush1.msra.mxu1 %v1001_v61  ;;  %1185 = vmatpush1.msra.mxu0 %v1003_v20  ;;  %v983_v16 = vmul.f32 %v10574_v56, %v289_v4  ;;  %v281_v57 = vld [vmem:[%s16877_s7 + $0xb0] sm:$0xff]  ;;  %v978_v17 = vmul.f32 %v10568_v52, %v284_v5  ;;  %v980_v43 = vmul.f32 %v10570_v54, %v286_v6  ;;  %v276_v55 = vld [vmem:[%s16877_s7 + $0x88] sm:$0xff]  ;;  %v278_v56 = vld [vmem:[%s16877_s7 + $0x98] sm:$0xff] }
 0x25a   :  { %1025 = vmatprep.subr.mxu1 %v998_v21  ;;  %1186 = vmatprep.subr.mxu0 %v1000_v22  ;;  %v977_v44 = vmul.f32 %v10564_v46, %v283_v7  ;;  %v979_v18 = vmul.f32 %v10566_v49, %v285_v8  ;;  %v275_v52 = vld [vmem:[%s16877_s7 + $0x80] sm:$0xff]  ;;  %v277_v54 = vld [vmem:[%s16877_s7 + $0x90] sm:$0xff]  ;;  %v974_v19 = vmul.f32 %v10560_v42, %v280_v9  ;;  %v272_v46 = vld [vmem:[%s16877_s7 + $0x68] sm:$0xff] }
 0x25b   :  { %1026 = vmatpush1.msra.mxu1 %v997_v23  ;;  %1187 = vmatpush1.msra.mxu0 %v999_v26  ;;  %v976_v40 = vmul.f32 %v10562_v45, %v282_v10  ;;  %v274_v49 = vld [vmem:[%s16877_s7 + $0x78] sm:$0xff]  ;;  %v973_v61 = vmul.f32 %v10556_v38, %v279_v58  ;;  %v975_v20 = vmul.f32 %v10558_v41, %v281_v57  ;;  %v271_v42 = vld [vmem:[%s16877_s7 + $0x60] sm:$0xff]  ;;  %v273_v45 = vld [vmem:[%s16877_s7 + $0x70] sm:$0xff] }
 0x25c   :  { %1027 = vmatprep.subr.mxu1 %v994_v27  ;;  %1188 = vmatprep.subr.mxu0 %v996_v30  ;;  %v970_v39 = vmul.f32 %v10552_v34, %v276_v55  ;;  %v972_v0 = vmul.f32 %v10554_v37, %v278_v56  ;;  %v268_v38 = vld [vmem:[%s16877_s7 + $0x48] sm:$0xff]  ;;  %v270_v41 = vld [vmem:[%s16877_s7 + $0x58] sm:$0xff]  ;;  %v969_v21 = vmul.f32 %v10548_v31, %v275_v52  ;;  %v267_v34 = vld [vmem:[%s16877_s7 + $0x40] sm:$0xff]  ;;  %v16962_v52 = vmov 1.0  }
 0x25d   :  { %1028 = vmatpush1.msra.mxu1 %v993_v60  ;;  %1189 = vmatpush1.msra.mxu0 %v995_v53  ;;  %v971_v22 = vmul.f32 %v10550_v33, %v277_v54  ;;  %v269_v37 = vld [vmem:[%s16877_s7 + $0x50] sm:$0xff]  ;;  %v17177_v23 = vld [vmem:[#allocation50_spill] sm:$0xff]  ;;  %v264_v31 = vld [vmem:[%s16877_s7 + $0x28] sm:$0xff] }
 0x25e   :  { %1029 = vmatprep.subr.mxu1 %v990_v15  ;;  %1190 = vmatprep.subr.mxu0 %v992_v50  ;;  %v17176_v35 = vld [vmem:[#allocation49_spill] sm:$0xff]  ;;  %v968_v26 = vmul.f32 %v17177_v23, %v274_v49  ;;  %v17178_v32 = vld [vmem:[#allocation47_spill] sm:$0xff]  ;;  %v17179_v27 = vld [vmem:[#allocation48_spill] sm:$0xff] }
 0x25f   :  { %1030 = vmatpush1.msra.mxu1 %v989_v51  ;;  %1191 = vmatpush1.msra.mxu0 %v991_v11  ;;  %v966_v36 = vmul.f32 %v17176_v35, %v272_v46  ;;  %v266_v33 = vld [vmem:[%s16877_s7 + $0x38] sm:$0xff]  ;;  %v965_v63 = vmul.f32 %v17178_v32, %v271_v42  ;;  %v967_v30 = vmul.f32 %v17179_v27, %v273_v45  ;;  %v263_v29 = vld [vmem:[%s16877_s7 + $0x20] sm:$0xff]  ;;  %v265_v2 = vld [vmem:[%s16877_s7 + $0x30] sm:$0xff]  ;;  %v17193_v46 = vmov 0.0  }
 0x260   :  { %1031 = vmatprep.subr.mxu1 %v986_v12  ;;  %1192 = vmatprep.subr.mxu0 %v988_v48  ;;  %v17180_v60 = vld [vmem:[#allocation45_spill] sm:$0xff]  ;;  %v17181_v25 = vld [vmem:[#allocation46_spill] sm:$0xff]  ;;  %v260_v15 = vld [vmem:[%s16877_s7 + $0x8] sm:$0xff] }
 0x261   :  { %1032 = vmatpush1.msra.mxu1 %v985_v59  ;;  %1193 = vmatpush1.msra.mxu0 %v987_v13  ;;  %v962_v53 = vmul.f32 %v17180_v60, %v268_v38  ;;  %v964_v28 = vmul.f32 %v17181_v25, %v270_v41  ;;  %v262_v50 = vld [vmem:[%s16877_s7 + $0x18] sm:$0xff]  ;;  %v17182_v24 = vld [vmem:[#allocation43_spill] sm:$0xff]  ;;  %v17183_v51 = vld [vmem:[#allocation44_spill] sm:$0xff] }
 0x262   :  { %1033 = vmatprep.subr.mxu1 %v982_v14  ;;  %1194 = vmatprep.subr.mxu0 %v984_v47  ;;  %v961_v1 = vmul.f32 %v17182_v24, %v267_v34  ;;  %v963_v11 = vmul.f32 %v17183_v51, %v269_v37  ;;  %v259_v3 = vld [vmem:[%s16877_s7] sm:$0xff]  ;;  %v261_v4 = vld [vmem:[%s16877_s7 + $0x10] sm:$0xff]  ;;  %v254_v55 = vld [vmem:[%s16878_s5 + $0x18] sm:$0xff] }
 0x263   :  { %1034 = vmatpush1.msra.mxu1 %v981_v62  ;;  %1195 = vmatpush1.msra.mxu0 %v983_v16  ;;  %v17184_v12 = vld [vmem:[#allocation41_spill] sm:$0xff]  ;;  %v17185_v5 = vld [vmem:[#allocation42_spill] sm:$0xff]  ;;  %v17186_v59 = vld [vmem:[#allocation39_spill] sm:$0xff] }
 0x264   :  { %1035 = vmatprep.subr.mxu1 %v978_v17  ;;  %1196 = vmatprep.subr.mxu0 %v980_v43  ;;  %v958_v48 = vmul.f32 %v17184_v12, %v264_v31  ;;  %v960_v6 = vmul.f32 %v17185_v5, %v266_v33  ;;  %v957_v13 = vmul.f32 %v17186_v59, %v263_v29  ;;  %v17187_v7 = vld [vmem:[#allocation40_spill] sm:$0xff]  ;;  %v17188_v14 = vld [vmem:[#allocation37_spill] sm:$0xff]  ;;  %v17189_v9 = vld [vmem:[#allocation38_spill] sm:$0xff] }
 0x265   :  { %1036 = vmatpush1.msra.mxu1 %v977_v44  ;;  %1197 = vmatpush1.msra.mxu0 %v979_v18  ;;  %v959_v8 = vmul.f32 %v17187_v7, %v265_v2  ;;  %v954_v47 = vmul.f32 %v17188_v14, %v260_v15  ;;  %v956_v10 = vmul.f32 %v17189_v9, %v262_v50  ;;  %v17190_v62 = vld [vmem:[#allocation35_spill] sm:$0xff]  ;;  %v17191_v58 = vld [vmem:[#allocation36_spill] sm:$0xff]  ;;  %v10861_v17 = vld [vmem:[%s16879_s8 + $0xf8] sm:$0xff] }
 0x266   :  { %1037 = vmatprep.subr.mxu1 %v974_v19  ;;  %1198 = vmatprep.subr.mxu0 %v976_v40  ;;  %v953_v16 = vmul.f32 %v17190_v62, %v259_v3  ;;  %v955_v57 = vmul.f32 %v17191_v58, %v261_v4  ;;  %v252_v43 = vld [vmem:[%s16878_s5 + $0x8] sm:$0xff]  ;;  %v10872_v56 = vld [vmem:[%s16879_s8 + $0x1f8] sm:$0xff]  ;;  %v251_v44 = vld [vmem:[%s16878_s5] sm:$0xff] }
 0x267   :  { %1038 = vmatpush1.msra.mxu1 %v973_v61  ;;  %1199 = vmatpush1.msra.mxu0 %v975_v20  ;;  %v253_v18 = vld [vmem:[%s16878_s5 + $0x10] sm:$0xff]  ;;  %v17192_v54 = vld [vmem:[#allocation18_spill] sm:$0xff]  ;;  %v10993_v37 = vld [vmem:[%s16879_s8 + $0xe8] sm:$0xff] }
 0x268   :  { %1039 = vmatprep.subr.mxu1 %v970_v39  ;;  %1200 = vmatprep.subr.mxu0 %v972_v0  ;;  %v2012_v19 = vmul.f32 %v10861_v17, %v17192_v54  ;;  %v2044_v40 = vmul.f32 %v10872_v56, %v17192_v54  ;;  %v10949_v49 = vld [vmem:[%s16879_s8 + $0x78] sm:$0xff]  ;;  %v10961_v20 = vld [vmem:[%s16879_s8 + $0xf0] sm:$0xff]  ;;  %v10998_v35 = vld [vmem:[%s16879_s8 + $0x1e8] sm:$0xff] }
 0x269   :  { %1040 = vmatpush1.msra.mxu1 %v969_v21  ;;  %1201 = vmatpush1.msra.mxu0 %v971_v22  ;;  %v10954_v61 = vld [vmem:[%s16879_s8 + $0x178] sm:$0xff]  ;;  %v10966_v42 = vld [vmem:[%s16879_s8 + $0x1f0] sm:$0xff]  ;;  %v1996_v0 = vmul.f32 %v10949_v49, %v17192_v54  ;;  %v11012_v31 = vld [vmem:[%s16879_s8 + $0x168] sm:$0xff] }
 0x26a   :  { %1041 = vmatprep.subr.mxu1 %v966_v36  ;;  %1202 = vmatprep.subr.mxu0 %v968_v26  ;;  %v10971_v45 = vld [vmem:[%s16879_s8 + $0x70] sm:$0xff]  ;;  %v2028_v38 = vmul.f32 %v10954_v61, %v17192_v54  ;;  %v11007_v26 = vld [vmem:[%s16879_s8 + $0x68] sm:$0xff]  ;;  %v11021_v27 = vld [vmem:[%s16879_s8 + $0xe0] sm:$0xff] }
 0x26b   :  { %1042 = vmatpush1.msra.mxu1 %v965_v63  ;;  %1203 = vmatpush1.msra.mxu0 %v967_v30  ;;  %v10976_v39 = vld [vmem:[%s16879_s8 + $0x170] sm:$0xff]  ;;  %v11026_v30 = vld [vmem:[%s16879_s8 + $0x1e0] sm:$0xff]  ;;  %v11055_v24 = vld [vmem:[%s16879_s8 + $0xd8] sm:$0xff] }
 0x26c   :  { %1043 = vmatprep.subr.mxu1 %v962_v53  ;;  %1204 = vmatprep.subr.mxu0 %v964_v28  ;;  %v17194_v41 = vld [vmem:[#allocation20_spill] sm:$0xff]  ;;  %v17195_v21 = vld [vmem:[#allocation17_spill] sm:$0xff]  ;;  %v11033_v29 = vld [vmem:[%s16879_s8 + $0x60] sm:$0xff] }
 0x26d   :  { %1044 = vmatpush1.msra.mxu1 %v961_v1  ;;  %1205 = vmatpush1.msra.mxu0 %v963_v11  ;;  %v2011_v22 = vmul.f32 %v10961_v20, %v17195_v21  ;;  %v2043_v34 = vmul.f32 %v10966_v42, %v17195_v21  ;;  %v1995_v36 = vmul.f32 %v10971_v45, %v17195_v21  ;;  %v17196_v33 = vld [vmem:[#allocation16_spill] sm:$0xff]  ;;  %v11038_v2 = vld [vmem:[%s16879_s8 + $0x160] sm:$0xff]  ;;  %v11060_v1 = vld [vmem:[%s16879_s8 + $0x1d8] sm:$0xff] }
 0x26e   :  { %1045 = vmatprep.subr.mxu1 %v958_v48  ;;  %1206 = vmatprep.subr.mxu0 %v960_v6  ;;  %v2027_v23 = vmul.f32 %v10976_v39, %v17195_v21  ;;  %v2010_v32 = vmul.f32 %v10993_v37, %v17196_v33  ;;  %v2042_v63 = vmul.f32 %v10998_v35, %v17196_v33  ;;  %v17198_v25 = vld [vmem:[#allocation19_spill] sm:$0xff]  ;;  %v11069_v3 = vld [vmem:[%s16879_s8 + $0x58] sm:$0xff]  ;;  %v11081_v6 = vld [vmem:[%s16879_s8 + $0xd0] sm:$0xff] }
 0x26f   :  { %1046 = vmatpush1.msra.mxu1 %v957_v13  ;;  %1207 = vmatpush1.msra.mxu0 %v959_v8  ;;  %17197 = vst [vmem:[#allocation49_spill] sm:$0xff] %v11038_v2  ;;  %v1994_v60 = vmul.f32 %v11007_v26, %v17196_v33  ;;  %v2026_v53 = vmul.f32 %v11012_v31, %v17196_v33  ;;  %v17199_v28 = vld [vmem:[#allocation15_spill] sm:$0xff]  ;;  %17200 = vst [vmem:[#allocation50_spill] sm:$0xff] %v11060_v1  ;;  %v366_v4 = vld [vmem:[%s16879_s8 + $0x158] sm:$0xff] }
 0x270   :  { %1047 = vmatprep.subr.mxu1 %v954_v47  ;;  %1208 = vmatprep.subr.mxu0 %v956_v10  ;;  %v2009_v15 = vmul.f32 %v11021_v27, %v17199_v28  ;;  %v2041_v50 = vmul.f32 %v11026_v30, %v17199_v28  ;;  %v1993_v51 = vmul.f32 %v11033_v29, %v17199_v28  ;;  %v17202_v12 = vld [vmem:[#allocation14_spill] sm:$0xff]  ;;  %v381_v59 = vld [vmem:[%s16879_s8 + $0x1d0] sm:$0xff]  ;;  %v380_v58 = vld [vmem:[%s16879_s8 + $0x1c8] sm:$0xff] }
 0x271   :  { %1048 = vmatpush1.msra.mxu1 %v953_v16  ;;  %1209 = vmatpush1.msra.mxu0 %v955_v57  ;;  %v2025_v11 = vmul.f32 %v11038_v2, %v17199_v28  ;;  %17201 = vst [vmem:[#allocation47_spill] sm:$0xff] %v11069_v3  ;;  %v2008_v48 = vmul.f32 %v11055_v24, %v17202_v12  ;;  %17203 = vst [vmem:[#allocation48_spill] sm:$0xff] %v11081_v6  ;;  %v11091_v13 = vld [vmem:[%s16879_s8 + $0x50] sm:$0xff]  ;;  %v17205_v47 = vld [vmem:[#allocation22_spill] sm:$0xff] }
 0x272   :  { %1082 = vmatmul.mubr.f32.vlgmr.msra.gmra.mxu1 %v16962_v52  ;;  %1243 = vmatmul.mubr.f32.vlgmr.msra.gmra.mxu0 %v16962_v52  ;;  %v2040_v5 = vmul.f32 %v11060_v1, %v17202_v12  ;;  %17204 = vst [vmem:[#allocation45_spill] sm:$0xff] %v11091_v13  ;;  %v365_v7 = vld [vmem:[%s16879_s8 + $0x150] sm:$0xff]  ;;  %v1992_v8 = vmul.f32 %v11069_v3, %v17202_v12  ;;  %v11109_v16 = vld [vmem:[%s16879_s8 + $0xc8] sm:$0xff]  ;;  %v362_v28 = vld [vmem:[%s16879_s8 + $0x138] sm:$0xff] }
 0x273   :  { %1369 = vmatprep.subr.mxu1 %v252_v43  ;;  %1530 = vmatprep.subr.mxu0 %v254_v55  ;;  %v2024_v14 = vmul.f32 %v366_v4, %v17202_v12  ;;  %v17206_v9 = vld [vmem:[#allocation13_spill] sm:$0xff]  ;;  %17207 = vst [vmem:[#allocation46_spill] sm:$0xff] %v11109_v16  ;;  %v11120_v55 = vld [vmem:[%s16879_s8 + $0x48] sm:$0xff] }
 0x274   :  { %1370 = vmatpush1.msra.mxu1 %v251_v44  ;;  %1531 = vmatpush1.msra.mxu0 %v253_v18  ;;  %v2007_v10 = vmul.f32 %v11081_v6, %v17206_v9  ;;  %v2039_v62 = vmul.f32 %v381_v59, %v17206_v9  ;;  %v1991_v57 = vmul.f32 %v11091_v13, %v17206_v9  ;;  %v364_v44 = vld [vmem:[%s16879_s8 + $0x148] sm:$0xff]  ;;  %v377_v4 = vld [vmem:[%s16879_s8 + $0x1b0] sm:$0xff] }
 0x275   :  { %8287 = vmatprep.subr.mxu1 %v2012_v19  ;;  %8367 = vmatprep.subr.mxu0 %v2044_v40  ;;  %v2023_v43 = vmul.f32 %v365_v7, %v17206_v9  ;;  %17208 = vst [vmem:[#allocation43_spill] sm:$0xff] %v11120_v55  ;;  %v17209_v18 = vld [vmem:[#allocation12_spill] sm:$0xff]  ;;  %v11131_v40 = vld [vmem:[%s16879_s8 + $0xc0] sm:$0xff] }
 0x276   :  { %1087 = vmatprep.mubr.f32.mxu1 %v17193_v46  ;;  %1248 = vmatprep.mubr.f32.mxu0 %v17193_v46  ;;  %v2006_v54 = vmul.f32 %v11109_v16, %v17209_v18  ;;  %v2038_v19 = vmul.f32 %v380_v58, %v17209_v18  ;;  %17210 = vst [vmem:[#allocation44_spill] sm:$0xff] %v11131_v40  ;;  %v329_v12 = vld [vmem:[%s16879_s8 + $0x30] sm:$0xff]  ;;  %v344_v9 = vld [vmem:[%s16879_s8 + $0xa8] sm:$0xff] }
 0x277   :  { %1088 = vmatmul.mubr.f32.gmra.mxu1 %v16962_v52  ;;  %1249 = vmatmul.mubr.f32.gmra.mxu0 %v16962_v52  ;;  %v1990_v21 = vmul.f32 %v11120_v55, %v17209_v18  ;;  %v17214_v7 = vld [vmem:[#allocation24_spill] sm:$0xff] }
 0x278   :  { %1093 = vmatprep.mubr.f32.mxu1 %v17193_v46  ;;  %1254 = vmatprep.mubr.f32.mxu0 %v17193_v46 }
 0x27b   :  { %1094 = vmatmul.mubr.f32.gmra.mxu1 %v16962_v52  ;;  %1255 = vmatmul.mubr.f32.gmra.mxu0 %v16962_v52 }
 0x27c   :  { %1099 = vmatprep.mubr.f32.mxu1 %v17193_v46  ;;  %1260 = vmatprep.mubr.f32.mxu0 %v17193_v46 }
 0x27f   :  { %1100 = vmatmul.mubr.f32.gmra.mxu1 %v16962_v52  ;;  %1261 = vmatmul.mubr.f32.gmra.mxu0 %v16962_v52 }
 0x280   :  { %1105 = vmatprep.mubr.f32.mxu1 %v17193_v46  ;;  %1266 = vmatprep.mubr.f32.mxu0 %v17193_v46 }
 0x283   :  { %1106 = vmatmul.mubr.f32.gmra.mxu1 %v16962_v52  ;;  %1267 = vmatmul.mubr.f32.gmra.mxu0 %v16962_v52 }
 0x284   :  { %1111 = vmatprep.mubr.f32.mxu1 %v17193_v46  ;;  %1272 = vmatprep.mubr.f32.mxu0 %v17193_v46 }
 0x287   :  { %1112 = vmatmul.mubr.f32.gmra.mxu1 %v16962_v52  ;;  %1273 = vmatmul.mubr.f32.gmra.mxu0 %v16962_v52 }
 0x288   :  { %1117 = vmatprep.mubr.f32.mxu1 %v17193_v46  ;;  %1278 = vmatprep.mubr.f32.mxu0 %v17193_v46 }
 0x28b   :  { %1118 = vmatmul.mubr.f32.gmra.mxu1 %v16962_v52  ;;  %1279 = vmatmul.mubr.f32.gmra.mxu0 %v16962_v52 }
 0x28c   :  { %1123 = vmatprep.mubr.f32.mxu1 %v17193_v46  ;;  %1284 = vmatprep.mubr.f32.mxu0 %v17193_v46 }
 0x28f   :  { %1124 = vmatmul.mubr.f32.gmra.mxu1 %v16962_v52  ;;  %1285 = vmatmul.mubr.f32.gmra.mxu0 %v16962_v52 }
 0x290   :  { %1129 = vmatprep.mubr.f32.mxu1 %v17193_v46  ;;  %1290 = vmatprep.mubr.f32.mxu0 %v17193_v46 }
 0x293   :  { %1130 = vmatmul.mubr.f32.gmra.mxu1 %v16962_v52  ;;  %1291 = vmatmul.mubr.f32.gmra.mxu0 %v16962_v52 }
 0x294   :  { %1135 = vmatprep.mubr.f32.mxu1 %v17193_v46  ;;  %1296 = vmatprep.mubr.f32.mxu0 %v17193_v46 }
 0x297   :  { %1136 = vmatmul.mubr.f32.gmra.mxu1 %v16962_v52  ;;  %1297 = vmatmul.mubr.f32.gmra.mxu0 %v16962_v52 }
 0x298   :  { %1141 = vmatprep.mubr.f32.mxu1 %v17193_v46  ;;  %1302 = vmatprep.mubr.f32.mxu0 %v17193_v46 }
 0x29b   :  { %1142 = vmatmul.mubr.f32.gmra.mxu1 %v16962_v52  ;;  %1303 = vmatmul.mubr.f32.gmra.mxu0 %v16962_v52 }
 0x29c   :  { %1147 = vmatprep.mubr.f32.mxu1 %v17193_v46  ;;  %1308 = vmatprep.mubr.f32.mxu0 %v17193_v46 }
 0x29f   :  { %1148 = vmatmul.mubr.f32.gmra.mxu1 %v16962_v52  ;;  %1309 = vmatmul.mubr.f32.gmra.mxu0 %v16962_v52 }
 0x2a0   :  { %1153 = vmatprep.mubr.f32.mxu1 %v17193_v46  ;;  %1314 = vmatprep.mubr.f32.mxu0 %v17193_v46 }
 0x2a3   :  { %1154 = vmatmul.mubr.f32.gmra.mxu1 %v16962_v52  ;;  %1315 = vmatmul.mubr.f32.gmra.mxu0 %v16962_v52 }
 0x2a4   :  { %1159 = vmatprep.mubr.f32.mxu1 %v17193_v46  ;;  %1320 = vmatprep.mubr.f32.mxu0 %v17193_v46 }
 0x2a7   :  { %1160 = vmatmul.mubr.f32.gmra.mxu1 %v16962_v52  ;;  %1321 = vmatmul.mubr.f32.gmra.mxu0 %v16962_v52 }
 0x2a8   :  { %1165 = vmatprep.mubr.f32.mxu1 %v17193_v46  ;;  %1326 = vmatprep.mubr.f32.mxu0 %v17193_v46 }
 0x2ab   :  { %1166 = vmatmul.mubr.f32.gmra.mxu1 %v16962_v52  ;;  %1327 = vmatmul.mubr.f32.gmra.mxu0 %v16962_v52 }
 0x2ac   :  { %1171 = vmatprep.mubr.f32.mxu1 %v17193_v46  ;;  %1332 = vmatprep.mubr.f32.mxu0 %v17193_v46 }
 0x2af   :  { %1172 = vmatmul.mubr.f32.gmra.mxu1 %v16962_v52  ;;  %1333 = vmatmul.mubr.f32.gmra.mxu0 %v16962_v52 }
 0x2b0   :  { %1403 = vmatprep.mubr.f32.mxu1 %v17193_v46  ;;  %1564 = vmatprep.mubr.f32.mxu0 %v17193_v46 }
 0x2b3   :  { %8024 = vmatmul.mubr.msk.f32.vlgmr.msra.gmra.mxu1 %vm582_vm1, %v17194_v41  ;;  %8040 = vmatmul.mubr.msk.f32.vlgmr.msra.gmra.mxu0 %vm582_vm1, %v17194_v41  ;;  %v363_v41 = vld [vmem:[%s16879_s8 + $0x140] sm:$0xff] }
 0x2b4   :  { %8288 = vmatpush3.msra.mxu1 %v1996_v0  ;;  %8368 = vmatpush3.msra.mxu0 %v2028_v38  ;;  %v379_v0 = vld [vmem:[%s16879_s8 + $0x1c0] sm:$0xff] }
 0x2b5   :  { %8289 = vmatprep.subr.mxu1 %v2011_v22  ;;  %8369 = vmatprep.subr.mxu0 %v2043_v34  ;;  %v331_v38 = vld [vmem:[%s16879_s8 + $0x40] sm:$0xff]  ;;  %v2022_v22 = vmul.f32 %v364_v44, %v17209_v18  ;;  %v17211_v34 = vld [vmem:[#allocation21_spill] sm:$0xff]  ;;  %v17216_v44 = vld [vmem:[#allocation8_spill] sm:$0xff] }
 0x2b6   :  { %8290 = vmatpush3.msra.mxu1 %v1995_v36  ;;  %8370 = vmatpush3.msra.mxu0 %v2027_v23  ;;  %v17212_v36 = vld [vmem:[#allocation11_spill] sm:$0xff]  ;;  %v2002_v18 = vmul.f32 %v344_v9, %v17216_v44 }
 0x2b7   :  { %1409 = vmatprep.mubr.f32.mxu1 %v17193_v46  ;;  %1570 = vmatprep.mubr.f32.mxu0 %v17193_v46  ;;  %v2005_v23 = vmul.f32 %v11131_v40, %v17212_v36  ;;  %v2037_v33 = vmul.f32 %v379_v0, %v17212_v36  ;;  %v375_v0 = vld [vmem:[%s16879_s8 + $0x1a0] sm:$0xff]  ;;  %v340_v9 = vld [vmem:[%s16879_s8 + $0x88] sm:$0xff] }
 0x2b8   :  { %8291 = vmatprep.subr.mxu1 %v2010_v32  ;;  %8371 = vmatprep.subr.mxu0 %v2042_v63  ;;  %v346_v32 = vld [vmem:[%s16879_s8 + $0xb8] sm:$0xff] }
 0x2b9   :  { %8025 = vmatmul.mubr.msk.f32.gmra.mxu1 %vm582_vm1, %v17198_v25  ;;  %8041 = vmatmul.mubr.msk.f32.gmra.mxu0 %vm582_vm1, %v17198_v25  ;;  %v378_v63 = vld [vmem:[%s16879_s8 + $0x1b8] sm:$0xff] }
 0x2ba   :  { %8292 = vmatpush3.msra.mxu1 %v1994_v60  ;;  %8372 = vmatpush3.msra.mxu0 %v2026_v53  ;;  %v1989_v60 = vmul.f32 %v331_v38, %v17212_v36  ;;  %v2021_v53 = vmul.f32 %v363_v41, %v17212_v36  ;;  %v330_v25 = vld [vmem:[%s16879_s8 + $0x38] sm:$0xff]  ;;  %v327_v38 = vld [vmem:[%s16879_s8 + $0x20] sm:$0xff] }
 0x2bb   :  { %8293 = vmatprep.subr.mxu1 %v2009_v15  ;;  %8373 = vmatprep.subr.mxu0 %v2041_v50  ;;  %v17213_v15 = vld [vmem:[#allocation10_spill] sm:$0xff]  ;;  %v17218_v36 = vld [vmem:[#allocation7_spill] sm:$0xff] }
 0x2bc   :  { %8294 = vmatpush3.msra.mxu1 %v1993_v51  ;;  %8374 = vmatpush3.msra.mxu0 %v2025_v11  ;;  %v2004_v50 = vmul.f32 %v346_v32, %v17213_v15  ;;  %v2036_v51 = vmul.f32 %v378_v63, %v17213_v15  ;;  %v345_v11 = vld [vmem:[%s16879_s8 + $0xb0] sm:$0xff]  ;;  %v2020_v59 = vmul.f32 %v362_v28, %v17213_v15  ;;  %v359_v41 = vld [vmem:[%s16879_s8 + $0x120] sm:$0xff]  ;;  %v342_v32 = vld [vmem:[%s16879_s8 + $0x98] sm:$0xff] }
 0x2bd   :  { %1415 = vmatprep.mubr.f32.mxu1 %v17193_v46  ;;  %1576 = vmatprep.mubr.f32.mxu0 %v17193_v46  ;;  %v374_v63 = vld [vmem:[%s16879_s8 + $0x198] sm:$0xff] }
 0x2be   :  { %8295 = vmatprep.subr.mxu1 %v2008_v48  ;;  %8375 = vmatprep.subr.mxu0 %v2040_v5  ;;  %v361_v48 = vld [vmem:[%s16879_s8 + $0x130] sm:$0xff]  ;;  %v1988_v5 = vmul.f32 %v330_v25, %v17213_v15  ;;  %v326_v25 = vld [vmem:[%s16879_s8 + $0x18] sm:$0xff] }
 0x2bf   :  { %8026 = vmatmul.mubr.msk.f32.gmra.mxu1 %vm582_vm1, %v17205_v47  ;;  %8042 = vmatmul.mubr.msk.f32.gmra.mxu0 %vm582_vm1, %v17205_v47  ;;  %v358_v28 = vld [vmem:[%s16879_s8 + $0x118] sm:$0xff] }
 0x2c0   :  { %8296 = vmatpush3.msra.mxu1 %v1992_v8  ;;  %8376 = vmatpush3.msra.mxu0 %v2024_v14  ;;  %v17215_v8 = vld [vmem:[#allocation9_spill] sm:$0xff]  ;;  %v17219_v15 = vld [vmem:[#allocation6_spill] sm:$0xff] }
 0x2c1   :  { %8297 = vmatprep.subr.mxu1 %v2007_v10  ;;  %8377 = vmatprep.subr.mxu0 %v2039_v62  ;;  %v2003_v14 = vmul.f32 %v345_v11, %v17215_v8  ;;  %v2035_v47 = vmul.f32 %v377_v4, %v17215_v8  ;;  %v376_v10 = vld [vmem:[%s16879_s8 + $0x1a8] sm:$0xff]  ;;  %v1987_v62 = vmul.f32 %v329_v12, %v17215_v8  ;;  %v341_v11 = vld [vmem:[%s16879_s8 + $0x90] sm:$0xff] }
 0x2c2   :  { %8298 = vmatpush3.msra.mxu1 %v1991_v57  ;;  %8378 = vmatpush3.msra.mxu0 %v2023_v43  ;;  %v2019_v58 = vmul.f32 %v361_v48, %v17215_v8  ;;  %v328_v57 = vld [vmem:[%s16879_s8 + $0x28] sm:$0xff]  ;;  %v373_v4 = vld [vmem:[%s16879_s8 + $0x190] sm:$0xff] }
 0x2c3   :  { %1421 = vmatprep.mubr.f32.mxu1 %v17193_v46  ;;  %1582 = vmatprep.mubr.f32.mxu0 %v17193_v46  ;;  %v360_v43 = vld [vmem:[%s16879_s8 + $0x128] sm:$0xff]  ;;  %v325_v12 = vld [vmem:[%s16879_s8 + $0x10] sm:$0xff] }
 0x2c4   :  { %8299 = vmatprep.subr.mxu1 %v2006_v54  ;;  %8379 = vmatprep.subr.mxu0 %v2038_v19  ;;  %v2034_v54 = vmul.f32 %v376_v10, %v17216_v44  ;;  %v343_v19 = vld [vmem:[%s16879_s8 + $0xa0] sm:$0xff]  ;;  %v357_v48 = vld [vmem:[%s16879_s8 + $0x110] sm:$0xff]  ;;  %v372_v10 = vld [vmem:[%s16879_s8 + $0x188] sm:$0xff] }
 0x2c5   :  { %8027 = vmatmul.mubr.msk.f32.gmra.mxu1 %vm582_vm1, %v17211_v34  ;;  %8043 = vmatmul.mubr.msk.f32.gmra.mxu0 %vm582_vm1, %v17211_v34  ;;  %v17217_v34 = vld [vmem:[#allocation23_spill] sm:$0xff]  ;;  %v17221_v8 = vld [vmem:[#allocation4_spill] sm:$0xff] }
 0x2c6   :  { %8300 = vmatpush3.msra.mxu1 %v1990_v21  ;;  %8380 = vmatpush3.msra.mxu0 %v2022_v22  ;;  %v1986_v21 = vmul.f32 %v328_v57, %v17216_v44  ;;  %v2018_v22 = vmul.f32 %v360_v43, %v17216_v44  ;;  %v324_v57 = vld [vmem:[%s16879_s8 + $0x8] sm:$0xff]  ;;  %v17222_v44 = vld [vmem:[#allocation5_spill] sm:$0xff] }
 0x2c7   :  { %8301 = vmatprep.subr.mxu1 %v2005_v23  ;;  %8381 = vmatprep.subr.mxu0 %v2037_v33  ;;  %v2001_v23 = vmul.f32 %v343_v19, %v17218_v36  ;;  %v2033_v33 = vmul.f32 %v375_v0, %v17218_v36  ;;  %v356_v43 = vld [vmem:[%s16879_s8 + $0x108] sm:$0xff]  ;;  %v339_v19 = vld [vmem:[%s16879_s8 + $0x80] sm:$0xff] }
 0x2c8   :  { %8302 = vmatpush3.msra.mxu1 %v1989_v60  ;;  %8382 = vmatpush3.msra.mxu0 %v2021_v53  ;;  %v1985_v60 = vmul.f32 %v327_v38, %v17218_v36  ;;  %v2017_v53 = vmul.f32 %v359_v41, %v17218_v36  ;;  %v371_v0 = vld [vmem:[%s16879_s8 + $0x180] sm:$0xff] }
 0x2c9   :  { %1427 = vmatprep.mubr.f32.mxu1 %v17193_v46  ;;  %1588 = vmatprep.mubr.f32.mxu0 %v17193_v46  ;;  %v323_v38 = vld [vmem:[%s16879_s8] sm:$0xff] }
 0x2ca   :  { %8303 = vmatprep.subr.mxu1 %v2004_v50  ;;  %8383 = vmatprep.subr.mxu0 %v2036_v51  ;;  %v2000_v50 = vmul.f32 %v342_v32, %v17219_v15  ;;  %v2032_v51 = vmul.f32 %v374_v63, %v17219_v15  ;;  %v355_v41 = vld [vmem:[%s16879_s8 + $0x100] sm:$0xff] }
 0x2cb   :  { %8028 = vmatmul.mubr.msk.f32.gmra.mxu1 %vm582_vm1, %v17214_v7  ;;  %8044 = vmatmul.mubr.msk.f32.gmra.mxu0 %vm582_vm1, %v17214_v7  ;;  %v17220_v7 = vld [vmem:[#allocation26_spill] sm:$0xff]  ;;  %v17224_v36 = vld [vmem:[#allocation3_spill] sm:$0xff] }
 0x2cc   :  { %8304 = vmatpush3.msra.mxu1 %v1988_v5  ;;  %8384 = vmatpush3.msra.mxu0 %v2020_v59  ;;  %v1984_v5 = vmul.f32 %v326_v25, %v17219_v15  ;;  %v2016_v59 = vmul.f32 %v358_v28, %v17219_v15  ;;  %v1981_v32 = vmul.f32 %v323_v38, %v17224_v36  ;;  %v17227_v25 = vld [vmem:[#allocation30_spill] sm:$0xff]  ;;  %v17230_v28 = vld [vmem:[#allocation31_spill] sm:$0xff] }
 0x2cd   :  { %8305 = vmatprep.subr.mxu1 %v2003_v14  ;;  %8385 = vmatprep.subr.mxu0 %v2035_v47  ;;  %v1999_v14 = vmul.f32 %v341_v11, %v17221_v8  ;;  %v2031_v47 = vmul.f32 %v373_v4, %v17221_v8  ;;  %v2013_v63 = vmul.f32 %v355_v41, %v17224_v36  ;;  %v17231_v15 = vld [vmem:[#allocation34_spill] sm:$0xff] }
 0x2ce   :  { %8306 = vmatpush3.msra.mxu1 %v1987_v62  ;;  %8386 = vmatpush3.msra.mxu0 %v2019_v58  ;;  %v1983_v62 = vmul.f32 %v325_v12, %v17221_v8  ;;  %v2015_v58 = vmul.f32 %v357_v48, %v17221_v8 }
 0x2cf   :  { %1433 = vmatprep.mubr.f32.mxu1 %v17193_v46  ;;  %1594 = vmatprep.mubr.f32.mxu0 %v17193_v46 }
 0x2d0   :  { %8307 = vmatprep.subr.mxu1 %v2002_v18  ;;  %8387 = vmatprep.subr.mxu0 %v2034_v54  ;;  %v1998_v18 = vmul.f32 %v340_v9, %v17222_v44  ;;  %v2030_v54 = vmul.f32 %v372_v10, %v17222_v44 }
 0x2d1   :  { %8029 = vmatmul.mubr.msk.f32.gmra.mxu1 %vm582_vm1, %v17217_v34  ;;  %8045 = vmatmul.mubr.msk.f32.gmra.mxu0 %vm582_vm1, %v17217_v34  ;;  %v17223_v34 = vld [vmem:[#allocation25_spill] sm:$0xff] }
 0x2d2   :  { %8308 = vmatpush3.msra.mxu1 %v1986_v21  ;;  %8388 = vmatpush3.msra.mxu0 %v2018_v22  ;;  %v1982_v21 = vmul.f32 %v324_v57, %v17222_v44  ;;  %v2014_v22 = vmul.f32 %v356_v43, %v17222_v44 }
 0x2d3   :  { %8309 = vmatprep.subr.mxu1 %v2001_v23  ;;  %8389 = vmatprep.subr.mxu0 %v2033_v33  ;;  %v1997_v23 = vmul.f32 %v339_v19, %v17224_v36  ;;  %v2029_v33 = vmul.f32 %v371_v0, %v17224_v36 }
 0x2d4   :  { %8310 = vmatpush3.msra.mxu1 %v1985_v60  ;;  %8390 = vmatpush3.msra.mxu0 %v2017_v53  ;;  %v17225_v60 = vld [vmem:[#allocation28_spill] sm:$0xff]  ;;  %v17226_v53 = vld [vmem:[#allocation27_spill] sm:$0xff] }
 0x2d5   :  { %1439 = vmatprep.mubr.f32.mxu1 %v17193_v46  ;;  %1600 = vmatprep.mubr.f32.mxu0 %v17193_v46 }
 0x2d6   :  { %8311 = vmatprep.subr.mxu1 %v2000_v50  ;;  %8391 = vmatprep.subr.mxu0 %v2032_v51  ;;  %v17232_v50 = vld [vmem:[#allocation33_spill] sm:$0xff] }
 0x2d7   :  { %8030 = vmatmul.mubr.msk.f32.gmra.mxu1 %vm582_vm1, %v17220_v7  ;;  %8046 = vmatmul.mubr.msk.f32.gmra.mxu0 %vm582_vm1, %v17220_v7 }
 0x2d8   :  { %8312 = vmatpush3.msra.mxu1 %v1984_v5  ;;  %8392 = vmatpush3.msra.mxu0 %v2016_v59 }
 0x2d9   :  { %8313 = vmatprep.subr.mxu1 %v1999_v14  ;;  %8393 = vmatprep.subr.mxu0 %v2031_v47 }
 0x2da   :  { %8314 = vmatpush3.msra.mxu1 %v1983_v62  ;;  %8394 = vmatpush3.msra.mxu0 %v2015_v58 }
 0x2db   :  { %1445 = vmatprep.mubr.f32.mxu1 %v17193_v46  ;;  %1606 = vmatprep.mubr.f32.mxu0 %v17193_v46 }
 0x2dc   :  { %8315 = vmatprep.subr.mxu1 %v1998_v18  ;;  %8395 = vmatprep.subr.mxu0 %v2030_v54 }
 0x2dd   :  { %8031 = vmatmul.mubr.msk.f32.gmra.mxu1 %vm582_vm1, %v17223_v34  ;;  %8047 = vmatmul.mubr.msk.f32.gmra.mxu0 %vm582_vm1, %v17223_v34 }
 0x2de   :  { %8316 = vmatpush3.msra.mxu1 %v1982_v21  ;;  %8396 = vmatpush3.msra.mxu0 %v2014_v22 }
 0x2df   :  { %8317 = vmatprep.subr.mxu1 %v1997_v23  ;;  %8397 = vmatprep.subr.mxu0 %v2029_v33 }
 0x2e0   :  { %8318 = vmatpush3.msra.mxu1 %v1981_v32  ;;  %8398 = vmatpush3.msra.mxu0 %v2013_v63 }
 0x2e1   :  { %1451 = vmatprep.mubr.f32.mxu1 %v17193_v46  ;;  %1612 = vmatprep.mubr.f32.mxu0 %v17193_v46 }
 0x2e2   :  { %8032 = vmatmul.mubr.msk.f32.gmra.mxu1 %vm582_vm1, %v17225_v60  ;;  %8048 = vmatmul.mubr.msk.f32.gmra.mxu0 %vm582_vm1, %v17225_v60 }
 0x2e3   :  { %1457 = vmatprep.mubr.f32.mxu1 %v17193_v46  ;;  %1618 = vmatprep.mubr.f32.mxu0 %v17193_v46 }
 0x2e4   :  { %8447 = vmatprep.subr.mxu1 %v10861_v17  ;;  %8527 = vmatprep.subr.mxu0 %v10872_v56  ;;  %v17228_v17 = vld [vmem:[#allocation29_spill] sm:$0xff]  ;;  %v17229_v56 = vld [vmem:[#allocation32_spill] sm:$0xff] }
 0x2e6   :  { %8033 = vmatmul.mubr.msk.f32.gmra.mxu1 %vm582_vm1, %v17226_v53  ;;  %8049 = vmatmul.mubr.msk.f32.gmra.mxu0 %vm582_vm1, %v17226_v53 }
 0x2e7   :  { %1463 = vmatprep.mubr.f32.mxu1 %v17193_v46  ;;  %1624 = vmatprep.mubr.f32.mxu0 %v17193_v46 }
 0x2ea   :  { %8034 = vmatmul.mubr.msk.f32.gmra.mxu1 %vm582_vm1, %v17227_v25  ;;  %8050 = vmatmul.mubr.msk.f32.gmra.mxu0 %vm582_vm1, %v17227_v25 }
 0x2eb   :  { %1469 = vmatprep.mubr.f32.mxu1 %v17193_v46  ;;  %1630 = vmatprep.mubr.f32.mxu0 %v17193_v46 }
 0x2ee   :  { %8035 = vmatmul.mubr.msk.f32.gmra.mxu1 %vm582_vm1, %v17228_v17  ;;  %8051 = vmatmul.mubr.msk.f32.gmra.mxu0 %vm582_vm1, %v17228_v17 }
 0x2ef   :  { %1475 = vmatprep.mubr.f32.mxu1 %v17193_v46  ;;  %1636 = vmatprep.mubr.f32.mxu0 %v17193_v46 }
 0x2f2   :  { %8036 = vmatmul.mubr.msk.f32.gmra.mxu1 %vm582_vm1, %v17229_v56  ;;  %8052 = vmatmul.mubr.msk.f32.gmra.mxu0 %vm582_vm1, %v17229_v56 }
 0x2f3   :  { %1481 = vmatprep.mubr.f32.mxu1 %v17193_v46  ;;  %1642 = vmatprep.mubr.f32.mxu0 %v17193_v46 }
 0x2f6   :  { %8037 = vmatmul.mubr.msk.f32.gmra.mxu1 %vm582_vm1, %v17230_v28  ;;  %8053 = vmatmul.mubr.msk.f32.gmra.mxu0 %vm582_vm1, %v17230_v28 }
 0x2f7   :  { %1487 = vmatprep.mubr.f32.mxu1 %v17193_v46  ;;  %1648 = vmatprep.mubr.f32.mxu0 %v17193_v46 }
 0x2fa   :  { %8038 = vmatmul.mubr.msk.f32.gmra.mxu1 %vm582_vm1, %v17231_v15  ;;  %8054 = vmatmul.mubr.msk.f32.gmra.mxu0 %vm582_vm1, %v17231_v15 }
 0x2fb   :  { %1493 = vmatprep.mubr.f32.mxu1 %v17193_v46  ;;  %1654 = vmatprep.mubr.f32.mxu0 %v17193_v46 }
 0x2fe   :  { %8039 = vmatmul.mubr.msk.f32.gmra.mxu1 %vm582_vm1, %v17232_v50  ;;  %8055 = vmatmul.mubr.msk.f32.gmra.mxu0 %vm582_vm1, %v17232_v50 }
 0x332   :  { %v11358_v51 = vpop.f32.mrf.mxu1  ;;  %v11360_v11 = vpop.f32.mrf.mxu0 }
 0x334   :  { %v11362_v4 = vpop.f32.mrf.mxu1  ;;  %v11364_v12 = vpop.f32.mrf.mxu0 }
 0x337   :  { %v11366_v48 = vpop.f32.mrf.mxu1  ;;  %v11368_v5 = vpop.f32.mrf.mxu0 }
 0x339   :  { %v11370_v59 = vpop.f32.mrf.mxu1  ;;  %v11372_v7 = vpop.f32.mrf.mxu0 }
 0x33b   :  { %v11374_v8 = vpop.f32.mrf.mxu1  ;;  %v11376_v14 = vpop.f32.mrf.mxu0 }
 0x33d   :  { %v11378_v47 = vpop.f32.mrf.mxu1  ;;  %v11380_v9 = vpop.f32.mrf.mxu0 }
 0x33f   :  { %v11382_v10 = vpop.f32.mrf.mxu1  ;;  %v11384_v62 = vpop.f32.mrf.mxu0 }
 0x341   :  { %v11386_v58 = vpop.f32.mrf.mxu1  ;;  %v11388_v57 = vpop.f32.mrf.mxu0 }
 0x343   :  { %v11390_v43 = vpop.f32.mrf.mxu1  ;;  %v11392_v44 = vpop.f32.mrf.mxu0 }
 0x345   :  { %v11394_v18 = vpop.f32.mrf.mxu1  ;;  %v11396_v54 = vpop.f32.mrf.mxu0 }
 0x347   :  { %v11398_v19 = vpop.f32.mrf.mxu1  ;;  %v11400_v0 = vpop.f32.mrf.mxu0 }
 0x349   :  { %v11402_v38 = vpop.f32.mrf.mxu1  ;;  %v11404_v41 = vpop.f32.mrf.mxu0 }
 0x34b   :  { %v11406_v21 = vpop.f32.mrf.mxu1  ;;  %v11408_v22 = vpop.f32.mrf.mxu0 }
 0x34d   :  { %v11410_v34 = vpop.f32.mrf.mxu1  ;;  %v11412_v36 = vpop.f32.mrf.mxu0 }
 0x34e   :  { %17233 = vst [vmem:[#allocation41_spill] sm:$0xff] %v11410_v34  ;;  %17234 = vst [vmem:[#allocation42_spill] sm:$0xff] %v11412_v36 }
 0x34f   :  { %v11414_v23 = vpop.f32.mrf.mxu1  ;;  %v11416_v33 = vpop.f32.mrf.mxu0 }
 0x350   :  { %17235 = vst [vmem:[#allocation39_spill] sm:$0xff] %v11414_v23  ;;  %17236 = vst [vmem:[#allocation40_spill] sm:$0xff] %v11416_v33 }
 0x351   :  { %v11418_v32 = vpop.f32.mrf.mxu1  ;;  %v11420_v63 = vpop.f32.mrf.mxu0 }
 0x352   :  { %17237 = vst [vmem:[#allocation37_spill] sm:$0xff] %v11418_v32  ;;  %17238 = vst [vmem:[#allocation38_spill] sm:$0xff] %v11420_v63 }
 0x353   :  { %v11422_v60 = vpop.f32.mrf.mxu1  ;;  %v11424_v53 = vpop.f32.mrf.mxu0 }
 0x354   :  { %17239 = vst [vmem:[#allocation35_spill] sm:$0xff] %v11422_v60  ;;  %17240 = vst [vmem:[#allocation36_spill] sm:$0xff] %v11424_v53 }
 0x355   :  { %v11426_v25 = vpop.f32.mrf.mxu1  ;;  %v11428_v17 = vpop.f32.mrf.mxu0 }
 0x356   :  { %17241 = vst [vmem:[#allocation18_spill] sm:$0xff] %v11426_v25  ;;  %17242 = vst [vmem:[#allocation20_spill] sm:$0xff] %v11428_v17 }
 0x357   :  { %v11430_v56 = vpop.f32.mrf.mxu1  ;;  %v11432_v28 = vpop.f32.mrf.mxu0 }
 0x358   :  { %17243 = vst [vmem:[#allocation17_spill] sm:$0xff] %v11430_v56  ;;  %17244 = vst [vmem:[#allocation16_spill] sm:$0xff] %v11432_v28 }
 0x359   :  { %v11434_v15 = vpop.f32.mrf.mxu1  ;;  %v11436_v50 = vpop.f32.mrf.mxu0 }
 0x35a   :  { %17245 = vst [vmem:[#allocation19_spill] sm:$0xff] %v11434_v15  ;;  %17246 = vst [vmem:[#allocation15_spill] sm:$0xff] %v11436_v50 }
 0x35b   :  { %v11438_v52 = vpop.f32.mrf.mxu1  ;;  %v11440_v46 = vpop.f32.mrf.mxu0 }
 0x35c   :  { %17247 = vst [vmem:[#allocation14_spill] sm:$0xff] %v11438_v52  ;;  %17248 = vst [vmem:[#allocation22_spill] sm:$0xff] %v11440_v46 }
 0x35d   :  { %v11442_v63 = vpop.f32.mrf.mxu1  ;;  %v11444_v60 = vpop.f32.mrf.mxu0 }
 0x35e   :  { %17249 = vst [vmem:[#allocation13_spill] sm:$0xff] %v11442_v63  ;;  %17250 = vst [vmem:[#allocation12_spill] sm:$0xff] %v11444_v60 }
 0x35f   :  { %v11446_v53 = vpop.f32.mrf.mxu1  ;;  %v11448_v25 = vpop.f32.mrf.mxu0 }
 0x360   :  { %17251 = vst [vmem:[#allocation21_spill] sm:$0xff] %v11446_v53  ;;  %17252 = vst [vmem:[#allocation11_spill] sm:$0xff] %v11448_v25 }
 0x361   :  { %v11450_v17 = vpop.f32.mrf.mxu1  ;;  %v11452_v56 = vpop.f32.mrf.mxu0 }
 0x362   :  { %17253 = vst [vmem:[#allocation10_spill] sm:$0xff] %v11450_v17  ;;  %17254 = vst [vmem:[#allocation24_spill] sm:$0xff] %v11452_v56 }
 0x363   :  { %v11454_v28 = vpop.f32.mrf.mxu1  ;;  %v11456_v15 = vpop.f32.mrf.mxu0 }
 0x364   :  { %17255 = vst [vmem:[#allocation9_spill] sm:$0xff] %v11454_v28  ;;  %17256 = vst [vmem:[#allocation8_spill] sm:$0xff] %v11456_v15 }
 0x365   :  { %v11458_v50 = vpop.f32.mrf.mxu1  ;;  %v11460_v52 = vpop.f32.mrf.mxu0 }
 0x366   :  { %17257 = vst [vmem:[#allocation23_spill] sm:$0xff] %v11458_v50  ;;  %17258 = vst [vmem:[#allocation7_spill] sm:$0xff] %v11460_v52 }
 0x367   :  { %v11462_v46 = vpop.f32.mrf.mxu1  ;;  %v11464_v63 = vpop.f32.mrf.mxu0 }
 0x368   :  { %17259 = vst [vmem:[#allocation6_spill] sm:$0xff] %v11462_v46  ;;  %17260 = vst [vmem:[#allocation26_spill] sm:$0xff] %v11464_v63 }
 0x369   :  { %v11466_v60 = vpop.f32.mrf.mxu1  ;;  %v11468_v53 = vpop.f32.mrf.mxu0 }
 0x36a   :  { %17261 = vst [vmem:[#allocation4_spill] sm:$0xff] %v11466_v60  ;;  %17262 = vst [vmem:[#allocation5_spill] sm:$0xff] %v11468_v53 }
 0x36b   :  { %v11470_v25 = vpop.f32.mrf.mxu1  ;;  %v11472_v17 = vpop.f32.mrf.mxu0 }
 0x36c   :  { %17263 = vst [vmem:[#allocation25_spill] sm:$0xff] %v11470_v25  ;;  %17264 = vst [vmem:[#allocation3_spill] sm:$0xff] %v11472_v17 }
 0x36d   :  { %v11474_v56 = vpop.f32.mrf.mxu1  ;;  %v11476_v28 = vpop.f32.mrf.mxu0 }
 0x36e   :  { %17265 = vst [vmem:[#allocation28_spill] sm:$0xff] %v11474_v56  ;;  %17266 = vst [vmem:[#allocation27_spill] sm:$0xff] %v11476_v28 }
 0x36f   :  { %v11478_v15 = vpop.f32.mrf.mxu1  ;;  %v11480_v50 = vpop.f32.mrf.mxu0 }
 0x370   :  { %17267 = vst [vmem:[#allocation30_spill] sm:$0xff] %v11478_v15  ;;  %17268 = vst [vmem:[#allocation29_spill] sm:$0xff] %v11480_v50 }
 0x371   :  { %v11482_v52 = vpop.f32.mrf.mxu1  ;;  %v11484_v46 = vpop.f32.mrf.mxu0 }
 0x372   :  { %17269 = vst [vmem:[#allocation32_spill] sm:$0xff] %v11482_v52  ;;  %17270 = vst [vmem:[#allocation31_spill] sm:$0xff] %v11484_v46  ;;  %v183_v52 = vld [vmem:[%s16880_s1] sm:$0xff]  ;;  %v185_v46 = vld [vmem:[%s16880_s1 + $0x10] sm:$0xff] }
 0x373   :  { %v1405_v63 = vpop.f32.mrf.mxu1  ;;  %v1566_v60 = vpop.f32.mrf.mxu0 }
 0x374   :  { %v1406_v53 = vadd.f32 %v1405_v63, %v11358_v51  ;;  %v1567_v25 = vadd.f32 %v1566_v60, %v11360_v11  ;;  %v184_v60 = vld [vmem:[%s16880_s1 + $0x8] sm:$0xff] }
 0x375   :  { %v1407_v32 = vpop.f32.mrf.mxu1  ;;  %v1568_v17 = vpop.f32.mrf.mxu0 }
 0x376   :  { %v1661_v40 = vmul.f32 0.2, %v1406_v53  ;;  %v1663_v56 = vmul.f32 0.2, %v1567_v25  ;;  %v1408_v28 = vadd.f32 %v1407_v32, %v11362_v4  ;;  %v1569_v15 = vadd.f32 %v1568_v17, %v11364_v12  ;;  %v186_v4 = vld [vmem:[%s16880_s1 + $0x18] sm:$0xff] }
 0x378   :  { %v1725_v50 = vmax.f32 %v1406_v53, %v1661_v40  ;;  %v1727_v51 = vmax.f32 %v1567_v25, %v1663_v56  ;;  %v1662_v63 = vmul.f32 0.2, %v1408_v28  ;;  %v1664_v11 = vmul.f32 0.2, %v1569_v15 }
 0x379   :  { %v1411_v12 = vpop.f32.mrf.mxu1  ;;  %v1572_v32 = vpop.f32.mrf.mxu0 }
 0x37a   :  { %v1789_v17 = vadd.f32 %v1725_v50, %v183_v52  ;;  %v1791_v33 = vadd.f32 %v1727_v51, %v185_v46  ;;  %v1726_v55 = vmax.f32 %v1408_v28, %v1662_v63  ;;  %v1728_v16 = vmax.f32 %v1569_v15, %v1664_v11 }
 0x37b   :  { %v1412_v13 = vadd.f32 %v1411_v12, %v11366_v48  ;;  %v1573_v40 = vadd.f32 %v1572_v32, %v11368_v5  ;;  %v1413_v53 = vpop.f32.mrf.mxu1  ;;  %v1574_v25 = vpop.f32.mrf.mxu0  ;;  %v187_v48 = vld [vmem:[%s16880_s1 + $0x20] sm:$0xff]  ;;  %v189_v5 = vld [vmem:[%s16880_s1 + $0x30] sm:$0xff] }
 0x37c   :  { %v1853_v56 = vmul.f32 1.442695, %v1789_v17  ;;  %v1857_v23 = vmul.f32 1.442695, %v1791_v33  ;;  %v1790_v6 = vadd.f32 %v1726_v55, %v184_v60  ;;  %v1792_v36 = vadd.f32 %v1728_v16, %v186_v4 }
 0x37d   :  { %v1665_v1 = vmul.f32 0.2, %v1412_v13  ;;  %v1667_v34 = vmul.f32 0.2, %v1573_v40  ;;  %v1414_v3 = vadd.f32 %v1413_v53, %v11370_v59  ;;  %v1575_v2 = vadd.f32 %v1574_v25, %v11372_v7 }
 0x37e   :  { %9464 = vpow2.f32 %v1853_v56  ;;  %v1855_v52 = vmul.f32 1.442695, %v1790_v6  ;;  %v1859_v46 = vmul.f32 1.442695, %v1792_v36  ;;  %v188_v6 = vld [vmem:[%s16880_s1 + $0x28] sm:$0xff] }
 0x37f   :  { %9466 = vpow2.f32 %v1857_v23  ;;  %v1729_v55 = vmax.f32 %v1412_v13, %v1665_v1  ;;  %v1731_v16 = vmax.f32 %v1573_v40, %v1667_v34  ;;  %v1666_v33 = vmul.f32 0.2, %v1414_v3  ;;  %v1417_v28 = vpop.f32.mrf.mxu1  ;;  %v1578_v15 = vpop.f32.mrf.mxu0  ;;  %v190_v1 = vld [vmem:[%s16880_s1 + $0x38] sm:$0xff] }
 0x380   :  { %9468 = vpow2.f32 %v1855_v52  ;;  %v1668_v59 = vmul.f32 0.2, %v1575_v2  ;;  %v1418_v7 = vadd.f32 %v1417_v28, %v11374_v8  ;;  %v1579_v36 = vadd.f32 %v1578_v15, %v11376_v14  ;;  %v191_v14 = vld [vmem:[%s16880_s1 + $0x40] sm:$0xff] }
 0x381   :  { %9470 = vpow2.f32 %v1859_v46  ;;  %v1793_v50 = vadd.f32 %v1729_v55, %v187_v48  ;;  %v1795_v51 = vadd.f32 %v1731_v16, %v189_v5  ;;  %v1730_v63 = vmax.f32 %v1414_v3, %v1666_v33  ;;  %v1419_v13 = vpop.f32.mrf.mxu1  ;;  %v1580_v34 = vpop.f32.mrf.mxu0  ;;  %v193_v3 = vld [vmem:[%s16880_s1 + $0x50] sm:$0xff]  ;;  %v192_v16 = vld [vmem:[%s16880_s1 + $0x48] sm:$0xff] }
 0x382   :  { %v1732_v23 = vmax.f32 %v1575_v2, %v1668_v59  ;;  %v1669_v11 = vmul.f32 0.2, %v1418_v7  ;;  %v1671_v60 = vmul.f32 0.2, %v1579_v36  ;;  %v1420_v4 = vadd.f32 %v1419_v13, %v11378_v47 }
 0x383   :  { %v1861_v12 = vmul.f32 1.442695, %v1793_v50  ;;  %v1865_v32 = vmul.f32 1.442695, %v1795_v51  ;;  %v1794_v8 = vadd.f32 %v1730_v63, %v188_v6  ;;  %v1581_v17 = vadd.f32 %v1580_v34, %v11380_v9  ;;  %v194_v9 = vld [vmem:[%s16880_s1 + $0x58] sm:$0xff]  ;;  %v195_v34 = vld [vmem:[%s16880_s1 + $0x60] sm:$0xff] }
 0x384   :  { %v1796_v40 = vadd.f32 %v1732_v23, %v190_v1  ;;  %v1733_v53 = vmax.f32 %v1418_v7, %v1669_v11  ;;  %v1735_v2 = vmax.f32 %v1579_v36, %v1671_v60  ;;  %v1670_v25 = vmul.f32 0.2, %v1420_v4 }
 0x385   :  { %9472 = vpow2.f32 %v1861_v12  ;;  %v1863_v56 = vmul.f32 1.442695, %v1794_v8  ;;  %v1672_v47 = vmul.f32 0.2, %v1581_v17  ;;  %v1423_v52 = vpop.f32.mrf.mxu1  ;;  %v1584_v46 = vpop.f32.mrf.mxu0 }
 0x386   :  { %9474 = vpow2.f32 %v1865_v32  ;;  %v1867_v48 = vmul.f32 1.442695, %v1796_v40  ;;  %v1797_v5 = vadd.f32 %v1733_v53, %v191_v14  ;;  %v1799_v55 = vadd.f32 %v1735_v2, %v193_v3  ;;  %v196_v2 = vld [vmem:[%s16880_s1 + $0x68] sm:$0xff] }
 0x387   :  { %9476 = vpow2.f32 %v1863_v56  ;;  %v1734_v33 = vmax.f32 %v1420_v4, %v1670_v25  ;;  %v1736_v28 = vmax.f32 %v1581_v17, %v1672_v47  ;;  %v1424_v15 = vadd.f32 %v1423_v52, %v11382_v10  ;;  %v1425_v6 = vpop.f32.mrf.mxu1  ;;  %v1586_v59 = vpop.f32.mrf.mxu0  ;;  %v198_v25 = vld [vmem:[%s16880_s1 + $0x78] sm:$0xff] }
 0x388   :  { %9478 = vpow2.f32 %v1867_v48  ;;  %v1869_v7 = vmul.f32 1.442695, %v1797_v5  ;;  %v1873_v36 = vmul.f32 1.442695, %v1799_v55  ;;  %v1585_v50 = vadd.f32 %v1584_v46, %v11384_v62  ;;  %v197_v62 = vld [vmem:[%s16880_s1 + $0x70] sm:$0xff] }
 0x389   :  { %v1798_v51 = vadd.f32 %v1734_v33, %v192_v16  ;;  %v1800_v63 = vadd.f32 %v1736_v28, %v194_v9  ;;  %v1673_v1 = vmul.f32 0.2, %v1424_v15  ;;  %v1426_v13 = vadd.f32 %v1425_v6, %v11386_v58  ;;  %v199_v6 = vld [vmem:[%s16880_s1 + $0x80] sm:$0xff] }
 0x38a   :  { %9480 = vpow2.f32 %v1869_v7  ;;  %v1675_v23 = vmul.f32 0.2, %v1585_v50  ;;  %v1587_v10 = vadd.f32 %v1586_v59, %v11388_v57  ;;  %v201_v59 = vld [vmem:[%s16880_s1 + $0x90] sm:$0xff] }
 0x38b   :  { %v11541_v11 = vpop.eup %9464  ;;  %9482 = vpow2.f32 %v1873_v36  ;;  %v1871_v60 = vmul.f32 1.442695, %v1798_v51  ;;  %v1875_v4 = vmul.f32 1.442695, %v1800_v63  ;;  %v1737_v12 = vmax.f32 %v1424_v15, %v1673_v1  ;;  %v1429_v32 = vpop.f32.mrf.mxu1 }
 0x38c   :  { %v1590_v58 = vpop.f32.mrf.mxu0  ;;  %v11546_v8 = vpop.eup %9466  ;;  %v1739_v14 = vmax.f32 %v1585_v50, %v1675_v23  ;;  %v1674_v3 = vmul.f32 0.2, %v1426_v13  ;;  %v1676_v17 = vmul.f32 0.2, %v1587_v10  ;;  %v1430_v40 = vadd.f32 %v1429_v32, %v11390_v43  ;;  %v200_v50 = vld [vmem:[%s16880_s1 + $0x88] sm:$0xff] }
 0x38d   :  { %v11549_v57 = vpop.eup %9468  ;;  %9484 = vpow2.f32 %v1871_v60  ;;  %v1801_v53 = vadd.f32 %v1737_v12, %v195_v34  ;;  %v1591_v56 = vadd.f32 %v1590_v58, %v11392_v44  ;;  %v1431_v47 = vpop.f32.mrf.mxu1 }
 0x38e   :  { %v1592_v52 = vpop.f32.mrf.mxu0  ;;  %v11558_v46 = vpop.eup %9470  ;;  %9486 = vpow2.f32 %v1875_v4  ;;  %v1803_v43 = vadd.f32 %v1739_v14, %v197_v62  ;;  %v1738_v48 = vmax.f32 %v1426_v13, %v1674_v3  ;;  %v1740_v5 = vmax.f32 %v1587_v10, %v1676_v17  ;;  %2109 = vmatprep.mubr.f32.mxu1 %v11549_v57 }
 0x38f   :  { %v1877_v55 = vmul.f32 1.442695, %v1801_v53  ;;  %v1677_v16 = vmul.f32 0.2, %v1430_v40  ;;  %v1679_v9 = vmul.f32 0.2, %v1591_v56  ;;  %v1432_v33 = vadd.f32 %v1431_v47, %v11394_v18  ;;  %2254 = vmatprep.mubr.f32.mxu0 %v11558_v46  ;;  %2110 = vmatmul.mubr.f32.vlgmr.msra.gmra.mxu1 %v11541_v11 }
 0x390   :  { %v1881_v44 = vmul.f32 1.442695, %v1803_v43  ;;  %v1802_v28 = vadd.f32 %v1738_v48, %v196_v2  ;;  %v1804_v15 = vadd.f32 %v1740_v5, %v198_v25  ;;  %v1593_v7 = vadd.f32 %v1592_v52, %v11396_v54  ;;  %2255 = vmatmul.mubr.f32.vlgmr.msra.gmra.mxu0 %v11546_v8  ;;  %8448 = vmatpush3.msra.mxu1 %v10949_v49  ;;  %v204_v5 = vld [vmem:[%s16880_s1 + $0xa8] sm:$0xff] }
 0x391   :  { %9488 = vpow2.f32 %v1877_v55  ;;  %v1741_v18 = vmax.f32 %v1430_v40, %v1677_v16  ;;  %v1743_v36 = vmax.f32 %v1591_v56, %v1679_v9  ;;  %v1678_v51 = vmul.f32 0.2, %v1432_v33  ;;  %v1435_v63 = vpop.f32.mrf.mxu1  ;;  %v1596_v1 = vpop.f32.mrf.mxu0  ;;  %8528 = vmatpush3.msra.mxu0 %v10954_v61  ;;  %8449 = vmatprep.subr.mxu1 %v10961_v20  ;;  %v202_v61 = vld [vmem:[%s16880_s1 + $0x98] sm:$0xff] }
 0x392   :  { %v11578_v13 = vpop.eup %9472  ;;  %9490 = vpow2.f32 %v1881_v44  ;;  %v1879_v54 = vmul.f32 1.442695, %v1802_v28  ;;  %v1883_v34 = vmul.f32 1.442695, %v1804_v15  ;;  %v1680_v49 = vmul.f32 0.2, %v1593_v7  ;;  %8529 = vmatprep.subr.mxu0 %v10966_v42  ;;  %8450 = vmatpush3.msra.mxu1 %v10971_v45 }
 0x393   :  { %v11582_v23 = vpop.eup %9474  ;;  %v1805_v10 = vadd.f32 %v1741_v18, %v199_v6  ;;  %v1807_v60 = vadd.f32 %v1743_v36, %v201_v59  ;;  %v1742_v4 = vmax.f32 %v1432_v33, %v1678_v51  ;;  %v1436_v20 = vadd.f32 %v1435_v63, %v11398_v19  ;;  %v1437_v12 = vpop.f32.mrf.mxu1  ;;  %8530 = vmatpush3.msra.mxu0 %v10976_v39  ;;  %v17271_v15 = vld [vmem:[#allocation49_spill] sm:$0xff] }
 0x394   :  { %v1598_v62 = vpop.f32.mrf.mxu0  ;;  %v11589_v32 = vpop.eup %9476  ;;  %9492 = vpow2.f32 %v1879_v54  ;;  %v1744_v42 = vmax.f32 %v1593_v7, %v1680_v49  ;;  %v1597_v45 = vadd.f32 %v1596_v1, %v11400_v0  ;;  %v1438_v58 = vadd.f32 %v1437_v12, %v11402_v38  ;;  %8451 = vmatprep.subr.mxu1 %v10993_v37  ;;  %8531 = vmatprep.subr.mxu0 %v10998_v35  ;;  %v203_v38 = vld [vmem:[%s16880_s1 + $0xa0] sm:$0xff]  ;;  %v17273_v18 = vld [vmem:[#allocation41_spill] sm:$0xff]  ;;  %v17276_v12 = vld [vmem:[#allocation48_spill] sm:$0xff] }
 0x395   :  { %v11595_v14 = vpop.eup %9478  ;;  %9494 = vpow2.f32 %v1883_v34  ;;  %v1885_v19 = vmul.f32 1.442695, %v1805_v10  ;;  %v1889_v3 = vmul.f32 1.442695, %v1807_v60  ;;  %v1806_v17 = vadd.f32 %v1742_v4, %v200_v50  ;;  %2114 = vmatprep.mubr.f32.mxu1 %v11589_v32  ;;  %8452 = vmatpush3.msra.mxu1 %v11007_v26  ;;  %v205_v26 = vld [vmem:[%s16880_s1 + $0xb0] sm:$0xff]  ;;  %v17274_v50 = vld [vmem:[#allocation50_spill] sm:$0xff] }
 0x396   :  { %v1808_v39 = vadd.f32 %v1744_v42, %v202_v61  ;;  %v1681_v40 = vmul.f32 0.2, %v1436_v20  ;;  %v1683_v53 = vmul.f32 0.2, %v1597_v45  ;;  %v1682_v0 = vmul.f32 0.2, %v1438_v58  ;;  %2259 = vmatprep.mubr.f32.mxu0 %v11595_v14  ;;  %2115 = vmatmul.mubr.f32.gmra.mxu1 %v11578_v13 }
 0x397   :  { %v11601_v37 = vpop.eup %9480  ;;  %9496 = vpow2.f32 %v1885_v19  ;;  %v1887_v35 = vmul.f32 1.442695, %v1806_v17  ;;  %v1599_v2 = vadd.f32 %v1598_v62, %v11404_v41  ;;  %v1441_v25 = vpop.f32.mrf.mxu1  ;;  %2260 = vmatmul.mubr.f32.gmra.mxu0 %v11582_v23  ;;  %8453 = vmatprep.subr.mxu1 %v11021_v27  ;;  %v17275_v1 = vld [vmem:[#allocation42_spill] sm:$0xff]  ;;  %v209_v60 = vld [vmem:[%s16880_s1 + $0xd0] sm:$0xff]  ;;  %v17277_v19 = vld [vmem:[#allocation39_spill] sm:$0xff] }
 0x398   :  { %v1602_v56 = vpop.f32.mrf.mxu0  ;;  %v11612_v47 = vpop.eup %9482  ;;  %9498 = vpow2.f32 %v1889_v3  ;;  %v1891_v52 = vmul.f32 1.442695, %v1808_v39  ;;  %v1745_v43 = vmax.f32 %v1436_v20, %v1681_v40  ;;  %v1747_v48 = vmax.f32 %v1597_v45, %v1683_v53  ;;  %8532 = vmatpush3.msra.mxu0 %v11012_v31  ;;  %8454 = vmatpush3.msra.mxu1 %v11033_v29  ;;  %v206_v31 = vld [vmem:[%s16880_s1 + $0xb8] sm:$0xff]  ;;  %v208_v45 = vld [vmem:[%s16880_s1 + $0xc8] sm:$0xff] }
 0x399   :  { %9500 = vpow2.f32 %v1887_v35  ;;  %v1746_v41 = vmax.f32 %v1438_v58, %v1682_v0  ;;  %v1684_v55 = vmul.f32 0.2, %v1599_v2  ;;  %v1442_v16 = vadd.f32 %v1441_v25, %v11406_v21  ;;  %v1443_v27 = vpop.f32.mrf.mxu1  ;;  %8533 = vmatprep.subr.mxu0 %v11026_v30  ;;  %8455 = vmatprep.subr.mxu1 %v11055_v24  ;;  %v17272_v21 = vld [vmem:[#allocation47_spill] sm:$0xff]  ;;  %v9976_v17 = vld [vmem:[%s16879_s8 + $0x158] sm:$0xff]  ;;  %v9977_v25 = vld [vmem:[%s16879_s8 + $0x1d0] sm:$0xff] }
 0x39a   :  { %v1604_v9 = vpop.f32.mrf.mxu0  ;;  %v11622_v33 = vpop.eup %9484  ;;  %9502 = vpow2.f32 %v1891_v52  ;;  %v1809_v44 = vadd.f32 %v1745_v43, %v203_v38  ;;  %v1811_v28 = vadd.f32 %v1747_v48, %v205_v26  ;;  %v1603_v29 = vadd.f32 %v1602_v56, %v11408_v22  ;;  %8534 = vmatpush3.msra.mxu0 %v17271_v15  ;;  %8456 = vmatpush3.msra.mxu1 %v17272_v21  ;;  %v207_v24 = vld [vmem:[%s16880_s1 + $0xc0] sm:$0xff]  ;;  %v17278_v39 = vld [vmem:[#allocation45_spill] sm:$0xff] }
 0x39b   :  { %v11630_v6 = vpop.eup %9486  ;;  %v1810_v30 = vadd.f32 %v1746_v41, %v204_v5  ;;  %v1748_v59 = vmax.f32 %v1599_v2, %v1684_v55  ;;  %v1685_v7 = vmul.f32 0.2, %v1442_v16  ;;  %v1444_v36 = vadd.f32 %v1443_v27, %v17273_v18  ;;  %2119 = vmatprep.mubr.f32.mxu1 %v11622_v33  ;;  %8535 = vmatprep.subr.mxu0 %v17274_v50  ;;  %v210_v38 = vld [vmem:[%s16880_s1 + $0xd8] sm:$0xff]  ;;  %v9978_v5 = vld [vmem:[%s16879_s8 + $0x150] sm:$0xff]  ;;  %v17280_v41 = vld [vmem:[#allocation43_spill] sm:$0xff] }
 0x39c   :  { %v1893_v22 = vmul.f32 1.442695, %v1809_v44  ;;  %v1897_v51 = vmul.f32 1.442695, %v1811_v28  ;;  %v1687_v63 = vmul.f32 0.2, %v1603_v29  ;;  %v1605_v54 = vadd.f32 %v1604_v9, %v17275_v1  ;;  %2264 = vmatprep.mubr.f32.mxu0 %v11630_v6  ;;  %2120 = vmatmul.mubr.f32.gmra.mxu1 %v11601_v37 }
 0x39d   :  { %v1895_v34 = vmul.f32 1.442695, %v1810_v30  ;;  %v1812_v49 = vadd.f32 %v1748_v59, %v206_v31  ;;  %v1749_v10 = vmax.f32 %v1442_v16, %v1685_v7  ;;  %v1686_v4 = vmul.f32 0.2, %v1444_v36  ;;  %v1447_v61 = vpop.f32.mrf.mxu1  ;;  %v1608_v20 = vpop.f32.mrf.mxu0  ;;  %2265 = vmatmul.mubr.f32.gmra.mxu0 %v11612_v47  ;;  %8457 = vmatprep.subr.mxu1 %v17276_v12  ;;  %v17279_v56 = vld [vmem:[#allocation46_spill] sm:$0xff]  ;;  %v17281_v44 = vld [vmem:[#allocation40_spill] sm:$0xff] }
 0x39e   :  { %v11646_v62 = vpop.eup %9488  ;;  %9504 = vpow2.f32 %v1893_v22  ;;  %v1751_v42 = vmax.f32 %v1603_v29, %v1687_v63  ;;  %v1688_v58 = vmul.f32 0.2, %v1605_v54  ;;  %v1448_v3 = vadd.f32 %v1447_v61, %v17277_v19  ;;  %8536 = vmatpush3.msra.mxu0 %v9976_v17  ;;  %8458 = vmatpush3.msra.mxu1 %v17278_v39  ;;  %v211_v9 = vld [vmem:[%s16880_s1 + $0xe0] sm:$0xff]  ;;  %v9979_v31 = vld [vmem:[%s16879_s8 + $0x1c8] sm:$0xff] }
 0x39f   :  { %v11656_v40 = vpop.eup %9490  ;;  %9506 = vpow2.f32 %v1897_v51  ;;  %v1899_v53 = vmul.f32 1.442695, %v1812_v49  ;;  %v1813_v0 = vadd.f32 %v1749_v10, %v207_v24  ;;  %v1750_v35 = vmax.f32 %v1444_v36, %v1686_v4  ;;  %v1449_v26 = vpop.f32.mrf.mxu1  ;;  %8537 = vmatprep.subr.mxu0 %v9977_v25  ;;  %8459 = vmatprep.subr.mxu1 %v17279_v56  ;;  %v17282_v29 = vld [vmem:[#allocation44_spill] sm:$0xff]  ;;  %v17283_v24 = vld [vmem:[#allocation37_spill] sm:$0xff]  ;;  %v17284_v63 = vld [vmem:[#allocation38_spill] sm:$0xff] }
 0x3a0   :  { %v1610_v2 = vpop.f32.mrf.mxu0  ;;  %9508 = vpow2.f32 %v1895_v34  ;;  %v1815_v52 = vadd.f32 %v1751_v42, %v209_v60  ;;  %v1752_v43 = vmax.f32 %v1605_v54, %v1688_v58  ;;  %v1689_v48 = vmul.f32 0.2, %v1448_v3  ;;  %8538 = vmatpush3.msra.mxu0 %v9978_v5  ;;  %8460 = vmatpush3.msra.mxu1 %v17280_v41  ;;  %v9980_v50 = vld [vmem:[%s16879_s8 + $0x148] sm:$0xff]  ;;  %v213_v10 = vld [vmem:[%s16880_s1 + $0xf0] sm:$0xff]  ;;  %v9982_v17 = vld [vmem:[%s16879_s8 + $0x40] sm:$0xff] }
 0x3a1   :  { %v11669_v55 = vpop.eup %9492  ;;  %9510 = vpow2.f32 %v1899_v53  ;;  %v1901_v16 = vmul.f32 1.442695, %v1813_v0  ;;  %v1814_v27 = vadd.f32 %v1750_v35, %v208_v45  ;;  %v1609_v28 = vadd.f32 %v1608_v20, %v17281_v44  ;;  %8539 = vmatprep.subr.mxu0 %v9979_v31  ;;  %8461 = vmatprep.subr.mxu1 %v17282_v29  ;;  %v9981_v20 = vld [vmem:[%s16879_s8 + $0x1c0] sm:$0xff]  ;;  %v212_v45 = vld [vmem:[%s16880_s1 + $0xe8] sm:$0xff]  ;;  %v9986_v44 = vld [vmem:[%s16879_s8 + $0x38] sm:$0xff] }
 0x3a2   :  { %v11679_v15 = vpop.eup %9494  ;;  %v1905_v21 = vmul.f32 1.442695, %v1815_v52  ;;  %v1816_v30 = vadd.f32 %v1752_v43, %v210_v38  ;;  %v1753_v59 = vmax.f32 %v1448_v3, %v1689_v48  ;;  %v1450_v7 = vadd.f32 %v1449_v26, %v17283_v24  ;;  %v1453_v18 = vpop.f32.mrf.mxu1  ;;  %2124 = vmatprep.mubr.f32.mxu1 %v11669_v55  ;;  %8540 = vmatpush3.msra.mxu0 %v9980_v50  ;;  %v17285_v19 = vld [vmem:[#allocation35_spill] sm:$0xff]  ;;  %v214_v38 = vld [vmem:[%s16880_s1 + $0xf8] sm:$0xff]  ;;  %v17286_v26 = vld [vmem:[#allocation36_spill] sm:$0xff] }
 0x3a3   :  { %v1614_v36 = vpop.f32.mrf.mxu0  ;;  %9512 = vpow2.f32 %v1901_v16  ;;  %v1903_v22 = vmul.f32 1.442695, %v1814_v27  ;;  %v1691_v51 = vmul.f32 0.2, %v1609_v28  ;;  %v1611_v1 = vadd.f32 %v1610_v2, %v17284_v63  ;;  %2269 = vmatprep.mubr.f32.mxu0 %v11679_v15  ;;  %2125 = vmatmul.mubr.f32.gmra.mxu1 %v11646_v62  ;;  %v9983_v39 = vld [vmem:[%s16879_s8 + $0x140] sm:$0xff]  ;;  %v9984_v52 = vld [vmem:[%s16879_s8 + $0xb8] sm:$0xff] }
 0x3a4   :  { %v11689_v54 = vpop.eup %9496  ;;  %9514 = vpow2.f32 %v1905_v21  ;;  %v1907_v34 = vmul.f32 1.442695, %v1816_v30  ;;  %v1817_v49 = vadd.f32 %v1753_v59, %v211_v9  ;;  %v1690_v60 = vmul.f32 0.2, %v1450_v7  ;;  %v1455_v4 = vpop.f32.mrf.mxu1  ;;  %2270 = vmatmul.mubr.f32.gmra.mxu0 %v11656_v40  ;;  %8541 = vmatprep.subr.mxu0 %v9981_v20  ;;  %v9985_v43 = vld [vmem:[%s16879_s8 + $0x1b8] sm:$0xff]  ;;  %v215_v31 = vld [vmem:[%s16880_s1 + $0x100] sm:$0xff] }
 0x3a5   :  { %v1616_v61 = vpop.f32.mrf.mxu0  ;;  %v11698_v12 = vpop.eup %9498  ;;  %9516 = vpow2.f32 %v1903_v22  ;;  %v1755_v42 = vmax.f32 %v1609_v28, %v1691_v51  ;;  %v1692_v58 = vmul.f32 0.2, %v1611_v1  ;;  %v1454_v3 = vadd.f32 %v1453_v18, %v17285_v19  ;;  %8462 = vmatpush3.msra.mxu1 %v9982_v17  ;;  %8542 = vmatpush3.msra.mxu0 %v9983_v39  ;;  %v17287_v27 = vld [vmem:[#allocation18_spill] sm:$0xff]  ;;  %v17288_v21 = vld [vmem:[#allocation20_spill] sm:$0xff] }
 0x3a6   :  { %v11710_v53 = vpop.eup %9500  ;;  %9518 = vpow2.f32 %v1907_v34  ;;  %v1909_v0 = vmul.f32 1.442695, %v1817_v49  ;;  %v1754_v35 = vmax.f32 %v1450_v7, %v1690_v60  ;;  %v1615_v2 = vadd.f32 %v1614_v36, %v17286_v26  ;;  %v1459_v25 = vpop.f32.mrf.mxu1  ;;  %8463 = vmatprep.subr.mxu1 %v9984_v52  ;;  %8543 = vmatprep.subr.mxu0 %v9985_v43  ;;  %v217_v50 = vld [vmem:[%s16880_s1 + $0x110] sm:$0xff]  ;;  %v216_v34 = vld [vmem:[%s16880_s1 + $0x108] sm:$0xff]  ;;  %v9988_v20 = vld [vmem:[%s16879_s8 + $0x138] sm:$0xff] }
 0x3a7   :  { %v11716_v56 = vpop.f32.mrf.mxu0  ;;  %v11724_v48 = vpop.eup %9502  ;;  %v1819_v5 = vadd.f32 %v1755_v42, %v213_v10  ;;  %v1756_v41 = vmax.f32 %v1611_v1, %v1692_v58  ;;  %v1693_v16 = vmul.f32 0.2, %v1454_v3  ;;  %v1456_v9 = vadd.f32 %v1455_v4, %v17287_v27  ;;  %2129 = vmatprep.mubr.f32.mxu1 %v11710_v53  ;;  %8464 = vmatpush3.msra.mxu1 %v9986_v44  ;;  %v9987_v51 = vld [vmem:[%s16879_s8 + $0xb0] sm:$0xff]  ;;  %v218_v17 = vld [vmem:[%s16880_s1 + $0x118] sm:$0xff] }
 0x3a8   :  { %9520 = vpow2.f32 %v1909_v0  ;;  %v1818_v28 = vadd.f32 %v1754_v35, %v212_v45  ;;  %v1695_v29 = vmul.f32 0.2, %v1615_v2  ;;  %v1617_v30 = vadd.f32 %v1616_v61, %v17288_v21  ;;  %v1461_v59 = vpop.f32.mrf.mxu1  ;;  %2274 = vmatprep.mubr.f32.mxu0 %v11724_v48  ;;  %2130 = vmatmul.mubr.f32.gmra.mxu1 %v11689_v54  ;;  %v17289_v10 = vld [vmem:[#allocation17_spill] sm:$0xff]  ;;  %v9991_v0 = vld [vmem:[%s16879_s8 + $0xa8] sm:$0xff] }
 0x3a9   :  { %v11735_v24 = vpop.f32.mrf.mxu0  ;;  %v1913_v7 = vmul.f32 1.442695, %v1819_v5  ;;  %v1820_v18 = vadd.f32 %v1756_v41, %v214_v38  ;;  %v1757_v36 = vmax.f32 %v1454_v3, %v1693_v16  ;;  %v1694_v22 = vmul.f32 0.2, %v1456_v9  ;;  %2275 = vmatmul.mubr.f32.gmra.mxu0 %v11698_v12  ;;  %8465 = vmatprep.subr.mxu1 %v9987_v51  ;;  %v9989_v42 = vld [vmem:[%s16879_s8 + $0x30] sm:$0xff]  ;;  %v9993_v5 = vld [vmem:[%s16879_s8 + $0x28] sm:$0xff] }
 0x3aa   :  { %v1911_v63 = vmul.f32 1.442695, %v1818_v28  ;;  %v1759_v1 = vmax.f32 %v1615_v2, %v1695_v29  ;;  %v1696_v49 = vmul.f32 0.2, %v1617_v30  ;;  %v1460_v60 = vadd.f32 %v1459_v25, %v17289_v10  ;;  %v11750_v4 = vpop.f32.mrf.mxu1  ;;  %8544 = vmatpush3.msra.mxu0 %v9988_v20  ;;  %8466 = vmatpush3.msra.mxu1 %v9989_v42  ;;  %v9990_v39 = vld [vmem:[%s16879_s8 + $0x1b0] sm:$0xff]  ;;  %v9995_v29 = vld [vmem:[%s16879_s8 + $0xa0] sm:$0xff] }
 0x3ab   :  { %v11752_v61 = vpop.f32.mrf.mxu0  ;;  %v11760_v45 = vpop.eup %9504  ;;  %9522 = vpow2.f32 %v1913_v7  ;;  %v1915_v58 = vmul.f32 1.442695, %v1820_v18  ;;  %v1821_v19 = vadd.f32 %v1757_v36, %v215_v31  ;;  %v1758_v3 = vmax.f32 %v1456_v9, %v1694_v22  ;;  %8545 = vmatprep.subr.mxu0 %v9990_v39  ;;  %8467 = vmatprep.subr.mxu1 %v9991_v0  ;;  %v9992_v43 = vld [vmem:[%s16879_s8 + $0x130] sm:$0xff]  ;;  %v219_v9 = vld [vmem:[%s16880_s1 + $0x120] sm:$0xff]  ;;  %v9994_v31 = vld [vmem:[%s16879_s8 + $0x1a8] sm:$0xff] }
 0x3ac   :  { %v11771_v35 = vpop.eup %9506  ;;  %9524 = vpow2.f32 %v1911_v63  ;;  %v1823_v38 = vadd.f32 %v1759_v1, %v217_v50  ;;  %v1760_v26 = vmax.f32 %v1617_v30, %v1696_v49  ;;  %v1697_v2 = vmul.f32 0.2, %v1460_v60  ;;  %v11773_v25 = vpop.f32.mrf.mxu1  ;;  %8546 = vmatpush3.msra.mxu0 %v9992_v43  ;;  %8468 = vmatpush3.msra.mxu1 %v9993_v5  ;;  %v17290_v44 = vld [vmem:[#allocation16_spill] sm:$0xff]  ;;  %v17291_v36 = vld [vmem:[#allocation19_spill] sm:$0xff] }
 0x3ad   :  { %v11775_v52 = vpop.f32.mrf.mxu0  ;;  %v11783_v41 = vpop.eup %9508  ;;  %9526 = vpow2.f32 %v1915_v58  ;;  %v1917_v16 = vmul.f32 1.442695, %v1821_v19  ;;  %v1822_v27 = vadd.f32 %v1758_v3, %v216_v34  ;;  %v1621_v28 = vadd.f32 %v11716_v56, %v17290_v44  ;;  %8547 = vmatprep.subr.mxu0 %v9994_v31  ;;  %8469 = vmatprep.subr.mxu1 %v9995_v29  ;;  %v9996_v51 = vld [vmem:[%s16879_s8 + $0x128] sm:$0xff]  ;;  %v221_v20 = vld [vmem:[%s16880_s1 + $0x130] sm:$0xff]  ;;  %v9999_v43 = vld [vmem:[%s16879_s8 + $0x120] sm:$0xff] }
 0x3ae   :  { %v11796_v21 = vpop.eup %9510  ;;  %v1921_v30 = vmul.f32 1.442695, %v1823_v38  ;;  %v1824_v7 = vadd.f32 %v1760_v26, %v218_v17  ;;  %v1761_v18 = vmax.f32 %v1460_v60, %v1697_v2  ;;  %v1462_v50 = vadd.f32 %v1461_v59, %v17291_v36  ;;  %v11799_v22 = vpop.f32.mrf.mxu1  ;;  %2134 = vmatprep.mubr.f32.mxu1 %v11783_v41  ;;  %8548 = vmatpush3.msra.mxu0 %v9996_v51  ;;  %v17292_v34 = vld [vmem:[#allocation15_spill] sm:$0xff]  ;;  %v17293_v38 = vld [vmem:[#allocation14_spill] sm:$0xff]  ;;  %v17295_v36 = vld [vmem:[#allocation13_spill] sm:$0xff] }
 0x3af   :  { %v11801_v56 = vpop.f32.mrf.mxu0  ;;  %9528 = vpow2.f32 %v1917_v16  ;;  %v1919_v63 = vmul.f32 1.442695, %v1822_v27  ;;  %v1699_v1 = vmul.f32 0.2, %v1621_v28  ;;  %v1623_v49 = vadd.f32 %v11735_v24, %v17292_v34  ;;  %2279 = vmatprep.mubr.f32.mxu0 %v11796_v21  ;;  %2135 = vmatmul.mubr.f32.gmra.mxu1 %v11760_v45  ;;  %v9997_v24 = vld [vmem:[%s16879_s8 + $0x1a0] sm:$0xff]  ;;  %v220_v39 = vld [vmem:[%s16880_s1 + $0x128] sm:$0xff] }
 0x3b0   :  { %v11811_v59 = vpop.eup %9512  ;;  %9530 = vpow2.f32 %v1921_v30  ;;  %v1923_v10 = vmul.f32 1.442695, %v1824_v7  ;;  %v1825_v60 = vadd.f32 %v1761_v18, %v219_v9  ;;  %v1698_v42 = vmul.f32 0.2, %v1462_v50  ;;  %v11816_v58 = vpop.f32.mrf.mxu1  ;;  %2280 = vmatmul.mubr.f32.gmra.mxu0 %v11771_v35  ;;  %8549 = vmatprep.subr.mxu0 %v9997_v24  ;;  %v9998_v2 = vld [vmem:[%s16879_s8 + $0x20] sm:$0xff]  ;;  %v222_v9 = vld [vmem:[%s16880_s1 + $0x138] sm:$0xff] }
 0x3b1   :  { %v11818_v19 = vpop.f32.mrf.mxu0  ;;  %v11824_v3 = vpop.eup %9514  ;;  %9532 = vpow2.f32 %v1919_v63  ;;  %v1763_v17 = vmax.f32 %v1621_v28, %v1699_v1  ;;  %v1700_v0 = vmul.f32 0.2, %v1623_v49  ;;  %v1466_v26 = vadd.f32 %v11750_v4, %v17293_v38  ;;  %8470 = vmatpush3.msra.mxu1 %v9998_v2  ;;  %8550 = vmatpush3.msra.mxu0 %v9999_v43  ;;  %v17294_v4 = vld [vmem:[#allocation22_spill] sm:$0xff]  ;;  %v224_v2 = vld [vmem:[%s16880_s1 + $0x148] sm:$0xff] }
 0x3b2   :  { %v11837_v5 = vpop.eup %9516  ;;  %9534 = vpow2.f32 %v1923_v10  ;;  %v1925_v16 = vmul.f32 1.442695, %v1825_v60  ;;  %v1762_v27 = vmax.f32 %v1462_v50, %v1698_v42  ;;  %v1627_v44 = vadd.f32 %v11752_v61, %v17294_v4  ;;  %v10000_v28 = vld [vmem:[%s16879_s8 + $0x98] sm:$0xff]  ;;  %v11854_v51 = vpop.f32.mrf.mxu1  ;;  %v223_v1 = vld [vmem:[%s16880_s1 + $0x140] sm:$0xff] }
 0x3b3   :  { %8471 = vmatprep.subr.mxu1 %v10000_v28  ;;  %v10001_v31 = vld [vmem:[%s16879_s8 + $0x198] sm:$0xff]  ;;  %v11850_v29 = vpop.eup %9518  ;;  %v1827_v30 = vadd.f32 %v1763_v17, %v221_v20  ;;  %v1764_v7 = vmax.f32 %v1623_v49, %v1700_v0  ;;  %v1701_v18 = vmul.f32 0.2, %v1466_v26  ;;  %v1468_v50 = vadd.f32 %v11773_v25, %v17295_v36  ;;  %2139 = vmatprep.mubr.f32.mxu1 %v11837_v5  ;;  %v17296_v49 = vld [vmem:[#allocation12_spill] sm:$0xff]  ;;  %v11865_v25 = vpop.f32.mrf.mxu0 }
 0x3b4   :  { %8551 = vmatprep.subr.mxu0 %v10001_v31  ;;  %v10002_v61 = vld [vmem:[%s16879_s8 + $0x18] sm:$0xff]  ;;  %9536 = vpow2.f32 %v1925_v16  ;;  %v1826_v63 = vadd.f32 %v1762_v27, %v220_v39  ;;  %v1703_v34 = vmul.f32 0.2, %v1627_v44  ;;  %v1629_v10 = vadd.f32 %v11775_v52, %v17296_v49  ;;  %2284 = vmatprep.mubr.f32.mxu0 %v11850_v29  ;;  %v225_v17 = vld [vmem:[%s16880_s1 + $0x150] sm:$0xff] }
 0x3b5   :  { %8472 = vmatpush3.msra.mxu1 %v10002_v61  ;;  %v11869_v60 = vpop.eup %9520  ;;  %v1929_v20 = vmul.f32 1.442695, %v1827_v30  ;;  %v1828_v42 = vadd.f32 %v1764_v7, %v222_v9  ;;  %v1765_v24 = vmax.f32 %v1466_v26, %v1701_v18  ;;  %v1702_v39 = vmul.f32 0.2, %v1468_v50  ;;  %2285 = vmatmul.mubr.f32.gmra.mxu0 %v11824_v3  ;;  %v10003_v52 = vld [vmem:[%s16879_s8 + $0x90] sm:$0xff]  ;;  %v10004_v27 = vld [vmem:[%s16879_s8 + $0x118] sm:$0xff]  ;;  %v11892_v30 = vpop.f32.mrf.mxu1 }
 0x3b6   :  { %2140 = vmatmul.mubr.f32.gmra.mxu1 %v11811_v59  ;;  %8473 = vmatprep.subr.mxu1 %v10003_v52  ;;  %v1927_v0 = vmul.f32 1.442695, %v1826_v63  ;;  %v1767_v38 = vmax.f32 %v1627_v44, %v1703_v34  ;;  %v1704_v43 = vmul.f32 0.2, %v1629_v10  ;;  %v17297_v26 = vld [vmem:[#allocation21_spill] sm:$0xff]  ;;  %v10007_v7 = vld [vmem:[%s16879_s8 + $0x88] sm:$0xff]  ;;  %v11902_v63 = vpop.f32.mrf.mxu0 }
 0x3b7   :  { %v1472_v16 = vadd.f32 %v11799_v22, %v17297_v26  ;;  %8552 = vmatpush3.msra.mxu0 %v10004_v27  ;;  %v10005_v9 = vld [vmem:[%s16879_s8 + $0x10] sm:$0xff]  ;;  %9538 = vpow2.f32 %v1929_v20  ;;  %v1931_v4 = vmul.f32 1.442695, %v1828_v42  ;;  %v1829_v44 = vadd.f32 %v1765_v24, %v223_v1  ;;  %v226_v31 = vld [vmem:[%s16880_s1 + $0x158] sm:$0xff]  ;;  %v10009_v34 = vld [vmem:[%s16879_s8 + $0x8] sm:$0xff] }
 0x3b8   :  { %8474 = vmatpush3.msra.mxu1 %v10005_v9  ;;  %v1766_v28 = vmax.f32 %v1468_v50, %v1702_v39  ;;  %v10006_v22 = vld [vmem:[%s16879_s8 + $0x190] sm:$0xff]  ;;  %v11900_v18 = vpop.eup %9522  ;;  %9540 = vpow2.f32 %v1927_v0  ;;  %v1831_v36 = vadd.f32 %v1767_v38, %v225_v17  ;;  %v1768_v50 = vmax.f32 %v1629_v10, %v1704_v43  ;;  %v227_v10 = vld [vmem:[%s16880_s1 + $0x160] sm:$0xff]  ;;  %v10010_v39 = vld [vmem:[%s16879_s8 + $0x188] sm:$0xff] }
 0x3b9   :  { %8553 = vmatprep.subr.mxu0 %v10006_v22  ;;  %8475 = vmatprep.subr.mxu1 %v10007_v7  ;;  %v1705_v61 = vmul.f32 0.2, %v1472_v16  ;;  %v10008_v1 = vld [vmem:[%s16879_s8 + $0x110] sm:$0xff]  ;;  %v11910_v49 = vpop.eup %9524  ;;  %9542 = vpow2.f32 %v1931_v4  ;;  %v1933_v20 = vmul.f32 1.442695, %v1829_v44  ;;  %v17298_v24 = vld [vmem:[#allocation11_spill] sm:$0xff]  ;;  %v1483_v22 = vpop.f32.mrf.mxu1 }
 0x3ba   :  { %8554 = vmatpush3.msra.mxu0 %v10008_v1  ;;  %8476 = vmatpush3.msra.mxu1 %v10009_v34  ;;  %v1830_v42 = vadd.f32 %v1766_v28, %v224_v2  ;;  %v1633_v17 = vadd.f32 %v11801_v56, %v17298_v24  ;;  %v10011_v52 = vld [vmem:[%s16879_s8 + $0x80] sm:$0xff]  ;;  %v11923_v0 = vpop.eup %9526  ;;  %v1937_v38 = vmul.f32 1.442695, %v1831_v36  ;;  %v1832_v2 = vadd.f32 %v1768_v50, %v226_v31  ;;  %v10012_v56 = vld [vmem:[%s16879_s8 + $0x108] sm:$0xff]  ;;  %v229_v7 = vld [vmem:[%s16880_s1 + $0x170] sm:$0xff]  ;;  %v11940_v50 = vpop.f32.mrf.mxu0 }
 0x3bb   :  { %8555 = vmatprep.subr.mxu0 %v10010_v39  ;;  %8477 = vmatprep.subr.mxu1 %v10011_v52  ;;  %v1769_v43 = vmax.f32 %v1472_v16, %v1705_v61  ;;  %v17299_v26 = vld [vmem:[#allocation10_spill] sm:$0xff]  ;;  %9544 = vpow2.f32 %v1933_v20  ;;  %v17300_v44 = vld [vmem:[#allocation24_spill] sm:$0xff] }
 0x3bc   :  { %v1474_v27 = vadd.f32 %v11816_v58, %v17299_v26  ;;  %2144 = vmatprep.mubr.f32.mxu1 %v11910_v49  ;;  %8556 = vmatpush3.msra.mxu0 %v10012_v56  ;;  %v1935_v9 = vmul.f32 1.442695, %v1830_v42  ;;  %v1707_v4 = vmul.f32 0.2, %v1633_v17  ;;  %v1635_v28 = vadd.f32 %v11818_v19, %v17300_v44  ;;  %v11935_v16 = vpop.eup %9528  ;;  %v10013_v19 = vld [vmem:[%s16879_s8 + $0x180] sm:$0xff]  ;;  %v228_v34 = vld [vmem:[%s16880_s1 + $0x168] sm:$0xff] }
 0x3bd   :  { %2289 = vmatprep.mubr.f32.mxu0 %v11923_v0  ;;  %2145 = vmatmul.mubr.f32.gmra.mxu1 %v11869_v60  ;;  %17301 = vst [vmem:[#allocation34_spill] sm:$0xff] %v11935_v16  ;;  %9546 = vpow2.f32 %v1937_v38  ;;  %v1939_v58 = vmul.f32 1.442695, %v1832_v2  ;;  %v1833_v31 = vadd.f32 %v1769_v43, %v227_v10  ;;  %v11946_v61 = vpop.eup %9530  ;;  %v17303_v42 = vld [vmem:[#allocation9_spill] sm:$0xff]  ;;  %v10014_v24 = vld [vmem:[%s16879_s8] sm:$0xff] }
 0x3be   :  { %v1706_v36 = vmul.f32 0.2, %v1474_v27  ;;  %2290 = vmatmul.mubr.f32.gmra.mxu0 %v11900_v18  ;;  %8557 = vmatprep.subr.mxu0 %v10013_v19  ;;  %17302 = vst [vmem:[#allocation33_spill] sm:$0xff] %v11946_v61  ;;  %9548 = vpow2.f32 %v1935_v9  ;;  %v1771_v1 = vmax.f32 %v1633_v17, %v1707_v4  ;;  %v1708_v20 = vmul.f32 0.2, %v1635_v28  ;;  %v10015_v39 = vld [vmem:[%s16879_s8 + $0x100] sm:$0xff]  ;;  %v11959_v52 = vpop.eup %9532 }
 0x3bf   :  { %v1478_v10 = vadd.f32 %v11854_v51, %v17303_v42  ;;  %8478 = vmatpush3.msra.mxu1 %v10014_v24  ;;  %8558 = vmatpush3.msra.mxu0 %v10015_v39  ;;  %9550 = vpow2.f32 %v1939_v58  ;;  %v1941_v17 = vmul.f32 1.442695, %v1833_v31  ;;  %v230_v2 = vld [vmem:[%s16880_s1 + $0x178] sm:$0xff]  ;;  %v17304_v51 = vld [vmem:[#allocation8_spill] sm:$0xff]  ;;  %v11966_v26 = vpop.eup %9534  ;;  %v17305_v44 = vld [vmem:[#allocation23_spill] sm:$0xff]  ;;  %v1485_v42 = vpop.f32.mrf.mxu1 }
 0x3c0   :  { %v1770_v38 = vmax.f32 %v1474_v27, %v1706_v36  ;;  %v1639_v43 = vadd.f32 %v11865_v25, %v17304_v51  ;;  %v1835_v56 = vadd.f32 %v1771_v1, %v229_v7  ;;  %v1772_v9 = vmax.f32 %v1635_v28, %v1708_v20  ;;  %2149 = vmatprep.mubr.f32.mxu1 %v11959_v52  ;;  %v231_v58 = vld [vmem:[%s16880_s1 + $0x180] sm:$0xff]  ;;  %v1646_v24 = vpop.f32.mrf.mxu0 }
 0x3c1   :  { %v1709_v4 = vmul.f32 0.2, %v1478_v10  ;;  %v1480_v19 = vadd.f32 %v11892_v30, %v17305_v44  ;;  %9552 = vpow2.f32 %v1941_v17  ;;  %v17306_v36 = vld [vmem:[#allocation7_spill] sm:$0xff]  ;;  %2294 = vmatprep.mubr.f32.mxu0 %v11966_v26  ;;  %2150 = vmatmul.mubr.f32.gmra.mxu1 %v11935_v16  ;;  %v11978_v28 = vpop.eup %9536  ;;  %v17308_v51 = vld [vmem:[#allocation6_spill] sm:$0xff] }
 0x3c2   :  { %v1834_v27 = vadd.f32 %v1770_v38, %v228_v34  ;;  %v1711_v31 = vmul.f32 0.2, %v1639_v43  ;;  %v1641_v25 = vadd.f32 %v11902_v63, %v17306_v36  ;;  %17307 = vst [vmem:[#allocation49_spill] sm:$0xff] %v11978_v28  ;;  %v1945_v30 = vmul.f32 1.442695, %v1835_v56  ;;  %v233_v34 = vld [vmem:[%s16880_s1 + $0x190] sm:$0xff]  ;;  %2295 = vmatmul.mubr.f32.gmra.mxu0 %v11946_v61  ;;  %v1650_v61 = vpop.f32.mrf.mxu0 }
 0x3c3   :  { %v1836_v7 = vadd.f32 %v1772_v9, %v230_v2  ;;  %v1773_v1 = vmax.f32 %v1478_v10, %v1709_v4  ;;  %v1710_v20 = vmul.f32 0.2, %v1480_v19  ;;  %v232_v63 = vld [vmem:[%s16880_s1 + $0x188] sm:$0xff]  ;;  %v1484_v44 = vadd.f32 %v1483_v22, %v17308_v51  ;;  %v234_v9 = vld [vmem:[%s16880_s1 + $0x198] sm:$0xff]  ;;  %v1489_v4 = vpop.f32.mrf.mxu1 }
 0x3c4   :  { %v1943_v39 = vmul.f32 1.442695, %v1834_v27  ;;  %v1775_v17 = vmax.f32 %v1639_v43, %v1711_v31  ;;  %v1712_v38 = vmul.f32 0.2, %v1641_v25  ;;  %9554 = vpow2.f32 %v1945_v30  ;;  %v11991_v36 = vpop.eup %9538 }
 0x3c5   :  { %v1947_v56 = vmul.f32 1.442695, %v1836_v7  ;;  %v1837_v2 = vadd.f32 %v1773_v1, %v231_v58  ;;  %v1774_v10 = vmax.f32 %v1480_v19, %v1710_v20  ;;  %17309 = vst [vmem:[#allocation47_spill] sm:$0xff] %v11991_v36  ;;  %v1713_v31 = vmul.f32 0.2, %v1484_v44  ;;  %v11993_v16 = vpop.eup %9540  ;;  %v235_v19 = vld [vmem:[%s16880_s1 + $0x1a0] sm:$0xff] }
 0x3c6   :  { %9556 = vpow2.f32 %v1943_v39  ;;  %v1839_v43 = vadd.f32 %v1775_v17, %v233_v34  ;;  %v1776_v27 = vmax.f32 %v1641_v25, %v1712_v38  ;;  %17310 = vst [vmem:[#allocation41_spill] sm:$0xff] %v11993_v16  ;;  %v17311_v58 = vld [vmem:[#allocation26_spill] sm:$0xff]  ;;  %v12000_v1 = vpop.eup %9542  ;;  %v17313_v25 = vld [vmem:[#allocation4_spill] sm:$0xff]  ;;  %2154 = vmatprep.mubr.f32.mxu1 %v11993_v16 }
 0x3c7   :  { %9558 = vpow2.f32 %v1947_v56  ;;  %v1949_v22 = vmul.f32 1.442695, %v1837_v2  ;;  %v1838_v30 = vadd.f32 %v1774_v10, %v232_v63  ;;  %v1645_v7 = vadd.f32 %v11940_v50, %v17311_v58  ;;  %17312 = vst [vmem:[#allocation50_spill] sm:$0xff] %v12000_v1  ;;  %v17314_v63 = vld [vmem:[#allocation5_spill] sm:$0xff]  ;;  %v1491_v2 = vpop.f32.mrf.mxu1  ;;  %2299 = vmatprep.mubr.f32.mxu0 %v12000_v1  ;;  %2155 = vmatmul.mubr.f32.gmra.mxu1 %v11978_v28  ;;  %v17320_v28 = vld [vmem:[#allocation28_spill] sm:$0xff] }
 0x3c8   :  { %v1953_v20 = vmul.f32 1.442695, %v1839_v43  ;;  %v1840_v39 = vadd.f32 %v1776_v27, %v234_v9  ;;  %v1777_v34 = vmax.f32 %v1484_v44, %v1713_v31  ;;  %v1486_v17 = vadd.f32 %v1485_v42, %v17313_v25  ;;  %v12007_v50 = vpop.eup %9544  ;;  %v237_v42 = vld [vmem:[%s16880_s1 + $0x1b0] sm:$0xff]  ;;  %v1652_v43 = vpop.f32.mrf.mxu0  ;;  %2300 = vmatmul.mubr.f32.gmra.mxu0 %v11991_v36  ;;  %v236_v31 = vld [vmem:[%s16880_s1 + $0x1a8] sm:$0xff] }
 0x3c9   :  { %9560 = vpow2.f32 %v1949_v22  ;;  %v1951_v38 = vmul.f32 1.442695, %v1838_v30  ;;  %v1715_v51 = vmul.f32 0.2, %v1645_v7  ;;  %v1647_v56 = vadd.f32 %v1646_v24, %v17314_v63  ;;  %17315 = vst [vmem:[#allocation42_spill] sm:$0xff] %v12007_v50  ;;  %v17317_v30 = vld [vmem:[#allocation25_spill] sm:$0xff]  ;;  %v1495_v16 = vpop.f32.mrf.mxu1 }
 0x3ca   :  { %9562 = vpow2.f32 %v1953_v20  ;;  %v1955_v10 = vmul.f32 1.442695, %v1840_v39  ;;  %v1841_v9 = vadd.f32 %v1777_v34, %v235_v19  ;;  %v1714_v44 = vmul.f32 0.2, %v1486_v17  ;;  %v12013_v27 = vpop.eup %9546  ;;  %v238_v34 = vld [vmem:[%s16880_s1 + $0x1b8] sm:$0xff]  ;;  %v17318_v25 = vld [vmem:[#allocation3_spill] sm:$0xff] }
 0x3cb   :  { %17316 = vst [vmem:[#allocation48_spill] sm:$0xff] %v12013_v27  ;;  %9564 = vpow2.f32 %v1951_v38  ;;  %v1779_v24 = vmax.f32 %v1645_v7, %v1715_v51  ;;  %v1716_v22 = vmul.f32 0.2, %v1647_v56  ;;  %v1490_v58 = vadd.f32 %v1489_v4, %v17317_v30  ;;  %v12019_v19 = vpop.eup %9548  ;;  %v1656_v30 = vpop.f32.mrf.mxu0 }
 0x3cc   :  { %9566 = vpow2.f32 %v1955_v10  ;;  %v1957_v20 = vmul.f32 1.442695, %v1841_v9  ;;  %v1778_v39 = vmax.f32 %v1486_v17, %v1714_v44  ;;  %v1651_v63 = vadd.f32 %v1650_v61, %v17318_v25  ;;  %v12025_v38 = vpop.eup %9550  ;;  %2159 = vmatprep.mubr.f32.mxu1 %v12019_v19  ;;  %v239_v17 = vld [vmem:[%s16880_s1 + $0x1c0] sm:$0xff] }
 0x3cd   :  { %17319 = vst [vmem:[#allocation39_spill] sm:$0xff] %v12025_v38  ;;  %v1843_v7 = vadd.f32 %v1779_v24, %v237_v42  ;;  %v1780_v51 = vmax.f32 %v1647_v56, %v1716_v22  ;;  %v1717_v36 = vmul.f32 0.2, %v1490_v58  ;;  %v1492_v1 = vadd.f32 %v1491_v2, %v17320_v28  ;;  %v17321_v9 = vld [vmem:[#allocation27_spill] sm:$0xff]  ;;  %2304 = vmatprep.mubr.f32.mxu0 %v12025_v38  ;;  %v241_v42 = vld [vmem:[%s16880_s1 + $0x1d0] sm:$0xff]  ;;  %v17322_v25 = vld [vmem:[#allocation30_spill] sm:$0xff] }
 0x3ce   :  { %v1842_v4 = vadd.f32 %v1778_v39, %v236_v31  ;;  %v1719_v10 = vmul.f32 0.2, %v1651_v63  ;;  %v1653_v44 = vadd.f32 %v1652_v43, %v17321_v9  ;;  %2160 = vmatmul.mubr.f32.gmra.mxu1 %v12007_v50  ;;  %v12035_v61 = vpop.eup %9552  ;;  %2305 = vmatmul.mubr.f32.gmra.mxu0 %v12013_v27  ;;  %v240_v43 = vld [vmem:[%s16880_s1 + $0x1c8] sm:$0xff]  ;;  %v1496_v9 = vadd.f32 %v1495_v16, %v17322_v25  ;;  %v1658_v27 = vpop.f32.mrf.mxu0 }
 0x3cf   :  { %v1961_v56 = vmul.f32 1.442695, %v1843_v7  ;;  %v1844_v28 = vadd.f32 %v1780_v51, %v238_v34  ;;  %v1781_v2 = vmax.f32 %v1490_v58, %v1717_v36  ;;  %v1718_v24 = vmul.f32 0.2, %v1492_v1  ;;  %v242_v58 = vld [vmem:[%s16880_s1 + $0x1d8] sm:$0xff]  ;;  %v1497_v51 = vpop.f32.mrf.mxu1 }
 0x3d0   :  { %v1959_v31 = vmul.f32 1.442695, %v1842_v4  ;;  %v1783_v22 = vmax.f32 %v1651_v63, %v1719_v10  ;;  %v1720_v39 = vmul.f32 0.2, %v1653_v44  ;;  %9568 = vpow2.f32 %v1957_v20 }
 0x3d1   :  { %v1963_v7 = vmul.f32 1.442695, %v1844_v28  ;;  %v1845_v34 = vadd.f32 %v1781_v2, %v239_v17  ;;  %v1782_v36 = vmax.f32 %v1492_v1, %v1718_v24  ;;  %v12048_v50 = vpop.eup %9554  ;;  %v1721_v10 = vmul.f32 0.2, %v1496_v9  ;;  %v243_v1 = vld [vmem:[%s16880_s1 + $0x1e0] sm:$0xff]  ;;  %v17323_v17 = vld [vmem:[#allocation29_spill] sm:$0xff] }
 0x3d2   :  { %9570 = vpow2.f32 %v1959_v31  ;;  %v1847_v63 = vadd.f32 %v1783_v22, %v241_v42  ;;  %v1784_v4 = vmax.f32 %v1653_v44, %v1720_v39  ;;  %v1657_v28 = vadd.f32 %v1656_v30, %v17323_v17  ;;  %v17324_v42 = vld [vmem:[#allocation32_spill] sm:$0xff] }
 0x3d3   :  { %v12050_v38 = vpop.eup %9556  ;;  %9572 = vpow2.f32 %v1963_v7  ;;  %v1965_v16 = vmul.f32 1.442695, %v1845_v34  ;;  %v1846_v20 = vadd.f32 %v1782_v36, %v240_v43  ;;  %v1785_v31 = vmax.f32 %v1496_v9, %v1721_v10  ;;  %v17325_v7 = vld [vmem:[#allocation31_spill] sm:$0xff]  ;;  %v245_v9 = vld [vmem:[%s16880_s1 + $0x1f0] sm:$0xff] }
 0x3d4   :  { %v12056_v2 = vpop.eup %9558  ;;  %9574 = vpow2.f32 %v1961_v56  ;;  %v1848_v24 = vadd.f32 %v1784_v4, %v242_v58  ;;  %v1498_v44 = vadd.f32 %v1497_v51, %v17324_v42  ;;  %2164 = vmatprep.mubr.f32.mxu1 %v12050_v38  ;;  %v1969_v22 = vmul.f32 1.442695, %v1847_v63  ;;  %v244_v51 = vld [vmem:[%s16880_s1 + $0x1e8] sm:$0xff] }
 0x3d5   :  { %v1967_v39 = vmul.f32 1.442695, %v1846_v20  ;;  %v1723_v25 = vmul.f32 0.2, %v1657_v28  ;;  %v1659_v43 = vadd.f32 %v1658_v27, %v17325_v7  ;;  %2309 = vmatprep.mubr.f32.mxu0 %v12056_v2  ;;  %2165 = vmatmul.mubr.f32.gmra.mxu1 %v12035_v61  ;;  %9576 = vpow2.f32 %v1965_v16  ;;  %v246_v16 = vld [vmem:[%s16880_s1 + $0x1f8] sm:$0xff] }
 0x3d6   :  { %v12063_v34 = vpop.eup %9560  ;;  %v1971_v30 = vmul.f32 1.442695, %v1848_v24  ;;  %v1849_v56 = vadd.f32 %v1785_v31, %v243_v1  ;;  %v1722_v36 = vmul.f32 0.2, %v1498_v44  ;;  %2310 = vmatmul.mubr.f32.gmra.mxu0 %v12048_v50 }
 0x3d7   :  { %v12069_v58 = vpop.eup %9562  ;;  %9578 = vpow2.f32 %v1967_v39  ;;  %v1787_v27 = vmax.f32 %v1657_v28, %v1723_v25  ;;  %v1724_v63 = vmul.f32 0.2, %v1659_v43 }
 0x3d8   :  { %v12074_v4 = vpop.eup %9564  ;;  %9580 = vpow2.f32 %v1971_v30  ;;  %v1786_v10 = vmax.f32 %v1498_v44, %v1722_v36  ;;  %v1973_v1 = vmul.f32 1.442695, %v1849_v56 }
 0x3d9   :  { %v12079_v20 = vpop.eup %9566  ;;  %9582 = vpow2.f32 %v1969_v22  ;;  %v1851_v17 = vadd.f32 %v1787_v27, %v245_v9  ;;  %v1788_v24 = vmax.f32 %v1659_v43, %v1724_v63  ;;  %2169 = vmatprep.mubr.f32.mxu1 %v12074_v4 }
 0x3da   :  { %v1850_v28 = vadd.f32 %v1786_v10, %v244_v51  ;;  %2314 = vmatprep.mubr.f32.mxu0 %v12079_v20  ;;  %2170 = vmatmul.mubr.f32.gmra.mxu1 %v12063_v34  ;;  %9584 = vpow2.f32 %v1973_v1 }
 0x3db   :  { %v1852_v31 = vadd.f32 %v1788_v24, %v246_v16  ;;  %2315 = vmatmul.mubr.f32.gmra.mxu0 %v12069_v58  ;;  %v1977_v42 = vmul.f32 1.442695, %v1851_v17 }
 0x3dc   :  { %v1975_v44 = vmul.f32 1.442695, %v1850_v28 }
 0x3dd   :  { %v1979_v39 = vmul.f32 1.442695, %v1852_v31  ;;  %v12085_v25 = vpop.eup %9568 }
 0x3de   :  { %9586 = vpow2.f32 %v1975_v44 }
 0x3df   :  { %v12087_v22 = vpop.eup %9570  ;;  %9588 = vpow2.f32 %v1979_v39 }
 0x3e0   :  { %v12089_v7 = vpop.eup %9572  ;;  %9590 = vpow2.f32 %v1977_v42  ;;  %2174 = vmatprep.mubr.f32.mxu1 %v12087_v22 }
 0x3e1   :  { %v12092_v43 = vpop.eup %9574  ;;  %2319 = vmatprep.mubr.f32.mxu0 %v12089_v7  ;;  %2175 = vmatmul.mubr.f32.gmra.mxu1 %v12085_v25 }
 0x3e2   :  { %2320 = vmatmul.mubr.f32.gmra.mxu0 %v12092_v43  ;;  %v12097_v30 = vpop.eup %9576 }
 0x3e4   :  { %v12099_v56 = vpop.eup %9578 }
 0x3e5   :  { %v12101_v9 = vpop.eup %9580  ;;  %2179 = vmatprep.mubr.f32.mxu1 %v12099_v56 }
 0x3e6   :  { %v12104_v36 = vpop.eup %9582  ;;  %2324 = vmatprep.mubr.f32.mxu0 %v12101_v9  ;;  %2180 = vmatmul.mubr.f32.gmra.mxu1 %v12097_v30 }
 0x3e7   :  { %2325 = vmatmul.mubr.f32.gmra.mxu0 %v12104_v36  ;;  %v12109_v27 = vpop.eup %9584 }
 0x3eb   :  { %v12111_v51 = vpop.eup %9586 }
 0x3ec   :  { %v12113_v63 = vpop.eup %9588  ;;  %2184 = vmatprep.mubr.f32.mxu1 %v12111_v51 }
 0x3ed   :  { %v12116_v10 = vpop.eup %9590  ;;  %2329 = vmatprep.mubr.f32.mxu0 %v12113_v63  ;;  %2185 = vmatmul.mubr.f32.gmra.mxu1 %v12109_v27 }
 0x3ee   :  { %2330 = vmatmul.mubr.f32.gmra.mxu0 %v12116_v10  ;;  %2399 = vmatprep.mubr.f32.mxu1 %v11549_v57  ;;  %v17328_v57 = vld [vmem:[#allocation41_spill] sm:$0xff] }
 0x3ef   :  { %2544 = vmatprep.mubr.f32.mxu0 %v11558_v46  ;;  %v17329_v46 = vld [vmem:[#allocation50_spill] sm:$0xff] }
 0x3f1   :  { %2400 = vmatmul.mubr.f32.vlgmr.msra.gmra.mxu1 %v11541_v11  ;;  %v17326_v11 = vld [vmem:[#allocation34_spill] sm:$0xff] }
 0x3f2   :  { %2545 = vmatmul.mubr.f32.vlgmr.msra.gmra.mxu0 %v11546_v8  ;;  %2404 = vmatprep.mubr.f32.mxu1 %v11589_v32  ;;  %v17327_v8 = vld [vmem:[#allocation33_spill] sm:$0xff]  ;;  %v17332_v32 = vld [vmem:[#allocation39_spill] sm:$0xff] }
 0x3f3   :  { %2549 = vmatprep.mubr.f32.mxu0 %v11595_v14  ;;  %v17333_v14 = vld [vmem:[#allocation42_spill] sm:$0xff] }
 0x3f5   :  { %2405 = vmatmul.mubr.f32.gmra.mxu1 %v11578_v13  ;;  %v17330_v13 = vld [vmem:[#allocation49_spill] sm:$0xff] }
 0x3f6   :  { %2550 = vmatmul.mubr.f32.gmra.mxu0 %v11582_v23  ;;  %2409 = vmatprep.mubr.f32.mxu1 %v11622_v33  ;;  %v17331_v23 = vld [vmem:[#allocation47_spill] sm:$0xff]  ;;  %v2762_v33 = vld [vmem:[%s16881_s10 + $0x18] sm:$0xff] }
 0x3f7   :  { %2554 = vmatprep.mubr.f32.mxu0 %v11630_v6  ;;  %9347 = vmatprep.subr.mxu1 %v2762_v33 }
 0x3f8   :  { %9348 = vmatpush3.msra.mxu1 %v2762_v33 }
 0x3f9   :  { %2410 = vmatmul.mubr.f32.gmra.mxu1 %v11601_v37  ;;  %v17334_v37 = vld [vmem:[#allocation48_spill] sm:$0xff] }
 0x3fa   :  { %2555 = vmatmul.mubr.f32.gmra.mxu0 %v11612_v47  ;;  %2414 = vmatprep.mubr.f32.mxu1 %v11669_v55  ;;  %v17335_v47 = vmov 0.0  }
 0x3fb   :  { %2559 = vmatprep.mubr.f32.mxu0 %v11679_v15 }
 0x3fd   :  { %2415 = vmatmul.mubr.f32.gmra.mxu1 %v11646_v62 }
 0x3fe   :  { %2560 = vmatmul.mubr.f32.gmra.mxu0 %v11656_v40  ;;  %2419 = vmatprep.mubr.f32.mxu1 %v11710_v53 }
 0x3ff   :  { %2564 = vmatprep.mubr.f32.mxu0 %v11724_v48 }
 0x401   :  { %2420 = vmatmul.mubr.f32.gmra.mxu1 %v11689_v54 }
 0x402   :  { %2565 = vmatmul.mubr.f32.gmra.mxu0 %v11698_v12  ;;  %2424 = vmatprep.mubr.f32.mxu1 %v11783_v41  ;;  %v2761_v12 = vld [vmem:[%s16881_s10 + $0x10] sm:$0xff] }
 0x403   :  { %2569 = vmatprep.mubr.f32.mxu0 %v11796_v21  ;;  %9349 = vmatprep.subr.mxu1 %v2761_v12 }
 0x404   :  { %9350 = vmatpush3.msra.mxu1 %v2761_v12 }
 0x405   :  { %2425 = vmatmul.mubr.f32.gmra.mxu1 %v11760_v45 }
 0x406   :  { %2570 = vmatmul.mubr.f32.gmra.mxu0 %v11771_v35  ;;  %2429 = vmatprep.mubr.f32.mxu1 %v11837_v5 }
 0x407   :  { %2574 = vmatprep.mubr.f32.mxu0 %v11850_v29 }
 0x409   :  { %2430 = vmatmul.mubr.f32.gmra.mxu1 %v11811_v59 }
 0x40a   :  { %2575 = vmatmul.mubr.f32.gmra.mxu0 %v11824_v3  ;;  %2434 = vmatprep.mubr.f32.mxu1 %v11910_v49  ;;  %v2760_v3 = vld [vmem:[%s16881_s10 + $0x8] sm:$0xff]  ;;  %v2759_v49 = vld [vmem:[%s16881_s10] sm:$0xff] }
 0x40b   :  { %2579 = vmatprep.mubr.f32.mxu0 %v11923_v0  ;;  %9351 = vmatprep.subr.mxu1 %v2760_v3 }
 0x40c   :  { %9352 = vmatpush3.msra.mxu1 %v2760_v3 }
 0x40d   :  { %2435 = vmatmul.mubr.f32.gmra.mxu1 %v11869_v60  ;;  %9353 = vmatprep.subr.mxu1 %v2759_v49 }
 0x40e   :  { %2580 = vmatmul.mubr.f32.gmra.mxu0 %v11900_v18  ;;  %2439 = vmatprep.mubr.f32.mxu1 %v11959_v52 }
 0x40f   :  { %2584 = vmatprep.mubr.f32.mxu0 %v11966_v26  ;;  %9354 = vmatpush3.msra.mxu1 %v2759_v49 }
 0x411   :  { %2440 = vmatmul.mubr.f32.gmra.mxu1 %v17326_v11 }
 0x412   :  { %2585 = vmatmul.mubr.f32.gmra.mxu0 %v17327_v8  ;;  %2444 = vmatprep.mubr.f32.mxu1 %v17328_v57 }
 0x413   :  { %2589 = vmatprep.mubr.f32.mxu0 %v17329_v46 }
 0x415   :  { %2445 = vmatmul.mubr.f32.gmra.mxu1 %v17330_v13 }
 0x416   :  { %2590 = vmatmul.mubr.f32.gmra.mxu0 %v17331_v23  ;;  %2449 = vmatprep.mubr.f32.mxu1 %v12019_v19 }
 0x417   :  { %2594 = vmatprep.mubr.f32.mxu0 %v17332_v32 }
 0x419   :  { %2450 = vmatmul.mubr.f32.gmra.mxu1 %v17333_v14 }
 0x41a   :  { %2595 = vmatmul.mubr.f32.gmra.mxu0 %v17334_v37  ;;  %2454 = vmatprep.mubr.f32.mxu1 %v12050_v38 }
 0x41b   :  { %2599 = vmatprep.mubr.f32.mxu0 %v12056_v2 }
 0x41d   :  { %2455 = vmatmul.mubr.f32.gmra.mxu1 %v12035_v61 }
 0x41e   :  { %2600 = vmatmul.mubr.f32.gmra.mxu0 %v12048_v50  ;;  %2459 = vmatprep.mubr.f32.mxu1 %v12074_v4 }
 0x41f   :  { %2604 = vmatprep.mubr.f32.mxu0 %v12079_v20 }
 0x421   :  { %2460 = vmatmul.mubr.f32.gmra.mxu1 %v12063_v34 }
 0x422   :  { %2605 = vmatmul.mubr.f32.gmra.mxu0 %v12069_v58  ;;  %2464 = vmatprep.mubr.f32.mxu1 %v12087_v22 }
 0x423   :  { %2609 = vmatprep.mubr.f32.mxu0 %v12089_v7 }
 0x425   :  { %2465 = vmatmul.mubr.f32.gmra.mxu1 %v12085_v25 }
 0x426   :  { %2610 = vmatmul.mubr.f32.gmra.mxu0 %v12092_v43  ;;  %2469 = vmatprep.mubr.f32.mxu1 %v12099_v56 }
 0x427   :  { %2614 = vmatprep.mubr.f32.mxu0 %v12101_v9 }
 0x429   :  { %2470 = vmatmul.mubr.f32.gmra.mxu1 %v12097_v30 }
 0x42a   :  { %2615 = vmatmul.mubr.f32.gmra.mxu0 %v12104_v36  ;;  %2474 = vmatprep.mubr.f32.mxu1 %v12111_v51 }
 0x42b   :  { %2619 = vmatprep.mubr.f32.mxu0 %v12113_v63 }
 0x42d   :  { %2475 = vmatmul.mubr.f32.gmra.mxu1 %v12109_v27 }
 0x42e   :  { %2620 = vmatmul.mubr.f32.gmra.mxu0 %v12116_v10 }
 0x42f   :  { %3688 = vmatprep.mubr.f32.mxu0 %v17335_v47 }
 0x44f   :  { %v8319_v6 = vpop.f32.mrf.mxu1 }
 0x450   :  { %v8399_v62 = vpop.f32.mrf.mxu0 }
 0x451   :  { %v8320_v40 = vpop.f32.mrf.mxu1 }
 0x452   :  { %v8321_v55 = vadd.f32 %v8320_v40, %v8319_v6  ;;  %v8400_v15 = vpop.f32.mrf.mxu0 }
 0x453   :  { %v8401_v54 = vadd.f32 %v8400_v15, %v8399_v62 }
 0x455   :  { %v12192_v53 = vadd.f32 %v8401_v54, %v8321_v55 }
 0x456   :  { %v8322_v48 = vpop.f32.mrf.mxu1 }
 0x457   :  { %v8402_v45 = vpop.f32.mrf.mxu0 }
 0x458   :  { %v8323_v35 = vpop.f32.mrf.mxu1 }
 0x459   :  { %v8324_v41 = vadd.f32 %v8323_v35, %v8322_v48  ;;  %v8403_v21 = vpop.f32.mrf.mxu0 }
 0x45a   :  { %v8404_v59 = vadd.f32 %v8403_v21, %v8402_v45 }
 0x45c   :  { %v12197_v5 = vadd.f32 %v8404_v59, %v8324_v41  ;;  %v8325_v29 = vpop.f32.mrf.mxu1 }
 0x45d   :  { %v8405_v60 = vpop.f32.mrf.mxu0 }
 0x45e   :  { %v8326_v18 = vpop.f32.mrf.mxu1 }
 0x45f   :  { %v8327_v0 = vadd.f32 %v8326_v18, %v8325_v29  ;;  %v8406_v52 = vpop.f32.mrf.mxu0 }
 0x460   :  { %v8407_v26 = vadd.f32 %v8406_v52, %v8405_v60 }
 0x462   :  { %v12202_v50 = vadd.f32 %v8407_v26, %v8327_v0 }
 0x463   :  { %v8328_v19 = vpop.f32.mrf.mxu1 }
 0x464   :  { %v8408_v38 = vpop.f32.mrf.mxu0 }
 0x465   :  { %v8329_v61 = vpop.f32.mrf.mxu1 }
 0x466   :  { %v8330_v2 = vadd.f32 %v8329_v61, %v8328_v19  ;;  %v8409_v34 = vpop.f32.mrf.mxu0 }
 0x467   :  { %v8410_v58 = vadd.f32 %v8409_v34, %v8408_v38 }
 0x468   :  { %v8331_v4 = vpop.f32.mrf.mxu1 }
 0x469   :  { %v12204_v16 = vadd.f32 %v8410_v58, %v8330_v2  ;;  %v8411_v20 = vpop.f32.mrf.mxu0  ;;  %v12225_v58 = vld [vmem:[%s16882_s11 + $0x38] sm:$0xff] }
 0x46a   :  { %v8332_v1 = vpop.f32.mrf.mxu1  ;;  %9379 = vmatprep.subr.mxu1 %v12225_v58 }
 0x46b   :  { %v8333_v17 = vadd.f32 %v8332_v1, %v8331_v4  ;;  %v8412_v24 = vpop.f32.mrf.mxu0 }
 0x46c   :  { %v8413_v28 = vadd.f32 %v8412_v24, %v8411_v20 }
 0x46e   :  { %v12206_v31 = vadd.f32 %v8413_v28, %v8333_v17 }
 0x46f   :  { %v8334_v42 = vpop.f32.mrf.mxu1 }
 0x470   :  { %v8414_v44 = vpop.f32.mrf.mxu0 }
 0x471   :  { %v8335_v39 = vpop.f32.mrf.mxu1 }
 0x472   :  { %v8336_v25 = vadd.f32 %v8335_v39, %v8334_v42  ;;  %v8415_v22 = vpop.f32.mrf.mxu0 }
 0x473   :  { %v8416_v7 = vadd.f32 %v8415_v22, %v8414_v44 }
 0x475   :  { %v12208_v30 = vadd.f32 %v8416_v7, %v8336_v25  ;;  %v8417_v56 = vpop.f32.mrf.mxu0 }
 0x476   :  { %v8337_v43 = vpop.f32.mrf.mxu1 }
 0x477   :  { %v8418_v27 = vpop.f32.mrf.mxu0 }
 0x478   :  { %v8338_v9 = vpop.f32.mrf.mxu1  ;;  %v8419_v51 = vadd.f32 %v8418_v27, %v8417_v56 }
 0x479   :  { %v8339_v36 = vadd.f32 %v8338_v9, %v8337_v43 }
 0x47b   :  { %v12210_v63 = vadd.f32 %v8419_v51, %v8339_v36 }
 0x47d   :  { %v8340_v10 = vpop.f32.mrf.mxu1 }
 0x47e   :  { %v8420_v11 = vpop.f32.mrf.mxu0 }
 0x47f   :  { %v8341_v8 = vpop.f32.mrf.mxu1 }
 0x480   :  { %v8342_v57 = vadd.f32 %v8341_v8, %v8340_v10  ;;  %v8421_v46 = vpop.f32.mrf.mxu0 }
 0x481   :  { %v8422_v13 = vadd.f32 %v8421_v46, %v8420_v11  ;;  %v8343_v23 = vpop.f32.mrf.mxu1 }
 0x482   :  { %v8423_v14 = vpop.f32.mrf.mxu0 }
 0x483   :  { %v12212_v32 = vadd.f32 %v8422_v13, %v8342_v57  ;;  %v8344_v37 = vpop.f32.mrf.mxu1 }
 0x484   :  { %v8345_v33 = vadd.f32 %v8344_v37, %v8343_v23  ;;  %v8424_v6 = vpop.f32.mrf.mxu0 }
 0x485   :  { %v8425_v62 = vadd.f32 %v8424_v6, %v8423_v14 }
 0x487   :  { %v12214_v40 = vadd.f32 %v8425_v62, %v8345_v33  ;;  %v8346_v55 = vpop.f32.mrf.mxu1 }
 0x488   :  { %v8426_v15 = vpop.f32.mrf.mxu0 }
 0x489   :  { %v8347_v54 = vpop.f32.mrf.mxu1 }
 0x48a   :  { %v8348_v12 = vadd.f32 %v8347_v54, %v8346_v55  ;;  %v8427_v48 = vpop.f32.mrf.mxu0 }
 0x48b   :  { %v8428_v45 = vadd.f32 %v8427_v48, %v8426_v15 }
 0x48d   :  { %v12216_v41 = vadd.f32 %v8428_v45, %v8348_v12 }
 0x48e   :  { %v8349_v35 = vpop.f32.mrf.mxu1  ;;  %v8429_v21 = vpop.f32.mrf.mxu0 }
 0x490   :  { %v8350_v59 = vpop.f32.mrf.mxu1  ;;  %v8430_v29 = vpop.f32.mrf.mxu0 }
 0x491   :  { %v8351_v3 = vadd.f32 %v8350_v59, %v8349_v35  ;;  %v8431_v60 = vadd.f32 %v8430_v29, %v8429_v21 }
 0x493   :  { %v12218_v18 = vadd.f32 %v8431_v60, %v8351_v3 }
 0x495   :  { %v8352_v49 = vpop.f32.mrf.mxu1 }
 0x496   :  { %v8432_v0 = vpop.f32.mrf.mxu0 }
 0x497   :  { %v8353_v52 = vpop.f32.mrf.mxu1 }
 0x498   :  { %v8354_v26 = vadd.f32 %v8353_v52, %v8352_v49  ;;  %v8433_v19 = vpop.f32.mrf.mxu0 }
 0x499   :  { %v8434_v38 = vadd.f32 %v8433_v19, %v8432_v0 }
 0x49a   :  { %v8355_v61 = vpop.f32.mrf.mxu1 }
 0x49b   :  { %v12220_v2 = vadd.f32 %v8434_v38, %v8354_v26  ;;  %v8435_v34 = vpop.f32.mrf.mxu0 }
 0x49c   :  { %v8356_v4 = vpop.f32.mrf.mxu1 }
 0x49d   :  { %v8357_v20 = vadd.f32 %v8356_v4, %v8355_v61  ;;  %v8436_v1 = vpop.f32.mrf.mxu0 }
 0x49e   :  { %v8437_v17 = vadd.f32 %v8436_v1, %v8435_v34 }
 0x4a0   :  { %v12228_v24 = vadd.f32 %v8437_v17, %v8357_v20 }
 0x4a1   :  { %v8358_v28 = vpop.f32.mrf.mxu1 }
 0x4a2   :  { %v8438_v42 = vpop.f32.mrf.mxu0 }
 0x4a3   :  { %v8359_v44 = vpop.f32.mrf.mxu1 }
 0x4a4   :  { %v8360_v39 = vadd.f32 %v8359_v44, %v8358_v28  ;;  %v8439_v25 = vpop.f32.mrf.mxu0 }
 0x4a5   :  { %v8440_v22 = vadd.f32 %v8439_v25, %v8438_v42 }
 0x4a6   :  { %v8361_v7 = vpop.f32.mrf.mxu1 }
 0x4a7   :  { %v12230_v43 = vadd.f32 %v8440_v22, %v8360_v39  ;;  %v8441_v56 = vpop.f32.mrf.mxu0 }
 0x4a8   :  { %v8362_v9 = vpop.f32.mrf.mxu1 }
 0x4a9   :  { %v8363_v36 = vadd.f32 %v8362_v9, %v8361_v7  ;;  %v8442_v27 = vpop.f32.mrf.mxu0 }
 0x4aa   :  { %v8443_v51 = vadd.f32 %v8442_v27, %v8441_v56 }
 0x4ac   :  { %v12232_v10 = vadd.f32 %v8443_v51, %v8363_v36  ;;  %v12239_v36 = vld [vmem:[%s16883_s9] ss:$0 sm:$0xff] }
 0x4ad   :  { %v8364_v11 = vpop.f32.mrf.mxu1 }
 0x4ae   :  { %v8444_v8 = vpop.f32.mrf.mxu0 }
 0x4af   :  { %v8365_v57 = vpop.f32.mrf.mxu1 }
 0x4b0   :  { %v8366_v46 = vadd.f32 %v8365_v57, %v8364_v11  ;;  %v8445_v13 = vpop.f32.mrf.mxu0 }
 0x4b1   :  { %v8446_v23 = vadd.f32 %v8445_v13, %v8444_v8  ;;  %v8479_v14 = vpop.f32.mrf.mxu1 }
 0x4b2   :  { %v8559_v37 = vpop.f32.mrf.mxu0 }
 0x4b3   :  { %v12234_v33 = vadd.f32 %v8446_v23, %v8366_v46  ;;  %v8480_v6 = vpop.f32.mrf.mxu1 }
 0x4b4   :  { %v8481_v62 = vadd.f32 %v8480_v6, %v8479_v14  ;;  %v8560_v55 = vpop.f32.mrf.mxu0 }
 0x4b5   :  { %v8561_v15 = vadd.f32 %v8560_v55, %v8559_v37  ;;  %v8482_v54 = vpop.f32.mrf.mxu1 }
 0x4b6   :  { %v8562_v12 = vpop.f32.mrf.mxu0 }
 0x4b7   :  { %v2547_v48 = vadd.f32 %v8561_v15, %v8481_v62  ;;  %v8483_v45 = vpop.f32.mrf.mxu1 }
 0x4b8   :  { %v8484_v35 = vadd.f32 %v8483_v45, %v8482_v54  ;;  %v8563_v21 = vpop.f32.mrf.mxu0 }
 0x4b9   :  { %9592 = vrcp.f32 %v2547_v48  ;;  %v8564_v59 = vadd.f32 %v8563_v21, %v8562_v12  ;;  %v8485_v3 = vpop.f32.mrf.mxu1 }
 0x4ba   :  { %v8565_v29 = vpop.f32.mrf.mxu0 }
 0x4bb   :  { %v2552_v60 = vadd.f32 %v8564_v59, %v8484_v35  ;;  %v8486_v49 = vpop.f32.mrf.mxu1 }
 0x4bc   :  { %v8487_v0 = vadd.f32 %v8486_v49, %v8485_v3  ;;  %v8566_v52 = vpop.f32.mrf.mxu0 }
 0x4bd   :  { %9594 = vrcp.f32 %v2552_v60  ;;  %v8567_v26 = vadd.f32 %v8566_v52, %v8565_v29  ;;  %v8488_v19 = vpop.f32.mrf.mxu1 }
 0x4be   :  { %v8568_v38 = vpop.f32.mrf.mxu0 }
 0x4bf   :  { %v2557_v61 = vadd.f32 %v8567_v26, %v8487_v0  ;;  %v8489_v34 = vpop.f32.mrf.mxu1 }
 0x4c0   :  { %v8490_v4 = vadd.f32 %v8489_v34, %v8488_v19  ;;  %v8569_v20 = vpop.f32.mrf.mxu0 }
 0x4c1   :  { %9596 = vrcp.f32 %v2557_v61  ;;  %v8570_v1 = vadd.f32 %v8569_v20, %v8568_v38  ;;  %v8491_v17 = vpop.f32.mrf.mxu1 }
 0x4c2   :  { %v8571_v28 = vpop.f32.mrf.mxu0 }
 0x4c3   :  { %v2562_v42 = vadd.f32 %v8570_v1, %v8490_v4  ;;  %v8492_v44 = vpop.f32.mrf.mxu1 }
 0x4c4   :  { %v8493_v39 = vadd.f32 %v8492_v44, %v8491_v17  ;;  %v8572_v25 = vpop.f32.mrf.mxu0 }
 0x4c5   :  { %9598 = vrcp.f32 %v2562_v42  ;;  %v8573_v22 = vadd.f32 %v8572_v25, %v8571_v28  ;;  %v8494_v7 = vpop.f32.mrf.mxu1 }
 0x4c6   :  { %v9593_v56 = vpop.eup %9592  ;;  %v8574_v9 = vpop.f32.mrf.mxu0 }
 0x4c7   :  { %v2567_v27 = vadd.f32 %v8573_v22, %v8493_v39  ;;  %v8495_v51 = vpop.f32.mrf.mxu1  ;;  %v2641_v11 = vmul.f32 %v9593_v56, %v12192_v53 }
 0x4c8   :  { %v8496_v8 = vadd.f32 %v8495_v51, %v8494_v7  ;;  %v8575_v57 = vpop.f32.mrf.mxu0 }
 0x4c9   :  { %9600 = vrcp.f32 %v2567_v27  ;;  %v8576_v46 = vadd.f32 %v8575_v57, %v8574_v9  ;;  %v8497_v13 = vpop.f32.mrf.mxu1  ;;  %v12243_v23 = vadd.f32 %v12239_v36, %v2641_v11 }
 0x4ca   :  { %v9595_v14 = vpop.eup %9594  ;;  %v8577_v37 = vpop.f32.mrf.mxu0 }
 0x4cb   :  { %v2572_v6 = vadd.f32 %v8576_v46, %v8496_v8  ;;  %v8498_v62 = vpop.f32.mrf.mxu1  ;;  %v2695_v55 = vmul.f32 1.442695, %v12243_v23  ;;  %v2642_v15 = vmul.f32 %v9595_v14, %v12197_v5  ;;  %vm2679_vm2 = vcmp.gt.f32.partialorder %v12243_v23, 0.0 }
 0x4cc   :  { %v8499_v54 = vadd.f32 %v8498_v62, %v8497_v13  ;;  %v8578_v12 = vpop.f32.mrf.mxu0 }
 0x4cd   :  { %9602 = vrcp.f32 %v2572_v6  ;;  %v8579_v53 = vadd.f32 %v8578_v12, %v8577_v37  ;;  %v8500_v48 = vpop.f32.mrf.mxu1  ;;  %v12248_v45 = vadd.f32 %v12239_v36, %v2642_v15 }
 0x4ce   :  { %v9597_v35 = vpop.eup %9596  ;;  %v8580_v21 = vpop.f32.mrf.mxu0  ;;  %9604 = vpow2.f32 %v2695_v55 }
 0x4cf   :  { %v2577_v59 = vadd.f32 %v8579_v53, %v8499_v54  ;;  %v8501_v3 = vpop.f32.mrf.mxu1  ;;  %v2697_v29 = vmul.f32 1.442695, %v12248_v45  ;;  %v2643_v60 = vmul.f32 %v9597_v35, %v12202_v50  ;;  %vm2680_vm3 = vcmp.gt.f32.partialorder %v12248_v45, 0.0 }
 0x4d0   :  { %v8502_v49 = vadd.f32 %v8501_v3, %v8500_v48  ;;  %v8581_v0 = vpop.f32.mrf.mxu0 }
 0x4d1   :  { %9606 = vrcp.f32 %v2577_v59  ;;  %v8582_v5 = vadd.f32 %v8581_v0, %v8580_v21  ;;  %v8503_v52 = vpop.f32.mrf.mxu1  ;;  %v12253_v26 = vadd.f32 %v12239_v36, %v2643_v60 }
 0x4d2   :  { %v9599_v19 = vpop.eup %9598  ;;  %v8583_v38 = vpop.f32.mrf.mxu0  ;;  %9608 = vpow2.f32 %v2697_v29 }
 0x4d3   :  { %v2582_v61 = vadd.f32 %v8582_v5, %v8502_v49  ;;  %v8504_v34 = vpop.f32.mrf.mxu1  ;;  %v2699_v4 = vmul.f32 1.442695, %v12253_v26  ;;  %v2644_v20 = vmul.f32 %v9599_v19, %v12204_v16  ;;  %vm2681_vm4 = vcmp.gt.f32.partialorder %v12253_v26, 0.0 }
 0x4d4   :  { %v8505_v1 = vadd.f32 %v8504_v34, %v8503_v52  ;;  %v8584_v17 = vpop.f32.mrf.mxu0 }
 0x4d5   :  { %9610 = vrcp.f32 %v2582_v61  ;;  %v8585_v50 = vadd.f32 %v8584_v17, %v8583_v38  ;;  %v8506_v28 = vpop.f32.mrf.mxu1  ;;  %v12258_v42 = vadd.f32 %v12239_v36, %v2644_v20 }
 0x4d6   :  { %v9601_v44 = vpop.eup %9600  ;;  %v8586_v39 = vpop.f32.mrf.mxu0  ;;  %9612 = vpow2.f32 %v2699_v4 }
 0x4d7   :  { %v2587_v25 = vadd.f32 %v8585_v50, %v8505_v1  ;;  %v8507_v22 = vpop.f32.mrf.mxu1  ;;  %v2701_v7 = vmul.f32 1.442695, %v12258_v42  ;;  %v2645_v56 = vmul.f32 %v9601_v44, %v12206_v31  ;;  %vm2682_vm5 = vcmp.gt.f32.partialorder %v12258_v42, 0.0 }
 0x4d8   :  { %v8508_v9 = vadd.f32 %v8507_v22, %v8506_v28  ;;  %v8587_v27 = vpop.f32.mrf.mxu0 }
 0x4d9   :  { %9614 = vrcp.f32 %v2587_v25  ;;  %v8588_v16 = vadd.f32 %v8587_v27, %v8586_v39  ;;  %v8509_v51 = vpop.f32.mrf.mxu1  ;;  %v12263_v11 = vadd.f32 %v12239_v36, %v2645_v56 }
 0x4da   :  { %v9603_v8 = vpop.eup %9602  ;;  %v8589_v57 = vpop.f32.mrf.mxu0  ;;  %9616 = vpow2.f32 %v2701_v7 }
 0x4db   :  { %v9605_v46 = vpop.eup %9604  ;;  %v2592_v13 = vadd.f32 %v8588_v16, %v8508_v9  ;;  %v8510_v14 = vpop.f32.mrf.mxu1  ;;  %v2703_v37 = vmul.f32 1.442695, %v12263_v11  ;;  %v2646_v6 = vmul.f32 %v9603_v8, %v12208_v30  ;;  %vm2683_vm6 = vcmp.gt.f32.partialorder %v12263_v11, 0.0 }
 0x4dc   :  { %v8511_v62 = vadd.f32 %v8510_v14, %v8509_v51  ;;  %v8590_v31 = vpop.f32.mrf.mxu0  ;;  %v8057_v55 = vadd.f32 -1.0, %v9605_v46 }
 0x4dd   :  { %9618 = vrcp.f32 %v2592_v13  ;;  %v8591_v15 = vadd.f32 %v8590_v31, %v8589_v57  ;;  %v8512_v54 = vpop.f32.mrf.mxu1  ;;  %v12269_v12 = vadd.f32 %v12239_v36, %v2646_v6 }
 0x4de   :  { %v9607_v53 = vpop.eup %9606  ;;  %v8592_v48 = vpop.f32.mrf.mxu0  ;;  %v2743_v35 = vsel %vm2679_vm2, %v12243_v23, %v8057_v55  ;;  %9620 = vpow2.f32 %v2703_v37  ;;  %v3086_v55 = vld [vmem:[%s16882_s11 + $0x10] sm:$0xff] }
 0x4df   :  { %v9609_v21 = vpop.eup %9608  ;;  %v2597_v59 = vadd.f32 %v8591_v15, %v8511_v62  ;;  %9355 = vmatprep.mubr.msk.f32.mxu1 %vm388_vm0, %v2743_v35  ;;  %v8513_v30 = vpop.f32.mrf.mxu1  ;;  %v2705_v3 = vmul.f32 1.442695, %v12269_v12  ;;  %v2647_v29 = vmul.f32 %v9607_v53, %v12210_v63  ;;  %v3090_v63 = vld [vmem:[%s16882_s11 + $0x30] sm:$0xff]  ;;  %vm2684_vm7 = vcmp.gt.f32.partialorder %v12269_v12, 0.0 }
 0x4e0   :  { %v8514_v60 = vadd.f32 %v8513_v30, %v8512_v54  ;;  %v8593_v49 = vpop.f32.mrf.mxu0  ;;  %v8058_v0 = vadd.f32 -1.0, %v9609_v21 }
 0x4e1   :  { %9622 = vrcp.f32 %v2597_v59  ;;  %v8594_v5 = vadd.f32 %v8593_v49, %v8592_v48  ;;  %v8515_v52 = vpop.f32.mrf.mxu1  ;;  %v12277_v23 = vadd.f32 %v12239_v36, %v2647_v29 }
 0x4e2   :  { %v9611_v19 = vpop.eup %9610  ;;  %v8595_v38 = vpop.f32.mrf.mxu0  ;;  %v2744_v61 = vsel %vm2680_vm3, %v12248_v45, %v8058_v0  ;;  %9624 = vpow2.f32 %v2705_v3  ;;  %v3089_v45 = vld [vmem:[%s16882_s11 + $0x28] sm:$0xff]  ;;  %vm3575_vm3 = vcmask 130048  }
 0x4e3   :  { %v9613_v34 = vpop.eup %9612  ;;  %v2602_v4 = vadd.f32 %v8594_v5, %v8514_v60  ;;  %9356 = vmatmul.mubr.msk.f32.vlgmr.msra.gmra.mxu1 %vm388_vm0, %v2744_v61  ;;  %v8516_v20 = vpop.f32.mrf.mxu1  ;;  %v2707_v1 = vmul.f32 1.442695, %v12277_v23  ;;  %v2648_v17 = vmul.f32 %v9611_v19, %v12212_v32  ;;  %vm2685_vm8 = vcmp.gt.f32.partialorder %v12277_v23, 0.0 }
 0x4e4   :  { %v8517_v50 = vadd.f32 %v8516_v20, %v8515_v52  ;;  %v8596_v28 = vpop.f32.mrf.mxu0  ;;  %v8059_v44 = vadd.f32 -1.0, %v9613_v34  ;;  %9380 = vmatpush3.msra.mxu1 %v12225_v58  ;;  %v3088_v58 = vld [vmem:[%s16882_s11 + $0x20] sm:$0xff] }
 0x4e5   :  { %9626 = vrcp.f32 %v2602_v4  ;;  %v8597_v39 = vadd.f32 %v8596_v28, %v8595_v38  ;;  %v8518_v25 = vpop.f32.mrf.mxu1  ;;  %v12292_v22 = vadd.f32 %v12239_v36, %v2648_v17  ;;  %9381 = vmatprep.subr.mxu1 %v3090_v63 }
 0x4e6   :  { %v9615_v7 = vpop.eup %9614  ;;  %v8598_v32 = vpop.f32.mrf.mxu0  ;;  %v2745_v56 = vsel %vm2681_vm4, %v12253_v26, %v8059_v44  ;;  %9628 = vpow2.f32 %v2707_v1  ;;  %9382 = vmatpush3.msra.mxu1 %v3090_v63  ;;  %v3087_v26 = vld [vmem:[%s16882_s11 + $0x18] sm:$0xff] }
 0x4e7   :  { %v9617_v9 = vpop.eup %9616  ;;  %v2607_v27 = vadd.f32 %v8597_v39, %v8517_v50  ;;  %9358 = vmatprep.mubr.msk.f32.mxu1 %vm388_vm0, %v2745_v56  ;;  %v8519_v16 = vpop.f32.mrf.mxu1  ;;  %v2709_v51 = vmul.f32 1.442695, %v12292_v22  ;;  %v2649_v8 = vmul.f32 %v9615_v7, %v12214_v40  ;;  %9383 = vmatprep.subr.mxu1 %v3089_v45  ;;  %vm2686_vm9 = vcmp.gt.f32.partialorder %v12292_v22, 0.0 }
 0x4e8   :  { %v8520_v57 = vadd.f32 %v8519_v16, %v8518_v25  ;;  %v8599_v46 = vpop.f32.mrf.mxu0  ;;  %v8060_v13 = vadd.f32 -1.0, %v9617_v9  ;;  %9384 = vmatpush3.msra.mxu1 %v3089_v45 }
 0x4e9   :  { %9630 = vrcp.f32 %v2607_v27  ;;  %v8600_v14 = vadd.f32 %v8599_v46, %v8598_v32  ;;  %v8521_v37 = vpop.f32.mrf.mxu1  ;;  %v12306_v6 = vadd.f32 %v12239_v36, %v2649_v8  ;;  %9385 = vmatprep.subr.mxu1 %v3088_v58 }
 0x4ea   :  { %v9619_v62 = vpop.eup %9618  ;;  %v8601_v40 = vpop.f32.mrf.mxu0  ;;  %v2746_v31 = vsel %vm2682_vm5, %v12258_v42, %v8060_v13  ;;  %9632 = vpow2.f32 %v2709_v51  ;;  %9386 = vmatpush3.msra.mxu1 %v3088_v58 }
 0x4eb   :  { %v9621_v15 = vpop.eup %9620  ;;  %v2612_v54 = vadd.f32 %v8600_v14, %v8520_v57  ;;  %9359 = vmatmul.mubr.msk.f32.gmra.mxu1 %vm388_vm0, %v2746_v31  ;;  %v8522_v53 = vpop.f32.mrf.mxu1  ;;  %v2711_v48 = vmul.f32 1.442695, %v12306_v6  ;;  %v2650_v35 = vmul.f32 %v9619_v62, %v12216_v41  ;;  %9387 = vmatprep.subr.mxu1 %v3087_v26  ;;  %vm2687_vm10 = vcmp.gt.f32.partialorder %v12306_v6, 0.0 }
 0x4ec   :  { %v8523_v21 = vadd.f32 %v8522_v53, %v8521_v37  ;;  %v8602_v59 = vpop.f32.mrf.mxu0  ;;  %v8061_v30 = vadd.f32 -1.0, %v9621_v15  ;;  %9388 = vmatpush3.msra.mxu1 %v3087_v26 }
 0x4ed   :  { %9634 = vrcp.f32 %v2612_v54  ;;  %v8603_v42 = vadd.f32 %v8602_v59, %v8601_v40  ;;  %v8524_v3 = vpop.f32.mrf.mxu1  ;;  %v12317_v29 = vadd.f32 %v12239_v36, %v2650_v35  ;;  %9389 = vmatprep.subr.mxu1 %v3086_v55 }
 0x4ee   :  { %v9623_v60 = vpop.eup %9622  ;;  %v8604_v49 = vpop.f32.mrf.mxu0  ;;  %v2747_v0 = vsel %vm2683_vm6, %v12263_v11, %v8061_v30  ;;  %9636 = vpow2.f32 %v2711_v48  ;;  %9390 = vmatpush3.msra.mxu1 %v3086_v55 }
 0x4ef   :  { %v9625_v41 = vpop.eup %9624  ;;  %v2617_v5 = vadd.f32 %v8603_v42, %v8523_v21  ;;  %9361 = vmatprep.mubr.msk.f32.mxu1 %vm388_vm0, %v2747_v0  ;;  %v8525_v52 = vpop.f32.mrf.mxu1  ;;  %v2713_v19 = vmul.f32 1.442695, %v12317_v29  ;;  %v2651_v38 = vmul.f32 %v9623_v60, %v12218_v18  ;;  %vm2688_vm11 = vcmp.gt.f32.partialorder %v12317_v29, 0.0 }
 0x4f0   :  { %v8526_v61 = vadd.f32 %v8525_v52, %v8524_v3  ;;  %v8605_v63 = vpop.f32.mrf.mxu0  ;;  %v8062_v34 = vadd.f32 -1.0, %v9625_v41  ;;  %v3085_v41 = vld [vmem:[%s16882_s11 + $0x8] sm:$0xff] }
 0x4f1   :  { %9638 = vrcp.f32 %v2617_v5  ;;  %v8606_v4 = vadd.f32 %v8605_v63, %v8604_v49  ;;  %v2673_v11 = vadd.f32 %v12239_v36, %v2651_v38  ;;  %9391 = vmatprep.subr.mxu1 %v3085_v41  ;;  %v3084_v5 = vld [vmem:[%s16882_s11] sm:$0xff]  ;;  %v3117_v52 = vld [vmem:[%s16884_s13 + $0x48] sm:$0xff]  ;;  %v3119_v38 = vld [vmem:[%s16884_s13 + $0x58] sm:$0xff] }
 0x4f2   :  { %v9627_v20 = vpop.eup %9626  ;;  %v2748_v1 = vsel %vm2684_vm7, %v12269_v12, %v8062_v34  ;;  %9640 = vpow2.f32 %v2713_v19  ;;  %9392 = vmatpush3.msra.mxu1 %v3085_v41  ;;  %v3116_v19 = vld [vmem:[%s16884_s13 + $0x40] sm:$0xff]  ;;  %3652 = vmatprep.subr.mxu0 %v3117_v52 }
 0x4f3   :  { %v9629_v17 = vpop.eup %9628  ;;  %v2622_v50 = vadd.f32 %v8606_v4, %v8526_v61  ;;  %9362 = vmatmul.mubr.msk.f32.gmra.mxu1 %vm388_vm0, %v2748_v1  ;;  %v2715_v28 = vmul.f32 1.442695, %v2673_v11  ;;  %v2652_v18 = vmul.f32 %v9627_v20, %v12220_v2  ;;  %vm2689_vm12 = vcmp.gt.f32.partialorder %v2673_v11, 0.0  ;;  %9393 = vmatprep.subr.mxu1 %v3084_v5 }
 0x4f4   :  { %v8063_v44 = vadd.f32 -1.0, %v9629_v17  ;;  %9394 = vmatpush3.msra.mxu1 %v3084_v5  ;;  %3653 = vmatpush1.msra.mxu0 %v3116_v19 }
 0x4f5   :  { %9642 = vrcp.f32 %v2622_v50  ;;  %v2674_v45 = vadd.f32 %v12239_v36, %v2652_v18  ;;  %3813 = vmatprep.subr.mxu1 %v3119_v38 }
 0x4f6   :  { %v9631_v39 = vpop.eup %9630  ;;  %v2749_v25 = vsel %vm2685_vm8, %v12277_v23, %v8063_v44  ;;  %9644 = vpow2.f32 %v2715_v28 }
 0x4f7   :  { %v9633_v7 = vpop.eup %9632  ;;  %9364 = vmatprep.mubr.msk.f32.mxu1 %vm388_vm0, %v2749_v25  ;;  %v2717_v12 = vmul.f32 1.442695, %v2674_v45  ;;  %v2653_v32 = vmul.f32 %v9631_v39, %v12228_v24  ;;  %vm2690_vm13 = vcmp.gt.f32.partialorder %v2674_v45, 0.0 }
 0x4f8   :  { %v8064_v56 = vadd.f32 -1.0, %v9633_v7 }
 0x4f9   :  { %9646 = vpow2.f32 %v2717_v12  ;;  %v2675_v2 = vadd.f32 %v12239_v36, %v2653_v32  ;;  %v3118_v12 = vld [vmem:[%s16884_s13 + $0x50] sm:$0xff]  ;;  %v3109_v32 = vld [vmem:[%s16884_s13 + $0x8] sm:$0xff] }
 0x4fa   :  { %v9635_v58 = vpop.eup %9634  ;;  %v2750_v9 = vsel %vm2686_vm9, %v12292_v22, %v8064_v56  ;;  %v3111_v56 = vld [vmem:[%s16884_s13 + $0x18] sm:$0xff]  ;;  %3654 = vmatprep.subr.mxu0 %v3109_v32 }
 0x4fb   :  { %v9637_v27 = vpop.eup %9636  ;;  %9365 = vmatmul.mubr.msk.f32.gmra.mxu1 %vm388_vm0, %v2750_v9  ;;  %v2719_v23 = vmul.f32 1.442695, %v2675_v2  ;;  %v2654_v16 = vmul.f32 %v9635_v58, %v12230_v43  ;;  %vm2691_vm14 = vcmp.gt.f32.partialorder %v2675_v2, 0.0  ;;  %v3110_v58 = vld [vmem:[%s16884_s13 + $0x10] sm:$0xff]  ;;  %v3121_v9 = vld [vmem:[%s16884_s13 + $0x68] sm:$0xff] }
 0x4fc   :  { %v8065_v51 = vadd.f32 -1.0, %v9637_v27  ;;  %v3123_v27 = vld [vmem:[%s16884_s13 + $0x78] sm:$0xff] }
 0x4fd   :  { %9648 = vpow2.f32 %v2719_v23  ;;  %v2676_v24 = vadd.f32 %v12239_v36, %v2654_v16 }
 0x4fe   :  { %v9639_v8 = vpop.eup %9638  ;;  %v2751_v57 = vsel %vm2687_vm10, %v12306_v6, %v8065_v51  ;;  %v3120_v51 = vld [vmem:[%s16884_s13 + $0x60] sm:$0xff] }
 0x4ff   :  { %v9641_v46 = vpop.eup %9640  ;;  %9367 = vmatprep.mubr.msk.f32.mxu1 %vm388_vm0, %v2751_v57  ;;  %v2721_v13 = vmul.f32 1.442695, %v2676_v24  ;;  %v2655_v22 = vmul.f32 %v9639_v8, %v12232_v10  ;;  %vm2692_vm15 = vcmp.gt.f32.partialorder %v2676_v24, 0.0  ;;  %v3113_v8 = vld [vmem:[%s16884_s13 + $0x28] sm:$0xff]  ;;  %v3115_v57 = vld [vmem:[%s16884_s13 + $0x38] sm:$0xff] }
 0x500   :  { %v8066_v26 = vadd.f32 -1.0, %v9641_v46  ;;  %v3112_v46 = vld [vmem:[%s16884_s13 + $0x20] sm:$0xff] }
 0x501   :  { %9650 = vpow2.f32 %v2721_v13  ;;  %v2677_v43 = vadd.f32 %v12239_v36, %v2655_v22  ;;  %v3114_v13 = vld [vmem:[%s16884_s13 + $0x30] sm:$0xff] }
 0x502   :  { %v9643_v14 = vpop.eup %9642  ;;  %v2752_v37 = vsel %vm2688_vm11, %v12317_v29, %v8066_v26 }
 0x503   :  { %v9645_v62 = vpop.eup %9644  ;;  %9368 = vmatmul.mubr.msk.f32.gmra.mxu1 %vm388_vm0, %v2752_v37  ;;  %v2723_v40 = vmul.f32 1.442695, %v2677_v43  ;;  %v2656_v6 = vmul.f32 %v9643_v14, %v12234_v33  ;;  %vm2693_vm1 = vcmp.gt.f32.partialorder %v2677_v43, 0.0 }
 0x504   :  { %v8067_v31 = vadd.f32 -1.0, %v9645_v62 }
 0x505   :  { %9652 = vpow2.f32 %v2723_v40  ;;  %v2678_v10 = vadd.f32 %v12239_v36, %v2656_v6 }
 0x506   :  { %v9647_v55 = vpop.eup %9646  ;;  %v2753_v15 = vsel %vm2689_vm12, %v2673_v11, %v8067_v31 }
 0x507   :  { %9370 = vmatprep.mubr.msk.f32.mxu1 %vm388_vm0, %v2753_v15  ;;  %v8068_v54 = vadd.f32 -1.0, %v9647_v55  ;;  %v2725_v53 = vmul.f32 1.442695, %v2678_v10  ;;  %vm2694_vm2 = vcmp.gt.f32.partialorder %v2678_v10, 0.0 }
 0x509   :  { %v2754_v48 = vsel %vm2690_vm13, %v2674_v45, %v8068_v54  ;;  %9654 = vpow2.f32 %v2725_v53 }
 0x50a   :  { %v9649_v35 = vpop.eup %9648  ;;  %9371 = vmatmul.mubr.msk.f32.gmra.mxu1 %vm388_vm0, %v2754_v48 }
 0x50b   :  { %v8069_v21 = vadd.f32 -1.0, %v9649_v35 }
 0x50d   :  { %v2755_v33 = vsel %vm2691_vm14, %v2675_v2, %v8069_v21  ;;  %v3108_v2 = vld [vmem:[%s16884_s13] sm:$0xff] }
 0x50e   :  { %v9651_v59 = vpop.eup %9650  ;;  %9373 = vmatprep.mubr.msk.f32.mxu1 %vm388_vm0, %v2755_v33  ;;  %3655 = vmatpush1.msra.mxu0 %v3108_v2 }
 0x50f   :  { %v8070_v30 = vadd.f32 -1.0, %v9651_v59  ;;  %3974 = vmatprep.subr.mxu0 %v3121_v9 }
 0x511   :  { %v2756_v36 = vsel %vm2692_vm15, %v2676_v24, %v8070_v30  ;;  %v3122_v24 = vld [vmem:[%s16884_s13 + $0x70] sm:$0xff] }
 0x512   :  { %v9653_v42 = vpop.eup %9652  ;;  %9374 = vmatmul.mubr.msk.f32.gmra.mxu1 %vm388_vm0, %v2756_v36 }
 0x513   :  { %v8071_v3 = vadd.f32 -1.0, %v9653_v42 }
 0x515   :  { %v2757_v29 = vsel %vm2693_vm1, %v2677_v43, %v8071_v3 }
 0x516   :  { %v9655_v60 = vpop.eup %9654  ;;  %9376 = vmatprep.mubr.msk.f32.mxu1 %vm388_vm0, %v2757_v29 }
 0x517   :  { %v8072_v49 = vadd.f32 -1.0, %v9655_v60 }
 0x519   :  { %v2758_v0 = vsel %vm2694_vm2, %v2678_v10, %v8072_v49 }
 0x51a   :  { %9377 = vmatmul.mubr.msk.f32.gmra.mxu1 %vm388_vm0, %v2758_v0  ;;  %vm3381_vm0 = vcmask 523264  }
 0x5a3   :  { %v12370_v61 = vpop.f32.mrf.mxu1 }
 0x5a4   :  { %17336 = vst [vmem:[#allocation45_spill] sm:$0xff] %v12370_v61 }
 0x5a5   :  { %v12372_v63 = vpop.f32.mrf.mxu1 }
 0x5a6   :  { %17337 = vst [vmem:[#allocation46_spill] sm:$0xff] %v12372_v63  ;;  %9395 = vmatprep.mubr.msk.f32.mxu1 %vm3381_vm0, %v12372_v63 }
 0x5a7   :  { %9396 = vmatmul.mubr.msk.f32.vlgmr.msra.gmra.mxu1 %vm3381_vm0, %v12370_v61 }
 0x5a8   :  { %3814 = vmatpush1.msra.mxu1 %v3118_v12 }
 0x5a9   :  { %3815 = vmatprep.subr.mxu1 %v3111_v56 }
 0x5aa   :  { %3816 = vmatpush1.msra.mxu1 %v3110_v58 }
 0x5ab   :  { %v12378_v34 = vpop.f32.mrf.mxu1  ;;  %4135 = vmatprep.subr.mxu1 %v3123_v27 }
 0x5ac   :  { %17338 = vst [vmem:[#allocation43_spill] sm:$0xff] %v12378_v34 }
 0x5ad   :  { %v12380_v4 = vpop.f32.mrf.mxu1 }
 0x5ae   :  { %17339 = vst [vmem:[#allocation40_spill] sm:$0xff] %v12380_v4  ;;  %9398 = vmatprep.mubr.msk.f32.mxu1 %vm3381_vm0, %v12380_v4 }
 0x5af   :  { %9399 = vmatmul.mubr.msk.f32.gmra.mxu1 %vm3381_vm0, %v12378_v34 }
 0x5b3   :  { %v12386_v11 = vpop.f32.mrf.mxu1 }
 0x5b4   :  { %17340 = vst [vmem:[#allocation44_spill] sm:$0xff] %v12386_v11 }
 0x5b5   :  { %v12388_v20 = vpop.f32.mrf.mxu1 }
 0x5b6   :  { %17341 = vst [vmem:[#allocation37_spill] sm:$0xff] %v12388_v20  ;;  %9401 = vmatprep.mubr.msk.f32.mxu1 %vm3381_vm0, %v12388_v20 }
 0x5b7   :  { %9402 = vmatmul.mubr.msk.f32.gmra.mxu1 %vm3381_vm0, %v12386_v11 }
 0x5bb   :  { %v12394_v1 = vpop.f32.mrf.mxu1 }
 0x5bc   :  { %17342 = vst [vmem:[#allocation38_spill] sm:$0xff] %v12394_v1 }
 0x5bd   :  { %v12396_v17 = vpop.f32.mrf.mxu1 }
 0x5be   :  { %17343 = vst [vmem:[#allocation35_spill] sm:$0xff] %v12396_v17  ;;  %9404 = vmatprep.mubr.msk.f32.mxu1 %vm3381_vm0, %v12396_v17 }
 0x5bf   :  { %9405 = vmatmul.mubr.msk.f32.gmra.mxu1 %vm3381_vm0, %v12394_v1 }
 0x5c3   :  { %v12402_v50 = vpop.f32.mrf.mxu1 }
 0x5c4   :  { %17344 = vst [vmem:[#allocation36_spill] sm:$0xff] %v12402_v50 }
 0x5c5   :  { %v12404_v28 = vpop.f32.mrf.mxu1 }
 0x5c6   :  { %17345 = vst [vmem:[#allocation18_spill] sm:$0xff] %v12404_v28  ;;  %9407 = vmatprep.mubr.msk.f32.mxu1 %vm3381_vm0, %v12404_v28 }
 0x5c7   :  { %9408 = vmatmul.mubr.msk.f32.gmra.mxu1 %vm3381_vm0, %v12402_v50 }
 0x5ca   :  { %v12410_v18 = vpop.f32.mrf.mxu1 }
 0x5cb   :  { %17346 = vst [vmem:[#allocation20_spill] sm:$0xff] %v12410_v18 }
 0x5cc   :  { %v12412_v44 = vpop.f32.mrf.mxu1 }
 0x5cd   :  { %17347 = vst [vmem:[#allocation17_spill] sm:$0xff] %v12412_v44  ;;  %9410 = vmatprep.mubr.msk.f32.mxu1 %vm3381_vm0, %v12412_v44 }
 0x5ce   :  { %9411 = vmatmul.mubr.msk.f32.gmra.mxu1 %vm3381_vm0, %v12410_v18 }
 0x5d2   :  { %v12418_v45 = vpop.f32.mrf.mxu1 }
 0x5d3   :  { %17348 = vst [vmem:[#allocation16_spill] sm:$0xff] %v12418_v45 }
 0x5d4   :  { %v12420_v39 = vpop.f32.mrf.mxu1 }
 0x5d5   :  { %17349 = vst [vmem:[#allocation19_spill] sm:$0xff] %v12420_v39  ;;  %9413 = vmatprep.mubr.msk.f32.mxu1 %vm3381_vm0, %v12420_v39 }
 0x5d6   :  { %9414 = vmatmul.mubr.msk.f32.gmra.mxu1 %vm3381_vm0, %v12418_v45 }
 0x5da   :  { %v12426_v25 = vpop.f32.mrf.mxu1 }
 0x5db   :  { %17350 = vst [vmem:[#allocation15_spill] sm:$0xff] %v12426_v25 }
 0x5dc   :  { %v12428_v7 = vpop.f32.mrf.mxu1 }
 0x5dd   :  { %17351 = vst [vmem:[#allocation14_spill] sm:$0xff] %v12428_v7  ;;  %9416 = vmatprep.mubr.msk.f32.mxu1 %vm3381_vm0, %v12428_v7 }
 0x5de   :  { %9417 = vmatmul.mubr.msk.f32.gmra.mxu1 %vm3381_vm0, %v12426_v25 }
 0x5df   :  { %3849 = vmatprep.mubr.f32.mxu1 %v17335_v47 }
 0x667   :  { %v12456_v23 = vpop.f32.mrf.mxu1 }
 0x668   :  { %17352 = vst [vmem:[#allocation22_spill] sm:$0xff] %v12456_v23 }
 0x669   :  { %v12458_v16 = vpop.f32.mrf.mxu1 }
 0x66a   :  { %17353 = vst [vmem:[#allocation13_spill] sm:$0xff] %v12458_v16  ;;  %8105 = vmatmul.mubr.msk.f32.vlgmr.msra.gmra.mxu0 %vm3575_vm3, %v12458_v16  ;;  %8121 = vmatmul.mubr.msk.f32.vlgmr.msra.gmra.mxu1 %vm3575_vm3, %v12458_v16 }
 0x66b   :  { %3694 = vmatprep.mubr.f32.mxu0 %v17335_v47  ;;  %3855 = vmatprep.mubr.f32.mxu1 %v17335_v47 }
 0x66c   :  { %3975 = vmatpush1.msra.mxu0 %v3120_v51  ;;  %4136 = vmatpush1.msra.mxu1 %v3122_v24 }
 0x66d   :  { %3976 = vmatprep.subr.mxu0 %v3113_v8  ;;  %4137 = vmatprep.subr.mxu1 %v3115_v57 }
 0x66e   :  { %8106 = vmatmul.mubr.msk.f32.gmra.mxu0 %vm3575_vm3, %v12456_v23  ;;  %8122 = vmatmul.mubr.msk.f32.gmra.mxu1 %vm3575_vm3, %v12456_v23 }
 0x66f   :  { %v12488_v22 = vpop.f32.mrf.mxu1  ;;  %3700 = vmatprep.mubr.f32.mxu0 %v17335_v47  ;;  %3861 = vmatprep.mubr.f32.mxu1 %v17335_v47 }
 0x670   :  { %17354 = vst [vmem:[#allocation12_spill] sm:$0xff] %v12488_v22  ;;  %3977 = vmatpush1.msra.mxu0 %v3112_v46  ;;  %4138 = vmatpush1.msra.mxu1 %v3114_v13 }
 0x671   :  { %v12492_v26 = vpop.f32.mrf.mxu1 }
 0x672   :  { %17355 = vst [vmem:[#allocation21_spill] sm:$0xff] %v12492_v26  ;;  %8107 = vmatmul.mubr.msk.f32.gmra.mxu0 %vm3575_vm3, %v12492_v26  ;;  %8123 = vmatmul.mubr.msk.f32.gmra.mxu1 %vm3575_vm3, %v12492_v26 }
 0x673   :  { %3706 = vmatprep.mubr.f32.mxu0 %v17335_v47  ;;  %3867 = vmatprep.mubr.f32.mxu1 %v17335_v47 }
 0x676   :  { %8108 = vmatmul.mubr.msk.f32.gmra.mxu0 %vm3575_vm3, %v12488_v22  ;;  %8124 = vmatmul.mubr.msk.f32.gmra.mxu1 %vm3575_vm3, %v12488_v22 }
 0x677   :  { %v12504_v43 = vpop.f32.mrf.mxu1  ;;  %3712 = vmatprep.mubr.f32.mxu0 %v17335_v47  ;;  %3873 = vmatprep.mubr.f32.mxu1 %v17335_v47 }
 0x678   :  { %17356 = vst [vmem:[#allocation11_spill] sm:$0xff] %v12504_v43 }
 0x679   :  { %v12508_v14 = vpop.f32.mrf.mxu1 }
 0x67a   :  { %17357 = vst [vmem:[#allocation10_spill] sm:$0xff] %v12508_v14  ;;  %8109 = vmatmul.mubr.msk.f32.gmra.mxu0 %vm3575_vm3, %v12508_v14  ;;  %8125 = vmatmul.mubr.msk.f32.gmra.mxu1 %vm3575_vm3, %v12508_v14 }
 0x67b   :  { %3718 = vmatprep.mubr.f32.mxu0 %v17335_v47  ;;  %3879 = vmatprep.mubr.f32.mxu1 %v17335_v47 }
 0x67e   :  { %8110 = vmatmul.mubr.msk.f32.gmra.mxu0 %vm3575_vm3, %v12504_v43  ;;  %8126 = vmatmul.mubr.msk.f32.gmra.mxu1 %vm3575_vm3, %v12504_v43 }
 0x67f   :  { %v12520_v37 = vpop.f32.mrf.mxu1  ;;  %3724 = vmatprep.mubr.f32.mxu0 %v17335_v47  ;;  %3885 = vmatprep.mubr.f32.mxu1 %v17335_v47 }
 0x680   :  { %17358 = vst [vmem:[#allocation24_spill] sm:$0xff] %v12520_v37 }
 0x681   :  { %v12524_v62 = vpop.f32.mrf.mxu1 }
 0x682   :  { %17359 = vst [vmem:[#allocation9_spill] sm:$0xff] %v12524_v62  ;;  %8111 = vmatmul.mubr.msk.f32.gmra.mxu0 %vm3575_vm3, %v12524_v62  ;;  %8127 = vmatmul.mubr.msk.f32.gmra.mxu1 %vm3575_vm3, %v12524_v62 }
 0x683   :  { %3730 = vmatprep.mubr.f32.mxu0 %v17335_v47  ;;  %3891 = vmatprep.mubr.f32.mxu1 %v17335_v47 }
 0x686   :  { %8112 = vmatmul.mubr.msk.f32.gmra.mxu0 %vm3575_vm3, %v12520_v37  ;;  %8128 = vmatmul.mubr.msk.f32.gmra.mxu1 %vm3575_vm3, %v12520_v37 }
 0x687   :  { %v12536_v40 = vpop.f32.mrf.mxu1  ;;  %3736 = vmatprep.mubr.f32.mxu0 %v17335_v47  ;;  %3897 = vmatprep.mubr.f32.mxu1 %v17335_v47 }
 0x688   :  { %17360 = vst [vmem:[#allocation8_spill] sm:$0xff] %v12536_v40 }
 0x689   :  { %v12540_v6 = vpop.f32.mrf.mxu1 }
 0x68a   :  { %17361 = vst [vmem:[#allocation23_spill] sm:$0xff] %v12540_v6  ;;  %8113 = vmatmul.mubr.msk.f32.gmra.mxu0 %vm3575_vm3, %v12540_v6  ;;  %8129 = vmatmul.mubr.msk.f32.gmra.mxu1 %vm3575_vm3, %v12540_v6 }
 0x68b   :  { %3742 = vmatprep.mubr.f32.mxu0 %v17335_v47  ;;  %3903 = vmatprep.mubr.f32.mxu1 %v17335_v47 }
 0x68e   :  { %8114 = vmatmul.mubr.msk.f32.gmra.mxu0 %vm3575_vm3, %v12536_v40  ;;  %8130 = vmatmul.mubr.msk.f32.gmra.mxu1 %vm3575_vm3, %v12536_v40  ;;  %v12552_v31 = vpop.f32.mrf.mxu1 }
 0x68f   :  { %17362 = vst [vmem:[#allocation7_spill] sm:$0xff] %v12552_v31  ;;  %3748 = vmatprep.mubr.f32.mxu0 %v17335_v47  ;;  %3909 = vmatprep.mubr.f32.mxu1 %v17335_v47 }
 0x690   :  { %v12556_v10 = vpop.f32.mrf.mxu1 }
 0x691   :  { %17363 = vst [vmem:[#allocation6_spill] sm:$0xff] %v12556_v10 }
 0x692   :  { %8115 = vmatmul.mubr.msk.f32.gmra.mxu0 %vm3575_vm3, %v12556_v10  ;;  %8131 = vmatmul.mubr.msk.f32.gmra.mxu1 %vm3575_vm3, %v12556_v10 }
 0x693   :  { %3754 = vmatprep.mubr.f32.mxu0 %v17335_v47  ;;  %3915 = vmatprep.mubr.f32.mxu1 %v17335_v47 }
 0x696   :  { %8116 = vmatmul.mubr.msk.f32.gmra.mxu0 %vm3575_vm3, %v12552_v31  ;;  %8132 = vmatmul.mubr.msk.f32.gmra.mxu1 %vm3575_vm3, %v12552_v31  ;;  %v12568_v55 = vpop.f32.mrf.mxu1 }
 0x697   :  { %17364 = vst [vmem:[#allocation26_spill] sm:$0xff] %v12568_v55  ;;  %3760 = vmatprep.mubr.f32.mxu0 %v17335_v47  ;;  %3921 = vmatprep.mubr.f32.mxu1 %v17335_v47 }
 0x698   :  { %v12572_v15 = vpop.f32.mrf.mxu1 }
 0x699   :  { %17365 = vst [vmem:[#allocation4_spill] sm:$0xff] %v12572_v15 }
 0x69a   :  { %8117 = vmatmul.mubr.msk.f32.gmra.mxu0 %vm3575_vm3, %v12572_v15  ;;  %8133 = vmatmul.mubr.msk.f32.gmra.mxu1 %vm3575_vm3, %v12572_v15 }
 0x69b   :  { %3766 = vmatprep.mubr.f32.mxu0 %v17335_v47  ;;  %3927 = vmatprep.mubr.f32.mxu1 %v17335_v47 }
 0x69e   :  { %8118 = vmatmul.mubr.msk.f32.gmra.mxu0 %vm3575_vm3, %v12568_v55  ;;  %8134 = vmatmul.mubr.msk.f32.gmra.mxu1 %vm3575_vm3, %v12568_v55  ;;  %v12584_v54 = vpop.f32.mrf.mxu1 }
 0x69f   :  { %17366 = vst [vmem:[#allocation5_spill] sm:$0xff] %v12584_v54  ;;  %3772 = vmatprep.mubr.f32.mxu0 %v17335_v47  ;;  %3933 = vmatprep.mubr.f32.mxu1 %v17335_v47 }
 0x6a0   :  { %v12588_v53 = vpop.f32.mrf.mxu1 }
 0x6a1   :  { %17367 = vst [vmem:[#allocation25_spill] sm:$0xff] %v12588_v53 }
 0x6a2   :  { %8119 = vmatmul.mubr.msk.f32.gmra.mxu0 %vm3575_vm3, %v12588_v53  ;;  %8135 = vmatmul.mubr.msk.f32.gmra.mxu1 %vm3575_vm3, %v12588_v53 }
 0x6a3   :  { %3778 = vmatprep.mubr.f32.mxu0 %v17335_v47  ;;  %3939 = vmatprep.mubr.f32.mxu1 %v17335_v47 }
 0x6a6   :  { %8120 = vmatmul.mubr.msk.f32.gmra.mxu0 %vm3575_vm3, %v12584_v54  ;;  %8136 = vmatmul.mubr.msk.f32.gmra.mxu1 %vm3575_vm3, %v12584_v54 }
 0x6a7   :  { %4010 = vmatprep.mubr.f32.mxu0 %v17335_v47  ;;  %4171 = vmatprep.mubr.f32.mxu1 %v17335_v47 }
 0x6aa   :  { %8137 = vmatmul.mubr.msk.f32.vlgmr.msra.gmra.mxu0 %vm3575_vm3, %v12458_v16  ;;  %8153 = vmatmul.mubr.msk.f32.vlgmr.msra.gmra.mxu1 %vm3575_vm3, %v12458_v16  ;;  %v3245_v16 = vld [vmem:[%s16885_s14 + $0x3c8] sm:$0xff] }
 0x6ab   :  { %4016 = vmatprep.mubr.f32.mxu0 %v17335_v47  ;;  %4177 = vmatprep.mubr.f32.mxu1 %v17335_v47 }
 0x6ae   :  { %8138 = vmatmul.mubr.msk.f32.gmra.mxu0 %vm3575_vm3, %v12456_v23  ;;  %8154 = vmatmul.mubr.msk.f32.gmra.mxu1 %vm3575_vm3, %v12456_v23 }
 0x6af   :  { %4022 = vmatprep.mubr.f32.mxu0 %v17335_v47  ;;  %4183 = vmatprep.mubr.f32.mxu1 %v17335_v47 }
 0x6b2   :  { %8139 = vmatmul.mubr.msk.f32.gmra.mxu0 %vm3575_vm3, %v12492_v26  ;;  %8155 = vmatmul.mubr.msk.f32.gmra.mxu1 %vm3575_vm3, %v12492_v26 }
 0x6b3   :  { %4028 = vmatprep.mubr.f32.mxu0 %v17335_v47  ;;  %4189 = vmatprep.mubr.f32.mxu1 %v17335_v47 }
 0x6b6   :  { %8140 = vmatmul.mubr.msk.f32.gmra.mxu0 %vm3575_vm3, %v12488_v22  ;;  %8156 = vmatmul.mubr.msk.f32.gmra.mxu1 %vm3575_vm3, %v12488_v22 }
 0x6b7   :  { %4034 = vmatprep.mubr.f32.mxu0 %v17335_v47  ;;  %4195 = vmatprep.mubr.f32.mxu1 %v17335_v47 }
 0x6ba   :  { %8141 = vmatmul.mubr.msk.f32.gmra.mxu0 %vm3575_vm3, %v12508_v14  ;;  %8157 = vmatmul.mubr.msk.f32.gmra.mxu1 %vm3575_vm3, %v12508_v14 }
 0x6bb   :  { %4040 = vmatprep.mubr.f32.mxu0 %v17335_v47  ;;  %4201 = vmatprep.mubr.f32.mxu1 %v17335_v47 }
 0x6be   :  { %8142 = vmatmul.mubr.msk.f32.gmra.mxu0 %vm3575_vm3, %v12504_v43  ;;  %8158 = vmatmul.mubr.msk.f32.gmra.mxu1 %vm3575_vm3, %v12504_v43 }
 0x6bf   :  { %4046 = vmatprep.mubr.f32.mxu0 %v17335_v47  ;;  %4207 = vmatprep.mubr.f32.mxu1 %v17335_v47 }
 0x6c2   :  { %8143 = vmatmul.mubr.msk.f32.gmra.mxu0 %vm3575_vm3, %v12524_v62  ;;  %8159 = vmatmul.mubr.msk.f32.gmra.mxu1 %vm3575_vm3, %v12524_v62 }
 0x6c3   :  { %4052 = vmatprep.mubr.f32.mxu0 %v17335_v47  ;;  %4213 = vmatprep.mubr.f32.mxu1 %v17335_v47 }
 0x6c6   :  { %8144 = vmatmul.mubr.msk.f32.gmra.mxu0 %vm3575_vm3, %v12520_v37  ;;  %8160 = vmatmul.mubr.msk.f32.gmra.mxu1 %vm3575_vm3, %v12520_v37 }
 0x6c7   :  { %4058 = vmatprep.mubr.f32.mxu0 %v17335_v47  ;;  %4219 = vmatprep.mubr.f32.mxu1 %v17335_v47 }
 0x6ca   :  { %8145 = vmatmul.mubr.msk.f32.gmra.mxu0 %vm3575_vm3, %v12540_v6  ;;  %8161 = vmatmul.mubr.msk.f32.gmra.mxu1 %vm3575_vm3, %v12540_v6 }
 0x6cb   :  { %4064 = vmatprep.mubr.f32.mxu0 %v17335_v47  ;;  %4225 = vmatprep.mubr.f32.mxu1 %v17335_v47 }
 0x6ce   :  { %8146 = vmatmul.mubr.msk.f32.gmra.mxu0 %vm3575_vm3, %v12536_v40  ;;  %8162 = vmatmul.mubr.msk.f32.gmra.mxu1 %vm3575_vm3, %v12536_v40 }
 0x6cf   :  { %4070 = vmatprep.mubr.f32.mxu0 %v17335_v47  ;;  %4231 = vmatprep.mubr.f32.mxu1 %v17335_v47 }
 0x6d2   :  { %8147 = vmatmul.mubr.msk.f32.gmra.mxu0 %vm3575_vm3, %v12556_v10  ;;  %8163 = vmatmul.mubr.msk.f32.gmra.mxu1 %vm3575_vm3, %v12556_v10 }
 0x6d3   :  { %4076 = vmatprep.mubr.f32.mxu0 %v17335_v47  ;;  %4237 = vmatprep.mubr.f32.mxu1 %v17335_v47 }
 0x6d6   :  { %8148 = vmatmul.mubr.msk.f32.gmra.mxu0 %vm3575_vm3, %v12552_v31  ;;  %8164 = vmatmul.mubr.msk.f32.gmra.mxu1 %vm3575_vm3, %v12552_v31 }
 0x6d7   :  { %4082 = vmatprep.mubr.f32.mxu0 %v17335_v47  ;;  %4243 = vmatprep.mubr.f32.mxu1 %v17335_v47 }
 0x6da   :  { %8149 = vmatmul.mubr.msk.f32.gmra.mxu0 %vm3575_vm3, %v12572_v15  ;;  %8165 = vmatmul.mubr.msk.f32.gmra.mxu1 %vm3575_vm3, %v12572_v15 }
 0x6db   :  { %4088 = vmatprep.mubr.f32.mxu0 %v17335_v47  ;;  %4249 = vmatprep.mubr.f32.mxu1 %v17335_v47 }
 0x6de   :  { %8150 = vmatmul.mubr.msk.f32.gmra.mxu0 %vm3575_vm3, %v12568_v55  ;;  %8166 = vmatmul.mubr.msk.f32.gmra.mxu1 %vm3575_vm3, %v12568_v55 }
 0x6df   :  { %4094 = vmatprep.mubr.f32.mxu0 %v17335_v47  ;;  %4255 = vmatprep.mubr.f32.mxu1 %v17335_v47 }
 0x6e2   :  { %8151 = vmatmul.mubr.msk.f32.gmra.mxu0 %vm3575_vm3, %v12588_v53  ;;  %8167 = vmatmul.mubr.msk.f32.gmra.mxu1 %vm3575_vm3, %v12588_v53 }
 0x6e3   :  { %4100 = vmatprep.mubr.f32.mxu0 %v17335_v47  ;;  %4261 = vmatprep.mubr.f32.mxu1 %v17335_v47 }
 0x6e6   :  { %8152 = vmatmul.mubr.msk.f32.gmra.mxu0 %vm3575_vm3, %v12584_v54  ;;  %8168 = vmatmul.mubr.msk.f32.gmra.mxu1 %vm3575_vm3, %v12584_v54 }
 0x6e7   :  { %4460 = vmatprep.mubr.f32.mxu0 %v17335_v47  ;;  %4621 = vmatprep.mubr.f32.mxu1 %v17335_v47  ;;  %v3247_v47 = vld [vmem:[%s16885_s14 + $0x3d8] sm:$0xff] }
 0x72a   :  { %v12698_v48 = vpop.f32.mrf.mxu0  ;;  %v12700_v35 = vpop.f32.mrf.mxu1 }
 0x72b   :  { %17368 = vst [vmem:[#allocation3_spill] sm:$0xff] %v12698_v48  ;;  %17369 = vst [vmem:[#allocation28_spill] sm:$0xff] %v12700_v35  ;;  %v3244_v35 = vld [vmem:[%s16885_s14 + $0x3c0] sm:$0xff]  ;;  %v3246_v48 = vld [vmem:[%s16885_s14 + $0x3d0] sm:$0xff] }
 0x72c   :  { %v12702_v21 = vpop.f32.mrf.mxu0  ;;  %v12704_v33 = vpop.f32.mrf.mxu1 }
 0x72d   :  { %17370 = vst [vmem:[#allocation27_spill] sm:$0xff] %v12702_v21  ;;  %17371 = vst [vmem:[#allocation30_spill] sm:$0xff] %v12704_v33  ;;  %v3237_v33 = vld [vmem:[%s16885_s14 + $0x388] sm:$0xff]  ;;  %v3239_v21 = vld [vmem:[%s16885_s14 + $0x398] sm:$0xff] }
 0x72e   :  { %v12706_v59 = vpop.f32.mrf.mxu0  ;;  %v12708_v30 = vpop.f32.mrf.mxu1 }
 0x72f   :  { %17372 = vst [vmem:[#allocation29_spill] sm:$0xff] %v12706_v59  ;;  %17373 = vst [vmem:[#allocation32_spill] sm:$0xff] %v12708_v30 }
 0x730   :  { %v12710_v36 = vpop.f32.mrf.mxu0  ;;  %v12712_v42 = vpop.f32.mrf.mxu1 }
 0x731   :  { %17374 = vst [vmem:[#allocation31_spill] sm:$0xff] %v12710_v36  ;;  %17375 = vst [vmem:[#allocation34_spill] sm:$0xff] %v12712_v42  ;;  %v3236_v42 = vld [vmem:[%s16885_s14 + $0x380] sm:$0xff]  ;;  %v3238_v36 = vld [vmem:[%s16885_s14 + $0x390] sm:$0xff] }
 0x732   :  { %v12714_v3 = vpop.f32.mrf.mxu0  ;;  %v12716_v29 = vpop.f32.mrf.mxu1 }
 0x733   :  { %17376 = vst [vmem:[#allocation33_spill] sm:$0xff] %v12714_v3  ;;  %17377 = vst [vmem:[#allocation41_spill] sm:$0xff] %v12716_v29 }
 0x734   :  { %v12718_v60 = vpop.f32.mrf.mxu0  ;;  %v12720_v49 = vpop.f32.mrf.mxu1 }
 0x735   :  { %17378 = vst [vmem:[#allocation50_spill] sm:$0xff] %v12718_v60  ;;  %17379 = vst [vmem:[#allocation49_spill] sm:$0xff] %v12720_v49  ;;  %v3229_v49 = vld [vmem:[%s16885_s14 + $0x348] sm:$0xff]  ;;  %v3231_v60 = vld [vmem:[%s16885_s14 + $0x358] sm:$0xff] }
 0x736   :  { %v12722_v0 = vpop.f32.mrf.mxu0  ;;  %v12724_v41 = vpop.f32.mrf.mxu1 }
 0x737   :  { %17380 = vst [vmem:[#allocation47_spill] sm:$0xff] %v12722_v0  ;;  %17381 = vst [vmem:[#allocation39_spill] sm:$0xff] %v12724_v41 }
 0x738   :  { %v12726_v5 = vpop.f32.mrf.mxu0  ;;  %v12728_v52 = vpop.f32.mrf.mxu1 }
 0x739   :  { %17382 = vst [vmem:[#allocation42_spill] sm:$0xff] %v12726_v5  ;;  %17383 = vst [vmem:[#allocation48_spill] sm:$0xff] %v12728_v52 }
 0x73a   :  { %v12730_v19 = vpop.f32.mrf.mxu0  ;;  %v12732_v38 = vpop.f32.mrf.mxu1 }
 0x73b   :  { %17384 = vst [vmem:[#allocation51_spill] sm:$0xff] %v12732_v38  ;;  %v3228_v38 = vld [vmem:[%s16885_s14 + $0x340] sm:$0xff] }
 0x73c   :  { %v12734_v12 = vpop.f32.mrf.mxu0  ;;  %v12736_v32 = vpop.f32.mrf.mxu1 }
 0x73e   :  { %v12738_v56 = vpop.f32.mrf.mxu0  ;;  %v12740_v2 = vpop.f32.mrf.mxu1 }
 0x740   :  { %v12742_v58 = vpop.f32.mrf.mxu0  ;;  %v12744_v9 = vpop.f32.mrf.mxu1 }
 0x742   :  { %v12746_v27 = vpop.f32.mrf.mxu0  ;;  %v12748_v51 = vpop.f32.mrf.mxu1 }
 0x744   :  { %v12750_v24 = vpop.f32.mrf.mxu0  ;;  %v12752_v8 = vpop.f32.mrf.mxu1 }
 0x746   :  { %v12754_v57 = vpop.f32.mrf.mxu0  ;;  %v12756_v46 = vpop.f32.mrf.mxu1 }
 0x748   :  { %v12758_v13 = vpop.f32.mrf.mxu0  ;;  %v12760_v63 = vpop.f32.mrf.mxu1 }
 0x74a   :  { %v12762_v61 = vpop.f32.mrf.mxu0  ;;  %v12764_v4 = vpop.f32.mrf.mxu1 }
 0x74c   :  { %v12766_v34 = vpop.f32.mrf.mxu0  ;;  %v12768_v20 = vpop.f32.mrf.mxu1 }
 0x74e   :  { %v12770_v11 = vpop.f32.mrf.mxu0  ;;  %v12772_v17 = vpop.f32.mrf.mxu1 }
 0x750   :  { %v12774_v1 = vpop.f32.mrf.mxu0  ;;  %v12776_v28 = vpop.f32.mrf.mxu1 }
 0x752   :  { %v12778_v50 = vpop.f32.mrf.mxu0  ;;  %v12780_v44 = vpop.f32.mrf.mxu1 }
 0x754   :  { %v12782_v18 = vpop.f32.mrf.mxu0  ;;  %v12784_v39 = vpop.f32.mrf.mxu1 }
 0x756   :  { %v12786_v45 = vpop.f32.mrf.mxu0  ;;  %v12788_v7 = vpop.f32.mrf.mxu1 }
 0x758   :  { %v12790_v54 = vpop.f32.mrf.mxu0  ;;  %v12792_v53 = vpop.f32.mrf.mxu1 }
 0x75a   :  { %v12794_v55 = vpop.f32.mrf.mxu0  ;;  %v12796_v15 = vpop.f32.mrf.mxu1 }
 0x75c   :  { %v3764_v31 = vpop.f32.mrf.mxu0  ;;  %v3925_v10 = vpop.f32.mrf.mxu1 }
 0x75e   :  { %v3768_v40 = vpop.f32.mrf.mxu0  ;;  %v3929_v6 = vpop.f32.mrf.mxu1 }
 0x760   :  { %v3770_v37 = vpop.f32.mrf.mxu0  ;;  %v3931_v62 = vpop.f32.mrf.mxu1 }
 0x762   :  { %v3774_v43 = vpop.f32.mrf.mxu0  ;;  %v3935_v14 = vpop.f32.mrf.mxu1 }
 0x764   :  { %v3776_v22 = vpop.f32.mrf.mxu0  ;;  %v3937_v26 = vpop.f32.mrf.mxu1 }
 0x766   :  { %v3780_v23 = vpop.f32.mrf.mxu0  ;;  %v3941_v25 = vpop.f32.mrf.mxu1 }
 0x767   :  { %v4388_v41 = vmul.f32 %v3780_v23, %v3244_v35  ;;  %v4390_v0 = vmul.f32 %v3941_v25, %v3246_v48  ;;  %v3221_v25 = vld [vmem:[%s16885_s14 + $0x308] sm:$0xff]  ;;  %v3223_v23 = vld [vmem:[%s16885_s14 + $0x318] sm:$0xff]  ;;  %v4380_v48 = vmul.f32 %v3774_v43, %v3236_v42  ;;  %v4382_v35 = vmul.f32 %v3935_v14, %v3238_v36 }
 0x768   :  { %v3782_v30 = vpop.f32.mrf.mxu0  ;;  %v3943_v59 = vpop.f32.mrf.mxu1  ;;  %v3213_v43 = vld [vmem:[%s16885_s14 + $0x2c8] sm:$0xff]  ;;  %v3215_v14 = vld [vmem:[%s16885_s14 + $0x2d8] sm:$0xff]  ;;  %v4372_v36 = vmul.f32 %v3768_v40, %v3228_v38 }
 0x769   :  { %v4389_v29 = vmul.f32 %v3782_v30, %v3245_v16  ;;  %v4391_v3 = vmul.f32 %v3943_v59, %v3247_v47  ;;  %v3230_v47 = vld [vmem:[%s16885_s14 + $0x350] sm:$0xff]  ;;  %v4381_v16 = vmul.f32 %v3776_v22, %v3237_v33  ;;  %v4383_v59 = vmul.f32 %v3937_v26, %v3239_v21  ;;  %v3220_v22 = vld [vmem:[%s16885_s14 + $0x300] sm:$0xff]  ;;  %v3205_v40 = vld [vmem:[%s16885_s14 + $0x288] sm:$0xff] }
 0x76a   :  { %v12828_v52 = vpop.f32.mrf.mxu0  ;;  %v12830_v5 = vpop.f32.mrf.mxu1  ;;  %v3222_v26 = vld [vmem:[%s16885_s14 + $0x310] sm:$0xff]  ;;  %v4373_v21 = vmul.f32 %v3770_v37, %v3229_v49  ;;  %v4375_v33 = vmul.f32 %v3931_v62, %v3231_v60  ;;  %v4374_v42 = vmul.f32 %v3929_v6, %v3230_v47  ;;  %v3212_v37 = vld [vmem:[%s16885_s14 + $0x2c0] sm:$0xff]  ;;  %v4365_v60 = vmul.f32 %v3764_v31, %v3221_v25  ;;  %v3207_v6 = vld [vmem:[%s16885_s14 + $0x298] sm:$0xff] }
 0x76b   :  { %17385 = vst [vmem:[#allocation52_spill] sm:$0xff] %v12828_v52  ;;  %17386 = vst [vmem:[#allocation53_spill] sm:$0xff] %v12830_v5  ;;  %4396 = vmatprep.subr.mxu0 %v4389_v29  ;;  %4557 = vmatprep.subr.mxu1 %v4391_v3  ;;  %v3214_v62 = vld [vmem:[%s16885_s14 + $0x2d0] sm:$0xff]  ;;  %v4367_v49 = vmul.f32 %v3925_v10, %v3223_v23  ;;  %v3204_v31 = vld [vmem:[%s16885_s14 + $0x280] sm:$0xff]  ;;  %v4356_v25 = vmul.f32 %v12786_v45, %v3212_v37 }
 0x76c   :  { %v12844_v30 = vpop.f32.mrf.mxu0  ;;  %v12846_v5 = vpop.f32.mrf.mxu1  ;;  %4397 = vmatpush1.msra.mxu0 %v4388_v41  ;;  %4558 = vmatpush1.msra.mxu1 %v4390_v0  ;;  %v4364_v0 = vmul.f32 %v12794_v55, %v3220_v22  ;;  %v4366_v41 = vmul.f32 %v12796_v15, %v3222_v26  ;;  %v3206_v10 = vld [vmem:[%s16885_s14 + $0x290] sm:$0xff]  ;;  %v4359_v55 = vmul.f32 %v12792_v53, %v3215_v14  ;;  %v3197_v15 = vld [vmem:[%s16885_s14 + $0x248] sm:$0xff]  ;;  %v3191_v26 = vld [vmem:[%s16885_s14 + $0x218] sm:$0xff] }
 0x76d   :  { %17387 = vst [vmem:[#allocation54_spill] sm:$0xff] %v12844_v30  ;;  %17388 = vst [vmem:[#allocation55_spill] sm:$0xff] %v12846_v5  ;;  %4398 = vmatprep.subr.mxu0 %v4381_v16  ;;  %4559 = vmatprep.subr.mxu1 %v4383_v59  ;;  %v4357_v16 = vmul.f32 %v12790_v54, %v3213_v43  ;;  %v3199_v59 = vld [vmem:[%s16885_s14 + $0x258] sm:$0xff]  ;;  %v4358_v23 = vmul.f32 %v12788_v7, %v3214_v62  ;;  %v3196_v54 = vld [vmem:[%s16885_s14 + $0x240] sm:$0xff] }
 0x76e   :  { %v12860_v3 = vpop.f32.mrf.mxu0  ;;  %v12862_v29 = vpop.f32.mrf.mxu1  ;;  %4399 = vmatpush1.msra.mxu0 %v4380_v48  ;;  %4560 = vmatpush1.msra.mxu1 %v4382_v35  ;;  %v3198_v53 = vld [vmem:[%s16885_s14 + $0x250] sm:$0xff]  ;;  %v4349_v22 = vmul.f32 %v12782_v18, %v3205_v40  ;;  %v4351_v45 = vmul.f32 %v12784_v39, %v3207_v6  ;;  %v3189_v7 = vld [vmem:[%s16885_s14 + $0x208] sm:$0xff]  ;;  %v3188_v18 = vld [vmem:[%s16885_s14 + $0x200] sm:$0xff]  ;;  %v4340_v37 = vmul.f32 %v12770_v11, %v3196_v54 }
 0x76f   :  { %17389 = vst [vmem:[#allocation56_spill] sm:$0xff] %v12860_v3  ;;  %17390 = vst [vmem:[#allocation57_spill] sm:$0xff] %v12862_v29  ;;  %4400 = vmatprep.subr.mxu0 %v4373_v21  ;;  %4561 = vmatprep.subr.mxu1 %v4375_v33  ;;  %v4348_v21 = vmul.f32 %v12778_v50, %v3204_v31  ;;  %v4350_v33 = vmul.f32 %v12780_v44, %v3206_v10  ;;  %v3190_v39 = vld [vmem:[%s16885_s14 + $0x210] sm:$0xff]  ;;  %v3181_v44 = vld [vmem:[%s16885_s14 + $0x1c8] sm:$0xff] }
 0x770   :  { %v12878_v38 = vpop.f32.mrf.mxu0  ;;  %v12880_v47 = vpop.f32.mrf.mxu1  ;;  %4401 = vmatpush1.msra.mxu0 %v4372_v36  ;;  %4562 = vmatpush1.msra.mxu1 %v4374_v42  ;;  %v4341_v36 = vmul.f32 %v12774_v1, %v3197_v15  ;;  %v4343_v50 = vmul.f32 %v12776_v28, %v3199_v59  ;;  %v3183_v42 = vld [vmem:[%s16885_s14 + $0x1d8] sm:$0xff]  ;;  %v4342_v62 = vmul.f32 %v12772_v17, %v3198_v53  ;;  %v3180_v1 = vld [vmem:[%s16885_s14 + $0x1c0] sm:$0xff]  ;;  %v3182_v28 = vld [vmem:[%s16885_s14 + $0x1d0] sm:$0xff] }
 0x771   :  { %17391 = vst [vmem:[#allocation58_spill] sm:$0xff] %v12878_v38  ;;  %17392 = vst [vmem:[#allocation59_spill] sm:$0xff] %v12880_v47  ;;  %4402 = vmatprep.subr.mxu0 %v4365_v60  ;;  %4563 = vmatprep.subr.mxu1 %v4367_v49  ;;  %v4333_v40 = vmul.f32 %v12766_v34, %v3189_v7  ;;  %v4335_v11 = vmul.f32 %v12768_v20, %v3191_v26  ;;  %v3173_v17 = vld [vmem:[%s16885_s14 + $0x188] sm:$0xff]  ;;  %v3175_v6 = vld [vmem:[%s16885_s14 + $0x198] sm:$0xff] }
 0x772   :  { %v12898_v48 = vpop.f32.mrf.mxu0  ;;  %v12900_v35 = vpop.f32.mrf.mxu1  ;;  %4403 = vmatpush1.msra.mxu0 %v4364_v0  ;;  %4564 = vmatpush1.msra.mxu1 %v4366_v41  ;;  %v4332_v0 = vmul.f32 %v12762_v61, %v3188_v18  ;;  %v4334_v41 = vmul.f32 %v12764_v4, %v3190_v39  ;;  %v3172_v34 = vld [vmem:[%s16885_s14 + $0x180] sm:$0xff]  ;;  %v3174_v20 = vld [vmem:[%s16885_s14 + $0x190] sm:$0xff]  ;;  %v4327_v61 = vmul.f32 %v12760_v63, %v3183_v42  ;;  %v3165_v4 = vld [vmem:[%s16885_s14 + $0x148] sm:$0xff] }
 0x773   :  { %17393 = vst [vmem:[#allocation60_spill] sm:$0xff] %v12898_v48  ;;  %17394 = vst [vmem:[#allocation61_spill] sm:$0xff] %v12900_v35  ;;  %4404 = vmatprep.subr.mxu0 %v4357_v16  ;;  %4565 = vmatprep.subr.mxu1 %v4359_v55  ;;  %v4325_v16 = vmul.f32 %v12758_v13, %v3181_v44  ;;  %v3167_v55 = vld [vmem:[%s16885_s14 + $0x158] sm:$0xff]  ;;  %v4324_v15 = vmul.f32 %v12754_v57, %v3180_v1  ;;  %v3164_v63 = vld [vmem:[%s16885_s14 + $0x140] sm:$0xff] }
 0x774   :  { %v12918_v43 = vpop.f32.mrf.mxu0  ;;  %v12920_v14 = vpop.f32.mrf.mxu1  ;;  %4405 = vmatpush1.msra.mxu0 %v4356_v25  ;;  %4566 = vmatpush1.msra.mxu1 %v4358_v23  ;;  %v4326_v59 = vmul.f32 %v12756_v46, %v3182_v28  ;;  %v3166_v13 = vld [vmem:[%s16885_s14 + $0x150] sm:$0xff]  ;;  %v4317_v54 = vmul.f32 %v12750_v24, %v3173_v17  ;;  %v4319_v57 = vmul.f32 %v12752_v8, %v3175_v6  ;;  %v3157_v46 = vld [vmem:[%s16885_s14 + $0x108] sm:$0xff]  ;;  %v3159_v53 = vld [vmem:[%s16885_s14 + $0x118] sm:$0xff] }
 0x775   :  { %17395 = vst [vmem:[#allocation62_spill] sm:$0xff] %v12918_v43  ;;  %17396 = vst [vmem:[#allocation63_spill] sm:$0xff] %v12920_v14  ;;  %4406 = vmatprep.subr.mxu0 %v4349_v22  ;;  %4567 = vmatprep.subr.mxu1 %v4351_v45  ;;  %v4316_v22 = vmul.f32 %v12746_v27, %v3172_v34  ;;  %v4318_v45 = vmul.f32 %v12748_v51, %v3174_v20  ;;  %v3156_v24 = vld [vmem:[%s16885_s14 + $0x100] sm:$0xff]  ;;  %v3158_v8 = vld [vmem:[%s16885_s14 + $0x110] sm:$0xff] }
 0x776   :  { %v12938_v60 = vpop.f32.mrf.mxu0  ;;  %v12940_v49 = vpop.f32.mrf.mxu1  ;;  %4407 = vmatpush1.msra.mxu0 %v4348_v21  ;;  %4568 = vmatpush1.msra.mxu1 %v4350_v33  ;;  %v4309_v21 = vmul.f32 %v12742_v58, %v3165_v4  ;;  %v4311_v27 = vmul.f32 %v12744_v9, %v3167_v55  ;;  %v3149_v51 = vld [vmem:[%s16885_s14 + $0xc8] sm:$0xff]  ;;  %v3151_v33 = vld [vmem:[%s16885_s14 + $0xd8] sm:$0xff]  ;;  %v4308_v18 = vmul.f32 %v12738_v56, %v3164_v63  ;;  %v3148_v58 = vld [vmem:[%s16885_s14 + $0xc0] sm:$0xff] }
 0x777   :  { %17397 = vst [vmem:[#allocation64_spill] sm:$0xff] %v12938_v60  ;;  %17398 = vst [vmem:[#allocation65_spill] sm:$0xff] %v12940_v49  ;;  %4408 = vmatprep.subr.mxu0 %v4341_v36  ;;  %4569 = vmatprep.subr.mxu1 %v4343_v50  ;;  %v4310_v39 = vmul.f32 %v12740_v2, %v3166_v13  ;;  %v3150_v9 = vld [vmem:[%s16885_s14 + $0xd0] sm:$0xff]  ;;  %v4301_v44 = vmul.f32 %v12734_v12, %v3157_v46  ;;  %v3141_v2 = vld [vmem:[%s16885_s14 + $0x88] sm:$0xff] }
 0x778   :  { %v12958_v31 = vpop.f32.mrf.mxu0  ;;  %v12960_v10 = vpop.f32.mrf.mxu1  ;;  %4409 = vmatpush1.msra.mxu0 %v4340_v37  ;;  %4570 = vmatpush1.msra.mxu1 %v4342_v62  ;;  %v4303_v56 = vmul.f32 %v12736_v32, %v3159_v53  ;;  %v3143_v42 = vld [vmem:[%s16885_s14 + $0x98] sm:$0xff]  ;;  %v4300_v37 = vmul.f32 %v12730_v19, %v3156_v24  ;;  %v17401_v62 = vld [vmem:[#allocation51_spill] sm:$0xff]  ;;  %v3142_v32 = vld [vmem:[%s16885_s14 + $0x90] sm:$0xff] }
 0x779   :  { %17399 = vst [vmem:[#allocation66_spill] sm:$0xff] %v12958_v31  ;;  %17400 = vst [vmem:[#allocation67_spill] sm:$0xff] %v12960_v10  ;;  %4410 = vmatprep.subr.mxu0 %v4333_v40  ;;  %4571 = vmatprep.subr.mxu1 %v4335_v11  ;;  %v4302_v1 = vmul.f32 %v17401_v62, %v3158_v8  ;;  %v3140_v12 = vld [vmem:[%s16885_s14 + $0x80] sm:$0xff]  ;;  %v17403_v6 = vld [vmem:[#allocation48_spill] sm:$0xff] }
 0x77a   :  { %v12978_v25 = vpop.f32.mrf.mxu0  ;;  %v12980_v23 = vpop.f32.mrf.mxu1  ;;  %4411 = vmatpush1.msra.mxu0 %v4332_v0  ;;  %4572 = vmatpush1.msra.mxu1 %v4334_v41  ;;  %v17402_v11 = vld [vmem:[#allocation42_spill] sm:$0xff]  ;;  %v4295_v19 = vmul.f32 %v17403_v6, %v3151_v33  ;;  %v3133_v0 = vld [vmem:[%s16885_s14 + $0x48] sm:$0xff]  ;;  %v17409_v24 = vld [vmem:[#allocation41_spill] sm:$0xff] }
 0x77b   :  { %4412 = vmatprep.subr.mxu0 %v4325_v16  ;;  %4573 = vmatprep.subr.mxu1 %v4327_v61  ;;  %v4293_v17 = vmul.f32 %v17402_v11, %v3149_v51  ;;  %v3135_v41 = vld [vmem:[%s16885_s14 + $0x58] sm:$0xff]  ;;  %v17404_v34 = vld [vmem:[#allocation47_spill] sm:$0xff]  ;;  %v4286_v8 = vmul.f32 %v17409_v24, %v3142_v32  ;;  %v3126_v33 = vld [vmem:[%s16885_s14 + $0x10] sm:$0xff] }
 0x77c   :  { %v12998_v7 = vpop.f32.mrf.mxu0  ;;  %v13000_v26 = vpop.f32.mrf.mxu1  ;;  %4413 = vmatpush1.msra.mxu0 %v4324_v15  ;;  %4574 = vmatpush1.msra.mxu1 %v4326_v59  ;;  %v4292_v20 = vmul.f32 %v17404_v34, %v3148_v58  ;;  %v17405_v16 = vld [vmem:[#allocation39_spill] sm:$0xff]  ;;  %v3134_v59 = vld [vmem:[%s16885_s14 + $0x50] sm:$0xff]  ;;  %v17406_v63 = vld [vmem:[#allocation50_spill] sm:$0xff] }
 0x77d   :  { %4414 = vmatprep.subr.mxu0 %v4317_v54  ;;  %4575 = vmatprep.subr.mxu1 %v4319_v57  ;;  %v4294_v61 = vmul.f32 %v17405_v16, %v3150_v9  ;;  %v3132_v15 = vld [vmem:[%s16885_s14 + $0x40] sm:$0xff]  ;;  %v4285_v13 = vmul.f32 %v17406_v63, %v3141_v2  ;;  %v17407_v54 = vld [vmem:[#allocation49_spill] sm:$0xff]  ;;  %v3125_v46 = vld [vmem:[%s16885_s14 + $0x8] sm:$0xff]  ;;  %v17419_v63 = vmov 0.0  }
 0x77e   :  { %v13018_v36 = vpop.f32.mrf.mxu0  ;;  %v13020_v50 = vpop.f32.mrf.mxu1  ;;  %4415 = vmatpush1.msra.mxu0 %v4316_v22  ;;  %4576 = vmatpush1.msra.mxu1 %v4318_v45  ;;  %v4287_v57 = vmul.f32 %v17407_v54, %v3143_v42  ;;  %v3127_v53 = vld [vmem:[%s16885_s14 + $0x18] sm:$0xff]  ;;  %v3124_v51 = vld [vmem:[%s16885_s14] sm:$0xff]  ;;  %v17413_v2 = vld [vmem:[#allocation32_spill] sm:$0xff] }
 0x77f   :  { %4416 = vmatprep.subr.mxu0 %v4309_v21  ;;  %4577 = vmatprep.subr.mxu1 %v4311_v27  ;;  %v17408_v22 = vld [vmem:[#allocation33_spill] sm:$0xff]  ;;  %v17411_v58 = vld [vmem:[#allocation34_spill] sm:$0xff]  ;;  %v4278_v42 = vmul.f32 %v17413_v2, %v3134_v59  ;;  %v3241_v47 = vld [vmem:[%s16885_s14 + $0x3a8] sm:$0xff] }
 0x780   :  { %v13038_v28 = vpop.f32.mrf.mxu0  ;;  %v13040_v40 = vpop.f32.mrf.mxu1  ;;  %4417 = vmatpush1.msra.mxu0 %v4308_v18  ;;  %4578 = vmatpush1.msra.mxu1 %v4310_v39  ;;  %v4284_v45 = vmul.f32 %v17408_v22, %v3140_v12  ;;  %v17410_v18 = vld [vmem:[#allocation31_spill] sm:$0xff]  ;;  %v4279_v9 = vmul.f32 %v17411_v58, %v3135_v41  ;;  %v17415_v32 = vld [vmem:[#allocation30_spill] sm:$0xff]  ;;  %v3250_v30 = vld [vmem:[%s16885_s14 + $0x3f0] sm:$0xff] }
 0x781   :  { %4418 = vmatprep.subr.mxu0 %v4301_v44  ;;  %4579 = vmatprep.subr.mxu1 %v4303_v56  ;;  %v4277_v39 = vmul.f32 %v17410_v18, %v3133_v0  ;;  %v17412_v44 = vld [vmem:[#allocation29_spill] sm:$0xff]  ;;  %v4271_v11 = vmul.f32 %v17415_v32, %v3127_v53  ;;  %v3248_v5 = vld [vmem:[%s16885_s14 + $0x3e0] sm:$0xff] }
 0x782   :  { %v13058_v4 = vpop.f32.mrf.mxu0  ;;  %v13060_v55 = vpop.f32.mrf.mxu1  ;;  %4419 = vmatpush1.msra.mxu0 %v4300_v37  ;;  %4580 = vmatpush1.msra.mxu1 %v4302_v1  ;;  %v4276_v56 = vmul.f32 %v17412_v44, %v3132_v15  ;;  %v17414_v1 = vld [vmem:[#allocation27_spill] sm:$0xff]  ;;  %v3251_v52 = vld [vmem:[%s16885_s14 + $0x3f8] sm:$0xff]  ;;  %v3242_v43 = vld [vmem:[%s16885_s14 + $0x3b0] sm:$0xff] }
 0x783   :  { %4420 = vmatprep.subr.mxu0 %v4293_v17  ;;  %4581 = vmatprep.subr.mxu1 %v4295_v19  ;;  %v4269_v12 = vmul.f32 %v17414_v1, %v3125_v46  ;;  %v17416_v17 = vld [vmem:[#allocation3_spill] sm:$0xff]  ;;  %v17417_v19 = vld [vmem:[#allocation28_spill] sm:$0xff]  ;;  %v3243_v38 = vld [vmem:[%s16885_s14 + $0x3b8] sm:$0xff] }
 0x784   :  { %v13078_v21 = vpop.f32.mrf.mxu0  ;;  %v13080_v27 = vpop.f32.mrf.mxu1  ;;  %4421 = vmatpush1.msra.mxu0 %v4292_v20  ;;  %4582 = vmatpush1.msra.mxu1 %v4294_v61  ;;  %v4268_v6 = vmul.f32 %v17416_v17, %v3124_v51  ;;  %v4270_v0 = vmul.f32 %v17417_v19, %v3126_v33  ;;  %v17418_v61 = vmov 1.0   ;;  %v3240_v14 = vld [vmem:[%s16885_s14 + $0x3a0] sm:$0xff] }
 0x785   :  { %4422 = vmatprep.subr.mxu0 %v4285_v13  ;;  %4583 = vmatprep.subr.mxu1 %v4287_v57 }
 0x786   :  { %v13092_v37 = vpop.f32.mrf.mxu0  ;;  %v13094_v62 = vpop.f32.mrf.mxu1  ;;  %4423 = vmatpush1.msra.mxu0 %v4284_v45  ;;  %4584 = vmatpush1.msra.mxu1 %v4286_v8 }
 0x787   :  { %4424 = vmatprep.subr.mxu0 %v4277_v39  ;;  %4585 = vmatprep.subr.mxu1 %v4279_v9 }
 0x788   :  { %v13100_v41 = vpop.f32.mrf.mxu0  ;;  %v13102_v34 = vpop.f32.mrf.mxu1  ;;  %4425 = vmatpush1.msra.mxu0 %v4276_v56  ;;  %4586 = vmatpush1.msra.mxu1 %v4278_v42 }
 0x789   :  { %4426 = vmatprep.subr.mxu0 %v4269_v12  ;;  %4587 = vmatprep.subr.mxu1 %v4271_v11 }
 0x78a   :  { %v13104_v20 = vpop.f32.mrf.mxu0  ;;  %v13106_v16 = vpop.f32.mrf.mxu1  ;;  %4427 = vmatpush1.msra.mxu0 %v4268_v6  ;;  %4588 = vmatpush1.msra.mxu1 %v4270_v0  ;;  %v3249_v0 = vld [vmem:[%s16885_s14 + $0x3e8] sm:$0xff] }
 0x78b   :  { %4461 = vmatmul.mubr.f32.vlgmr.msra.gmra.mxu0 %v17418_v61  ;;  %4622 = vmatmul.mubr.f32.vlgmr.msra.gmra.mxu1 %v17418_v61 }
 0x78c   :  { %v13110_v15 = vpop.f32.mrf.mxu0  ;;  %v13112_v59 = vpop.f32.mrf.mxu1  ;;  %4466 = vmatprep.mubr.f32.mxu0 %v17419_v63  ;;  %4627 = vmatprep.mubr.f32.mxu1 %v17419_v63 }
 0x78e   :  { %v13116_v13 = vpop.f32.mrf.mxu0  ;;  %v13118_v54 = vpop.f32.mrf.mxu1 }
 0x78f   :  { %4467 = vmatmul.mubr.f32.gmra.mxu0 %v17418_v61  ;;  %4628 = vmatmul.mubr.f32.gmra.mxu1 %v17418_v61 }
 0x790   :  { %v13122_v57 = vpop.f32.mrf.mxu0  ;;  %v13124_v46 = vpop.f32.mrf.mxu1  ;;  %4472 = vmatprep.mubr.f32.mxu0 %v17419_v63  ;;  %4633 = vmatprep.mubr.f32.mxu1 %v17419_v63 }
 0x792   :  { %v13128_v53 = vpop.f32.mrf.mxu0  ;;  %v13130_v22 = vpop.f32.mrf.mxu1 }
 0x793   :  { %4473 = vmatmul.mubr.f32.gmra.mxu0 %v17418_v61  ;;  %4634 = vmatmul.mubr.f32.gmra.mxu1 %v17418_v61 }
 0x794   :  { %v13134_v45 = vpop.f32.mrf.mxu0  ;;  %v13136_v24 = vpop.f32.mrf.mxu1  ;;  %4478 = vmatprep.mubr.f32.mxu0 %v17419_v63  ;;  %4639 = vmatprep.mubr.f32.mxu1 %v17419_v63 }
 0x796   :  { %v13140_v8 = vpop.f32.mrf.mxu0  ;;  %v13142_v51 = vpop.f32.mrf.mxu1 }
 0x797   :  { %4479 = vmatmul.mubr.f32.gmra.mxu0 %v17418_v61  ;;  %4640 = vmatmul.mubr.f32.gmra.mxu1 %v17418_v61 }
 0x798   :  { %v13146_v33 = vpop.f32.mrf.mxu0  ;;  %v13148_v18 = vpop.f32.mrf.mxu1  ;;  %4484 = vmatprep.mubr.f32.mxu0 %v17419_v63  ;;  %4645 = vmatprep.mubr.f32.mxu1 %v17419_v63 }
 0x79a   :  { %v13152_v39 = vpop.f32.mrf.mxu0  ;;  %v13154_v58 = vpop.f32.mrf.mxu1 }
 0x79b   :  { %4485 = vmatmul.mubr.f32.gmra.mxu0 %v17418_v61  ;;  %4646 = vmatmul.mubr.f32.gmra.mxu1 %v17418_v61 }
 0x79c   :  { %v13158_v9 = vpop.f32.mrf.mxu0  ;;  %v13160_v44 = vpop.f32.mrf.mxu1  ;;  %4490 = vmatprep.mubr.f32.mxu0 %v17419_v63  ;;  %4651 = vmatprep.mubr.f32.mxu1 %v17419_v63 }
 0x79e   :  { %v4090_v56 = vpop.f32.mrf.mxu0  ;;  %v4251_v2 = vpop.f32.mrf.mxu1 }
 0x79f   :  { %4491 = vmatmul.mubr.f32.gmra.mxu0 %v17418_v61  ;;  %4652 = vmatmul.mubr.f32.gmra.mxu1 %v17418_v61 }
 0x7a0   :  { %v4092_v42 = vpop.f32.mrf.mxu0  ;;  %v4253_v1 = vpop.f32.mrf.mxu1  ;;  %4496 = vmatprep.mubr.f32.mxu0 %v17419_v63  ;;  %4657 = vmatprep.mubr.f32.mxu1 %v17419_v63 }
 0x7a2   :  { %v4096_v12 = vpop.f32.mrf.mxu0  ;;  %v4257_v32 = vpop.f32.mrf.mxu1 }
 0x7a3   :  { %4497 = vmatmul.mubr.f32.gmra.mxu0 %v17418_v61  ;;  %4658 = vmatmul.mubr.f32.gmra.mxu1 %v17418_v61 }
 0x7a4   :  { %v4098_v11 = vpop.f32.mrf.mxu0  ;;  %v4259_v17 = vpop.f32.mrf.mxu1  ;;  %4502 = vmatprep.mubr.f32.mxu0 %v17419_v63  ;;  %4663 = vmatprep.mubr.f32.mxu1 %v17419_v63 }
 0x7a5   :  { %v4385_v10 = vmul.f32 %v4098_v11, %v3241_v47  ;;  %v4387_v31 = vmul.f32 %v4259_v17, %v3243_v38  ;;  %v4386_v38 = vmul.f32 %v4257_v32, %v3242_v43  ;;  %v3225_v47 = vld [vmem:[%s16885_s14 + $0x328] sm:$0xff]  ;;  %v3224_v43 = vld [vmem:[%s16885_s14 + $0x320] sm:$0xff]  ;;  %v3211_v11 = vld [vmem:[%s16885_s14 + $0x2b8] sm:$0xff] }
 0x7a6   :  { %v4102_v6 = vpop.f32.mrf.mxu0  ;;  %v4263_v19 = vpop.f32.mrf.mxu1  ;;  %v3209_v32 = vld [vmem:[%s16885_s14 + $0x2a8] sm:$0xff] }
 0x7a7   :  { %4503 = vmatmul.mubr.f32.gmra.mxu0 %v17418_v61  ;;  %4664 = vmatmul.mubr.f32.gmra.mxu1 %v17418_v61  ;;  %v4392_v49 = vmul.f32 %v4102_v6, %v3248_v5  ;;  %v4394_v60 = vmul.f32 %v4263_v19, %v3250_v30  ;;  %v3232_v5 = vld [vmem:[%s16885_s14 + $0x360] sm:$0xff]  ;;  %v3234_v30 = vld [vmem:[%s16885_s14 + $0x370] sm:$0xff] }
 0x7a8   :  { %v4104_v29 = vpop.f32.mrf.mxu0  ;;  %v4265_v3 = vpop.f32.mrf.mxu1  ;;  %4508 = vmatprep.mubr.f32.mxu0 %v17419_v63  ;;  %4669 = vmatprep.mubr.f32.mxu1 %v17419_v63  ;;  %v3210_v6 = vld [vmem:[%s16885_s14 + $0x2b0] sm:$0xff] }
 0x7a9   :  { %v4393_v35 = vmul.f32 %v4104_v29, %v3249_v0  ;;  %v4395_v48 = vmul.f32 %v4265_v3, %v3251_v52  ;;  %v3233_v52 = vld [vmem:[%s16885_s14 + $0x368] sm:$0xff]  ;;  %v3235_v3 = vld [vmem:[%s16885_s14 + $0x378] sm:$0xff]  ;;  %v4384_v29 = vmul.f32 %v4096_v12, %v3240_v14  ;;  %v3226_v14 = vld [vmem:[%s16885_s14 + $0x330] sm:$0xff] }
 0x7aa   :  { %v3219_v12 = vld [vmem:[%s16885_s14 + $0x2f8] sm:$0xff] }
 0x7ab   :  { %4509 = vmatmul.mubr.f32.gmra.mxu0 %v17418_v61  ;;  %4670 = vmatmul.mubr.f32.gmra.mxu1 %v17418_v61 }
 0x7ac   :  { %4718 = vmatprep.subr.mxu0 %v4393_v35  ;;  %4879 = vmatprep.subr.mxu1 %v4395_v48  ;;  %v3227_v48 = vld [vmem:[%s16885_s14 + $0x338] sm:$0xff]  ;;  %v4377_v35 = vmul.f32 %v4092_v42, %v3233_v52  ;;  %v3201_v52 = vld [vmem:[%s16885_s14 + $0x268] sm:$0xff] }
 0x7ad   :  { %4719 = vmatpush1.msra.mxu0 %v4392_v49  ;;  %4880 = vmatpush1.msra.mxu1 %v4394_v60  ;;  %v4379_v60 = vmul.f32 %v4253_v1, %v3235_v3  ;;  %v4376_v49 = vmul.f32 %v4090_v56, %v3232_v5  ;;  %v4371_v42 = vmul.f32 %v13160_v44, %v3227_v48  ;;  %v3217_v1 = vld [vmem:[%s16885_s14 + $0x2e8] sm:$0xff]  ;;  %v3216_v56 = vld [vmem:[%s16885_s14 + $0x2e0] sm:$0xff] }
 0x7ae   :  { %4720 = vmatprep.subr.mxu0 %v4385_v10  ;;  %4881 = vmatprep.subr.mxu1 %v4387_v31  ;;  %v4378_v31 = vmul.f32 %v4251_v2, %v3234_v30  ;;  %v4369_v10 = vmul.f32 %v13158_v9, %v3225_v47  ;;  %v3218_v9 = vld [vmem:[%s16885_s14 + $0x2f0] sm:$0xff]  ;;  %v4368_v44 = vmul.f32 %v13152_v39, %v3224_v43  ;;  %v3193_v5 = vld [vmem:[%s16885_s14 + $0x228] sm:$0xff]  ;;  %v3195_v30 = vld [vmem:[%s16885_s14 + $0x238] sm:$0xff] }
 0x7af   :  { %4514 = vmatprep.mubr.f32.mxu0 %v17419_v63  ;;  %4675 = vmatprep.mubr.f32.mxu1 %v17419_v63  ;;  %v4370_v2 = vmul.f32 %v13154_v58, %v3226_v14  ;;  %v4361_v17 = vmul.f32 %v13146_v33, %v3217_v1  ;;  %v4363_v39 = vmul.f32 %v13148_v18, %v3219_v12  ;;  %v3208_v58 = vld [vmem:[%s16885_s14 + $0x2a0] sm:$0xff]  ;;  %v3177_v43 = vld [vmem:[%s16885_s14 + $0x1a8] sm:$0xff]  ;;  %v3179_v14 = vld [vmem:[%s16885_s14 + $0x1b8] sm:$0xff] }
 0x7b0   :  { %4721 = vmatpush1.msra.mxu0 %v4384_v29  ;;  %4882 = vmatpush1.msra.mxu1 %v4386_v38  ;;  %v4360_v19 = vmul.f32 %v13140_v8, %v3216_v56  ;;  %v4362_v0 = vmul.f32 %v13142_v51, %v3218_v9  ;;  %v4353_v33 = vmul.f32 %v13134_v45, %v3209_v32  ;;  %v3203_v8 = vld [vmem:[%s16885_s14 + $0x278] sm:$0xff]  ;;  %v3200_v51 = vld [vmem:[%s16885_s14 + $0x260] sm:$0xff]  ;;  %v3202_v45 = vld [vmem:[%s16885_s14 + $0x270] sm:$0xff] }
 0x7b1   :  { %4515 = vmatmul.mubr.f32.gmra.mxu0 %v17418_v61  ;;  %4676 = vmatmul.mubr.f32.gmra.mxu1 %v17418_v61  ;;  %v4355_v18 = vmul.f32 %v13136_v24, %v3211_v11  ;;  %v4352_v24 = vmul.f32 %v13128_v53, %v3208_v58  ;;  %v4354_v3 = vmul.f32 %v13130_v22, %v3210_v6  ;;  %v3192_v22 = vld [vmem:[%s16885_s14 + $0x220] sm:$0xff]  ;;  %v3194_v38 = vld [vmem:[%s16885_s14 + $0x230] sm:$0xff]  ;;  %v3169_v1 = vld [vmem:[%s16885_s14 + $0x168] sm:$0xff] }
 0x7b2   :  { %4722 = vmatprep.subr.mxu0 %v4377_v35  ;;  %4883 = vmatprep.subr.mxu1 %v4379_v60  ;;  %v4345_v29 = vmul.f32 %v13122_v57, %v3201_v52  ;;  %v4347_v53 = vmul.f32 %v13124_v46, %v3203_v8  ;;  %v4344_v47 = vmul.f32 %v13116_v13, %v3200_v51  ;;  %v3185_v35 = vld [vmem:[%s16885_s14 + $0x1e8] sm:$0xff]  ;;  %v3187_v13 = vld [vmem:[%s16885_s14 + $0x1f8] sm:$0xff] }
 0x7b3   :  { %4723 = vmatpush1.msra.mxu0 %v4376_v49  ;;  %4884 = vmatpush1.msra.mxu1 %v4378_v31  ;;  %v4346_v48 = vmul.f32 %v13118_v54, %v3202_v45  ;;  %v4337_v57 = vmul.f32 %v13110_v15, %v3193_v5  ;;  %v4339_v46 = vmul.f32 %v13112_v59, %v3195_v30  ;;  %v3184_v54 = vld [vmem:[%s16885_s14 + $0x1e0] sm:$0xff]  ;;  %v3186_v15 = vld [vmem:[%s16885_s14 + $0x1f0] sm:$0xff]  ;;  %v3161_v56 = vld [vmem:[%s16885_s14 + $0x128] sm:$0xff] }
 0x7b4   :  { %4724 = vmatprep.subr.mxu0 %v4369_v10  ;;  %4885 = vmatprep.subr.mxu1 %v4371_v42  ;;  %v4336_v59 = vmul.f32 %v13104_v20, %v3192_v22  ;;  %v4338_v60 = vmul.f32 %v13106_v16, %v3194_v38  ;;  %v4329_v49 = vmul.f32 %v13100_v41, %v3185_v35  ;;  %v3176_v16 = vld [vmem:[%s16885_s14 + $0x1a0] sm:$0xff]  ;;  %v3178_v31 = vld [vmem:[%s16885_s14 + $0x1b0] sm:$0xff]  ;;  %v3163_v9 = vld [vmem:[%s16885_s14 + $0x138] sm:$0xff] }
 0x7b5   :  { %4520 = vmatprep.mubr.f32.mxu0 %v17419_v63  ;;  %4681 = vmatprep.mubr.f32.mxu1 %v17419_v63  ;;  %v4331_v20 = vmul.f32 %v13102_v34, %v3187_v13  ;;  %v4328_v10 = vmul.f32 %v13092_v37, %v3184_v54  ;;  %v4330_v42 = vmul.f32 %v13094_v62, %v3186_v15  ;;  %v3171_v37 = vld [vmem:[%s16885_s14 + $0x178] sm:$0xff]  ;;  %v3168_v62 = vld [vmem:[%s16885_s14 + $0x160] sm:$0xff]  ;;  %v3145_v58 = vld [vmem:[%s16885_s14 + $0xa8] sm:$0xff] }
 0x7b6   :  { %4725 = vmatpush1.msra.mxu0 %v4368_v44  ;;  %4886 = vmatpush1.msra.mxu1 %v4370_v2  ;;  %v4321_v41 = vmul.f32 %v13078_v21, %v3177_v43  ;;  %v4323_v34 = vmul.f32 %v13080_v27, %v3179_v14  ;;  %v3170_v21 = vld [vmem:[%s16885_s14 + $0x170] sm:$0xff]  ;;  %v4320_v27 = vmul.f32 %v13058_v4, %v3176_v16  ;;  %v3147_v6 = vld [vmem:[%s16885_s14 + $0xb8] sm:$0xff]  ;;  %v17425_v5 = vld [vmem:[#allocation63_spill] sm:$0xff] }
 0x7b7   :  { %4521 = vmatmul.mubr.f32.gmra.mxu0 %v17418_v61  ;;  %4682 = vmatmul.mubr.f32.gmra.mxu1 %v17418_v61  ;;  %v4322_v12 = vmul.f32 %v13060_v55, %v3178_v31  ;;  %v4313_v44 = vmul.f32 %v13038_v28, %v3169_v1  ;;  %v4315_v4 = vmul.f32 %v13040_v40, %v3171_v37  ;;  %v3160_v55 = vld [vmem:[%s16885_s14 + $0x120] sm:$0xff]  ;;  %v3162_v2 = vld [vmem:[%s16885_s14 + $0x130] sm:$0xff]  ;;  %v3129_v35 = vld [vmem:[%s16885_s14 + $0x28] sm:$0xff] }
 0x7b8   :  { %4726 = vmatprep.subr.mxu0 %v4361_v17  ;;  %4887 = vmatprep.subr.mxu1 %v4363_v39  ;;  %v4312_v32 = vmul.f32 %v13018_v36, %v3168_v62  ;;  %v4314_v11 = vmul.f32 %v13020_v50, %v3170_v21  ;;  %v4305_v28 = vmul.f32 %v12998_v7, %v3161_v56  ;;  %v3153_v17 = vld [vmem:[%s16885_s14 + $0xe8] sm:$0xff]  ;;  %v3155_v36 = vld [vmem:[%s16885_s14 + $0xf8] sm:$0xff]  ;;  %v3152_v50 = vld [vmem:[%s16885_s14 + $0xe0] sm:$0xff] }
 0x7b9   :  { %4727 = vmatpush1.msra.mxu0 %v4360_v19  ;;  %4888 = vmatpush1.msra.mxu1 %v4362_v0  ;;  %v4307_v40 = vmul.f32 %v13000_v26, %v3163_v9  ;;  %v3154_v7 = vld [vmem:[%s16885_s14 + $0xf0] sm:$0xff]  ;;  %v4304_v26 = vmul.f32 %v12978_v25, %v3160_v55  ;;  %v4306_v39 = vmul.f32 %v12980_v23, %v3162_v2  ;;  %v17420_v19 = vld [vmem:[#allocation66_spill] sm:$0xff] }
 0x7ba   :  { %4728 = vmatprep.subr.mxu0 %v4353_v33  ;;  %4889 = vmatprep.subr.mxu1 %v4355_v18  ;;  %v4297_v0 = vmul.f32 %v17420_v19, %v3153_v17  ;;  %v17421_v33 = vld [vmem:[#allocation67_spill] sm:$0xff]  ;;  %v3146_v18 = vld [vmem:[%s16885_s14 + $0xb0] sm:$0xff]  ;;  %v4291_v30 = vmul.f32 %v17425_v5, %v3147_v6  ;;  %v3131_v13 = vld [vmem:[%s16885_s14 + $0x38] sm:$0xff] }
 0x7bb   :  { %4526 = vmatprep.mubr.f32.mxu0 %v17419_v63  ;;  %4687 = vmatprep.mubr.f32.mxu1 %v17419_v63  ;;  %v4299_v25 = vmul.f32 %v17421_v33, %v3155_v36  ;;  %v3144_v23 = vld [vmem:[%s16885_s14 + $0xa0] sm:$0xff]  ;;  %v17422_v52 = vld [vmem:[#allocation64_spill] sm:$0xff]  ;;  %v17423_v51 = vld [vmem:[#allocation65_spill] sm:$0xff] }
 0x7bc   :  { %4729 = vmatpush1.msra.mxu0 %v4352_v24  ;;  %4890 = vmatpush1.msra.mxu1 %v4354_v3  ;;  %v4296_v8 = vmul.f32 %v17422_v52, %v3152_v50  ;;  %v4298_v45 = vmul.f32 %v17423_v51, %v3154_v7  ;;  %v17424_v24 = vld [vmem:[#allocation62_spill] sm:$0xff]  ;;  %v3138_v38 = vld [vmem:[%s16885_s14 + $0x70] sm:$0xff]  ;;  %v3097_v17 = vld [vmem:[%s16886_s12 + $0x28] sm:$0xff] }
 0x7bd   :  { %4527 = vmatmul.mubr.f32.gmra.mxu0 %v17418_v61  ;;  %4688 = vmatmul.mubr.f32.gmra.mxu1 %v17418_v61  ;;  %v4289_v3 = vmul.f32 %v17424_v24, %v3145_v58  ;;  %v3136_v22 = vld [vmem:[%s16885_s14 + $0x60] sm:$0xff]  ;;  %v3130_v14 = vld [vmem:[%s16885_s14 + $0x30] sm:$0xff]  ;;  %v3283_v36 = vld [vmem:[%s16887_s15 + $0xf8] sm:$0xff] }
 0x7be   :  { %4730 = vmatprep.subr.mxu0 %v4345_v29  ;;  %4891 = vmatprep.subr.mxu1 %v4347_v53  ;;  %v3137_v29 = vld [vmem:[%s16885_s14 + $0x68] sm:$0xff]  ;;  %v3139_v53 = vld [vmem:[%s16885_s14 + $0x78] sm:$0xff]  ;;  %v3128_v54 = vld [vmem:[%s16885_s14 + $0x20] sm:$0xff] }
 0x7bf   :  { %4731 = vmatpush1.msra.mxu0 %v4344_v47  ;;  %4892 = vmatpush1.msra.mxu1 %v4346_v48  ;;  %v17426_v47 = vld [vmem:[#allocation60_spill] sm:$0xff]  ;;  %v17428_v15 = vld [vmem:[#allocation58_spill] sm:$0xff]  ;;  %v17431_v16 = vld [vmem:[#allocation57_spill] sm:$0xff] }
 0x7c0   :  { %4732 = vmatprep.subr.mxu0 %v4337_v57  ;;  %4893 = vmatprep.subr.mxu1 %v4339_v46  ;;  %v4288_v48 = vmul.f32 %v17426_v47, %v3144_v23  ;;  %v17427_v57 = vld [vmem:[#allocation61_spill] sm:$0xff]  ;;  %v4282_v31 = vmul.f32 %v17431_v16, %v3138_v38  ;;  %v17434_v1 = vld [vmem:[#allocation52_spill] sm:$0xff]  ;;  %v3100_v56 = vld [vmem:[%s16886_s12 + $0x40] sm:$0xff] }
 0x7c1   :  { %4532 = vmatprep.mubr.f32.mxu0 %v17419_v63  ;;  %4693 = vmatprep.mubr.f32.mxu1 %v17419_v63  ;;  %v4290_v46 = vmul.f32 %v17427_v57, %v3146_v18  ;;  %v4272_v37 = vmul.f32 %v17434_v1, %v3128_v54  ;;  %v17435_v62 = vld [vmem:[#allocation53_spill] sm:$0xff]  ;;  %v3092_v55 = vld [vmem:[%s16886_s12] sm:$0xff] }
 0x7c2   :  { %4733 = vmatpush1.msra.mxu0 %v4336_v59  ;;  %4894 = vmatpush1.msra.mxu1 %v4338_v60  ;;  %v4281_v59 = vmul.f32 %v17428_v15, %v3137_v29  ;;  %v17429_v60 = vld [vmem:[#allocation59_spill] sm:$0xff]  ;;  %v4274_v21 = vmul.f32 %v17435_v62, %v3130_v14  ;;  %v3102_v9 = vld [vmem:[%s16886_s12 + $0x50] sm:$0xff]  ;;  %v17441_v23 = vld [vmem:[#allocation10_spill] sm:$0xff] }
 0x7c3   :  { %4533 = vmatmul.mubr.f32.gmra.mxu0 %v17418_v61  ;;  %4694 = vmatmul.mubr.f32.gmra.mxu1 %v17418_v61  ;;  %v4283_v43 = vmul.f32 %v17429_v60, %v3139_v53  ;;  %v3094_v2 = vld [vmem:[%s16886_s12 + $0x10] sm:$0xff]  ;;  %v3096_v7 = vld [vmem:[%s16886_s12 + $0x20] sm:$0xff] }
 0x7c4   :  { %4734 = vmatprep.subr.mxu0 %v4329_v49  ;;  %4895 = vmatprep.subr.mxu1 %v4331_v20  ;;  %v17430_v49 = vld [vmem:[#allocation56_spill] sm:$0xff]  ;;  %v17436_v50 = vld [vmem:[#allocation13_spill] sm:$0xff]  ;;  %v17437_v58 = vld [vmem:[#allocation15_spill] sm:$0xff] }
 0x7c5   :  { %4735 = vmatpush1.msra.mxu0 %v4328_v10  ;;  %4896 = vmatpush1.msra.mxu1 %v4330_v42  ;;  %v4280_v20 = vmul.f32 %v17430_v49, %v3136_v22  ;;  %v17432_v10 = vld [vmem:[#allocation54_spill] sm:$0xff]  ;;  %v6355_v6 = vmul.f32 %v17437_v58, %v3283_v36  ;;  %v17439_v33 = vld [vmem:[#allocation21_spill] sm:$0xff]  ;;  %v17442_v18 = vld [vmem:[#allocation11_spill] sm:$0xff] }
 0x7c6   :  { %4736 = vmatprep.subr.mxu0 %v4321_v41  ;;  %4897 = vmatprep.subr.mxu1 %v4323_v34  ;;  %v4273_v42 = vmul.f32 %v17432_v10, %v3129_v35  ;;  %v17433_v41 = vld [vmem:[#allocation55_spill] sm:$0xff]  ;;  %v17443_v52 = vld [vmem:[#allocation9_spill] sm:$0xff]  ;;  %v17447_v24 = vld [vmem:[#allocation6_spill] sm:$0xff] }
 0x7c7   :  { %4538 = vmatprep.mubr.f32.mxu0 %v17419_v63  ;;  %4699 = vmatprep.mubr.f32.mxu1 %v17419_v63  ;;  %v4275_v34 = vmul.f32 %v17433_v41, %v3131_v13  ;;  %v17445_v51 = vld [vmem:[#allocation23_spill] sm:$0xff]  ;;  %v17449_v29 = vld [vmem:[#allocation4_spill] sm:$0xff]  ;;  %v17451_v54 = vld [vmem:[#allocation25_spill] sm:$0xff] }
 0x7c8   :  { %4737 = vmatpush1.msra.mxu0 %v4320_v27  ;;  %4898 = vmatpush1.msra.mxu1 %v4322_v12  ;;  %v3101_v27 = vld [vmem:[%s16886_s12 + $0x48] sm:$0xff]  ;;  %v3103_v12 = vld [vmem:[%s16886_s12 + $0x58] sm:$0xff]  ;;  %v3282_v10 = vld [vmem:[%s16887_s15 + $0xf0] sm:$0xff] }
 0x7c9   :  { %4539 = vmatmul.mubr.f32.gmra.mxu0 %v17418_v61  ;;  %4700 = vmatmul.mubr.f32.gmra.mxu1 %v17418_v61  ;;  %v17452_v14 = vld [vmem:[#allocation5_spill] sm:$0xff] }
 0x7ca   :  { %4738 = vmatprep.subr.mxu0 %v4313_v44  ;;  %4899 = vmatprep.subr.mxu1 %v4315_v4  ;;  %v3093_v44 = vld [vmem:[%s16886_s12 + $0x8] sm:$0xff]  ;;  %v3095_v4 = vld [vmem:[%s16886_s12 + $0x18] sm:$0xff]  ;;  %v3266_v41 = vld [vmem:[%s16887_s15 + $0x70] sm:$0xff] }
 0x7cb   :  { %4739 = vmatpush1.msra.mxu0 %v4312_v32  ;;  %4900 = vmatpush1.msra.mxu1 %v4314_v11  ;;  %v3105_v32 = vld [vmem:[%s16886_s12 + $0x68] sm:$0xff]  ;;  %v3107_v11 = vld [vmem:[%s16886_s12 + $0x78] sm:$0xff] }
 0x7cc   :  { %4740 = vmatprep.subr.mxu0 %v4305_v28  ;;  %4901 = vmatprep.subr.mxu1 %v4307_v40  ;;  %v3104_v28 = vld [vmem:[%s16886_s12 + $0x60] sm:$0xff]  ;;  %v3106_v40 = vld [vmem:[%s16886_s12 + $0x70] sm:$0xff]  ;;  %v3267_v49 = vld [vmem:[%s16887_s15 + $0x78] sm:$0xff] }
 0x7cd   :  { %4544 = vmatprep.mubr.f32.mxu0 %v17419_v63  ;;  %4705 = vmatprep.mubr.f32.mxu1 %v17419_v63  ;;  %v6339_v62 = vmul.f32 %v17437_v58, %v3267_v49 }
 0x7ce   :  { %4741 = vmatpush1.msra.mxu0 %v4304_v26  ;;  %4902 = vmatpush1.msra.mxu1 %v4306_v39  ;;  %v3098_v26 = vld [vmem:[%s16886_s12 + $0x30] sm:$0xff]  ;;  %v3315_v39 = vld [vmem:[%s16887_s15 + $0x1f8] sm:$0xff] }
 0x7cf   :  { %4545 = vmatmul.mubr.f32.gmra.mxu0 %v17418_v61  ;;  %4706 = vmatmul.mubr.f32.gmra.mxu1 %v17418_v61  ;;  %v6387_v19 = vmul.f32 %v17437_v58, %v3315_v39  ;;  %v3264_v39 = vld [vmem:[%s16887_s15 + $0x60] sm:$0xff] }
 0x7d0   :  { %4742 = vmatprep.subr.mxu0 %v4297_v0  ;;  %4903 = vmatprep.subr.mxu1 %v4299_v25  ;;  %v17438_v0 = vld [vmem:[#allocation22_spill] sm:$0xff]  ;;  %v17440_v25 = vld [vmem:[#allocation12_spill] sm:$0xff] }
 0x7d1   :  { %4743 = vmatpush1.msra.mxu0 %v4296_v8  ;;  %4904 = vmatpush1.msra.mxu1 %v4298_v45  ;;  %v17444_v8 = vld [vmem:[#allocation24_spill] sm:$0xff] }
 0x7d2   :  { %4744 = vmatprep.subr.mxu0 %v4289_v3  ;;  %4905 = vmatprep.subr.mxu1 %v4291_v30  ;;  %v17446_v45 = vld [vmem:[#allocation8_spill] sm:$0xff]  ;;  %v17448_v3 = vld [vmem:[#allocation7_spill] sm:$0xff] }
 0x7d3   :  { %4550 = vmatprep.mubr.f32.mxu0 %v17419_v63  ;;  %4711 = vmatprep.mubr.f32.mxu1 %v17419_v63 }
 0x7d4   :  { %4745 = vmatpush1.msra.mxu0 %v4288_v48  ;;  %4906 = vmatpush1.msra.mxu1 %v4290_v46  ;;  %v17450_v48 = vld [vmem:[#allocation26_spill] sm:$0xff] }
 0x7d5   :  { %4551 = vmatmul.mubr.f32.gmra.mxu0 %v17418_v61  ;;  %4712 = vmatmul.mubr.f32.gmra.mxu1 %v17418_v61 }
 0x7d6   :  { %4746 = vmatprep.subr.mxu0 %v4281_v59  ;;  %4907 = vmatprep.subr.mxu1 %v4283_v43 }
 0x7d7   :  { %4747 = vmatpush1.msra.mxu0 %v4280_v20  ;;  %4908 = vmatpush1.msra.mxu1 %v4282_v31  ;;  %v3299_v20 = vld [vmem:[%s16887_s15 + $0x178] sm:$0xff] }
 0x7d8   :  { %4748 = vmatprep.subr.mxu0 %v4273_v42  ;;  %4909 = vmatprep.subr.mxu1 %v4275_v34  ;;  %v3314_v42 = vld [vmem:[%s16887_s15 + $0x1f0] sm:$0xff] }
 0x7d9   :  { %4749 = vmatpush1.msra.mxu0 %v4272_v37  ;;  %4782 = vmatprep.mubr.f32.mxu0 %v17419_v63  ;;  %v3298_v34 = vld [vmem:[%s16887_s15 + $0x170] sm:$0xff] }
 0x7da   :  { %4910 = vmatpush1.msra.mxu1 %v4274_v21  ;;  %4943 = vmatprep.mubr.f32.mxu1 %v17419_v63  ;;  %v6371_v21 = vmul.f32 %v17437_v58, %v3299_v20 }
 0x7db   :  { %4783 = vmatmul.mubr.f32.vlgmr.msra.gmra.mxu0 %v17418_v61  ;;  %4944 = vmatmul.mubr.f32.vlgmr.msra.gmra.mxu1 %v17418_v61 }
 0x7dc   :  { %4788 = vmatprep.mubr.f32.mxu0 %v17419_v63  ;;  %4949 = vmatprep.mubr.f32.mxu1 %v17419_v63 }
 0x7dd   :  { %5068 = vmatprep.subr.mxu0 %v3101_v27  ;;  %5229 = vmatprep.subr.mxu1 %v3103_v12  ;;  %v17453_v27 = vld [vmem:[#allocation14_spill] sm:$0xff] }
 0x7de   :  { %5069 = vmatpush1.msra.mxu0 %v3100_v56  ;;  %5230 = vmatpush1.msra.mxu1 %v3102_v9  ;;  %v6354_v12 = vmul.f32 %v3282_v10, %v17453_v27  ;;  %v6386_v56 = vmul.f32 %v3314_v42, %v17453_v27  ;;  %v3281_v9 = vld [vmem:[%s16887_s15 + $0xe8] sm:$0xff] }
 0x7df   :  { %4789 = vmatmul.mubr.f32.gmra.mxu0 %v17418_v61  ;;  %4950 = vmatmul.mubr.f32.gmra.mxu1 %v17418_v61  ;;  %v17459_v42 = vld [vmem:[#allocation19_spill] sm:$0xff] }
 0x7e0   :  { %4794 = vmatprep.mubr.f32.mxu0 %v17419_v63  ;;  %4955 = vmatprep.mubr.f32.mxu1 %v17419_v63 }
 0x7e1   :  { %5070 = vmatprep.subr.mxu0 %v3093_v44  ;;  %5231 = vmatprep.subr.mxu1 %v3095_v4  ;;  %v3313_v44 = vld [vmem:[%s16887_s15 + $0x1e8] sm:$0xff] }
 0x7e2   :  { %5071 = vmatpush1.msra.mxu0 %v3092_v55  ;;  %5232 = vmatpush1.msra.mxu1 %v3094_v2  ;;  %v6338_v2 = vmul.f32 %v3266_v41, %v17453_v27 }
 0x7e3   :  { %4795 = vmatmul.mubr.f32.gmra.mxu0 %v17418_v61  ;;  %4956 = vmatmul.mubr.f32.gmra.mxu1 %v17418_v61 }
 0x7e4   :  { %4800 = vmatprep.mubr.f32.mxu0 %v17419_v63  ;;  %4961 = vmatprep.mubr.f32.mxu1 %v17419_v63 }
 0x7e5   :  { %5390 = vmatprep.subr.mxu0 %v3105_v32  ;;  %5551 = vmatprep.subr.mxu1 %v3107_v11  ;;  %v6370_v32 = vmul.f32 %v3298_v34, %v17453_v27  ;;  %v3265_v11 = vld [vmem:[%s16887_s15 + $0x68] sm:$0xff] }
 0x7e7   :  { %4801 = vmatmul.mubr.f32.gmra.mxu0 %v17418_v61  ;;  %4962 = vmatmul.mubr.f32.gmra.mxu1 %v17418_v61 }
 0x7e8   :  { %4806 = vmatprep.mubr.f32.mxu0 %v17419_v63  ;;  %4967 = vmatprep.mubr.f32.mxu1 %v17419_v63 }
 0x7eb   :  { %4807 = vmatmul.mubr.f32.gmra.mxu0 %v17418_v61  ;;  %4968 = vmatmul.mubr.f32.gmra.mxu1 %v17418_v61 }
 0x7ec   :  { %4812 = vmatprep.mubr.f32.mxu0 %v17419_v63  ;;  %4973 = vmatprep.mubr.f32.mxu1 %v17419_v63 }
 0x7ef   :  { %4813 = vmatmul.mubr.f32.gmra.mxu0 %v17418_v61  ;;  %4974 = vmatmul.mubr.f32.gmra.mxu1 %v17418_v61 }
 0x7f0   :  { %4818 = vmatprep.mubr.f32.mxu0 %v17419_v63  ;;  %4979 = vmatprep.mubr.f32.mxu1 %v17419_v63 }
 0x7f3   :  { %4819 = vmatmul.mubr.f32.gmra.mxu0 %v17418_v61  ;;  %4980 = vmatmul.mubr.f32.gmra.mxu1 %v17418_v61 }
 0x7f4   :  { %4824 = vmatprep.mubr.f32.mxu0 %v17419_v63  ;;  %4985 = vmatprep.mubr.f32.mxu1 %v17419_v63 }
 0x7f7   :  { %4825 = vmatmul.mubr.f32.gmra.mxu0 %v17418_v61  ;;  %4986 = vmatmul.mubr.f32.gmra.mxu1 %v17418_v61 }
 0x7f8   :  { %4830 = vmatprep.mubr.f32.mxu0 %v17419_v63  ;;  %4991 = vmatprep.mubr.f32.mxu1 %v17419_v63 }
 0x7fb   :  { %4831 = vmatmul.mubr.f32.gmra.mxu0 %v17418_v61  ;;  %4992 = vmatmul.mubr.f32.gmra.mxu1 %v17418_v61 }
 0x7fc   :  { %4836 = vmatprep.mubr.f32.mxu0 %v17419_v63  ;;  %4997 = vmatprep.mubr.f32.mxu1 %v17419_v63 }
 0x7ff   :  { %4837 = vmatmul.mubr.f32.gmra.mxu0 %v17418_v61  ;;  %4998 = vmatmul.mubr.f32.gmra.mxu1 %v17418_v61 }
 0x800   :  { %4842 = vmatprep.mubr.f32.mxu0 %v17419_v63  ;;  %5003 = vmatprep.mubr.f32.mxu1 %v17419_v63 }
 0x803   :  { %4843 = vmatmul.mubr.f32.gmra.mxu0 %v17418_v61  ;;  %5004 = vmatmul.mubr.f32.gmra.mxu1 %v17418_v61 }
 0x804   :  { %4848 = vmatprep.mubr.f32.mxu0 %v17419_v63  ;;  %5009 = vmatprep.mubr.f32.mxu1 %v17419_v63 }
 0x807   :  { %4849 = vmatmul.mubr.f32.gmra.mxu0 %v17418_v61  ;;  %5010 = vmatmul.mubr.f32.gmra.mxu1 %v17418_v61 }
 0x808   :  { %4854 = vmatprep.mubr.f32.mxu0 %v17419_v63  ;;  %5015 = vmatprep.mubr.f32.mxu1 %v17419_v63 }
 0x80b   :  { %4855 = vmatmul.mubr.f32.gmra.mxu0 %v17418_v61  ;;  %5016 = vmatmul.mubr.f32.gmra.mxu1 %v17418_v61 }
 0x80c   :  { %4860 = vmatprep.mubr.f32.mxu0 %v17419_v63  ;;  %5021 = vmatprep.mubr.f32.mxu1 %v17419_v63 }
 0x80f   :  { %4861 = vmatmul.mubr.f32.gmra.mxu0 %v17418_v61  ;;  %5022 = vmatmul.mubr.f32.gmra.mxu1 %v17418_v61 }
 0x810   :  { %4866 = vmatprep.mubr.f32.mxu0 %v17419_v63  ;;  %5027 = vmatprep.mubr.f32.mxu1 %v17419_v63 }
 0x813   :  { %4867 = vmatmul.mubr.f32.gmra.mxu0 %v17418_v61  ;;  %5028 = vmatmul.mubr.f32.gmra.mxu1 %v17418_v61 }
 0x814   :  { %4872 = vmatprep.mubr.f32.mxu0 %v17419_v63  ;;  %5033 = vmatprep.mubr.f32.mxu1 %v17419_v63 }
 0x817   :  { %4873 = vmatmul.mubr.f32.gmra.mxu0 %v17418_v61  ;;  %5034 = vmatmul.mubr.f32.gmra.mxu1 %v17418_v61  ;;  %v3099_v61 = vld [vmem:[%s16886_s12 + $0x38] sm:$0xff] }
 0x818   :  { %5104 = vmatprep.mubr.f32.mxu0 %v17419_v63  ;;  %5265 = vmatprep.mubr.f32.mxu1 %v17419_v63 }
 0x81b   :  { %8169 = vmatmul.mubr.msk.f32.vlgmr.msra.gmra.mxu0 %vm3575_vm3, %v17436_v50  ;;  %8185 = vmatmul.mubr.msk.f32.vlgmr.msra.gmra.mxu1 %vm3575_vm3, %v17436_v50 }
 0x81c   :  { %5391 = vmatpush1.msra.mxu0 %v3104_v28  ;;  %5552 = vmatpush1.msra.mxu1 %v3106_v40  ;;  %v3297_v28 = vld [vmem:[%s16887_s15 + $0x168] sm:$0xff] }
 0x81d   :  { %5392 = vmatprep.subr.mxu0 %v3097_v17  ;;  %5553 = vmatprep.subr.mxu1 %v3099_v61  ;;  %v17456_v61 = vld [vmem:[#allocation16_spill] sm:$0xff] }
 0x81e   :  { %5393 = vmatpush1.msra.mxu0 %v3096_v7  ;;  %5554 = vmatpush1.msra.mxu1 %v3098_v26  ;;  %v6353_v36 = vmul.f32 %v17456_v61, %v3281_v9  ;;  %v3280_v7 = vld [vmem:[%s16887_s15 + $0xe0] sm:$0xff]  ;;  %v6337_v20 = vmul.f32 %v17456_v61, %v3265_v11  ;;  %v6369_v10 = vmul.f32 %v17456_v61, %v3297_v28  ;;  %v17464_v28 = vld [vmem:[#allocation20_spill] sm:$0xff] }
 0x81f   :  { %5110 = vmatprep.mubr.f32.mxu0 %v17419_v63  ;;  %5271 = vmatprep.mubr.f32.mxu1 %v17419_v63  ;;  %v3312_v26 = vld [vmem:[%s16887_s15 + $0x1e0] sm:$0xff]  ;;  %v6352_v41 = vmul.f32 %v3280_v7, %v17459_v42  ;;  %v3278_v7 = vld [vmem:[%s16887_s15 + $0xd0] sm:$0xff] }
 0x820   :  { %8651 = vmatprep.subr.mxu0 %v6355_v6  ;;  %8731 = vmatprep.subr.mxu1 %v6387_v19  ;;  %v3296_v6 = vld [vmem:[%s16887_s15 + $0x160] sm:$0xff]  ;;  %v6384_v34 = vmul.f32 %v3312_v26, %v17459_v42  ;;  %v3310_v26 = vld [vmem:[%s16887_s15 + $0x1d0] sm:$0xff] }
 0x821   :  { %8170 = vmatmul.mubr.msk.f32.gmra.mxu0 %vm3575_vm3, %v17438_v0  ;;  %8186 = vmatmul.mubr.msk.f32.gmra.mxu1 %vm3575_vm3, %v17438_v0  ;;  %v6368_v9 = vmul.f32 %v3296_v6, %v17459_v42  ;;  %v3294_v6 = vld [vmem:[%s16887_s15 + $0x150] sm:$0xff] }
 0x822   :  { %5116 = vmatprep.mubr.f32.mxu0 %v17419_v63  ;;  %5277 = vmatprep.mubr.f32.mxu1 %v17419_v63 }
 0x825   :  { %8171 = vmatmul.mubr.msk.f32.gmra.mxu0 %vm3575_vm3, %v17439_v33  ;;  %8187 = vmatmul.mubr.msk.f32.gmra.mxu1 %vm3575_vm3, %v17439_v33 }
 0x826   :  { %5122 = vmatprep.mubr.f32.mxu0 %v17419_v63  ;;  %5283 = vmatprep.mubr.f32.mxu1 %v17419_v63 }
 0x829   :  { %8172 = vmatmul.mubr.msk.f32.gmra.mxu0 %vm3575_vm3, %v17440_v25  ;;  %8188 = vmatmul.mubr.msk.f32.gmra.mxu1 %vm3575_vm3, %v17440_v25 }
 0x82a   :  { %5128 = vmatprep.mubr.f32.mxu0 %v17419_v63  ;;  %5289 = vmatprep.mubr.f32.mxu1 %v17419_v63 }
 0x82d   :  { %8173 = vmatmul.mubr.msk.f32.gmra.mxu0 %vm3575_vm3, %v17441_v23  ;;  %8189 = vmatmul.mubr.msk.f32.gmra.mxu1 %vm3575_vm3, %v17441_v23 }
 0x82e   :  { %5134 = vmatprep.mubr.f32.mxu0 %v17419_v63  ;;  %5295 = vmatprep.mubr.f32.mxu1 %v17419_v63 }
 0x831   :  { %8174 = vmatmul.mubr.msk.f32.gmra.mxu0 %vm3575_vm3, %v17442_v18  ;;  %8190 = vmatmul.mubr.msk.f32.gmra.mxu1 %vm3575_vm3, %v17442_v18 }
 0x832   :  { %5140 = vmatprep.mubr.f32.mxu0 %v17419_v63  ;;  %5301 = vmatprep.mubr.f32.mxu1 %v17419_v63 }
 0x835   :  { %8175 = vmatmul.mubr.msk.f32.gmra.mxu0 %vm3575_vm3, %v17443_v52  ;;  %8191 = vmatmul.mubr.msk.f32.gmra.mxu1 %vm3575_vm3, %v17443_v52 }
 0x836   :  { %5146 = vmatprep.mubr.f32.mxu0 %v17419_v63  ;;  %5307 = vmatprep.mubr.f32.mxu1 %v17419_v63 }
 0x839   :  { %8176 = vmatmul.mubr.msk.f32.gmra.mxu0 %vm3575_vm3, %v17444_v8  ;;  %8192 = vmatmul.mubr.msk.f32.gmra.mxu1 %vm3575_vm3, %v17444_v8 }
 0x83a   :  { %5152 = vmatprep.mubr.f32.mxu0 %v17419_v63  ;;  %5313 = vmatprep.mubr.f32.mxu1 %v17419_v63 }
 0x83d   :  { %8177 = vmatmul.mubr.msk.f32.gmra.mxu0 %vm3575_vm3, %v17445_v51  ;;  %8193 = vmatmul.mubr.msk.f32.gmra.mxu1 %vm3575_vm3, %v17445_v51 }
 0x83e   :  { %5158 = vmatprep.mubr.f32.mxu0 %v17419_v63  ;;  %5319 = vmatprep.mubr.f32.mxu1 %v17419_v63 }
 0x841   :  { %8178 = vmatmul.mubr.msk.f32.gmra.mxu0 %vm3575_vm3, %v17446_v45  ;;  %8194 = vmatmul.mubr.msk.f32.gmra.mxu1 %vm3575_vm3, %v17446_v45 }
 0x842   :  { %5164 = vmatprep.mubr.f32.mxu0 %v17419_v63  ;;  %5325 = vmatprep.mubr.f32.mxu1 %v17419_v63 }
 0x845   :  { %8179 = vmatmul.mubr.msk.f32.gmra.mxu0 %vm3575_vm3, %v17447_v24  ;;  %8195 = vmatmul.mubr.msk.f32.gmra.mxu1 %vm3575_vm3, %v17447_v24 }
 0x846   :  { %5170 = vmatprep.mubr.f32.mxu0 %v17419_v63  ;;  %5331 = vmatprep.mubr.f32.mxu1 %v17419_v63 }
 0x849   :  { %8180 = vmatmul.mubr.msk.f32.gmra.mxu0 %vm3575_vm3, %v17448_v3  ;;  %8196 = vmatmul.mubr.msk.f32.gmra.mxu1 %vm3575_vm3, %v17448_v3 }
 0x84a   :  { %5176 = vmatprep.mubr.f32.mxu0 %v17419_v63  ;;  %5337 = vmatprep.mubr.f32.mxu1 %v17419_v63 }
 0x84b   :  { %v13644_v5 = vpop.f32.mrf.mxu0  ;;  %v13646_v30 = vpop.f32.mrf.mxu1 }
 0x84d   :  { %8181 = vmatmul.mubr.msk.f32.gmra.mxu0 %vm3575_vm3, %v17449_v29  ;;  %8197 = vmatmul.mubr.msk.f32.gmra.mxu1 %vm3575_vm3, %v17449_v29  ;;  %v13652_v53 = vpop.f32.mrf.mxu0  ;;  %v13654_v22 = vpop.f32.mrf.mxu1 }
 0x84e   :  { %5182 = vmatprep.mubr.f32.mxu0 %v17419_v63  ;;  %5343 = vmatprep.mubr.f32.mxu1 %v17419_v63 }
 0x84f   :  { %v13658_v38 = vpop.f32.mrf.mxu0  ;;  %v13660_v47 = vpop.f32.mrf.mxu1 }
 0x851   :  { %8182 = vmatmul.mubr.msk.f32.gmra.mxu0 %vm3575_vm3, %v17450_v48  ;;  %8198 = vmatmul.mubr.msk.f32.gmra.mxu1 %vm3575_vm3, %v17450_v48  ;;  %v13666_v57 = vpop.f32.mrf.mxu0  ;;  %v13668_v46 = vpop.f32.mrf.mxu1 }
 0x852   :  { %5188 = vmatprep.mubr.f32.mxu0 %v17419_v63  ;;  %5349 = vmatprep.mubr.f32.mxu1 %v17419_v63 }
 0x853   :  { %v13672_v35 = vpop.f32.mrf.mxu0  ;;  %v13674_v13 = vpop.f32.mrf.mxu1 }
 0x855   :  { %8183 = vmatmul.mubr.msk.f32.gmra.mxu0 %vm3575_vm3, %v17451_v54  ;;  %8199 = vmatmul.mubr.msk.f32.gmra.mxu1 %vm3575_vm3, %v17451_v54  ;;  %v13680_v15 = vpop.f32.mrf.mxu0  ;;  %v13682_v59 = vpop.f32.mrf.mxu1 }
 0x856   :  { %5194 = vmatprep.mubr.f32.mxu0 %v17419_v63  ;;  %5355 = vmatprep.mubr.f32.mxu1 %v17419_v63 }
 0x857   :  { %v13686_v60 = vpop.f32.mrf.mxu0  ;;  %v13688_v43 = vpop.f32.mrf.mxu1 }
 0x859   :  { %8184 = vmatmul.mubr.msk.f32.gmra.mxu0 %vm3575_vm3, %v17452_v14  ;;  %8200 = vmatmul.mubr.msk.f32.gmra.mxu1 %vm3575_vm3, %v17452_v14  ;;  %v13700_v16 = vpop.f32.mrf.mxu0  ;;  %v13702_v31 = vpop.f32.mrf.mxu1 }
 0x85a   :  { %5426 = vmatprep.mubr.f32.mxu0 %v17419_v63  ;;  %5587 = vmatprep.mubr.f32.mxu1 %v17419_v63 }
 0x85b   :  { %v13718_v1 = vpop.f32.mrf.mxu0  ;;  %v13720_v37 = vpop.f32.mrf.mxu1 }
 0x85d   :  { %8201 = vmatmul.mubr.msk.f32.vlgmr.msra.gmra.mxu0 %vm3575_vm3, %v17436_v50  ;;  %8217 = vmatmul.mubr.msk.f32.vlgmr.msra.gmra.mxu1 %vm3575_vm3, %v17436_v50  ;;  %v13736_v4 = vpop.f32.mrf.mxu0  ;;  %v13738_v55 = vpop.f32.mrf.mxu1  ;;  %v6385_v50 = vmul.f32 %v17456_v61, %v3313_v44  ;;  %v3263_v44 = vld [vmem:[%s16887_s15 + $0x58] sm:$0xff] }
 0x85e   :  { %8652 = vmatpush3.msra.mxu0 %v6339_v62  ;;  %8732 = vmatpush3.msra.mxu1 %v6371_v21  ;;  %v3279_v62 = vld [vmem:[%s16887_s15 + $0xd8] sm:$0xff] }
 0x85f   :  { %8653 = vmatprep.subr.mxu0 %v6354_v12  ;;  %8733 = vmatprep.subr.mxu1 %v6386_v56  ;;  %v13748_v40 = vpop.f32.mrf.mxu0  ;;  %v13750_v17 = vpop.f32.mrf.mxu1  ;;  %v3311_v21 = vld [vmem:[%s16887_s15 + $0x1d8] sm:$0xff] }
 0x860   :  { %17454 = vst [vmem:[#allocation51_spill] sm:$0xff] %v13748_v40  ;;  %17455 = vst [vmem:[#allocation42_spill] sm:$0xff] %v13750_v17  ;;  %8654 = vmatpush3.msra.mxu0 %v6338_v2  ;;  %8734 = vmatpush3.msra.mxu1 %v6370_v32  ;;  %v3295_v2 = vld [vmem:[%s16887_s15 + $0x158] sm:$0xff] }
 0x861   :  { %5432 = vmatprep.mubr.f32.mxu0 %v17419_v63  ;;  %5593 = vmatprep.mubr.f32.mxu1 %v17419_v63  ;;  %v13768_v19 = vpop.f32.mrf.mxu0  ;;  %v13770_v49 = vpop.f32.mrf.mxu1  ;;  %v3371_v17 = vld [vmem:[%s16887_s15 + $0x3b8] sm:$0xff] }
 0x862   :  { %17457 = vst [vmem:[#allocation48_spill] sm:$0xff] %v13768_v19  ;;  %17458 = vst [vmem:[#allocation47_spill] sm:$0xff] %v13770_v49  ;;  %8655 = vmatprep.subr.mxu0 %v6353_v36  ;;  %8735 = vmatprep.subr.mxu1 %v6385_v50  ;;  %v6351_v36 = vmul.f32 %v17464_v28, %v3279_v62  ;;  %v6383_v50 = vmul.f32 %v17464_v28, %v3311_v21  ;;  %v17467_v62 = vld [vmem:[#allocation17_spill] sm:$0xff] }
 0x863   :  { %8202 = vmatmul.mubr.msk.f32.gmra.mxu0 %vm3575_vm3, %v17438_v0  ;;  %8218 = vmatmul.mubr.msk.f32.gmra.mxu1 %vm3575_vm3, %v17438_v0  ;;  %v13786_v12 = vpop.f32.mrf.mxu0  ;;  %v13788_v56 = vpop.f32.mrf.mxu1  ;;  %v6336_v0 = vmul.f32 %v3264_v39, %v17459_v42  ;;  %v3262_v39 = vld [vmem:[%s16887_s15 + $0x50] sm:$0xff]  ;;  %v6350_v21 = vmul.f32 %v3278_v7, %v17467_v62  ;;  %v3261_v7 = vld [vmem:[%s16887_s15 + $0x48] sm:$0xff]  ;;  %v3339_v19 = vld [vmem:[%s16887_s15 + $0x2b8] sm:$0xff] }
 0x864   :  { %17460 = vst [vmem:[#allocation39_spill] sm:$0xff] %v13786_v12  ;;  %17461 = vst [vmem:[#allocation50_spill] sm:$0xff] %v13788_v56  ;;  %8656 = vmatpush3.msra.mxu0 %v6337_v20  ;;  %8736 = vmatpush3.msra.mxu1 %v6369_v10  ;;  %v3355_v40 = vld [vmem:[%s16887_s15 + $0x338] sm:$0xff] }
 0x865   :  { %8657 = vmatprep.subr.mxu0 %v6352_v41  ;;  %8737 = vmatprep.subr.mxu1 %v6384_v34  ;;  %v13798_v32 = vpop.f32.mrf.mxu0  ;;  %v13800_v11 = vpop.f32.mrf.mxu1  ;;  %v6335_v41 = vmul.f32 %v17464_v28, %v3263_v44  ;;  %v6367_v34 = vmul.f32 %v17464_v28, %v3295_v2  ;;  %v3309_v44 = vld [vmem:[%s16887_s15 + $0x1c8] sm:$0xff] }
 0x866   :  { %17462 = vst [vmem:[#allocation49_spill] sm:$0xff] %v13798_v32  ;;  %17463 = vst [vmem:[#allocation33_spill] sm:$0xff] %v13800_v11  ;;  %8658 = vmatpush3.msra.mxu0 %v6336_v0  ;;  %8738 = vmatpush3.msra.mxu1 %v6368_v9  ;;  %v6382_v0 = vmul.f32 %v3310_v26, %v17467_v62  ;;  %v3277_v9 = vld [vmem:[%s16887_s15 + $0xc8] sm:$0xff] }
 0x867   :  { %5438 = vmatprep.mubr.f32.mxu0 %v17419_v63  ;;  %5599 = vmatprep.mubr.f32.mxu1 %v17419_v63  ;;  %v13818_v20 = vpop.f32.mrf.mxu0  ;;  %v13820_v10 = vpop.f32.mrf.mxu1  ;;  %v3293_v26 = vld [vmem:[%s16887_s15 + $0x148] sm:$0xff] }
 0x868   :  { %17465 = vst [vmem:[#allocation41_spill] sm:$0xff] %v13818_v20  ;;  %17466 = vst [vmem:[#allocation31_spill] sm:$0xff] %v13820_v10  ;;  %8659 = vmatprep.subr.mxu0 %v6351_v36  ;;  %8739 = vmatprep.subr.mxu1 %v6383_v50  ;;  %v6366_v50 = vmul.f32 %v3294_v6, %v17467_v62 }
 0x869   :  { %8203 = vmatmul.mubr.msk.f32.gmra.mxu0 %vm3575_vm3, %v17439_v33  ;;  %8219 = vmatmul.mubr.msk.f32.gmra.mxu1 %vm3575_vm3, %v17439_v33  ;;  %v13836_v36 = vpop.f32.mrf.mxu0  ;;  %v13838_v2 = vpop.f32.mrf.mxu1  ;;  %v6334_v33 = vmul.f32 %v3262_v39, %v17467_v62 }
 0x86a   :  { %17468 = vst [vmem:[#allocation34_spill] sm:$0xff] %v13836_v36  ;;  %17469 = vst [vmem:[#allocation29_spill] sm:$0xff] %v13838_v2  ;;  %8660 = vmatpush3.msra.mxu0 %v6335_v41  ;;  %8740 = vmatpush3.msra.mxu1 %v6367_v34  ;;  %v17472_v41 = vld [vmem:[#allocation36_spill] sm:$0xff]  ;;  %v3276_v34 = vld [vmem:[%s16887_s15 + $0xc0] sm:$0xff] }
 0x86b   :  { %8661 = vmatprep.subr.mxu0 %v6350_v21  ;;  %8741 = vmatprep.subr.mxu1 %v6382_v0  ;;  %v13848_v10 = vpop.f32.mrf.mxu0  ;;  %v13850_v36 = vpop.f32.mrf.mxu1  ;;  %v6349_v39 = vmul.f32 %v17472_v41, %v3277_v9  ;;  %v6381_v6 = vmul.f32 %v17472_v41, %v3309_v44  ;;  %v3308_v21 = vld [vmem:[%s16887_s15 + $0x1c0] sm:$0xff] }
 0x86c   :  { %17470 = vst [vmem:[#allocation32_spill] sm:$0xff] %v13848_v10  ;;  %17471 = vst [vmem:[#allocation27_spill] sm:$0xff] %v13850_v36  ;;  %8662 = vmatpush3.msra.mxu0 %v6334_v33  ;;  %8742 = vmatpush3.msra.mxu1 %v6366_v50  ;;  %v3260_v0 = vld [vmem:[%s16887_s15 + $0x40] sm:$0xff]  ;;  %v6333_v50 = vmul.f32 %v17472_v41, %v3261_v7  ;;  %v6365_v36 = vmul.f32 %v17472_v41, %v3293_v26  ;;  %v3307_v7 = vld [vmem:[%s16887_s15 + $0x1b8] sm:$0xff] }
 0x86d   :  { %5444 = vmatprep.mubr.f32.mxu0 %v17419_v63  ;;  %5605 = vmatprep.mubr.f32.mxu1 %v17419_v63  ;;  %v3292_v9 = vld [vmem:[%s16887_s15 + $0x140] sm:$0xff]  ;;  %v13868_v44 = vpop.f32.mrf.mxu0  ;;  %v13870_v33 = vpop.f32.mrf.mxu1 }
 0x86e   :  { %17473 = vst [vmem:[#allocation30_spill] sm:$0xff] %v13868_v44  ;;  %17474 = vst [vmem:[#allocation3_spill] sm:$0xff] %v13870_v33  ;;  %8663 = vmatprep.subr.mxu0 %v6349_v39  ;;  %8743 = vmatprep.subr.mxu1 %v6381_v6  ;;  %v17475_v10 = vld [vmem:[#allocation18_spill] sm:$0xff] }
 0x86f   :  { %8204 = vmatmul.mubr.msk.f32.gmra.mxu0 %vm3575_vm3, %v17440_v25  ;;  %8220 = vmatmul.mubr.msk.f32.gmra.mxu1 %vm3575_vm3, %v17440_v25  ;;  %v6348_v2 = vmul.f32 %v3276_v34, %v17475_v10  ;;  %v6380_v20 = vmul.f32 %v3308_v21, %v17475_v10  ;;  %v3275_v33 = vld [vmem:[%s16887_s15 + $0xb8] sm:$0xff]  ;;  %v6332_v26 = vmul.f32 %v3260_v0, %v17475_v10 }
 0x870   :  { %8664 = vmatpush3.msra.mxu0 %v6333_v50  ;;  %8744 = vmatpush3.msra.mxu1 %v6365_v36  ;;  %v6364_v39 = vmul.f32 %v3292_v9, %v17475_v10  ;;  %v3259_v25 = vld [vmem:[%s16887_s15 + $0x38] sm:$0xff]  ;;  %v3258_v50 = vld [vmem:[%s16887_s15 + $0x30] sm:$0xff] }
 0x871   :  { %8665 = vmatprep.subr.mxu0 %v6348_v2  ;;  %8745 = vmatprep.subr.mxu1 %v6380_v20  ;;  %v3291_v6 = vld [vmem:[%s16887_s15 + $0x138] sm:$0xff]  ;;  %v13894_v34 = vpop.f32.mrf.mxu0  ;;  %v13896_v21 = vpop.f32.mrf.mxu1  ;;  %v3274_v20 = vld [vmem:[%s16887_s15 + $0xb0] sm:$0xff] }
 0x872   :  { %17476 = vst [vmem:[#allocation28_spill] sm:$0xff] %v13894_v34  ;;  %17477 = vst [vmem:[#allocation66_spill] sm:$0xff] %v13896_v21  ;;  %8666 = vmatpush3.msra.mxu0 %v6332_v26  ;;  %8746 = vmatpush3.msra.mxu1 %v6364_v39  ;;  %v17478_v36 = vld [vmem:[#allocation38_spill] sm:$0xff]  ;;  %v3306_v2 = vld [vmem:[%s16887_s15 + $0x1b0] sm:$0xff] }
 0x873   :  { %v6347_v0 = vmul.f32 %v17478_v36, %v3275_v33  ;;  %v6379_v9 = vmul.f32 %v17478_v36, %v3307_v7  ;;  %5450 = vmatprep.mubr.f32.mxu0 %v17419_v63  ;;  %5611 = vmatprep.mubr.f32.mxu1 %v17419_v63  ;;  %v3290_v33 = vld [vmem:[%s16887_s15 + $0x130] sm:$0xff]  ;;  %v13914_v7 = vpop.f32.mrf.mxu0  ;;  %v13916_v26 = vpop.f32.mrf.mxu1  ;;  %v6331_v39 = vmul.f32 %v17478_v36, %v3259_v25  ;;  %v17481_v34 = vld [vmem:[#allocation35_spill] sm:$0xff] }
 0x874   :  { %17479 = vst [vmem:[#allocation67_spill] sm:$0xff] %v13914_v7  ;;  %17480 = vst [vmem:[#allocation64_spill] sm:$0xff] %v13916_v26  ;;  %v6363_v21 = vmul.f32 %v17478_v36, %v3291_v6  ;;  %8205 = vmatmul.mubr.msk.f32.gmra.mxu0 %vm3575_vm3, %v17441_v23  ;;  %8221 = vmatmul.mubr.msk.f32.gmra.mxu1 %vm3575_vm3, %v17441_v23  ;;  %v6346_v44 = vmul.f32 %v3274_v20, %v17481_v34  ;;  %v3273_v26 = vld [vmem:[%s16887_s15 + $0xa8] sm:$0xff] }
 0x875   :  { %8667 = vmatprep.subr.mxu0 %v6347_v0  ;;  %8747 = vmatprep.subr.mxu1 %v6379_v9  ;;  %v6378_v11 = vmul.f32 %v3306_v2, %v17481_v34  ;;  %v3305_v25 = vld [vmem:[%s16887_s15 + $0x1a8] sm:$0xff]  ;;  %v6330_v6 = vmul.f32 %v3258_v50, %v17481_v34  ;;  %v6362_v0 = vmul.f32 %v3290_v33, %v17481_v34 }
 0x876   :  { %8668 = vmatpush3.msra.mxu0 %v6331_v39  ;;  %8748 = vmatpush3.msra.mxu1 %v6363_v21  ;;  %v3257_v23 = vld [vmem:[%s16887_s15 + $0x28] sm:$0xff]  ;;  %v3256_v39 = vld [vmem:[%s16887_s15 + $0x20] sm:$0xff] }
 0x877   :  { %8669 = vmatprep.subr.mxu0 %v6346_v44  ;;  %8749 = vmatprep.subr.mxu1 %v6378_v11  ;;  %v3289_v9 = vld [vmem:[%s16887_s15 + $0x128] sm:$0xff]  ;;  %v13940_v20 = vpop.f32.mrf.mxu0  ;;  %v13942_v2 = vpop.f32.mrf.mxu1  ;;  %v3272_v11 = vld [vmem:[%s16887_s15 + $0xa0] sm:$0xff] }
 0x878   :  { %17482 = vst [vmem:[#allocation65_spill] sm:$0xff] %v13940_v20  ;;  %17483 = vst [vmem:[#allocation62_spill] sm:$0xff] %v13942_v2  ;;  %8670 = vmatpush3.msra.mxu0 %v6330_v6  ;;  %8750 = vmatpush3.msra.mxu1 %v6362_v0  ;;  %v17484_v21 = vld [vmem:[#allocation44_spill] sm:$0xff]  ;;  %v3304_v44 = vld [vmem:[%s16887_s15 + $0x1a0] sm:$0xff] }
 0x879   :  { %v6345_v50 = vmul.f32 %v17484_v21, %v3273_v26  ;;  %v6377_v33 = vmul.f32 %v17484_v21, %v3305_v25  ;;  %5456 = vmatprep.mubr.f32.mxu0 %v17419_v63  ;;  %5617 = vmatprep.mubr.f32.mxu1 %v17419_v63  ;;  %v3288_v26 = vld [vmem:[%s16887_s15 + $0x120] sm:$0xff]  ;;  %v13960_v25 = vpop.f32.mrf.mxu0  ;;  %v13962_v6 = vpop.f32.mrf.mxu1  ;;  %v6329_v0 = vmul.f32 %v17484_v21, %v3257_v23  ;;  %v17487_v20 = vld [vmem:[#allocation37_spill] sm:$0xff] }
 0x87a   :  { %17485 = vst [vmem:[#allocation63_spill] sm:$0xff] %v13960_v25  ;;  %17486 = vst [vmem:[#allocation60_spill] sm:$0xff] %v13962_v6  ;;  %v6361_v2 = vmul.f32 %v17484_v21, %v3289_v9  ;;  %8206 = vmatmul.mubr.msk.f32.gmra.mxu0 %vm3575_vm3, %v17442_v18  ;;  %8222 = vmatmul.mubr.msk.f32.gmra.mxu1 %vm3575_vm3, %v17442_v18  ;;  %v6344_v7 = vmul.f32 %v3272_v11, %v17487_v20  ;;  %v3271_v6 = vld [vmem:[%s16887_s15 + $0x98] sm:$0xff] }
 0x87b   :  { %8671 = vmatprep.subr.mxu0 %v6345_v50  ;;  %8751 = vmatprep.subr.mxu1 %v6377_v33  ;;  %v6376_v32 = vmul.f32 %v3304_v44, %v17487_v20  ;;  %v3303_v23 = vld [vmem:[%s16887_s15 + $0x198] sm:$0xff]  ;;  %v6328_v9 = vmul.f32 %v3256_v39, %v17487_v20  ;;  %v6360_v50 = vmul.f32 %v3288_v26, %v17487_v20 }
 0x87c   :  { %8672 = vmatpush3.msra.mxu0 %v6329_v0  ;;  %8752 = vmatpush3.msra.mxu1 %v6361_v2  ;;  %v3255_v18 = vld [vmem:[%s16887_s15 + $0x18] sm:$0xff]  ;;  %v17490_v2 = vld [vmem:[#allocation43_spill] sm:$0xff]  ;;  %v3254_v0 = vld [vmem:[%s16887_s15 + $0x10] sm:$0xff] }
 0x87d   :  { %8673 = vmatprep.subr.mxu0 %v6344_v7  ;;  %8753 = vmatprep.subr.mxu1 %v6376_v32  ;;  %v3287_v33 = vld [vmem:[%s16887_s15 + $0x118] sm:$0xff]  ;;  %v13986_v11 = vpop.f32.mrf.mxu0  ;;  %v13988_v44 = vpop.f32.mrf.mxu1  ;;  %v6343_v39 = vmul.f32 %v17490_v2, %v3271_v6  ;;  %v6375_v26 = vmul.f32 %v17490_v2, %v3303_v23  ;;  %v3270_v32 = vld [vmem:[%s16887_s15 + $0x90] sm:$0xff] }
 0x87e   :  { %17488 = vst [vmem:[#allocation61_spill] sm:$0xff] %v13986_v11  ;;  %17489 = vst [vmem:[#allocation58_spill] sm:$0xff] %v13988_v44  ;;  %8674 = vmatpush3.msra.mxu0 %v6328_v9  ;;  %8754 = vmatpush3.msra.mxu1 %v6360_v50  ;;  %v3302_v7 = vld [vmem:[%s16887_s15 + $0x190] sm:$0xff]  ;;  %v6327_v50 = vmul.f32 %v17490_v2, %v3255_v18  ;;  %v6359_v44 = vmul.f32 %v17490_v2, %v3287_v33  ;;  %v3301_v18 = vld [vmem:[%s16887_s15 + $0x188] sm:$0xff] }
 0x87f   :  { %5462 = vmatprep.mubr.f32.mxu0 %v17419_v63  ;;  %5623 = vmatprep.mubr.f32.mxu1 %v17419_v63  ;;  %v3286_v6 = vld [vmem:[%s16887_s15 + $0x110] sm:$0xff]  ;;  %v14006_v23 = vpop.f32.mrf.mxu0  ;;  %v14008_v9 = vpop.f32.mrf.mxu1 }
 0x880   :  { %17491 = vst [vmem:[#allocation59_spill] sm:$0xff] %v14006_v23  ;;  %17492 = vst [vmem:[#allocation56_spill] sm:$0xff] %v14008_v9  ;;  %8675 = vmatprep.subr.mxu0 %v6343_v39  ;;  %8755 = vmatprep.subr.mxu1 %v6375_v26  ;;  %v17493_v11 = vld [vmem:[#allocation40_spill] sm:$0xff] }
 0x881   :  { %8207 = vmatmul.mubr.msk.f32.gmra.mxu0 %vm3575_vm3, %v17443_v52  ;;  %8223 = vmatmul.mubr.msk.f32.gmra.mxu1 %vm3575_vm3, %v17443_v52  ;;  %v6342_v25 = vmul.f32 %v3270_v32, %v17493_v11  ;;  %v6374_v56 = vmul.f32 %v3302_v7, %v17493_v11  ;;  %v3269_v9 = vld [vmem:[%s16887_s15 + $0x88] sm:$0xff]  ;;  %v6326_v33 = vmul.f32 %v3254_v0, %v17493_v11 }
 0x882   :  { %8676 = vmatpush3.msra.mxu0 %v6327_v50  ;;  %8756 = vmatpush3.msra.mxu1 %v6359_v44  ;;  %v6358_v39 = vmul.f32 %v3286_v6, %v17493_v11  ;;  %v3253_v52 = vld [vmem:[%s16887_s15 + $0x8] sm:$0xff]  ;;  %v17496_v44 = vld [vmem:[#allocation45_spill] sm:$0xff]  ;;  %v3252_v50 = vld [vmem:[%s16887_s15] sm:$0xff] }
 0x883   :  { %8677 = vmatprep.subr.mxu0 %v6342_v25  ;;  %8757 = vmatprep.subr.mxu1 %v6374_v56  ;;  %v3285_v26 = vld [vmem:[%s16887_s15 + $0x108] sm:$0xff]  ;;  %v14032_v32 = vpop.f32.mrf.mxu0  ;;  %v14034_v7 = vpop.f32.mrf.mxu1  ;;  %v6341_v0 = vmul.f32 %v17496_v44, %v3269_v9  ;;  %v6373_v6 = vmul.f32 %v17496_v44, %v3301_v18  ;;  %v3268_v56 = vld [vmem:[%s16887_s15 + $0x80] sm:$0xff] }
 0x884   :  { %17494 = vst [vmem:[#allocation57_spill] sm:$0xff] %v14032_v32  ;;  %17495 = vst [vmem:[#allocation54_spill] sm:$0xff] %v14034_v7  ;;  %8678 = vmatpush3.msra.mxu0 %v6326_v33  ;;  %8758 = vmatpush3.msra.mxu1 %v6358_v39  ;;  %v3300_v25 = vld [vmem:[%s16887_s15 + $0x180] sm:$0xff]  ;;  %v6325_v39 = vmul.f32 %v17496_v44, %v3253_v52  ;;  %v6357_v7 = vmul.f32 %v17496_v44, %v3285_v26  ;;  %v3379_v52 = vld [vmem:[%s16887_s15 + $0x3f8] sm:$0xff] }
 0x885   :  { %5468 = vmatprep.mubr.f32.mxu0 %v17419_v63  ;;  %5629 = vmatprep.mubr.f32.mxu1 %v17419_v63  ;;  %v3284_v9 = vld [vmem:[%s16887_s15 + $0x100] sm:$0xff]  ;;  %v14052_v18 = vpop.f32.mrf.mxu0  ;;  %v14054_v33 = vpop.f32.mrf.mxu1 }
 0x886   :  { %17497 = vst [vmem:[#allocation55_spill] sm:$0xff] %v14052_v18  ;;  %17498 = vst [vmem:[#allocation52_spill] sm:$0xff] %v14054_v33  ;;  %8679 = vmatprep.subr.mxu0 %v6341_v0  ;;  %8759 = vmatprep.subr.mxu1 %v6373_v6  ;;  %v17499_v32 = vld [vmem:[#allocation46_spill] sm:$0xff] }
 0x887   :  { %8208 = vmatmul.mubr.msk.f32.gmra.mxu0 %vm3575_vm3, %v17444_v8  ;;  %8224 = vmatmul.mubr.msk.f32.gmra.mxu1 %vm3575_vm3, %v17444_v8  ;;  %v6340_v23 = vmul.f32 %v3268_v56, %v17499_v32  ;;  %v6372_v12 = vmul.f32 %v3300_v25, %v17499_v32  ;;  %v3347_v33 = vld [vmem:[%s16887_s15 + $0x2f8] sm:$0xff]  ;;  %v6324_v26 = vmul.f32 %v3252_v50, %v17499_v32 }
 0x888   :  { %8680 = vmatpush3.msra.mxu0 %v6325_v39  ;;  %8760 = vmatpush3.msra.mxu1 %v6357_v7  ;;  %v6356_v0 = vmul.f32 %v3284_v9, %v17499_v32  ;;  %v6419_v56 = vmul.f32 %v17437_v58, %v3347_v33  ;;  %v6451_v25 = vmul.f32 %v17437_v58, %v3379_v52 }
 0x889   :  { %8681 = vmatprep.subr.mxu0 %v6340_v23  ;;  %8761 = vmatprep.subr.mxu1 %v6372_v12  ;;  %v14072_v8 = vpop.f32.mrf.mxu0  ;;  %v14074_v6 = vpop.f32.mrf.mxu1 }
 0x88a   :  { %17500 = vst [vmem:[#allocation53_spill] sm:$0xff] %v14072_v8  ;;  %17501 = vst [vmem:[#allocation13_spill] sm:$0xff] %v14074_v6  ;;  %8682 = vmatpush3.msra.mxu0 %v6324_v26  ;;  %8762 = vmatpush3.msra.mxu1 %v6356_v0 }
 0x88b   :  { %5474 = vmatprep.mubr.f32.mxu0 %v17419_v63  ;;  %5635 = vmatprep.mubr.f32.mxu1 %v17419_v63  ;;  %v14080_v7 = vpop.f32.mrf.mxu0  ;;  %v14082_v50 = vpop.f32.mrf.mxu1 }
 0x88c   :  { %17502 = vst [vmem:[#allocation15_spill] sm:$0xff] %v14080_v7  ;;  %17503 = vst [vmem:[#allocation22_spill] sm:$0xff] %v14082_v50  ;;  %8811 = vmatprep.subr.mxu0 %v6419_v56  ;;  %8891 = vmatprep.subr.mxu1 %v6451_v25  ;;  %v3350_v50 = vld [vmem:[%s16887_s15 + $0x310] sm:$0xff]  ;;  %v3336_v7 = vld [vmem:[%s16887_s15 + $0x2a0] sm:$0xff] }
 0x88d   :  { %8209 = vmatmul.mubr.msk.f32.gmra.mxu0 %vm3575_vm3, %v17445_v51  ;;  %8225 = vmatmul.mubr.msk.f32.gmra.mxu1 %vm3575_vm3, %v17445_v51 }
 0x88e   :  { %5480 = vmatprep.mubr.f32.mxu0 %v17419_v63  ;;  %5641 = vmatprep.mubr.f32.mxu1 %v17419_v63 }
 0x88f   :  { %v14090_v12 = vpop.f32.mrf.mxu0  ;;  %v14092_v23 = vpop.f32.mrf.mxu1 }
 0x890   :  { %17504 = vst [vmem:[#allocation21_spill] sm:$0xff] %v14090_v12  ;;  %17505 = vst [vmem:[#allocation12_spill] sm:$0xff] %v14092_v23  ;;  %v3369_v23 = vld [vmem:[%s16887_s15 + $0x3a8] sm:$0xff]  ;;  %v3318_v12 = vld [vmem:[%s16887_s15 + $0x210] sm:$0xff] }
 0x891   :  { %8210 = vmatmul.mubr.msk.f32.gmra.mxu0 %vm3575_vm3, %v17446_v45  ;;  %8226 = vmatmul.mubr.msk.f32.gmra.mxu1 %vm3575_vm3, %v17446_v45  ;;  %v14098_v9 = vpop.f32.mrf.mxu0  ;;  %v14100_v33 = vpop.f32.mrf.mxu1 }
 0x892   :  { %17506 = vst [vmem:[#allocation10_spill] sm:$0xff] %v14098_v9  ;;  %17507 = vst [vmem:[#allocation11_spill] sm:$0xff] %v14100_v33  ;;  %5486 = vmatprep.mubr.f32.mxu0 %v17419_v63  ;;  %5647 = vmatprep.mubr.f32.mxu1 %v17419_v63  ;;  %v3337_v9 = vld [vmem:[%s16887_s15 + $0x2a8] sm:$0xff] }
 0x895   :  { %8211 = vmatmul.mubr.msk.f32.gmra.mxu0 %vm3575_vm3, %v17447_v24  ;;  %8227 = vmatmul.mubr.msk.f32.gmra.mxu1 %vm3575_vm3, %v17447_v24  ;;  %v14108_v51 = vpop.f32.mrf.mxu0  ;;  %v14110_v39 = vpop.f32.mrf.mxu1 }
 0x896   :  { %17508 = vst [vmem:[#allocation9_spill] sm:$0xff] %v14108_v51  ;;  %17509 = vst [vmem:[#allocation24_spill] sm:$0xff] %v14110_v39  ;;  %5492 = vmatprep.mubr.f32.mxu0 %v17419_v63  ;;  %5653 = vmatprep.mubr.f32.mxu1 %v17419_v63  ;;  %v3366_v39 = vld [vmem:[%s16887_s15 + $0x390] sm:$0xff] }
 0x897   :  { %v14114_v45 = vpop.f32.mrf.mxu0  ;;  %v14116_v52 = vpop.f32.mrf.mxu1 }
 0x898   :  { %17510 = vst [vmem:[#allocation23_spill] sm:$0xff] %v14114_v45  ;;  %17511 = vst [vmem:[#allocation8_spill] sm:$0xff] %v14116_v52  ;;  %v3348_v52 = vld [vmem:[%s16887_s15 + $0x300] sm:$0xff]  ;;  %v3334_v45 = vld [vmem:[%s16887_s15 + $0x290] sm:$0xff] }
 0x899   :  { %8212 = vmatmul.mubr.msk.f32.gmra.mxu0 %vm3575_vm3, %v17448_v3  ;;  %8228 = vmatmul.mubr.msk.f32.gmra.mxu1 %vm3575_vm3, %v17448_v3 }
 0x89a   :  { %5498 = vmatprep.mubr.f32.mxu0 %v17419_v63  ;;  %5659 = vmatprep.mubr.f32.mxu1 %v17419_v63 }
 0x89b   :  { %v14124_v24 = vpop.f32.mrf.mxu0  ;;  %v14126_v26 = vpop.f32.mrf.mxu1 }
 0x89c   :  { %17512 = vst [vmem:[#allocation6_spill] sm:$0xff] %v14124_v24  ;;  %17513 = vst [vmem:[#allocation7_spill] sm:$0xff] %v14126_v26 }
 0x89d   :  { %8213 = vmatmul.mubr.msk.f32.gmra.mxu0 %vm3575_vm3, %v17449_v29  ;;  %8229 = vmatmul.mubr.msk.f32.gmra.mxu1 %vm3575_vm3, %v17449_v29  ;;  %v14132_v0 = vpop.f32.mrf.mxu0  ;;  %v14134_v56 = vpop.f32.mrf.mxu1 }
 0x89e   :  { %17514 = vst [vmem:[#allocation4_spill] sm:$0xff] %v14132_v0  ;;  %17515 = vst [vmem:[#allocation26_spill] sm:$0xff] %v14134_v56  ;;  %5504 = vmatprep.mubr.f32.mxu0 %v17419_v63  ;;  %5665 = vmatprep.mubr.f32.mxu1 %v17419_v63 }
 0x89f   :  { %v14138_v3 = vpop.f32.mrf.mxu0  ;;  %v14140_v25 = vpop.f32.mrf.mxu1 }
 0x8a0   :  { %17516 = vst [vmem:[#allocation25_spill] sm:$0xff] %v14138_v3  ;;  %17517 = vst [vmem:[#allocation5_spill] sm:$0xff] %v14140_v25 }
 0x8a1   :  { %8214 = vmatmul.mubr.msk.f32.gmra.mxu0 %vm3575_vm3, %v17450_v48  ;;  %8230 = vmatmul.mubr.msk.f32.gmra.mxu1 %vm3575_vm3, %v17450_v48  ;;  %v14146_v26 = vpop.f32.mrf.mxu0  ;;  %v14148_v29 = vpop.f32.mrf.mxu1 }
 0x8a2   :  { %17518 = vst [vmem:[#allocation14_spill] sm:$0xff] %v14146_v26  ;;  %17519 = vst [vmem:[#allocation16_spill] sm:$0xff] %v14148_v29  ;;  %5510 = vmatprep.mubr.f32.mxu0 %v17419_v63  ;;  %5671 = vmatprep.mubr.f32.mxu1 %v17419_v63 }
 0x8a3   :  { %v14152_v56 = vpop.f32.mrf.mxu0  ;;  %v14154_v0 = vpop.f32.mrf.mxu1 }
 0x8a4   :  { %17520 = vst [vmem:[#allocation19_spill] sm:$0xff] %v14152_v56  ;;  %17521 = vst [vmem:[#allocation20_spill] sm:$0xff] %v14154_v0 }
 0x8a5   :  { %8215 = vmatmul.mubr.msk.f32.gmra.mxu0 %vm3575_vm3, %v17451_v54  ;;  %8231 = vmatmul.mubr.msk.f32.gmra.mxu1 %vm3575_vm3, %v17451_v54  ;;  %v14160_v25 = vpop.f32.mrf.mxu0  ;;  %v14162_v48 = vpop.f32.mrf.mxu1 }
 0x8a6   :  { %17522 = vst [vmem:[#allocation17_spill] sm:$0xff] %v14160_v25  ;;  %17523 = vst [vmem:[#allocation36_spill] sm:$0xff] %v14162_v48  ;;  %5516 = vmatprep.mubr.f32.mxu0 %v17419_v63  ;;  %5677 = vmatprep.mubr.f32.mxu1 %v17419_v63 }
 0x8a7   :  { %v14166_v29 = vpop.f32.mrf.mxu0  ;;  %v14168_v26 = vpop.f32.mrf.mxu1 }
 0x8a8   :  { %17524 = vst [vmem:[#allocation18_spill] sm:$0xff] %v14166_v29  ;;  %17525 = vst [vmem:[#allocation38_spill] sm:$0xff] %v14168_v26 }
 0x8a9   :  { %8216 = vmatmul.mubr.msk.f32.gmra.mxu0 %vm3575_vm3, %v17452_v14  ;;  %8232 = vmatmul.mubr.msk.f32.gmra.mxu1 %vm3575_vm3, %v17452_v14  ;;  %v14174_v0 = vpop.f32.mrf.mxu0  ;;  %v14176_v54 = vpop.f32.mrf.mxu1 }
 0x8aa   :  { %17526 = vst [vmem:[#allocation35_spill] sm:$0xff] %v14174_v0  ;;  %17527 = vst [vmem:[#allocation44_spill] sm:$0xff] %v14176_v54 }
 0x8ab   :  { %v14178_v25 = vpop.f32.mrf.mxu0  ;;  %v14180_v48 = vpop.f32.mrf.mxu1 }
 0x8ac   :  { %17528 = vst [vmem:[#allocation37_spill] sm:$0xff] %v14178_v25  ;;  %17529 = vst [vmem:[#allocation43_spill] sm:$0xff] %v14180_v48 }
 0x8ad   :  { %v14182_v56 = vpop.f32.mrf.mxu0  ;;  %v14184_v63 = vpop.f32.mrf.mxu1 }
 0x8ae   :  { %17530 = vst [vmem:[#allocation40_spill] sm:$0xff] %v14182_v56  ;;  %17531 = vst [vmem:[#allocation45_spill] sm:$0xff] %v14184_v63 }
 0x8af   :  { %v14186_v29 = vpop.f32.mrf.mxu0  ;;  %v14188_v26 = vpop.f32.mrf.mxu1 }
 0x8b0   :  { %17532 = vst [vmem:[#allocation46_spill] sm:$0xff] %v14186_v29  ;;  %17533 = vst [vmem:[#allocation68_spill] sm:$0xff] %v14188_v26 }
 0x8b1   :  { %v14190_v3 = vpop.f32.mrf.mxu0  ;;  %v14192_v24 = vpop.f32.mrf.mxu1 }
 0x8b2   :  { %17534 = vst [vmem:[#allocation69_spill] sm:$0xff] %v14190_v3  ;;  %17535 = vst [vmem:[#allocation70_spill] sm:$0xff] %v14192_v24 }
 0x8b3   :  { %v14194_v14 = vpop.f32.mrf.mxu0  ;;  %v14196_v0 = vpop.f32.mrf.mxu1 }
 0x8b4   :  { %17536 = vst [vmem:[#allocation71_spill] sm:$0xff] %v14194_v14  ;;  %17537 = vst [vmem:[#allocation72_spill] sm:$0xff] %v14196_v0 }
 0x8b5   :  { %v14198_v54 = vpop.f32.mrf.mxu0  ;;  %v14200_v25 = vpop.f32.mrf.mxu1 }
 0x8b6   :  { %17538 = vst [vmem:[#allocation73_spill] sm:$0xff] %v14198_v54  ;;  %17539 = vst [vmem:[#allocation74_spill] sm:$0xff] %v14200_v25 }
 0x8b7   :  { %v14202_v48 = vpop.f32.mrf.mxu0  ;;  %v14204_v56 = vpop.f32.mrf.mxu1 }
 0x8b8   :  { %17540 = vst [vmem:[#allocation75_spill] sm:$0xff] %v14202_v48  ;;  %17541 = vst [vmem:[#allocation76_spill] sm:$0xff] %v14204_v56 }
 0x8b9   :  { %v14206_v63 = vpop.f32.mrf.mxu0  ;;  %v14208_v29 = vpop.f32.mrf.mxu1 }
 0x8ba   :  { %17542 = vst [vmem:[#allocation77_spill] sm:$0xff] %v14206_v63  ;;  %17543 = vst [vmem:[#allocation78_spill] sm:$0xff] %v14208_v29 }
 0x8bb   :  { %v14210_v26 = vpop.f32.mrf.mxu0  ;;  %v14212_v3 = vpop.f32.mrf.mxu1 }
 0x8bc   :  { %17544 = vst [vmem:[#allocation79_spill] sm:$0xff] %v14210_v26  ;;  %17545 = vst [vmem:[#allocation80_spill] sm:$0xff] %v14212_v3 }
 0x8bd   :  { %v14214_v24 = vpop.f32.mrf.mxu0  ;;  %v14216_v14 = vpop.f32.mrf.mxu1 }
 0x8be   :  { %17546 = vst [vmem:[#allocation81_spill] sm:$0xff] %v14214_v24  ;;  %17547 = vst [vmem:[#allocation82_spill] sm:$0xff] %v14216_v14 }
 0x8bf   :  { %v14218_v0 = vpop.f32.mrf.mxu0  ;;  %v14220_v54 = vpop.f32.mrf.mxu1 }
 0x8c0   :  { %17548 = vst [vmem:[#allocation83_spill] sm:$0xff] %v14218_v0  ;;  %17549 = vst [vmem:[#allocation84_spill] sm:$0xff] %v14220_v54 }
 0x8c1   :  { %v14222_v25 = vpop.f32.mrf.mxu0  ;;  %v14224_v48 = vpop.f32.mrf.mxu1 }
 0x8c2   :  { %17550 = vst [vmem:[#allocation85_spill] sm:$0xff] %v14222_v25  ;;  %17551 = vst [vmem:[#allocation86_spill] sm:$0xff] %v14224_v48  ;;  %v3316_v48 = vld [vmem:[%s16887_s15 + $0x200] sm:$0xff] }
 0x8c3   :  { %v14226_v56 = vpop.f32.mrf.mxu0  ;;  %v14228_v63 = vpop.f32.mrf.mxu1 }
 0x8c4   :  { %17552 = vst [vmem:[#allocation87_spill] sm:$0xff] %v14226_v56  ;;  %17553 = vst [vmem:[#allocation88_spill] sm:$0xff] %v14228_v63  ;;  %v3333_v63 = vld [vmem:[%s16887_s15 + $0x288] sm:$0xff]  ;;  %v3367_v56 = vld [vmem:[%s16887_s15 + $0x398] sm:$0xff] }
 0x8c5   :  { %v14230_v29 = vpop.f32.mrf.mxu0  ;;  %v14232_v26 = vpop.f32.mrf.mxu1  ;;  %v14318_v6 = vmul.f32 %v17496_v44, %v3333_v63  ;;  %v3368_v63 = vld [vmem:[%s16887_s15 + $0x3a0] sm:$0xff] }
 0x8c6   :  { %17554 = vst [vmem:[#allocation89_spill] sm:$0xff] %v14230_v29  ;;  %17555 = vst [vmem:[#allocation90_spill] sm:$0xff] %v14232_v26  ;;  %v3365_v26 = vld [vmem:[%s16887_s15 + $0x388] sm:$0xff]  ;;  %v3335_v29 = vld [vmem:[%s16887_s15 + $0x298] sm:$0xff] }
 0x8c7   :  { %v14234_v3 = vpop.f32.mrf.mxu0  ;;  %v14236_v24 = vpop.f32.mrf.mxu1  ;;  %17566 = vst [vmem:[#allocation101_spill] sm:$0xff] %v14318_v6  ;;  %v14321_v8 = vmul.f32 %v17496_v44, %v3365_v26 }
 0x8c8   :  { %17556 = vst [vmem:[#allocation91_spill] sm:$0xff] %v14234_v3  ;;  %17557 = vst [vmem:[#allocation92_spill] sm:$0xff] %v14236_v24  ;;  %v3317_v24 = vld [vmem:[%s16887_s15 + $0x208] sm:$0xff] }
 0x8c9   :  { %v14238_v14 = vpop.f32.mrf.mxu0  ;;  %v14240_v0 = vpop.f32.mrf.mxu1  ;;  %17567 = vst [vmem:[#allocation102_spill] sm:$0xff] %v14321_v8  ;;  %v14337_v6 = vmul.f32 %v17496_v44, %v3317_v24  ;;  %v3323_v8 = vld [vmem:[%s16887_s15 + $0x238] sm:$0xff]  ;;  %v3338_v24 = vld [vmem:[%s16887_s15 + $0x2b0] sm:$0xff] }
 0x8ca   :  { %17558 = vst [vmem:[#allocation93_spill] sm:$0xff] %v14238_v14  ;;  %17559 = vst [vmem:[#allocation94_spill] sm:$0xff] %v14240_v0  ;;  %v3349_v0 = vld [vmem:[%s16887_s15 + $0x308] sm:$0xff] }
 0x8cb   :  { %v14242_v54 = vpop.f32.mrf.mxu0  ;;  %v14244_v25 = vpop.f32.mrf.mxu1  ;;  %17570 = vst [vmem:[#allocation105_spill] sm:$0xff] %v14337_v6  ;;  %v14340_v26 = vmul.f32 %v17496_v44, %v3349_v0  ;;  %v3320_v44 = vld [vmem:[%s16887_s15 + $0x220] sm:$0xff]  ;;  %v14361_v0 = vmul.f32 %v17490_v2, %v3335_v29  ;;  %v3370_v6 = vld [vmem:[%s16887_s15 + $0x3b0] sm:$0xff] }
 0x8cc   :  { %17560 = vst [vmem:[#allocation95_spill] sm:$0xff] %v14242_v54  ;;  %17561 = vst [vmem:[#allocation96_spill] sm:$0xff] %v14244_v25  ;;  %v3332_v25 = vld [vmem:[%s16887_s15 + $0x280] sm:$0xff]  ;;  %v3322_v29 = vld [vmem:[%s16887_s15 + $0x230] sm:$0xff] }
 0x8cd   :  { %v3364_v54 = vld [vmem:[%s16887_s15 + $0x380] sm:$0xff]  ;;  %v14264_v14 = vpop.f32.mrf.mxu0  ;;  %v14266_v3 = vpop.f32.mrf.mxu1  ;;  %17571 = vst [vmem:[#allocation106_spill] sm:$0xff] %v14340_v26  ;;  %17574 = vst [vmem:[#allocation109_spill] sm:$0xff] %v14361_v0 }
 0x8ce   :  { %17562 = vst [vmem:[#allocation97_spill] sm:$0xff] %v14264_v14  ;;  %17563 = vst [vmem:[#allocation98_spill] sm:$0xff] %v14266_v3  ;;  %v3319_v3 = vld [vmem:[%s16887_s15 + $0x218] sm:$0xff] }
 0x8cf   :  { %v3351_v14 = vld [vmem:[%s16887_s15 + $0x318] sm:$0xff]  ;;  %v14292_v51 = vpop.f32.mrf.mxu0  ;;  %v14294_v33 = vpop.f32.mrf.mxu1 }
 0x8d0   :  { %17564 = vst [vmem:[#allocation99_spill] sm:$0xff] %v14292_v51  ;;  %17565 = vst [vmem:[#allocation100_spill] sm:$0xff] %v14294_v33  ;;  %v3321_v33 = vld [vmem:[%s16887_s15 + $0x228] sm:$0xff] }
 0x8d1   :  { %v3353_v51 = vld [vmem:[%s16887_s15 + $0x328] sm:$0xff]  ;;  %v14323_v18 = vpop.f32.mrf.mxu0  ;;  %v14325_v49 = vpop.f32.mrf.mxu1 }
 0x8d2   :  { %17568 = vst [vmem:[#allocation103_spill] sm:$0xff] %v14323_v18  ;;  %17569 = vst [vmem:[#allocation104_spill] sm:$0xff] %v14325_v49  ;;  %v14343_v49 = vmul.f32 %v3332_v25, %v17499_v32  ;;  %v14346_v18 = vmul.f32 %v3364_v54, %v17499_v32  ;;  %v14364_v25 = vmul.f32 %v17490_v2, %v3367_v56  ;;  %v3352_v56 = vld [vmem:[%s16887_s15 + $0x320] sm:$0xff] }
 0x8d3   :  { %v14367_v54 = vmul.f32 %v3316_v48, %v17499_v32  ;;  %v14374_v26 = vpop.f32.mrf.mxu1  ;;  %v14386_v48 = vmul.f32 %v17490_v2, %v3319_v3  ;;  %v3354_v3 = vld [vmem:[%s16887_s15 + $0x330] sm:$0xff] }
 0x8d4   :  { %17572 = vst [vmem:[#allocation107_spill] sm:$0xff] %v14343_v49  ;;  %17573 = vst [vmem:[#allocation108_spill] sm:$0xff] %v14346_v18  ;;  %v14370_v18 = vmul.f32 %v3348_v52, %v17499_v32  ;;  %v14372_v49 = vpop.f32.mrf.mxu0  ;;  %v14389_v32 = vmul.f32 %v17490_v2, %v3351_v14  ;;  %v14392_v52 = vmul.f32 %v3334_v45, %v17493_v11 }
 0x8d5   :  { %17575 = vst [vmem:[#allocation110_spill] sm:$0xff] %v14364_v25  ;;  %17576 = vst [vmem:[#allocation111_spill] sm:$0xff] %v14367_v54  ;;  %v14407_v2 = vmul.f32 %v17484_v21, %v3337_v9  ;;  %v14410_v45 = vmul.f32 %v17484_v21, %v3369_v23  ;;  %v14416_v14 = vmul.f32 %v3350_v50, %v17493_v11  ;;  %v3357_v9 = vld [vmem:[%s16887_s15 + $0x348] sm:$0xff]  ;;  %v3342_v25 = vld [vmem:[%s16887_s15 + $0x2d0] sm:$0xff] }
 0x8d6   :  { %17577 = vst [vmem:[#allocation112_spill] sm:$0xff] %v14370_v18  ;;  %17578 = vst [vmem:[#allocation113_spill] sm:$0xff] %v14372_v49  ;;  %v3341_v49 = vld [vmem:[%s16887_s15 + $0x2c8] sm:$0xff]  ;;  %v14418_v54 = vpop.f32.mrf.mxu0  ;;  %v14432_v23 = vmul.f32 %v17484_v21, %v3321_v33  ;;  %v14438_v50 = vmul.f32 %v3336_v7, %v17487_v20  ;;  %v3356_v33 = vld [vmem:[%s16887_s15 + $0x340] sm:$0xff]  ;;  %v14456_v7 = vmul.f32 %v17478_v36, %v3371_v17 }
 0x8d7   :  { %17579 = vst [vmem:[#allocation114_spill] sm:$0xff] %v14374_v26  ;;  %17580 = vst [vmem:[#allocation115_spill] sm:$0xff] %v14386_v48  ;;  %v14395_v26 = vmul.f32 %v3366_v39, %v17493_v11  ;;  %v3373_v18 = vld [vmem:[%s16887_s15 + $0x3c8] sm:$0xff]  ;;  %v14413_v39 = vmul.f32 %v3318_v12, %v17493_v11  ;;  %v3340_v12 = vld [vmem:[%s16887_s15 + $0x2c0] sm:$0xff]  ;;  %v14435_v11 = vmul.f32 %v17484_v21, %v3353_v51 }
 0x8d8   :  { %17581 = vst [vmem:[#allocation116_spill] sm:$0xff] %v14389_v32  ;;  %17582 = vst [vmem:[#allocation117_spill] sm:$0xff] %v14392_v52  ;;  %v3325_v52 = vld [vmem:[%s16887_s15 + $0x248] sm:$0xff]  ;;  %v14453_v21 = vmul.f32 %v17478_v36, %v3339_v19  ;;  %v14459_v51 = vmul.f32 %v3320_v44, %v17487_v20  ;;  %v3343_v48 = vld [vmem:[%s16887_s15 + $0x2d8] sm:$0xff]  ;;  %v14478_v44 = vmul.f32 %v17478_v36, %v3323_v8 }
 0x8d9   :  { %17583 = vst [vmem:[#allocation118_spill] sm:$0xff] %v14395_v26  ;;  %17584 = vst [vmem:[#allocation119_spill] sm:$0xff] %v14407_v2  ;;  %v14420_v26 = vpop.f32.mrf.mxu1  ;;  %v3375_v19 = vld [vmem:[%s16887_s15 + $0x3d8] sm:$0xff]  ;;  %v3374_v8 = vld [vmem:[%s16887_s15 + $0x3d0] sm:$0xff] }
 0x8da   :  { %17585 = vst [vmem:[#allocation120_spill] sm:$0xff] %v14410_v45  ;;  %17586 = vst [vmem:[#allocation121_spill] sm:$0xff] %v14413_v39  ;;  %v14464_v39 = vpop.f32.mrf.mxu0  ;;  %v3327_v17 = vld [vmem:[%s16887_s15 + $0x258] sm:$0xff]  ;;  %v3376_v2 = vld [vmem:[%s16887_s15 + $0x3e0] sm:$0xff] }
 0x8db   :  { %17587 = vst [vmem:[#allocation122_spill] sm:$0xff] %v14416_v14  ;;  %17588 = vst [vmem:[#allocation123_spill] sm:$0xff] %v14418_v54  ;;  %v3372_v54 = vld [vmem:[%s16887_s15 + $0x3c0] sm:$0xff]  ;;  %v14466_v32 = vpop.f32.mrf.mxu1  ;;  %v14560_v45 = vmul.f32 %v17464_v28, %v3327_v17 }
 0x8dc   :  { %17589 = vst [vmem:[#allocation124_spill] sm:$0xff] %v14420_v26  ;;  %17590 = vst [vmem:[#allocation125_spill] sm:$0xff] %v14432_v23  ;;  %v14441_v26 = vmul.f32 %v3368_v63, %v17487_v20  ;;  %v3324_v14 = vld [vmem:[%s16887_s15 + $0x240] sm:$0xff]  ;;  %v14462_v63 = vmul.f32 %v3352_v56, %v17487_v20  ;;  %v14481_v20 = vmul.f32 %v17478_v36, %v3355_v40  ;;  %v14510_v0 = vpop.f32.mrf.mxu0 }
 0x8dd   :  { %17591 = vst [vmem:[#allocation126_spill] sm:$0xff] %v14435_v11  ;;  %17592 = vst [vmem:[#allocation127_spill] sm:$0xff] %v14438_v50  ;;  %v14484_v56 = vmul.f32 %v3338_v24, %v17481_v34  ;;  %v14499_v40 = vmul.f32 %v17472_v41, %v3341_v49  ;;  %v14502_v36 = vmul.f32 %v17472_v41, %v3373_v18  ;;  %v3326_v49 = vld [vmem:[%s16887_s15 + $0x250] sm:$0xff]  ;;  %v3344_v23 = vld [vmem:[%s16887_s15 + $0x2e0] sm:$0xff] }
 0x8de   :  { %17593 = vst [vmem:[#allocation128_spill] sm:$0xff] %v14441_v26  ;;  %17594 = vst [vmem:[#allocation129_spill] sm:$0xff] %v14453_v21  ;;  %v14508_v24 = vmul.f32 %v3354_v3, %v17481_v34  ;;  %v3358_v18 = vld [vmem:[%s16887_s15 + $0x350] sm:$0xff]  ;;  %v14530_v3 = vmul.f32 %v3340_v12, %v17475_v10  ;;  %v3329_v26 = vld [vmem:[%s16887_s15 + $0x268] sm:$0xff]  ;;  %v14554_v12 = vmul.f32 %v3356_v33, %v17475_v10  ;;  %v5106_v50 = vpop.f32.mrf.mxu0 }
 0x8df   :  { %17595 = vst [vmem:[#allocation130_spill] sm:$0xff] %v14456_v7  ;;  %17596 = vst [vmem:[#allocation131_spill] sm:$0xff] %v14459_v51  ;;  %v3345_v51 = vld [vmem:[%s16887_s15 + $0x2e8] sm:$0xff]  ;;  %v3328_v17 = vld [vmem:[%s16887_s15 + $0x260] sm:$0xff] }
 0x8e0   :  { %17597 = vst [vmem:[#allocation132_spill] sm:$0xff] %v14462_v63  ;;  %17598 = vst [vmem:[#allocation133_spill] sm:$0xff] %v14464_v39  ;;  %v3359_v39 = vld [vmem:[%s16887_s15 + $0x358] sm:$0xff]  ;;  %v14512_v63 = vpop.f32.mrf.mxu1  ;;  %v3330_v21 = vld [vmem:[%s16887_s15 + $0x270] sm:$0xff] }
 0x8e1   :  { %17599 = vst [vmem:[#allocation134_spill] sm:$0xff] %v14466_v32  ;;  %17600 = vst [vmem:[#allocation135_spill] sm:$0xff] %v14478_v44  ;;  %v14487_v32 = vmul.f32 %v3370_v6, %v17481_v34  ;;  %v14505_v6 = vmul.f32 %v3322_v29, %v17481_v34  ;;  %v14524_v29 = vmul.f32 %v17472_v41, %v3325_v52  ;;  %v3361_v52 = vld [vmem:[%s16887_s15 + $0x368] sm:$0xff] }
 0x8e2   :  { %17601 = vst [vmem:[#allocation136_spill] sm:$0xff] %v14481_v20  ;;  %17602 = vst [vmem:[#allocation137_spill] sm:$0xff] %v14484_v56  ;;  %v14527_v34 = vmul.f32 %v17472_v41, %v3357_v9  ;;  %v14545_v41 = vmul.f32 %v17464_v28, %v3343_v48  ;;  %v14548_v9 = vmul.f32 %v17464_v28, %v3375_v19  ;;  %v5267_v11 = vpop.f32.mrf.mxu1 }
 0x8e3   :  { %17603 = vst [vmem:[#allocation138_spill] sm:$0xff] %v14487_v32  ;;  %17604 = vst [vmem:[#allocation139_spill] sm:$0xff] %v14499_v40  ;;  %v14563_v48 = vmul.f32 %v17464_v28, %v3359_v39  ;;  %v14566_v19 = vmul.f32 %v3342_v25, %v17467_v62  ;;  %v5268_v33 = vadd.f32 %v5267_v11, %v13646_v30  ;;  %v3360_v28 = vld [vmem:[%s16887_s15 + $0x360] sm:$0xff]  ;;  %v3331_v11 = vld [vmem:[%s16887_s15 + $0x278] sm:$0xff] }
 0x8e4   :  { %17605 = vst [vmem:[#allocation140_spill] sm:$0xff] %v14502_v36  ;;  %17606 = vst [vmem:[#allocation141_spill] sm:$0xff] %v14505_v6  ;;  %v14583_v25 = vmul.f32 %v3326_v49, %v17467_v62  ;;  %v14586_v39 = vmul.f32 %v3358_v18, %v17467_v62  ;;  %v5269_v30 = vpop.f32.mrf.mxu1  ;;  %v14601_v49 = vmul.f32 %v17456_v61, %v3329_v26  ;;  %v2956_v26 = vld [vmem:[%s16888_s2] sm:$0xff] }
 0x8e5   :  { %17607 = vst [vmem:[#allocation142_spill] sm:$0xff] %v14508_v24  ;;  %17608 = vst [vmem:[#allocation143_spill] sm:$0xff] %v14510_v0  ;;  %v3377_v0 = vld [vmem:[%s16887_s15 + $0x3e8] sm:$0xff]  ;;  %v5686_v6 = vmul.f32 0.2, %v5268_v33  ;;  %v5270_v56 = vadd.f32 %v5269_v30, %v13654_v22  ;;  %v14624_v22 = vmul.f32 %v3376_v2, %v17459_v42  ;;  %v14659_v40 = vmul.f32 %v3330_v21, %v17453_v27  ;;  %v2966_v21 = vld [vmem:[%s16888_s2 + $0x50] sm:$0xff] }
 0x8e6   :  { %17609 = vst [vmem:[#allocation144_spill] sm:$0xff] %v14512_v63  ;;  %17610 = vst [vmem:[#allocation145_spill] sm:$0xff] %v14524_v29  ;;  %v14533_v63 = vmul.f32 %v3372_v54, %v17475_v10  ;;  %v14551_v54 = vmul.f32 %v3324_v14, %v17475_v10  ;;  %v14569_v14 = vmul.f32 %v3374_v8, %v17467_v62  ;;  %v2957_v2 = vld [vmem:[%s16888_s2 + $0x8] sm:$0xff] }
 0x8e7   :  { %17611 = vst [vmem:[#allocation146_spill] sm:$0xff] %v14527_v34  ;;  %17612 = vst [vmem:[#allocation147_spill] sm:$0xff] %v14530_v3  ;;  %v5107_v10 = vadd.f32 %v5106_v50, %v13644_v5  ;;  %v5108_v5 = vpop.f32.mrf.mxu0  ;;  %v3363_v50 = vld [vmem:[%s16887_s15 + $0x378] sm:$0xff]  ;;  %v14595_v8 = vmul.f32 %v17456_v61, %v3345_v51  ;;  %v14598_v24 = vmul.f32 %v17456_v61, %v3377_v0  ;;  %v3346_v51 = vld [vmem:[%s16887_s15 + $0x2f0] sm:$0xff]  ;;  %v5687_v7 = vmul.f32 0.2, %v5270_v56 }
 0x8e8   :  { %17613 = vst [vmem:[#allocation148_spill] sm:$0xff] %v14533_v63  ;;  %17614 = vst [vmem:[#allocation149_spill] sm:$0xff] %v14551_v54  ;;  %v14604_v62 = vmul.f32 %v17456_v61, %v3361_v52  ;;  %v5109_v32 = vadd.f32 %v5108_v5, %v13652_v53  ;;  %v3378_v0 = vld [vmem:[%s16887_s15 + $0x3f0] sm:$0xff]  ;;  %v14621_v53 = vmul.f32 %v3344_v23, %v17459_v42 }
 0x8e9   :  { %17615 = vst [vmem:[#allocation150_spill] sm:$0xff] %v14554_v12  ;;  %17616 = vst [vmem:[#allocation151_spill] sm:$0xff] %v14586_v39  ;;  %v5684_v18 = vmul.f32 0.2, %v5107_v10  ;;  %v2958_v61 = vld [vmem:[%s16888_s2 + $0x10] sm:$0xff]  ;;  %v14627_v52 = vmul.f32 %v3328_v17, %v17459_v42  ;;  %v14630_v5 = vmul.f32 %v3360_v28, %v17459_v42  ;;  %v5814_v20 = vmax.f32 %v5268_v33, %v5686_v6  ;;  %v2959_v42 = vld [vmem:[%s16888_s2 + $0x18] sm:$0xff]  ;;  %v5273_v6 = vpop.f32.mrf.mxu1 }
 0x8ea   :  { %v5685_v44 = vmul.f32 0.2, %v5109_v32  ;;  %v3362_v23 = vld [vmem:[%s16887_s15 + $0x370] sm:$0xff]  ;;  %v14645_v33 = vmul.f32 %v17437_v58, %v3331_v11  ;;  %v14648_v17 = vmul.f32 %v17437_v58, %v3363_v50  ;;  %v14651_v28 = vmul.f32 %v3346_v51, %v17453_v27 }
 0x8eb   :  { %v5812_v30 = vmax.f32 %v5107_v10, %v5684_v18  ;;  %v5112_v10 = vpop.f32.mrf.mxu0  ;;  %v14654_v18 = vmul.f32 %v3378_v0, %v17453_v27  ;;  %v5942_v54 = vadd.f32 %v5814_v20, %v2958_v61  ;;  %v5815_v3 = vmax.f32 %v5270_v56, %v5687_v7  ;;  %v5275_v11 = vpop.f32.mrf.mxu1 }
 0x8ec   :  { %v5813_v63 = vmax.f32 %v5109_v32, %v5685_v44  ;;  %v5113_v34 = vadd.f32 %v5112_v10, %v13658_v38  ;;  %v5274_v29 = vadd.f32 %v5273_v6, %v13660_v47  ;;  %v14662_v58 = vmul.f32 %v3362_v23, %v17453_v27  ;;  %v2964_v27 = vld [vmem:[%s16888_s2 + $0x40] sm:$0xff] }
 0x8ed   :  { %v5940_v12 = vadd.f32 %v5812_v30, %v2956_v26  ;;  %v5114_v36 = vpop.f32.mrf.mxu0  ;;  %v6072_v51 = vmul.f32 1.442695, %v5942_v54  ;;  %v5943_v39 = vadd.f32 %v5815_v3, %v2959_v42  ;;  %v5276_v38 = vadd.f32 %v5275_v11, %v13668_v46  ;;  %v5279_v47 = vpop.f32.mrf.mxu1 }
 0x8ee   :  { %v5941_v0 = vadd.f32 %v5813_v63, %v2957_v2  ;;  %v5692_v26 = vmul.f32 0.2, %v5113_v34  ;;  %v5694_v20 = vmul.f32 0.2, %v5274_v29  ;;  %v5115_v32 = vadd.f32 %v5114_v36, %v13666_v57 }
 0x8ef   :  { %v6068_v50 = vmul.f32 1.442695, %v5940_v12  ;;  %v5118_v7 = vpop.f32.mrf.mxu0  ;;  %v6074_v56 = vmul.f32 1.442695, %v5943_v39  ;;  %v5281_v54 = vpop.f32.mrf.mxu1  ;;  %v2965_v12 = vld [vmem:[%s16888_s2 + $0x48] sm:$0xff]  ;;  %v5280_v30 = vadd.f32 %v5279_v47, %v13674_v13 }
 0x8f0   :  { %v6070_v44 = vmul.f32 1.442695, %v5941_v0  ;;  %v5119_v63 = vadd.f32 %v5118_v7, %v13672_v35  ;;  %v5820_v3 = vmax.f32 %v5113_v34, %v5692_v26  ;;  %v5822_v57 = vmax.f32 %v5274_v29, %v5694_v20  ;;  %v2967_v35 = vld [vmem:[%s16888_s2 + $0x58] sm:$0xff]  ;;  %v2972_v29 = vld [vmem:[%s16888_s2 + $0x80] sm:$0xff]  ;;  %v2974_v20 = vld [vmem:[%s16888_s2 + $0x90] sm:$0xff] }
 0x8f1   :  { %9656 = vpow2.f32 %v6068_v50  ;;  %v5693_v36 = vmul.f32 0.2, %v5115_v32  ;;  %v5120_v46 = vpop.f32.mrf.mxu0  ;;  %v5695_v39 = vmul.f32 0.2, %v5276_v38  ;;  %v5285_v10 = vpop.f32.mrf.mxu1  ;;  %v5702_v50 = vmul.f32 0.2, %v5280_v30 }
 0x8f2   :  { %9658 = vpow2.f32 %v6072_v51  ;;  %v5700_v61 = vmul.f32 0.2, %v5119_v63  ;;  %v5948_v23 = vadd.f32 %v5820_v3, %v2964_v27  ;;  %v5950_v2 = vadd.f32 %v5822_v57, %v2966_v21 }
 0x8f3   :  { %9660 = vpow2.f32 %v6070_v44  ;;  %v5821_v42 = vmax.f32 %v5115_v32, %v5693_v36  ;;  %v5124_v34 = vpop.f32.mrf.mxu0  ;;  %v5823_v6 = vmax.f32 %v5276_v38, %v5695_v39  ;;  %v5121_v51 = vadd.f32 %v5120_v46, %v13680_v15  ;;  %v5287_v47 = vpop.f32.mrf.mxu1 }
 0x8f4   :  { %9662 = vpow2.f32 %v6074_v56  ;;  %v5828_v11 = vmax.f32 %v5119_v63, %v5700_v61  ;;  %v6084_v13 = vmul.f32 1.442695, %v5948_v23  ;;  %v6088_v0 = vmul.f32 1.442695, %v5950_v2 }
 0x8f5   :  { %v5949_v26 = vadd.f32 %v5821_v42, %v2965_v12  ;;  %v5282_v32 = vadd.f32 %v5281_v54, %v13682_v59  ;;  %v5126_v7 = vpop.f32.mrf.mxu0  ;;  %v5951_v44 = vadd.f32 %v5823_v6, %v2967_v35  ;;  %v5830_v27 = vmax.f32 %v5280_v30, %v5702_v50  ;;  %v5291_v57 = vpop.f32.mrf.mxu1  ;;  %v2973_v59 = vld [vmem:[%s16888_s2 + $0x88] sm:$0xff]  ;;  %v2975_v54 = vld [vmem:[%s16888_s2 + $0x98] sm:$0xff]  ;;  %v2980_v42 = vld [vmem:[%s16888_s2 + $0xc0] sm:$0xff] }
 0x8f6   :  { %v5956_v56 = vadd.f32 %v5828_v11, %v2972_v29  ;;  %v5701_v21 = vmul.f32 0.2, %v5121_v51  ;;  %9664 = vpow2.f32 %v6084_v13  ;;  %v5125_v15 = vadd.f32 %v5124_v34, %v13686_v60 }
 0x8f7   :  { %v6086_v38 = vmul.f32 1.442695, %v5949_v26  ;;  %v5703_v63 = vmul.f32 0.2, %v5282_v32  ;;  %v5130_v3 = vpop.f32.mrf.mxu0  ;;  %9666 = vpow2.f32 %v6088_v0  ;;  %v6090_v36 = vmul.f32 1.442695, %v5951_v44  ;;  %v5293_v60 = vpop.f32.mrf.mxu1 }
 0x8f8   :  { %v6100_v46 = vmul.f32 1.442695, %v5956_v56  ;;  %v5958_v12 = vadd.f32 %v5830_v27, %v2974_v20  ;;  %v5829_v39 = vmax.f32 %v5121_v51, %v5701_v21  ;;  %v5708_v30 = vmul.f32 0.2, %v5125_v15 }
 0x8f9   :  { %9668 = vpow2.f32 %v6086_v38  ;;  %v5831_v61 = vmax.f32 %v5282_v32, %v5703_v63  ;;  %v5132_v23 = vpop.f32.mrf.mxu0  ;;  %v5286_v35 = vadd.f32 %v5285_v10, %v13688_v43  ;;  %v5127_v29 = vadd.f32 %v5126_v7, %v13700_v16  ;;  %v5297_v51 = vpop.f32.mrf.mxu1  ;;  %v2982_v43 = vld [vmem:[%s16888_s2 + $0xd0] sm:$0xff]  ;;  %v2981_v16 = vld [vmem:[%s16888_s2 + $0xc8] sm:$0xff] }
 0x8fa   :  { %9670 = vpow2.f32 %v6090_v36  ;;  %v6104_v2 = vmul.f32 1.442695, %v5958_v12  ;;  %v5957_v34 = vadd.f32 %v5829_v39, %v2973_v59  ;;  %v5836_v11 = vmax.f32 %v5125_v15, %v5708_v30 }
 0x8fb   :  { %9672 = vpow2.f32 %v6100_v46  ;;  %v5959_v6 = vadd.f32 %v5831_v61, %v2975_v54  ;;  %v5136_v50 = vpop.f32.mrf.mxu0  ;;  %v5710_v13 = vmul.f32 0.2, %v5286_v35  ;;  %v5709_v0 = vmul.f32 0.2, %v5127_v29  ;;  %v14712_v27 = vpop.f32.mrf.mxu1  ;;  %v2983_v46 = vld [vmem:[%s16888_s2 + $0xd8] sm:$0xff]  ;;  %v2988_v61 = vld [vmem:[%s16888_s2 + $0x100] sm:$0xff] }
 0x8fc   :  { %9674 = vpow2.f32 %v6104_v2  ;;  %v5288_v26 = vadd.f32 %v5287_v47, %v13702_v31  ;;  %v6102_v32 = vmul.f32 1.442695, %v5957_v34  ;;  %v5964_v56 = vadd.f32 %v5836_v11, %v2980_v42  ;;  %v2989_v11 = vld [vmem:[%s16888_s2 + $0x108] sm:$0xff] }
 0x8fd   :  { %v6106_v44 = vmul.f32 1.442695, %v5959_v6  ;;  %v5131_v10 = vadd.f32 %v5130_v3, %v13718_v1  ;;  %v14710_v7 = vpop.f32.mrf.mxu0  ;;  %v5838_v47 = vmax.f32 %v5286_v35, %v5710_v13  ;;  %v5837_v21 = vmax.f32 %v5127_v29, %v5709_v0  ;;  %v14725_v59 = vpop.f32.mrf.mxu1  ;;  %v2990_v6 = vld [vmem:[%s16888_s2 + $0x110] sm:$0xff] }
 0x8fe   :  { %v14701_v20 = vpop.eup %9656  ;;  %v5711_v38 = vmul.f32 0.2, %v5288_v26  ;;  %v5292_v63 = vadd.f32 %v5291_v57, %v13720_v37  ;;  %9676 = vpow2.f32 %v6102_v32  ;;  %v6116_v36 = vmul.f32 1.442695, %v5964_v56 }
 0x8ff   :  { %v14714_v31 = vpop.eup %9658  ;;  %v5716_v1 = vmul.f32 0.2, %v5131_v10  ;;  %v5133_v3 = vadd.f32 %v5132_v23, %v13736_v4  ;;  %v14723_v12 = vpop.f32.mrf.mxu0  ;;  %9678 = vpow2.f32 %v6106_v44  ;;  %v5966_v39 = vadd.f32 %v5838_v47, %v2982_v43  ;;  %v17617_v44 = vld [vmem:[#allocation51_spill] sm:$0xff] }
 0x900   :  { %v14717_v15 = vpop.eup %9660  ;;  %v5965_v37 = vadd.f32 %v5837_v21, %v2981_v16  ;;  %v5839_v57 = vmax.f32 %v5288_v26, %v5711_v38  ;;  %9680 = vpow2.f32 %v6116_v36  ;;  %v5718_v2 = vmul.f32 0.2, %v5292_v63  ;;  %v14735_v42 = vpop.f32.mrf.mxu1 }
 0x901   :  { %v14727_v54 = vpop.eup %9662  ;;  %6516 = vmatprep.mubr.f32.mxu0 %v14717_v15  ;;  %v5844_v30 = vmax.f32 %v5131_v10, %v5716_v1  ;;  %v5717_v4 = vmul.f32 0.2, %v5133_v3  ;;  %v14733_v23 = vpop.f32.mrf.mxu0  ;;  %v6120_v35 = vmul.f32 1.442695, %v5966_v39  ;;  %v5294_v13 = vadd.f32 %v5293_v60, %v13738_v55  ;;  %v17618_v60 = vld [vmem:[#allocation42_spill] sm:$0xff] }
 0x902   :  { %6661 = vmatprep.mubr.f32.mxu1 %v14727_v54  ;;  %6517 = vmatmul.mubr.f32.vlgmr.msra.gmra.mxu0 %v14701_v20  ;;  %v6118_v29 = vmul.f32 1.442695, %v5965_v37  ;;  %v5967_v34 = vadd.f32 %v5839_v57, %v2983_v46  ;;  %v5846_v26 = vmax.f32 %v5292_v63, %v5718_v2  ;;  %v5137_v56 = vadd.f32 %v5136_v50, %v17617_v44  ;;  %v14751_v16 = vpop.f32.mrf.mxu1  ;;  %v17619_v57 = vld [vmem:[#allocation48_spill] sm:$0xff] }
 0x903   :  { %6662 = vmatmul.mubr.f32.vlgmr.msra.gmra.mxu1 %v14714_v31  ;;  %8812 = vmatpush3.msra.mxu0 %v14645_v33  ;;  %v5972_v0 = vadd.f32 %v5844_v30, %v2988_v61  ;;  %v5845_v32 = vmax.f32 %v5133_v3, %v5717_v4  ;;  %v14749_v43 = vpop.f32.mrf.mxu0  ;;  %v14754_v10 = vpop.eup %9664  ;;  %9682 = vpow2.f32 %v6120_v35  ;;  %v5719_v55 = vmul.f32 0.2, %v5294_v13 }
 0x904   :  { %8892 = vmatpush3.msra.mxu1 %v14648_v17  ;;  %v6122_v47 = vmul.f32 1.442695, %v5967_v34  ;;  %v5298_v21 = vadd.f32 %v5297_v51, %v17618_v60  ;;  %8813 = vmatprep.subr.mxu0 %v14651_v28  ;;  %v14759_v33 = vpop.eup %9666  ;;  %9684 = vpow2.f32 %v6118_v29  ;;  %v5974_v38 = vadd.f32 %v5846_v26, %v2990_v6  ;;  %v2991_v17 = vld [vmem:[%s16888_s2 + $0x118] sm:$0xff]  ;;  %v14766_v46 = vpop.f32.mrf.mxu1  ;;  %v17620_v29 = vld [vmem:[#allocation47_spill] sm:$0xff] }
 0x905   :  { %8893 = vmatprep.subr.mxu1 %v14654_v18  ;;  %v6132_v50 = vmul.f32 1.442695, %v5972_v0  ;;  %v5973_v63 = vadd.f32 %v5845_v32, %v2989_v11  ;;  %v14764_v36 = vpop.f32.mrf.mxu0  ;;  %8814 = vmatpush3.msra.mxu0 %v14659_v40  ;;  %v5847_v18 = vmax.f32 %v5294_v13, %v5719_v55  ;;  %v5724_v51 = vmul.f32 0.2, %v5137_v56  ;;  %v2996_v40 = vld [vmem:[%s16888_s2 + $0x140] sm:$0xff] }
 0x906   :  { %8894 = vmatpush3.msra.mxu1 %v14662_v58  ;;  %v14770_v28 = vpop.eup %9668  ;;  %9686 = vpow2.f32 %v6122_v47  ;;  %v5726_v1 = vmul.f32 0.2, %v5298_v21  ;;  %8815 = vmatprep.subr.mxu0 %v14595_v8  ;;  %v6136_v39 = vmul.f32 1.442695, %v5974_v38  ;;  %v2998_v58 = vld [vmem:[%s16888_s2 + $0x150] sm:$0xff]  ;;  %v5139_v61 = vadd.f32 %v14710_v7, %v17619_v57  ;;  %v17621_v11 = vld [vmem:[#allocation39_spill] sm:$0xff] }
 0x907   :  { %8895 = vmatprep.subr.mxu1 %v14598_v24  ;;  %v14774_v3 = vpop.eup %9670  ;;  %9688 = vpow2.f32 %v6132_v50  ;;  %v6134_v37 = vmul.f32 1.442695, %v5973_v63  ;;  %6521 = vmatprep.mubr.f32.mxu0 %v14770_v28  ;;  %v14785_v8 = vpop.f32.mrf.mxu0  ;;  %v5975_v2 = vadd.f32 %v5847_v18, %v2991_v17  ;;  %v5852_v4 = vmax.f32 %v5137_v56, %v5724_v51  ;;  %v17622_v0 = vld [vmem:[#allocation50_spill] sm:$0xff]  ;;  %v2997_v47 = vld [vmem:[%s16888_s2 + $0x148] sm:$0xff] }
 0x908   :  { %v14787_v24 = vpop.f32.mrf.mxu1  ;;  %8816 = vmatpush3.msra.mxu0 %v14601_v49  ;;  %v14790_v30 = vpop.eup %9672  ;;  %v5854_v35 = vmax.f32 %v5298_v21, %v5726_v1  ;;  %v5300_v34 = vadd.f32 %v14712_v27, %v17620_v29  ;;  %6666 = vmatprep.mubr.f32.mxu1 %v14774_v3  ;;  %9690 = vpow2.f32 %v6136_v39  ;;  %v5725_v7 = vmul.f32 0.2, %v5139_v61 }
 0x909   :  { %v14795_v6 = vpop.eup %9674  ;;  %v5143_v13 = vadd.f32 %v14723_v12, %v17621_v11  ;;  %v5304_v49 = vadd.f32 %v14725_v59, %v17622_v0  ;;  %6522 = vmatmul.mubr.f32.gmra.mxu0 %v14754_v10  ;;  %6667 = vmatmul.mubr.f32.gmra.mxu1 %v14759_v33  ;;  %v14803_v26 = vpop.f32.mrf.mxu0  ;;  %9692 = vpow2.f32 %v6134_v37  ;;  %v6138_v27 = vmul.f32 1.442695, %v5975_v2  ;;  %v3006_v37 = vld [vmem:[%s16888_s2 + $0x190] sm:$0xff] }
 0x90a   :  { %v14805_v32 = vpop.f32.mrf.mxu1  ;;  %v5980_v44 = vadd.f32 %v5852_v4, %v2996_v40  ;;  %v5982_v56 = vadd.f32 %v5854_v35, %v2998_v58  ;;  %8896 = vmatpush3.msra.mxu1 %v14604_v62  ;;  %8817 = vmatprep.subr.mxu0 %v14621_v53  ;;  %v5853_v12 = vmax.f32 %v5139_v61, %v5725_v7  ;;  %v5727_v59 = vmul.f32 0.2, %v5300_v34  ;;  %v2999_v62 = vld [vmem:[%s16888_s2 + $0x158] sm:$0xff]  ;;  %v3004_v53 = vld [vmem:[%s16888_s2 + $0x180] sm:$0xff]  ;;  %v3005_v7 = vld [vmem:[%s16888_s2 + $0x188] sm:$0xff] }
 0x90b   :  { %v5732_v55 = vmul.f32 0.2, %v5143_v13  ;;  %v5734_v60 = vmul.f32 0.2, %v5304_v49  ;;  %8897 = vmatprep.subr.mxu1 %v14624_v22  ;;  %8818 = vmatpush3.msra.mxu0 %v14627_v52  ;;  %v14814_v21 = vpop.f32.mrf.mxu0  ;;  %v14818_v38 = vpop.eup %9676  ;;  %9694 = vpow2.f32 %v6138_v27  ;;  %v17623_v22 = vld [vmem:[#allocation49_spill] sm:$0xff] }
 0x90c   :  { %v14816_v50 = vpop.f32.mrf.mxu1  ;;  %v6148_v63 = vmul.f32 1.442695, %v5980_v44  ;;  %v6152_v17 = vmul.f32 1.442695, %v5982_v56  ;;  %v5145_v52 = vadd.f32 %v14733_v23, %v17623_v22  ;;  %8898 = vmatpush3.msra.mxu1 %v14630_v5  ;;  %8819 = vmatprep.subr.mxu0 %v14545_v41  ;;  %v14830_v18 = vpop.eup %9678  ;;  %v5981_v51 = vadd.f32 %v5853_v12, %v2997_v47  ;;  %v17625_v5 = vld [vmem:[#allocation33_spill] sm:$0xff]  ;;  %v3012_v47 = vld [vmem:[%s16888_s2 + $0x1c0] sm:$0xff] }
 0x90d   :  { %v5855_v1 = vmax.f32 %v5300_v34, %v5727_v59  ;;  %v5860_v39 = vmax.f32 %v5143_v13, %v5732_v55  ;;  %v5862_v40 = vmax.f32 %v5304_v49, %v5734_v60  ;;  %6526 = vmatprep.mubr.f32.mxu0 %v14818_v38  ;;  %v14836_v58 = vpop.f32.mrf.mxu0  ;;  %v14840_v23 = vpop.eup %9680  ;;  %v5306_v61 = vadd.f32 %v14735_v42, %v17625_v5  ;;  %v17626_v2 = vld [vmem:[#allocation41_spill] sm:$0xff]  ;;  %v17628_v12 = vld [vmem:[#allocation31_spill] sm:$0xff] }
 0x90e   :  { %v14838_v57 = vpop.f32.mrf.mxu1  ;;  %17624 = vst [vmem:[#allocation51_spill] sm:$0xff] %v14840_v23  ;;  %9696 = vpow2.f32 %v6148_v63  ;;  %v5733_v41 = vmul.f32 0.2, %v5145_v52  ;;  %v5149_v4 = vadd.f32 %v14749_v43, %v17626_v2  ;;  %6671 = vmatprep.mubr.f32.mxu1 %v14830_v18  ;;  %8899 = vmatprep.subr.mxu1 %v14548_v9  ;;  %v6150_v35 = vmul.f32 1.442695, %v5981_v51  ;;  %v3007_v56 = vld [vmem:[%s16888_s2 + $0x198] sm:$0xff] }
 0x90f   :  { %9698 = vpow2.f32 %v6152_v17  ;;  %v5983_v29 = vadd.f32 %v5855_v1, %v2999_v62  ;;  %v5988_v34 = vadd.f32 %v5860_v39, %v3004_v53  ;;  %6527 = vmatmul.mubr.f32.gmra.mxu0 %v14790_v30  ;;  %6672 = vmatmul.mubr.f32.gmra.mxu1 %v14795_v6  ;;  %v14853_v42 = vpop.f32.mrf.mxu0  ;;  %v5990_v43 = vadd.f32 %v5862_v40, %v3006_v37  ;;  %v17629_v53 = vld [vmem:[#allocation151_spill] sm:$0xff] }
 0x910   :  { %v14855_v11 = vpop.f32.mrf.mxu1  ;;  %v5861_v13 = vmax.f32 %v5145_v52, %v5733_v41  ;;  %v5735_v0 = vmul.f32 0.2, %v5306_v61  ;;  %v5740_v9 = vmul.f32 0.2, %v5149_v4  ;;  %8820 = vmatpush3.msra.mxu0 %v14560_v45  ;;  %8900 = vmatpush3.msra.mxu1 %v14563_v48  ;;  %v14859_v49 = vpop.eup %9682  ;;  %9700 = vpow2.f32 %v6150_v35  ;;  %v17631_v52 = vld [vmem:[#allocation29_spill] sm:$0xff]  ;;  %v17632_v1 = vld [vmem:[#allocation139_spill] sm:$0xff] }
 0x911   :  { %17627 = vst [vmem:[#allocation42_spill] sm:$0xff] %v14859_v49  ;;  %v6154_v27 = vmul.f32 1.442695, %v5983_v29  ;;  %v6164_v44 = vmul.f32 1.442695, %v5988_v34  ;;  %v5310_v59 = vadd.f32 %v14751_v16, %v17628_v12  ;;  %8821 = vmatprep.subr.mxu0 %v14566_v19  ;;  %8901 = vmatprep.subr.mxu1 %v14569_v14  ;;  %v14871_v45 = vpop.f32.mrf.mxu0  ;;  %v14875_v55 = vpop.eup %9684  ;;  %v17630_v16 = vld [vmem:[#allocation34_spill] sm:$0xff]  ;;  %v5312_v51 = vadd.f32 %v14766_v46, %v17631_v52 }
 0x912   :  { %v14873_v48 = vpop.f32.mrf.mxu1  ;;  %v6168_v60 = vmul.f32 1.442695, %v5990_v43  ;;  %v5989_v63 = vadd.f32 %v5861_v13, %v3005_v7  ;;  %v5863_v17 = vmax.f32 %v5306_v61, %v5735_v0  ;;  %v5868_v62 = vmax.f32 %v5149_v4, %v5740_v9  ;;  %8822 = vmatpush3.msra.mxu0 %v14583_v25  ;;  %8902 = vmatpush3.msra.mxu1 %v17629_v53  ;;  %v17634_v46 = vld [vmem:[#allocation140_spill] sm:$0xff]  ;;  %v3015_v0 = vld [vmem:[%s16888_s2 + $0x1d8] sm:$0xff] }
 0x913   :  { %v14879_v22 = vpop.eup %9686  ;;  %9702 = vpow2.f32 %v6154_v27  ;;  %v5742_v19 = vmul.f32 0.2, %v5310_v59  ;;  %v5151_v14 = vadd.f32 %v14764_v36, %v17630_v16  ;;  %6531 = vmatprep.mubr.f32.mxu0 %v14875_v55  ;;  %8823 = vmatprep.subr.mxu0 %v17632_v1  ;;  %v14887_v39 = vpop.f32.mrf.mxu0  ;;  %v3014_v36 = vld [vmem:[%s16888_s2 + $0x1d0] sm:$0xff]  ;;  %v5743_v4 = vmul.f32 0.2, %v5312_v51  ;;  %v3013_v13 = vld [vmem:[%s16888_s2 + $0x1c8] sm:$0xff] }
 0x914   :  { %v14889_v37 = vpop.f32.mrf.mxu1  ;;  %v14891_v25 = vpop.eup %9688  ;;  %9704 = vpow2.f32 %v6164_v44  ;;  %v6166_v40 = vmul.f32 1.442695, %v5989_v63  ;;  %v5991_v41 = vadd.f32 %v5863_v17, %v3007_v56  ;;  %v5996_v5 = vadd.f32 %v5868_v62, %v3012_v47  ;;  %6676 = vmatprep.mubr.f32.mxu1 %v14879_v22  ;;  %8903 = vmatprep.subr.mxu1 %v17634_v46  ;;  %v17636_v9 = vld [vmem:[#allocation32_spill] sm:$0xff]  ;;  %v17637_v44 = vld [vmem:[#allocation145_spill] sm:$0xff]  ;;  %v17638_v56 = vld [vmem:[#allocation146_spill] sm:$0xff] }
 0x915   :  { %17633 = vst [vmem:[#allocation48_spill] sm:$0xff] %v14891_v25  ;;  %9706 = vpow2.f32 %v6168_v60  ;;  %v5870_v61 = vmax.f32 %v5310_v59, %v5742_v19  ;;  %v5741_v2 = vmul.f32 0.2, %v5151_v14  ;;  %6532 = vmatmul.mubr.f32.gmra.mxu0 %v14840_v23  ;;  %6677 = vmatmul.mubr.f32.gmra.mxu1 %v14859_v49  ;;  %v14900_v35 = vpop.f32.mrf.mxu0  ;;  %v14904_v34 = vpop.eup %9690  ;;  %v5155_v27 = vadd.f32 %v14785_v8, %v17636_v9  ;;  %v17640_v63 = vld [vmem:[#allocation27_spill] sm:$0xff]  ;;  %v17642_v16 = vld [vmem:[#allocation30_spill] sm:$0xff]  ;;  %v17683_v49 = vld [vmem:[#allocation109_spill] sm:$0xff] }
 0x916   :  { %v14902_v29 = vpop.f32.mrf.mxu1  ;;  %17635 = vst [vmem:[#allocation47_spill] sm:$0xff] %v14904_v34  ;;  %9708 = vpow2.f32 %v6166_v40  ;;  %v6170_v7 = vmul.f32 1.442695, %v5991_v41  ;;  %v6180_v43 = vmul.f32 1.442695, %v5996_v5  ;;  %8824 = vmatpush3.msra.mxu0 %v17637_v44  ;;  %8904 = vmatpush3.msra.mxu1 %v17638_v56  ;;  %v14916_v47 = vpop.eup %9692  ;;  %v5871_v60 = vmax.f32 %v5312_v51, %v5743_v4  ;;  %v17641_v62 = vld [vmem:[#allocation147_spill] sm:$0xff] }
 0x917   :  { %17639 = vst [vmem:[#allocation39_spill] sm:$0xff] %v14916_v47  ;;  %v5998_v12 = vadd.f32 %v5870_v61, %v3014_v36  ;;  %v5869_v59 = vmax.f32 %v5151_v14, %v5741_v2  ;;  %v5316_v17 = vadd.f32 %v14787_v24, %v17640_v63  ;;  %8825 = vmatprep.subr.mxu0 %v17641_v62  ;;  %v14921_v53 = vpop.f32.mrf.mxu0  ;;  %v5748_v8 = vmul.f32 0.2, %v5155_v27  ;;  %v17643_v1 = vld [vmem:[#allocation3_spill] sm:$0xff]  ;;  %v17644_v41 = vld [vmem:[#allocation148_spill] sm:$0xff]  ;;  %v17645_v14 = vld [vmem:[#allocation149_spill] sm:$0xff] }
 0x918   :  { %v14923_v19 = vpop.f32.mrf.mxu1  ;;  %9710 = vpow2.f32 %v6170_v7  ;;  %v5157_v52 = vadd.f32 %v14803_v26, %v17642_v16  ;;  %v5318_v40 = vadd.f32 %v14805_v32, %v17643_v1  ;;  %8905 = vmatprep.subr.mxu1 %v17644_v41  ;;  %8826 = vmatpush3.msra.mxu0 %v17645_v14  ;;  %v14931_v51 = vpop.eup %9694  ;;  %v5999_v36 = vadd.f32 %v5871_v60, %v3015_v0  ;;  %v3020_v46 = vld [vmem:[%s16888_s2 + $0x200] sm:$0xff]  ;;  %v3022_v56 = vld [vmem:[%s16888_s2 + $0x210] sm:$0xff]  ;;  %v3023_v14 = vld [vmem:[%s16888_s2 + $0x218] sm:$0xff] }
 0x919   :  { %17646 = vst [vmem:[#allocation50_spill] sm:$0xff] %v14931_v51  ;;  %9712 = vpow2.f32 %v6180_v43  ;;  %v6184_v24 = vmul.f32 1.442695, %v5998_v12  ;;  %v5997_v5 = vadd.f32 %v5869_v59, %v3013_v13  ;;  %v17647_v61 = vld [vmem:[#allocation150_spill] sm:$0xff]  ;;  %6536 = vmatprep.mubr.f32.mxu0 %v14916_v47  ;;  %v14938_v26 = vpop.f32.mrf.mxu0  ;;  %v5876_v2 = vmax.f32 %v5155_v27, %v5748_v8  ;;  %6681 = vmatprep.mubr.f32.mxu1 %v14931_v51  ;;  %v17648_v43 = vld [vmem:[#allocation129_spill] sm:$0xff]  ;;  %v3021_v27 = vld [vmem:[%s16888_s2 + $0x208] sm:$0xff] }
 0x91a   :  { %8906 = vmatpush3.msra.mxu1 %v17647_v61  ;;  %v14940_v32 = vpop.f32.mrf.mxu1  ;;  %v5750_v4 = vmul.f32 0.2, %v5316_v17  ;;  %v5749_v7 = vmul.f32 0.2, %v5157_v52  ;;  %v5751_v9 = vmul.f32 0.2, %v5318_v40  ;;  %8827 = vmatprep.subr.mxu0 %v17648_v43 }
 0x91b   :  { %v14944_v13 = vpop.eup %9696  ;;  %9714 = vpow2.f32 %v6184_v24  ;;  %v6182_v0 = vmul.f32 1.442695, %v5997_v5  ;;  %v6186_v44 = vmul.f32 1.442695, %v5999_v36  ;;  %v17650_v12 = vld [vmem:[#allocation28_spill] sm:$0xff]  ;;  %v17651_v60 = vld [vmem:[#allocation130_spill] sm:$0xff]  ;;  %6537 = vmatmul.mubr.f32.gmra.mxu0 %v14891_v25  ;;  %v14956_v63 = vpop.f32.mrf.mxu0  ;;  %v6004_v16 = vadd.f32 %v5876_v2, %v3020_v46  ;;  %6682 = vmatmul.mubr.f32.gmra.mxu1 %v14904_v34 }
 0x91c   :  { %17649 = vst [vmem:[#allocation49_spill] sm:$0xff] %v14944_v13  ;;  %v5161_v59 = vadd.f32 %v14814_v21, %v17650_v12  ;;  %8907 = vmatprep.subr.mxu1 %v17651_v60  ;;  %v14958_v62 = vpop.f32.mrf.mxu1  ;;  %v14960_v8 = vpop.eup %9698  ;;  %v5878_v1 = vmax.f32 %v5316_v17, %v5750_v4  ;;  %v5877_v41 = vmax.f32 %v5157_v52, %v5749_v7  ;;  %v17653_v5 = vld [vmem:[#allocation66_spill] sm:$0xff]  ;;  %v17654_v61 = vld [vmem:[#allocation67_spill] sm:$0xff]  ;;  %v17656_v46 = vld [vmem:[#allocation136_spill] sm:$0xff] }
 0x91d   :  { %17652 = vst [vmem:[#allocation33_spill] sm:$0xff] %v14960_v8  ;;  %v5879_v24 = vmax.f32 %v5318_v40, %v5751_v9  ;;  %9716 = vpow2.f32 %v6182_v0  ;;  %v5322_v36 = vadd.f32 %v14816_v50, %v17653_v5  ;;  %v5163_v43 = vadd.f32 %v14836_v58, %v17654_v61  ;;  %v17655_v12 = vld [vmem:[#allocation135_spill] sm:$0xff]  ;;  %8908 = vmatpush3.msra.mxu1 %v17656_v46  ;;  %v14972_v17 = vpop.f32.mrf.mxu0  ;;  %v14976_v2 = vpop.eup %9700  ;;  %v17658_v9 = vld [vmem:[#allocation137_spill] sm:$0xff]  ;;  %v17659_v58 = vld [vmem:[#allocation138_spill] sm:$0xff] }
 0x91e   :  { %v5756_v21 = vmul.f32 0.2, %v5161_v59  ;;  %8828 = vmatpush3.msra.mxu0 %v17655_v12  ;;  %v14974_v52 = vpop.f32.mrf.mxu1  ;;  %17657 = vst [vmem:[#allocation41_spill] sm:$0xff] %v14976_v2  ;;  %9718 = vpow2.f32 %v6186_v44  ;;  %v6196_v40 = vmul.f32 1.442695, %v6004_v16  ;;  %v6006_v4 = vadd.f32 %v5878_v1, %v3022_v56  ;;  %v3028_v50 = vld [vmem:[%s16888_s2 + $0x240] sm:$0xff]  ;;  %8909 = vmatprep.subr.mxu1 %v17659_v58 }
 0x91f   :  { %v6005_v7 = vadd.f32 %v5877_v41, %v3021_v27  ;;  %8829 = vmatprep.subr.mxu0 %v17658_v9  ;;  %v6007_v0 = vadd.f32 %v5879_v24, %v3023_v14  ;;  %v5758_v5 = vmul.f32 0.2, %v5322_v36  ;;  %v5757_v61 = vmul.f32 0.2, %v5163_v43  ;;  %v17660_v12 = vld [vmem:[#allocation141_spill] sm:$0xff]  ;;  %v17661_v46 = vld [vmem:[#allocation142_spill] sm:$0xff]  ;;  %v14985_v44 = vpop.f32.mrf.mxu0  ;;  %6541 = vmatprep.mubr.f32.mxu0 %v14976_v2 }
 0x920   :  { %v5884_v60 = vmax.f32 %v5161_v59, %v5756_v21  ;;  %8830 = vmatpush3.msra.mxu0 %v17660_v12  ;;  %8910 = vmatpush3.msra.mxu1 %v17661_v46  ;;  %v14987_v56 = vpop.f32.mrf.mxu1  ;;  %v14989_v27 = vpop.eup %9702  ;;  %9720 = vpow2.f32 %v6196_v40  ;;  %v6200_v16 = vmul.f32 1.442695, %v6006_v4  ;;  %v3030_v41 = vld [vmem:[%s16888_s2 + $0x250] sm:$0xff]  ;;  %v3029_v59 = vld [vmem:[%s16888_s2 + $0x248] sm:$0xff]  ;;  %v17669_v2 = vld [vmem:[#allocation62_spill] sm:$0xff] }
 0x921   :  { %17662 = vst [vmem:[#allocation31_spill] sm:$0xff] %v14989_v27  ;;  %v6198_v1 = vmul.f32 1.442695, %v6005_v7  ;;  %v17663_v14 = vld [vmem:[#allocation64_spill] sm:$0xff]  ;;  %v17664_v21 = vld [vmem:[#allocation119_spill] sm:$0xff]  ;;  %v15001_v9 = vpop.eup %9704  ;;  %v5886_v7 = vmax.f32 %v5322_v36, %v5758_v5  ;;  %v5885_v58 = vmax.f32 %v5163_v43, %v5757_v61  ;;  %6686 = vmatprep.mubr.f32.mxu1 %v14989_v27  ;;  %v15005_v46 = vpop.f32.mrf.mxu0  ;;  %6542 = vmatmul.mubr.f32.gmra.mxu0 %v14944_v13  ;;  %v3031_v5 = vld [vmem:[%s16888_s2 + $0x258] sm:$0xff] }
 0x922   :  { %v5324_v24 = vadd.f32 %v14838_v57, %v17663_v14  ;;  %8831 = vmatprep.subr.mxu0 %v17664_v21  ;;  %17665 = vst [vmem:[#allocation151_spill] sm:$0xff] %v15001_v9  ;;  %v6202_v40 = vmul.f32 1.442695, %v6007_v0  ;;  %v6012_v4 = vadd.f32 %v5884_v60, %v3028_v50  ;;  %v17666_v12 = vld [vmem:[#allocation120_spill] sm:$0xff]  ;;  %v15007_v34 = vpop.f32.mrf.mxu1  ;;  %v15009_v25 = vpop.eup %9706  ;;  %9722 = vpow2.f32 %v6200_v16  ;;  %v17668_v14 = vld [vmem:[#allocation65_spill] sm:$0xff]  ;;  %6687 = vmatmul.mubr.f32.gmra.mxu1 %v14960_v8 }
 0x923   :  { %8911 = vmatprep.subr.mxu1 %v17666_v12  ;;  %17667 = vst [vmem:[#allocation34_spill] sm:$0xff] %v15009_v25  ;;  %v5167_v21 = vadd.f32 %v14853_v42, %v17668_v14  ;;  %v5328_v50 = vadd.f32 %v14855_v11, %v17669_v2  ;;  %v15017_v36 = vpop.eup %9708  ;;  %9724 = vpow2.f32 %v6198_v1  ;;  %v6014_v0 = vadd.f32 %v5886_v7, %v3030_v41  ;;  %v17671_v61 = vld [vmem:[#allocation125_spill] sm:$0xff]  ;;  %v17672_v42 = vld [vmem:[#allocation126_spill] sm:$0xff]  ;;  %v15024_v16 = vpop.f32.mrf.mxu0  ;;  %v17673_v1 = vld [vmem:[#allocation127_spill] sm:$0xff] }
 0x924   :  { %v5759_v57 = vmul.f32 0.2, %v5324_v24  ;;  %17670 = vst [vmem:[#allocation29_spill] sm:$0xff] %v15017_v36  ;;  %v6212_v43 = vmul.f32 1.442695, %v6012_v4  ;;  %v6013_v60 = vadd.f32 %v5885_v58, %v3029_v59  ;;  %8832 = vmatpush3.msra.mxu0 %v17671_v61  ;;  %8912 = vmatpush3.msra.mxu1 %v17672_v42  ;;  %v15026_v11 = vpop.f32.mrf.mxu1  ;;  %9726 = vpow2.f32 %v6202_v40  ;;  %v17674_v41 = vld [vmem:[#allocation128_spill] sm:$0xff] }
 0x925   :  { %v5764_v12 = vmul.f32 0.2, %v5167_v21  ;;  %v5766_v14 = vmul.f32 0.2, %v5328_v50  ;;  %8833 = vmatprep.subr.mxu0 %v17673_v1  ;;  %8913 = vmatprep.subr.mxu1 %v17674_v41  ;;  %v15030_v59 = vpop.eup %9710  ;;  %v6216_v4 = vmul.f32 1.442695, %v6014_v0  ;;  %v15042_v1 = vpop.f32.mrf.mxu0 }
 0x926   :  { %v5887_v2 = vmax.f32 %v5324_v24, %v5759_v57  ;;  %17675 = vst [vmem:[#allocation139_spill] sm:$0xff] %v15030_v59  ;;  %9728 = vpow2.f32 %v6212_v43  ;;  %v6214_v7 = vmul.f32 1.442695, %v6013_v60  ;;  %v3036_v58 = vld [vmem:[%s16888_s2 + $0x280] sm:$0xff]  ;;  %v3038_v40 = vld [vmem:[%s16888_s2 + $0x290] sm:$0xff]  ;;  %v15044_v43 = vpop.f32.mrf.mxu1  ;;  %v15046_v0 = vpop.eup %9712  ;;  %6546 = vmatprep.mubr.f32.mxu0 %v15017_v36  ;;  %6691 = vmatprep.mubr.f32.mxu1 %v15030_v59 }
 0x927   :  { %v17676_v24 = vld [vmem:[#allocation63_spill] sm:$0xff]  ;;  %v17678_v42 = vld [vmem:[#allocation132_spill] sm:$0xff]  ;;  %17679 = vst [vmem:[#allocation140_spill] sm:$0xff] %v15046_v0  ;;  %v5892_v41 = vmax.f32 %v5167_v21, %v5764_v12  ;;  %v5894_v8 = vmax.f32 %v5328_v50, %v5766_v14  ;;  %9730 = vpow2.f32 %v6216_v4  ;;  %v17685_v12 = vld [vmem:[#allocation110_spill] sm:$0xff]  ;;  %6547 = vmatmul.mubr.f32.gmra.mxu0 %v15001_v9  ;;  %6692 = vmatmul.mubr.f32.gmra.mxu1 %v15009_v25 }
 0x928   :  { %v5169_v57 = vadd.f32 %v14871_v45, %v17676_v24  ;;  %v17677_v61 = vld [vmem:[#allocation131_spill] sm:$0xff]  ;;  %8914 = vmatpush3.msra.mxu1 %v17678_v42  ;;  %v6015_v60 = vadd.f32 %v5887_v2, %v3031_v5  ;;  %v17680_v13 = vld [vmem:[#allocation60_spill] sm:$0xff]  ;;  %v17681_v24 = vld [vmem:[#allocation61_spill] sm:$0xff]  ;;  %v15057_v5 = vpop.f32.mrf.mxu0  ;;  %v15059_v21 = vpop.f32.mrf.mxu1  ;;  %9732 = vpow2.f32 %v6214_v7 }
 0x929   :  { %8834 = vmatpush3.msra.mxu0 %v17677_v61  ;;  %v5330_v27 = vadd.f32 %v14873_v48, %v17680_v13  ;;  %v5173_v61 = vadd.f32 %v14887_v39, %v17681_v24  ;;  %v17682_v42 = vld [vmem:[#allocation58_spill] sm:$0xff]  ;;  %v15061_v50 = vpop.eup %9714  ;;  %v6020_v13 = vadd.f32 %v5892_v41, %v3036_v58  ;;  %v6022_v2 = vadd.f32 %v5894_v8, %v3038_v40  ;;  %v3037_v39 = vld [vmem:[%s16888_s2 + $0x288] sm:$0xff]  ;;  %v3046_v9 = vld [vmem:[%s16888_s2 + $0x2d0] sm:$0xff] }
 0x92a   :  { %v5765_v45 = vmul.f32 0.2, %v5169_v57  ;;  %v5334_v51 = vadd.f32 %v14889_v37, %v17682_v42  ;;  %8835 = vmatprep.subr.mxu0 %v17683_v49  ;;  %17684 = vst [vmem:[#allocation32_spill] sm:$0xff] %v15061_v50  ;;  %v6218_v48 = vmul.f32 1.442695, %v6015_v60  ;;  %8915 = vmatprep.subr.mxu1 %v17685_v12  ;;  %v17686_v24 = vld [vmem:[#allocation115_spill] sm:$0xff]  ;;  %v15070_v7 = vpop.f32.mrf.mxu0  ;;  %v15072_v58 = vpop.f32.mrf.mxu1 }
 0x92b   :  { %v5767_v49 = vmul.f32 0.2, %v5330_v27  ;;  %v5772_v14 = vmul.f32 0.2, %v5173_v61  ;;  %8836 = vmatpush3.msra.mxu0 %v17686_v24  ;;  %v15074_v8 = vpop.eup %9716  ;;  %v6228_v40 = vmul.f32 1.442695, %v6020_v13 }
 0x92c   :  { %v5893_v37 = vmax.f32 %v5169_v57, %v5765_v45  ;;  %v5774_v4 = vmul.f32 0.2, %v5334_v51  ;;  %9734 = vpow2.f32 %v6218_v48  ;;  %v6232_v60 = vmul.f32 1.442695, %v6022_v2  ;;  %v3039_v57 = vld [vmem:[%s16888_s2 + $0x298] sm:$0xff]  ;;  %v3044_v41 = vld [vmem:[%s16888_s2 + $0x2c0] sm:$0xff]  ;;  %v15086_v25 = vpop.eup %9718  ;;  %6551 = vmatprep.mubr.f32.mxu0 %v15074_v8 }
 0x92d   :  { %v17687_v45 = vld [vmem:[#allocation59_spill] sm:$0xff]  ;;  %v17688_v12 = vld [vmem:[#allocation116_spill] sm:$0xff]  ;;  %v17689_v24 = vld [vmem:[#allocation117_spill] sm:$0xff]  ;;  %17690 = vst [vmem:[#allocation145_spill] sm:$0xff] %v15086_v25  ;;  %v5895_v13 = vmax.f32 %v5330_v27, %v5767_v49  ;;  %v5900_v2 = vmax.f32 %v5173_v61, %v5772_v14  ;;  %9736 = vpow2.f32 %v6228_v40  ;;  %v15098_v27 = vpop.eup %9720  ;;  %6696 = vmatprep.mubr.f32.mxu1 %v15086_v25  ;;  %6552 = vmatmul.mubr.f32.gmra.mxu0 %v15046_v0 }
 0x92e   :  { %v5175_v42 = vadd.f32 %v14900_v35, %v17687_v45  ;;  %8916 = vmatpush3.msra.mxu1 %v17688_v12  ;;  %8837 = vmatprep.subr.mxu0 %v17689_v24  ;;  %v6021_v48 = vadd.f32 %v5893_v37, %v3037_v39  ;;  %v5902_v59 = vmax.f32 %v5334_v51, %v5774_v4  ;;  %v17691_v36 = vld [vmem:[#allocation118_spill] sm:$0xff]  ;;  %v17692_v23 = vld [vmem:[#allocation56_spill] sm:$0xff]  ;;  %v17693_v45 = vld [vmem:[#allocation57_spill] sm:$0xff]  ;;  %9738 = vpow2.f32 %v6232_v60 }
 0x92f   :  { %8917 = vmatprep.subr.mxu1 %v17691_v36  ;;  %v5336_v35 = vadd.f32 %v14902_v29, %v17692_v23  ;;  %v5179_v12 = vadd.f32 %v14921_v53, %v17693_v45  ;;  %v17694_v24 = vld [vmem:[#allocation121_spill] sm:$0xff]  ;;  %v17695_v39 = vld [vmem:[#allocation122_spill] sm:$0xff]  ;;  %v6023_v37 = vadd.f32 %v5895_v13, %v3039_v57  ;;  %v6028_v51 = vadd.f32 %v5900_v2, %v3044_v41  ;;  %v3045_v36 = vld [vmem:[%s16888_s2 + $0x2c8] sm:$0xff]  ;;  %v15105_v23 = vpop.f32.mrf.mxu0  ;;  %v15107_v29 = vpop.f32.mrf.mxu1 }
 0x930   :  { %v5773_v47 = vmul.f32 0.2, %v5175_v42  ;;  %8838 = vmatpush3.msra.mxu0 %v17694_v24  ;;  %8918 = vmatpush3.msra.mxu1 %v17695_v39  ;;  %v6230_v61 = vmul.f32 1.442695, %v6021_v48  ;;  %v6030_v53 = vadd.f32 %v5902_v59, %v3046_v9  ;;  %v17696_v40 = vld [vmem:[#allocation101_spill] sm:$0xff]  ;;  %v17697_v60 = vld [vmem:[#allocation102_spill] sm:$0xff]  ;;  %v15111_v57 = vpop.eup %9722 }
 0x931   :  { %v5775_v14 = vmul.f32 0.2, %v5336_v35  ;;  %v5780_v4 = vmul.f32 0.2, %v5179_v12  ;;  %8839 = vmatprep.subr.mxu0 %v17696_v40  ;;  %8919 = vmatprep.subr.mxu1 %v17697_v60  ;;  %17698 = vst [vmem:[#allocation146_spill] sm:$0xff] %v15111_v57  ;;  %v3047_v13 = vld [vmem:[%s16888_s2 + $0x2d8] sm:$0xff]  ;;  %v15125_v2 = vpop.eup %9724  ;;  %v15129_v40 = vpop.f32.mrf.mxu1 }
 0x932   :  { %v5901_v49 = vmax.f32 %v5175_v42, %v5773_v47  ;;  %9740 = vpow2.f32 %v6230_v61  ;;  %v6234_v41 = vmul.f32 1.442695, %v6023_v37  ;;  %v6244_v48 = vmul.f32 1.442695, %v6028_v51  ;;  %v3052_v9 = vld [vmem:[%s16888_s2 + $0x300] sm:$0xff]  ;;  %6697 = vmatmul.mubr.f32.gmra.mxu1 %v15061_v50  ;;  %v15123_v42 = vpop.f32.mrf.mxu0  ;;  %v17700_v37 = vld [vmem:[#allocation105_spill] sm:$0xff]  ;;  %v15131_v60 = vpop.eup %9726  ;;  %6556 = vmatprep.mubr.f32.mxu0 %v15125_v2 }
 0x933   :  { %v17699_v47 = vld [vmem:[#allocation54_spill] sm:$0xff]  ;;  %v6248_v45 = vmul.f32 1.442695, %v6030_v53  ;;  %v5903_v39 = vmax.f32 %v5336_v35, %v5775_v14  ;;  %v5908_v61 = vmax.f32 %v5179_v12, %v5780_v4  ;;  %8840 = vmatpush3.msra.mxu0 %v17700_v37  ;;  %v17703_v0 = vld [vmem:[#allocation52_spill] sm:$0xff]  ;;  %v17704_v53 = vld [vmem:[#allocation107_spill] sm:$0xff]  ;;  %v15139_v12 = vpop.eup %9728  ;;  %6701 = vmatprep.mubr.f32.mxu1 %v15131_v60 }
 0x934   :  { %v5340_v59 = vadd.f32 %v14923_v19, %v17699_v47  ;;  %v6029_v24 = vadd.f32 %v5901_v49, %v3045_v36  ;;  %v17701_v51 = vld [vmem:[#allocation106_spill] sm:$0xff]  ;;  %9742 = vpow2.f32 %v6234_v41  ;;  %v17702_v47 = vld [vmem:[#allocation55_spill] sm:$0xff]  ;;  %v5342_v25 = vadd.f32 %v14940_v32, %v17703_v0  ;;  %8841 = vmatprep.subr.mxu0 %v17704_v53  ;;  %v17705_v35 = vld [vmem:[#allocation108_spill] sm:$0xff]  ;;  %17706 = vst [vmem:[#allocation27_spill] sm:$0xff] %v15139_v12 }
 0x935   :  { %8920 = vmatpush3.msra.mxu1 %v17701_v51  ;;  %v5181_v50 = vadd.f32 %v14938_v26, %v17702_v47  ;;  %9744 = vpow2.f32 %v6244_v48  ;;  %v6031_v49 = vadd.f32 %v5903_v39, %v3047_v13  ;;  %v6036_v14 = vadd.f32 %v5908_v61, %v3052_v9  ;;  %v3054_v4 = vld [vmem:[%s16888_s2 + $0x310] sm:$0xff]  ;;  %v17707_v41 = vld [vmem:[#allocation111_spill] sm:$0xff]  ;;  %v15148_v48 = vpop.f32.mrf.mxu0  ;;  %v15150_v13 = vpop.eup %9730  ;;  %6557 = vmatmul.mubr.f32.gmra.mxu0 %v15098_v27 }
 0x936   :  { %v5782_v19 = vmul.f32 0.2, %v5340_v59  ;;  %8921 = vmatprep.subr.mxu1 %v17705_v35  ;;  %v6246_v36 = vmul.f32 1.442695, %v6029_v24  ;;  %8842 = vmatpush3.msra.mxu0 %v17707_v41  ;;  %v17708_v26 = vld [vmem:[#allocation112_spill] sm:$0xff]  ;;  %9746 = vpow2.f32 %v6248_v45  ;;  %17709 = vst [vmem:[#allocation147_spill] sm:$0xff] %v15150_v13  ;;  %v15162_v51 = vpop.f32.mrf.mxu1 }
 0x937   :  { %8922 = vmatpush3.msra.mxu1 %v17708_v26  ;;  %v5781_v0 = vmul.f32 0.2, %v5181_v50  ;;  %v5783_v37 = vmul.f32 0.2, %v5342_v25  ;;  %v6250_v9 = vmul.f32 1.442695, %v6031_v49 }
 0x938   :  { %v5910_v32 = vmax.f32 %v5340_v59, %v5782_v19  ;;  %9748 = vpow2.f32 %v6246_v36  ;;  %v6260_v24 = vmul.f32 1.442695, %v6036_v14  ;;  %v3053_v39 = vld [vmem:[%s16888_s2 + $0x308] sm:$0xff]  ;;  %v3055_v59 = vld [vmem:[%s16888_s2 + $0x318] sm:$0xff]  ;;  %6702 = vmatmul.mubr.f32.gmra.mxu1 %v15111_v57  ;;  %v15164_v19 = vpop.eup %9732 }
 0x939   :  { %v17710_v45 = vld [vmem:[#allocation53_spill] sm:$0xff]  ;;  %17711 = vst [vmem:[#allocation30_spill] sm:$0xff] %v15164_v19  ;;  %v5909_v53 = vmax.f32 %v5181_v50, %v5781_v0  ;;  %v5911_v35 = vmax.f32 %v5342_v25, %v5783_v37  ;;  %9750 = vpow2.f32 %v6250_v9  ;;  %v17713_v41 = vld [vmem:[#allocation15_spill] sm:$0xff]  ;;  %6561 = vmatprep.mubr.f32.mxu0 %v15164_v19  ;;  %v15184_v0 = vpop.f32.mrf.mxu0  ;;  %v17720_v19 = vld [vmem:[#allocation10_spill] sm:$0xff] }
 0x93a   :  { %v5185_v61 = vadd.f32 %v14956_v63, %v17710_v45  ;;  %v6038_v47 = vadd.f32 %v5910_v32, %v3054_v4  ;;  %v17712_v36 = vld [vmem:[#allocation13_spill] sm:$0xff]  ;;  %v5187_v26 = vadd.f32 %v14972_v17, %v17713_v41  ;;  %v17714_v45 = vld [vmem:[#allocation22_spill] sm:$0xff]  ;;  %9752 = vpow2.f32 %v6260_v24  ;;  %6562 = vmatmul.mubr.f32.gmra.mxu0 %v15139_v12  ;;  %v17719_v12 = vld [vmem:[#allocation12_spill] sm:$0xff] }
 0x93b   :  { %v5346_v49 = vadd.f32 %v14958_v62, %v17712_v36  ;;  %v10016_v14 = vld [vmem:[%s16887_s15 + $0xf8] sm:$0xff]  ;;  %v5348_v57 = vadd.f32 %v14974_v52, %v17714_v45  ;;  %v15179_v62 = vpop.eup %9734  ;;  %v6037_v4 = vadd.f32 %v5909_v53, %v3053_v39  ;;  %v6039_v32 = vadd.f32 %v5911_v35, %v3055_v59  ;;  %v3060_v17 = vld [vmem:[%s16888_s2 + $0x340] sm:$0xff] }
 0x93c   :  { %8971 = vmatprep.subr.mxu0 %v10016_v14  ;;  %v5788_v63 = vmul.f32 0.2, %v5185_v61  ;;  %v10017_v25 = vld [vmem:[%s16887_s15 + $0x1f8] sm:$0xff]  ;;  %17715 = vst [vmem:[#allocation3_spill] sm:$0xff] %v15179_v62  ;;  %v6264_v50 = vmul.f32 1.442695, %v6038_v47  ;;  %6706 = vmatprep.mubr.f32.mxu1 %v15179_v62  ;;  %v15188_v14 = vpop.f32.mrf.mxu1  ;;  %v15190_v24 = vpop.eup %9736  ;;  %v5352_v62 = vadd.f32 %v14987_v56, %v17719_v12 }
 0x93d   :  { %9051 = vmatprep.subr.mxu1 %v10017_v25  ;;  %v5790_v37 = vmul.f32 0.2, %v5346_v49  ;;  %v5789_v9 = vmul.f32 0.2, %v5187_v26  ;;  %v5791_v36 = vmul.f32 0.2, %v5348_v57  ;;  %6707 = vmatmul.mubr.f32.gmra.mxu1 %v15150_v13 }
 0x93e   :  { %v5916_v52 = vmax.f32 %v5185_v61, %v5788_v63  ;;  %17716 = vst [vmem:[#allocation148_spill] sm:$0xff] %v15190_v24  ;;  %9754 = vpow2.f32 %v6264_v50  ;;  %v6262_v39 = vmul.f32 1.442695, %v6037_v4  ;;  %v6266_v59 = vmul.f32 1.442695, %v6039_v32  ;;  %v3062_v47 = vld [vmem:[%s16888_s2 + $0x350] sm:$0xff]  ;;  %v15201_v63 = vpop.eup %9738 }
 0x93f   :  { %v3061_v61 = vld [vmem:[%s16888_s2 + $0x348] sm:$0xff]  ;;  %v17717_v53 = vld [vmem:[#allocation21_spill] sm:$0xff]  ;;  %17718 = vst [vmem:[#allocation149_spill] sm:$0xff] %v15201_v63  ;;  %v5918_v45 = vmax.f32 %v5346_v49, %v5790_v37  ;;  %v5917_v25 = vmax.f32 %v5187_v26, %v5789_v9  ;;  %v5919_v4 = vmax.f32 %v5348_v57, %v5791_v36  ;;  %v15212_v13 = vpop.eup %9740  ;;  %v3068_v57 = vld [vmem:[%s16888_s2 + $0x380] sm:$0xff]  ;;  %v5798_v56 = vmul.f32 0.2, %v5352_v62 }
 0x940   :  { %v5191_v35 = vadd.f32 %v14985_v44, %v17717_v53  ;;  %v6044_v41 = vadd.f32 %v5916_v52, %v3060_v17  ;;  %v3063_v50 = vld [vmem:[%s16888_s2 + $0x358] sm:$0xff]  ;;  %9756 = vpow2.f32 %v6262_v39  ;;  %v5193_v44 = vadd.f32 %v15005_v46, %v17720_v19  ;;  %v15210_v53 = vpop.f32.mrf.mxu0  ;;  %v15217_v52 = vpop.f32.mrf.mxu1  ;;  %6566 = vmatprep.mubr.f32.mxu0 %v15212_v13  ;;  %v3070_v39 = vld [vmem:[%s16888_s2 + $0x390] sm:$0xff] }
 0x941   :  { %9758 = vpow2.f32 %v6266_v59  ;;  %v6046_v26 = vadd.f32 %v5918_v45, %v3062_v47  ;;  %v6045_v17 = vadd.f32 %v5917_v25, %v3061_v61  ;;  %v6047_v37 = vadd.f32 %v5919_v4, %v3063_v50  ;;  %v15220_v46 = vpop.eup %9742  ;;  %v3069_v59 = vld [vmem:[%s16888_s2 + $0x388] sm:$0xff]  ;;  %6567 = vmatmul.mubr.f32.gmra.mxu0 %v15190_v24 }
 0x942   :  { %v5796_v32 = vmul.f32 0.2, %v5191_v35  ;;  %v6276_v49 = vmul.f32 1.442695, %v6044_v41  ;;  %v5797_v12 = vmul.f32 0.2, %v5193_v44  ;;  %v5926_v25 = vmax.f32 %v5352_v62, %v5798_v56  ;;  %6711 = vmatprep.mubr.f32.mxu1 %v15220_v46  ;;  %v15234_v4 = vpop.f32.mrf.mxu0 }
 0x943   :  { %v6280_v19 = vmul.f32 1.442695, %v6046_v26  ;;  %v6278_v36 = vmul.f32 1.442695, %v6045_v17  ;;  %v17721_v47 = vld [vmem:[#allocation11_spill] sm:$0xff]  ;;  %v17724_v26 = vld [vmem:[#allocation9_spill] sm:$0xff]  ;;  %6712 = vmatmul.mubr.f32.gmra.mxu1 %v15201_v63 }
 0x944   :  { %v5924_v9 = vmax.f32 %v5191_v35, %v5796_v32  ;;  %9760 = vpow2.f32 %v6276_v49  ;;  %v5354_v61 = vadd.f32 %v15007_v34, %v17721_v47  ;;  %v15231_v35 = vpop.eup %9744  ;;  %v6282_v41 = vmul.f32 1.442695, %v6047_v37  ;;  %v17725_v34 = vld [vmem:[#allocation24_spill] sm:$0xff]  ;;  %v15243_v37 = vpop.f32.mrf.mxu1  ;;  %v3071_v56 = vld [vmem:[%s16888_s2 + $0x398] sm:$0xff] }
 0x945   :  { %17722 = vst [vmem:[#allocation150_spill] sm:$0xff] %v15231_v35  ;;  %v5925_v50 = vmax.f32 %v5193_v44, %v5797_v12  ;;  %v15236_v32 = vpop.eup %9746  ;;  %9762 = vpow2.f32 %v6280_v19  ;;  %v5197_v17 = vadd.f32 %v15024_v16, %v17724_v26  ;;  %v5358_v47 = vadd.f32 %v15026_v11, %v17725_v34 }
 0x946   :  { %v6052_v45 = vadd.f32 %v5924_v9, %v3068_v57  ;;  %17723 = vst [vmem:[#allocation129_spill] sm:$0xff] %v15236_v32  ;;  %v5799_v49 = vmul.f32 0.2, %v5354_v61  ;;  %v15245_v62 = vpop.eup %9748  ;;  %9764 = vpow2.f32 %v6278_v36  ;;  %v6054_v57 = vadd.f32 %v5926_v25, %v3070_v39  ;;  %v3076_v36 = vld [vmem:[%s16888_s2 + $0x3c0] sm:$0xff]  ;;  %v3078_v39 = vld [vmem:[%s16888_s2 + $0x3d0] sm:$0xff] }
 0x947   :  { %17726 = vst [vmem:[#allocation28_spill] sm:$0xff] %v15245_v62  ;;  %v6053_v9 = vadd.f32 %v5925_v50, %v3069_v59  ;;  %9766 = vpow2.f32 %v6282_v41  ;;  %v5804_v16 = vmul.f32 0.2, %v5197_v17  ;;  %v5806_v19 = vmul.f32 0.2, %v5358_v47  ;;  %6571 = vmatprep.mubr.f32.mxu0 %v15245_v62  ;;  %v15251_v11 = vpop.eup %9750  ;;  %v17728_v59 = vld [vmem:[#allocation23_spill] sm:$0xff]  ;;  %v15262_v41 = vpop.f32.mrf.mxu0 }
 0x948   :  { %v6292_v44 = vmul.f32 1.442695, %v6052_v45  ;;  %v5927_v12 = vmax.f32 %v5354_v61, %v5799_v49  ;;  %17727 = vst [vmem:[#allocation130_spill] sm:$0xff] %v15251_v11  ;;  %v6296_v26 = vmul.f32 1.442695, %v6054_v57  ;;  %v5199_v61 = vadd.f32 %v15042_v1, %v17728_v59  ;;  %6572 = vmatmul.mubr.f32.gmra.mxu0 %v15231_v35  ;;  %v15264_v45 = vpop.eup %9752  ;;  %6716 = vmatprep.mubr.f32.mxu1 %v15251_v11  ;;  %v17731_v62 = vld [vmem:[#allocation6_spill] sm:$0xff] }
 0x949   :  { %v6294_v34 = vmul.f32 1.442695, %v6053_v9  ;;  %17729 = vst [vmem:[#allocation66_spill] sm:$0xff] %v15264_v45  ;;  %v5932_v50 = vmax.f32 %v5197_v17, %v5804_v16  ;;  %v5934_v49 = vmax.f32 %v5358_v47, %v5806_v19  ;;  %v15269_v9 = vpop.f32.mrf.mxu1  ;;  %v5429_v1 = vadd.f32 %v15057_v5, %v17731_v62  ;;  %v17732_v59 = vld [vmem:[#allocation7_spill] sm:$0xff]  ;;  %6717 = vmatmul.mubr.f32.gmra.mxu1 %v15236_v32  ;;  %v15281_v5 = vpop.f32.mrf.mxu0  ;;  %v17737_v11 = vld [vmem:[#allocation26_spill] sm:$0xff] }
 0x94a   :  { %9768 = vpow2.f32 %v6292_v44  ;;  %v6055_v25 = vadd.f32 %v5927_v12, %v3071_v56  ;;  %v17730_v44 = vld [vmem:[#allocation8_spill] sm:$0xff]  ;;  %v5805_v63 = vmul.f32 0.2, %v5199_v61  ;;  %v5590_v35 = vadd.f32 %v15059_v21, %v17732_v59 }
 0x94b   :  { %v5360_v57 = vadd.f32 %v15044_v43, %v17730_v44  ;;  %9770 = vpow2.f32 %v6296_v26  ;;  %v15276_v56 = vpop.eup %9754  ;;  %v6060_v47 = vadd.f32 %v5932_v50, %v3076_v36  ;;  %v6062_v43 = vadd.f32 %v5934_v49, %v3078_v39  ;;  %v3077_v12 = vld [vmem:[%s16888_s2 + $0x3c8] sm:$0xff]  ;;  %v2960_v36 = vld [vmem:[%s16888_s2 + $0x20] sm:$0xff] }
 0x94c   :  { %17733 = vst [vmem:[#allocation67_spill] sm:$0xff] %v15276_v56  ;;  %9772 = vpow2.f32 %v6294_v34  ;;  %v6298_v17 = vmul.f32 1.442695, %v6055_v25  ;;  %v5933_v16 = vmax.f32 %v5199_v61, %v5805_v63  ;;  %v5688_v26 = vmul.f32 0.2, %v5429_v1  ;;  %v3079_v34 = vld [vmem:[%s16888_s2 + $0x3d8] sm:$0xff]  ;;  %v15293_v61 = vpop.f32.mrf.mxu1 }
 0x94d   :  { %v5807_v19 = vmul.f32 0.2, %v5360_v57  ;;  %v5690_v44 = vmul.f32 0.2, %v5590_v35  ;;  %v15283_v62 = vpop.eup %9756  ;;  %v6308_v21 = vmul.f32 1.442695, %v6060_v47  ;;  %v5592_v24 = vadd.f32 %v15072_v58, %v17737_v11  ;;  %v15313_v58 = vpop.f32.mrf.mxu0 }
 0x94e   :  { %17734 = vst [vmem:[#allocation135_spill] sm:$0xff] %v15283_v62  ;;  %9774 = vpow2.f32 %v6298_v17  ;;  %v6312_v59 = vmul.f32 1.442695, %v6062_v43  ;;  %v17735_v39 = vld [vmem:[#allocation4_spill] sm:$0xff]  ;;  %v15295_v25 = vpop.eup %9758  ;;  %v6061_v50 = vadd.f32 %v5933_v16, %v3077_v12  ;;  %v5816_v17 = vmax.f32 %v5429_v1, %v5688_v26  ;;  %6576 = vmatprep.mubr.f32.mxu0 %v15283_v62 }
 0x94f   :  { %v5431_v63 = vadd.f32 %v15070_v7, %v17735_v39  ;;  %17736 = vst [vmem:[#allocation136_spill] sm:$0xff] %v15295_v25  ;;  %v5935_v49 = vmax.f32 %v5360_v57, %v5807_v19  ;;  %v2962_v47 = vld [vmem:[%s16888_s2 + $0x30] sm:$0xff]  ;;  %v5818_v43 = vmax.f32 %v5590_v35, %v5690_v44  ;;  %9776 = vpow2.f32 %v6308_v21  ;;  %6721 = vmatprep.mubr.f32.mxu1 %v15295_v25  ;;  %v2961_v16 = vld [vmem:[%s16888_s2 + $0x28] sm:$0xff]  ;;  %v15315_v44 = vpop.f32.mrf.mxu1  ;;  %v15336_v62 = vpop.f32.mrf.mxu0 }
 0x950   :  { %v17738_v7 = vld [vmem:[#allocation25_spill] sm:$0xff]  ;;  %6577 = vmatmul.mubr.f32.gmra.mxu0 %v15264_v45  ;;  %9778 = vpow2.f32 %v6312_v59  ;;  %v6310_v1 = vmul.f32 1.442695, %v6061_v50  ;;  %v5944_v35 = vadd.f32 %v5816_v17, %v2960_v36  ;;  %6722 = vmatmul.mubr.f32.gmra.mxu1 %v15276_v56  ;;  %v5691_v19 = vmul.f32 0.2, %v5592_v24  ;;  %v2968_v50 = vld [vmem:[%s16888_s2 + $0x60] sm:$0xff] }
 0x951   :  { %v5689_v32 = vmul.f32 0.2, %v5431_v63  ;;  %v5435_v39 = vadd.f32 %v15105_v23, %v17738_v7  ;;  %v15307_v57 = vpop.eup %9760  ;;  %v6063_v12 = vadd.f32 %v5935_v49, %v3079_v34  ;;  %v5946_v11 = vadd.f32 %v5818_v43, %v2962_v47  ;;  %v2963_v36 = vld [vmem:[%s16888_s2 + $0x38] sm:$0xff]  ;;  %v17743_v45 = vld [vmem:[#allocation16_spill] sm:$0xff] }
 0x952   :  { %17739 = vst [vmem:[#allocation137_spill] sm:$0xff] %v15307_v57  ;;  %v15317_v21 = vpop.eup %9762  ;;  %9780 = vpow2.f32 %v6310_v1  ;;  %v6076_v34 = vmul.f32 1.442695, %v5944_v35  ;;  %v17741_v49 = vld [vmem:[#allocation5_spill] sm:$0xff]  ;;  %v5819_v43 = vmax.f32 %v5592_v24, %v5691_v19  ;;  %v17742_v35 = vld [vmem:[#allocation14_spill] sm:$0xff]  ;;  %v5598_v25 = vadd.f32 %v15129_v40, %v17743_v45 }
 0x953   :  { %v5817_v23 = vmax.f32 %v5431_v63, %v5689_v32  ;;  %v5696_v26 = vmul.f32 0.2, %v5435_v39  ;;  %17740 = vst [vmem:[#allocation138_spill] sm:$0xff] %v15317_v21  ;;  %v6314_v59 = vmul.f32 1.442695, %v6063_v12  ;;  %v5596_v32 = vadd.f32 %v15107_v29, %v17741_v49  ;;  %v15327_v63 = vpop.eup %9764 }
 0x954   :  { %v6080_v17 = vmul.f32 1.442695, %v5946_v11  ;;  %v15329_v1 = vpop.eup %9766  ;;  %v5437_v56 = vadd.f32 %v15123_v42, %v17742_v35  ;;  %6581 = vmatprep.mubr.f32.mxu0 %v15327_v63  ;;  %v5947_v24 = vadd.f32 %v5819_v43, %v2963_v36  ;;  %v2970_v11 = vld [vmem:[%s16888_s2 + $0x70] sm:$0xff]  ;;  %v15345_v42 = vpop.f32.mrf.mxu1  ;;  %v2971_v36 = vld [vmem:[%s16888_s2 + $0x78] sm:$0xff] }
 0x955   :  { %v5945_v47 = vadd.f32 %v5817_v23, %v2961_v16  ;;  %v5824_v7 = vmax.f32 %v5435_v39, %v5696_v26  ;;  %9782 = vpow2.f32 %v6314_v59  ;;  %v5698_v12 = vmul.f32 0.2, %v5596_v32  ;;  %6726 = vmatprep.mubr.f32.mxu1 %v15329_v1  ;;  %6582 = vmatmul.mubr.f32.gmra.mxu0 %v15307_v57  ;;  %v15362_v35 = vpop.f32.mrf.mxu0 }
 0x956   :  { %9784 = vpow2.f32 %v6076_v34  ;;  %v5697_v45 = vmul.f32 0.2, %v5437_v56  ;;  %v5699_v23 = vmul.f32 0.2, %v5598_v25  ;;  %6727 = vmatmul.mubr.f32.gmra.mxu1 %v15317_v21  ;;  %v6082_v26 = vmul.f32 1.442695, %v5947_v24 }
 0x957   :  { %v15338_v29 = vpop.eup %9768  ;;  %v6078_v16 = vmul.f32 1.442695, %v5945_v47  ;;  %v5952_v39 = vadd.f32 %v5824_v7, %v2968_v50  ;;  %9786 = vpow2.f32 %v6080_v17  ;;  %v5826_v40 = vmax.f32 %v5596_v32, %v5698_v12  ;;  %v2969_v34 = vld [vmem:[%s16888_s2 + $0x68] sm:$0xff]  ;;  %v17748_v24 = vld [vmem:[#allocation17_spill] sm:$0xff] }
 0x958   :  { %17744 = vst [vmem:[#allocation141_spill] sm:$0xff] %v15338_v29  ;;  %v15348_v19 = vpop.eup %9770  ;;  %v17746_v50 = vld [vmem:[#allocation19_spill] sm:$0xff]  ;;  %v5825_v47 = vmax.f32 %v5437_v56, %v5697_v45  ;;  %v5827_v43 = vmax.f32 %v5598_v25, %v5699_v23  ;;  %v17747_v7 = vld [vmem:[#allocation20_spill] sm:$0xff] }
 0x959   :  { %17745 = vst [vmem:[#allocation142_spill] sm:$0xff] %v15348_v19  ;;  %9788 = vpow2.f32 %v6078_v16  ;;  %v6092_v59 = vmul.f32 1.442695, %v5952_v39  ;;  %v5441_v49 = vadd.f32 %v15148_v48, %v17746_v50  ;;  %v15358_v32 = vpop.eup %9772  ;;  %v5954_v17 = vadd.f32 %v5826_v40, %v2970_v11  ;;  %v17749_v21 = vld [vmem:[#allocation36_spill] sm:$0xff]  ;;  %v15369_v48 = vpop.f32.mrf.mxu1  ;;  %v2976_v40 = vld [vmem:[%s16888_s2 + $0xa0] sm:$0xff] }
 0x95a   :  { %v5602_v12 = vadd.f32 %v15162_v51, %v17747_v7  ;;  %9790 = vpow2.f32 %v6082_v26  ;;  %v5443_v39 = vadd.f32 %v15184_v0, %v17748_v24  ;;  %v5604_v57 = vadd.f32 %v15188_v14, %v17749_v21  ;;  %6586 = vmatprep.mubr.f32.mxu0 %v15358_v32  ;;  %v17752_v50 = vld [vmem:[#allocation18_spill] sm:$0xff] }
 0x95b   :  { %v5704_v16 = vmul.f32 0.2, %v5441_v49  ;;  %v15371_v11 = vpop.eup %9774  ;;  %9792 = vpow2.f32 %v6092_v59  ;;  %v6096_v56 = vmul.f32 1.442695, %v5954_v17  ;;  %v5953_v25 = vadd.f32 %v5825_v47, %v2969_v34  ;;  %6587 = vmatmul.mubr.f32.gmra.mxu0 %v15338_v29  ;;  %v2978_v34 = vld [vmem:[%s16888_s2 + $0xb0] sm:$0xff]  ;;  %v15389_v17 = vpop.f32.mrf.mxu0  ;;  %v2979_v24 = vld [vmem:[%s16888_s2 + $0xb8] sm:$0xff] }
 0x95c   :  { %17750 = vst [vmem:[#allocation64_spill] sm:$0xff] %v15371_v11  ;;  %v5955_v51 = vadd.f32 %v5827_v43, %v2971_v36  ;;  %v5706_v45 = vmul.f32 0.2, %v5602_v12  ;;  %v5705_v23 = vmul.f32 0.2, %v5443_v39  ;;  %6731 = vmatprep.mubr.f32.mxu1 %v15371_v11  ;;  %v15378_v21 = vpop.eup %9776  ;;  %v2977_v36 = vld [vmem:[%s16888_s2 + $0xa8] sm:$0xff] }
 0x95d   :  { %v5832_v0 = vmax.f32 %v5441_v49, %v5704_v16  ;;  %v5707_v14 = vmul.f32 0.2, %v5604_v57  ;;  %17751 = vst [vmem:[#allocation119_spill] sm:$0xff] %v15378_v21  ;;  %9794 = vpow2.f32 %v6096_v56  ;;  %v6094_v26 = vmul.f32 1.442695, %v5953_v25  ;;  %6732 = vmatmul.mubr.f32.gmra.mxu1 %v15348_v19  ;;  %v15391_v47 = vpop.eup %9778  ;;  %v15396_v25 = vpop.f32.mrf.mxu1  ;;  %v17754_v29 = vld [vmem:[#allocation38_spill] sm:$0xff] }
 0x95e   :  { %v6098_v59 = vmul.f32 1.442695, %v5955_v51  ;;  %v5447_v49 = vadd.f32 %v15210_v53, %v17752_v50  ;;  %17753 = vst [vmem:[#allocation120_spill] sm:$0xff] %v15391_v47  ;;  %v5834_v7 = vmax.f32 %v5602_v12, %v5706_v45  ;;  %v5833_v16 = vmax.f32 %v5443_v39, %v5705_v23  ;;  %v17755_v50 = vld [vmem:[#allocation35_spill] sm:$0xff] }
 0x95f   :  { %v5960_v43 = vadd.f32 %v5832_v0, %v2976_v40  ;;  %v5835_v56 = vmax.f32 %v5604_v57, %v5707_v14  ;;  %9796 = vpow2.f32 %v6094_v26  ;;  %v5608_v53 = vadd.f32 %v15217_v52, %v17754_v29  ;;  %v15402_v11 = vpop.eup %9780  ;;  %v2984_v57 = vld [vmem:[%s16888_s2 + $0xe0] sm:$0xff]  ;;  %v15408_v52 = vpop.f32.mrf.mxu0 }
 0x960   :  { %v5712_v51 = vmul.f32 0.2, %v5447_v49  ;;  %v5449_v19 = vadd.f32 %v15234_v4, %v17755_v50  ;;  %9798 = vpow2.f32 %v6098_v59  ;;  %v5962_v39 = vadd.f32 %v5834_v7, %v2978_v34  ;;  %6591 = vmatprep.mubr.f32.mxu0 %v15402_v11  ;;  %v2986_v59 = vld [vmem:[%s16888_s2 + $0xf0] sm:$0xff]  ;;  %v2985_v34 = vld [vmem:[%s16888_s2 + $0xe8] sm:$0xff] }
 0x961   :  { %v6108_v12 = vmul.f32 1.442695, %v5960_v43  ;;  %v5961_v40 = vadd.f32 %v5833_v16, %v2977_v36  ;;  %v5963_v0 = vadd.f32 %v5835_v56, %v2979_v24  ;;  %v5714_v23 = vmul.f32 0.2, %v5608_v53  ;;  %v17756_v36 = vld [vmem:[#allocation44_spill] sm:$0xff]  ;;  %6592 = vmatmul.mubr.f32.gmra.mxu0 %v15378_v21  ;;  %v15421_v43 = vpop.f32.mrf.mxu1 }
 0x962   :  { %v5840_v45 = vmax.f32 %v5447_v49, %v5712_v51  ;;  %v5713_v14 = vmul.f32 0.2, %v5449_v19  ;;  %v15410_v29 = vpop.eup %9782  ;;  %v6112_v4 = vmul.f32 1.442695, %v5962_v39  ;;  %v5610_v49 = vadd.f32 %v15243_v37, %v17756_v36  ;;  %v17759_v39 = vld [vmem:[#allocation37_spill] sm:$0xff]  ;;  %v17760_v37 = vld [vmem:[#allocation43_spill] sm:$0xff] }
 0x963   :  { %9800 = vpow2.f32 %v6108_v12  ;;  %v6110_v26 = vmul.f32 1.442695, %v5961_v40  ;;  %v15423_v7 = vpop.eup %9784  ;;  %v6114_v16 = vmul.f32 1.442695, %v5963_v0  ;;  %v5842_v56 = vmax.f32 %v5608_v53, %v5714_v23  ;;  %6736 = vmatprep.mubr.f32.mxu1 %v15410_v29  ;;  %v2987_v0 = vld [vmem:[%s16888_s2 + $0xf8] sm:$0xff] }
 0x964   :  { %17757 = vst [vmem:[#allocation65_spill] sm:$0xff] %v15423_v7  ;;  %v5968_v24 = vadd.f32 %v5840_v45, %v2984_v57  ;;  %v5841_v51 = vmax.f32 %v5449_v19, %v5713_v14  ;;  %v15426_v50 = vpop.eup %9786  ;;  %9802 = vpow2.f32 %v6112_v4  ;;  %v5715_v12 = vmul.f32 0.2, %v5610_v49  ;;  %6737 = vmatmul.mubr.f32.gmra.mxu1 %v15391_v47  ;;  %v15438_v45 = vpop.f32.mrf.mxu0 }
 0x965   :  { %17758 = vst [vmem:[#allocation62_spill] sm:$0xff] %v15426_v50  ;;  %v5453_v40 = vadd.f32 %v15262_v41, %v17759_v39  ;;  %v5614_v36 = vadd.f32 %v15269_v9, %v17760_v37  ;;  %9804 = vpow2.f32 %v6110_v26  ;;  %v5970_v53 = vadd.f32 %v5842_v56, %v2986_v59  ;;  %v15441_v9 = vpop.f32.mrf.mxu1  ;;  %v17764_v37 = vld [vmem:[#allocation45_spill] sm:$0xff] }
 0x966   :  { %v15433_v21 = vpop.eup %9788  ;;  %v6124_v57 = vmul.f32 1.442695, %v5968_v24  ;;  %v5969_v19 = vadd.f32 %v5841_v51, %v2985_v34  ;;  %9806 = vpow2.f32 %v6114_v16  ;;  %v5843_v23 = vmax.f32 %v5610_v49, %v5715_v12  ;;  %v2992_v34 = vld [vmem:[%s16888_s2 + $0x120] sm:$0xff]  ;;  %v2994_v16 = vld [vmem:[%s16888_s2 + $0x130] sm:$0xff] }
 0x967   :  { %17761 = vst [vmem:[#allocation125_spill] sm:$0xff] %v15433_v21  ;;  %v5720_v41 = vmul.f32 0.2, %v5453_v40  ;;  %v5722_v14 = vmul.f32 0.2, %v5614_v36  ;;  %6806 = vmatprep.mubr.f32.mxu0 %v15433_v21  ;;  %v15443_v4 = vpop.eup %9790  ;;  %v17763_v49 = vld [vmem:[#allocation40_spill] sm:$0xff] }
 0x968   :  { %17762 = vst [vmem:[#allocation126_spill] sm:$0xff] %v15443_v4  ;;  %9808 = vpow2.f32 %v6124_v57  ;;  %v6128_v26 = vmul.f32 1.442695, %v5970_v53  ;;  %v6126_v59 = vmul.f32 1.442695, %v5969_v19  ;;  %v5455_v24 = vadd.f32 %v15281_v5, %v17763_v49  ;;  %6807 = vmatmul.mubr.f32.vlgmr.msra.gmra.mxu0 %v15423_v7  ;;  %v15454_v56 = vpop.eup %9792  ;;  %6951 = vmatprep.mubr.f32.mxu1 %v15443_v4  ;;  %v17765_v19 = vld [vmem:[#allocation46_spill] sm:$0xff]  ;;  %v15464_v49 = vpop.f32.mrf.mxu0 }
 0x969   :  { %v5971_v51 = vadd.f32 %v5843_v23, %v2987_v0  ;;  %v5848_v12 = vmax.f32 %v5453_v40, %v5720_v41  ;;  %v5850_v39 = vmax.f32 %v5614_v36, %v5722_v14  ;;  %v5616_v57 = vadd.f32 %v15293_v61, %v17764_v37  ;;  %v17766_v21 = vld [vmem:[#allocation68_spill] sm:$0xff]  ;;  %6952 = vmatmul.mubr.f32.vlgmr.msra.gmra.mxu1 %v15426_v50  ;;  %v10018_v40 = vld [vmem:[%s16887_s15 + $0x78] sm:$0xff] }
 0x96a   :  { %9810 = vpow2.f32 %v6128_v26  ;;  %v5721_v53 = vmul.f32 0.2, %v5455_v24  ;;  %v5459_v47 = vadd.f32 %v15313_v58, %v17765_v19  ;;  %v5620_v5 = vadd.f32 %v15315_v44, %v17766_v21  ;;  %8972 = vmatpush3.msra.mxu0 %v10018_v40  ;;  %v15469_v61 = vpop.eup %9794  ;;  %v2993_v58 = vld [vmem:[%s16888_s2 + $0x128] sm:$0xff]  ;;  %v15474_v44 = vpop.f32.mrf.mxu1  ;;  %v10019_v21 = vld [vmem:[%s16887_s15 + $0x178] sm:$0xff]  ;;  %v10020_v41 = vld [vmem:[%s16887_s15 + $0xf0] sm:$0xff] }
 0x96b   :  { %17767 = vst [vmem:[#allocation127_spill] sm:$0xff] %v15469_v61  ;;  %9812 = vpow2.f32 %v6126_v59  ;;  %v6130_v36 = vmul.f32 1.442695, %v5971_v51  ;;  %v5976_v0 = vadd.f32 %v5848_v12, %v2992_v34  ;;  %v5978_v23 = vadd.f32 %v5850_v39, %v2994_v16  ;;  %9052 = vmatpush3.msra.mxu1 %v10019_v21  ;;  %8973 = vmatprep.subr.mxu0 %v10020_v41  ;;  %v10021_v16 = vld [vmem:[%s16887_s15 + $0x1f0] sm:$0xff]  ;;  %v17769_v50 = vld [vmem:[#allocation70_spill] sm:$0xff] }
 0x96c   :  { %v5849_v14 = vmax.f32 %v5455_v24, %v5721_v53  ;;  %v5723_v26 = vmul.f32 0.2, %v5616_v57  ;;  %v5728_v59 = vmul.f32 0.2, %v5459_v47  ;;  %v5730_v34 = vmul.f32 0.2, %v5620_v5  ;;  %9053 = vmatprep.subr.mxu1 %v10021_v16  ;;  %v15488_v12 = vpop.eup %9796 }
 0x96d   :  { %v10022_v51 = vld [vmem:[%s16887_s15 + $0x70] sm:$0xff]  ;;  %9814 = vpow2.f32 %v6130_v36  ;;  %v6140_v39 = vmul.f32 1.442695, %v5976_v0  ;;  %v6144_v37 = vmul.f32 1.442695, %v5978_v23  ;;  %v2995_v24 = vld [vmem:[%s16888_s2 + $0x138] sm:$0xff]  ;;  %v15504_v0 = vpop.eup %9798  ;;  %6811 = vmatprep.mubr.f32.mxu0 %v15488_v12  ;;  %v5622_v7 = vadd.f32 %v15345_v42, %v17769_v50 }
 0x96e   :  { %8974 = vmatpush3.msra.mxu0 %v10022_v51  ;;  %v3000_v53 = vld [vmem:[%s16888_s2 + $0x160] sm:$0xff]  ;;  %v17768_v19 = vld [vmem:[#allocation69_spill] sm:$0xff]  ;;  %v10024_v36 = vld [vmem:[%s16887_s15 + $0xe8] sm:$0xff]  ;;  %v5977_v23 = vadd.f32 %v5849_v14, %v2993_v58  ;;  %v5851_v41 = vmax.f32 %v5616_v57, %v5723_v26  ;;  %v5856_v16 = vmax.f32 %v5459_v47, %v5728_v59  ;;  %6956 = vmatprep.mubr.f32.mxu1 %v15504_v0  ;;  %v15518_v47 = vpop.f32.mrf.mxu1 }
 0x96f   :  { %v5461_v40 = vadd.f32 %v15336_v62, %v17768_v19  ;;  %v10023_v21 = vld [vmem:[%s16887_s15 + $0x170] sm:$0xff]  ;;  %8975 = vmatprep.subr.mxu0 %v10024_v36  ;;  %v5858_v62 = vmax.f32 %v5620_v5, %v5730_v34  ;;  %v15510_v19 = vpop.f32.mrf.mxu0  ;;  %9816 = vpow2.f32 %v6140_v39  ;;  %v17770_v36 = vld [vmem:[#allocation71_spill] sm:$0xff]  ;;  %6812 = vmatmul.mubr.f32.gmra.mxu0 %v15454_v56  ;;  %v5731_v59 = vmul.f32 0.2, %v5622_v7 }
 0x970   :  { %9054 = vmatpush3.msra.mxu1 %v10023_v21  ;;  %v3002_v51 = vld [vmem:[%s16888_s2 + $0x170] sm:$0xff]  ;;  %v5465_v4 = vadd.f32 %v15362_v35, %v17770_v36  ;;  %v15520_v57 = vpop.eup %9800  ;;  %9818 = vpow2.f32 %v6144_v37  ;;  %v6142_v5 = vmul.f32 1.442695, %v5977_v23  ;;  %v5979_v58 = vadd.f32 %v5851_v41, %v2995_v24  ;;  %v3001_v26 = vld [vmem:[%s16888_s2 + $0x168] sm:$0xff]  ;;  %v3008_v41 = vld [vmem:[%s16888_s2 + $0x1a0] sm:$0xff] }
 0x971   :  { %v5729_v21 = vmul.f32 0.2, %v5461_v40  ;;  %17771 = vst [vmem:[#allocation128_spill] sm:$0xff] %v15520_v57  ;;  %v5984_v14 = vadd.f32 %v5856_v16, %v3000_v53  ;;  %6957 = vmatmul.mubr.f32.gmra.mxu1 %v15469_v61  ;;  %v10025_v42 = vld [vmem:[%s16887_s15 + $0x1e8] sm:$0xff]  ;;  %v5986_v35 = vadd.f32 %v5858_v62, %v3002_v51  ;;  %v15535_v24 = vpop.eup %9802  ;;  %v15545_v62 = vpop.f32.mrf.mxu0  ;;  %v10029_v36 = vld [vmem:[%s16887_s15 + $0x1e0] sm:$0xff] }
 0x972   :  { %9055 = vmatprep.subr.mxu1 %v10025_v42  ;;  %v5736_v34 = vmul.f32 0.2, %v5465_v4  ;;  %v10026_v39 = vld [vmem:[%s16887_s15 + $0x68] sm:$0xff]  ;;  %17772 = vst [vmem:[#allocation63_spill] sm:$0xff] %v15535_v24  ;;  %9820 = vpow2.f32 %v6142_v5  ;;  %v6146_v53 = vmul.f32 1.442695, %v5979_v58  ;;  %v15553_v5 = vpop.eup %9804  ;;  %v5859_v42 = vmax.f32 %v5622_v7, %v5731_v59 }
 0x973   :  { %v5857_v50 = vmax.f32 %v5461_v40, %v5729_v21  ;;  %8976 = vmatpush3.msra.mxu0 %v10026_v39  ;;  %v10027_v37 = vld [vmem:[%s16887_s15 + $0x168] sm:$0xff]  ;;  %v6156_v23 = vmul.f32 1.442695, %v5984_v14  ;;  %v3003_v40 = vld [vmem:[%s16888_s2 + $0x178] sm:$0xff]  ;;  %v10028_v21 = vld [vmem:[%s16887_s15 + $0xe0] sm:$0xff]  ;;  %17774 = vst [vmem:[#allocation131_spill] sm:$0xff] %v15553_v5  ;;  %6816 = vmatprep.mubr.f32.mxu0 %v15553_v5 }
 0x974   :  { %9056 = vmatpush3.msra.mxu1 %v10027_v37  ;;  %v17773_v16 = vld [vmem:[#allocation72_spill] sm:$0xff]  ;;  %8977 = vmatprep.subr.mxu0 %v10028_v21  ;;  %v6160_v58 = vmul.f32 1.442695, %v5986_v35  ;;  %v5864_v39 = vmax.f32 %v5465_v4, %v5736_v34  ;;  %v15555_v37 = vpop.f32.mrf.mxu1  ;;  %v15563_v21 = vpop.eup %9806  ;;  %9822 = vpow2.f32 %v6146_v53  ;;  %v17776_v35 = vld [vmem:[#allocation73_spill] sm:$0xff]  ;;  %v17777_v4 = vld [vmem:[#allocation74_spill] sm:$0xff] }
 0x975   :  { %v5626_v51 = vadd.f32 %v15369_v48, %v17773_v16  ;;  %9057 = vmatprep.subr.mxu1 %v10029_v36  ;;  %v5985_v14 = vadd.f32 %v5857_v50, %v3001_v26  ;;  %v10030_v48 = vld [vmem:[%s16887_s15 + $0x60] sm:$0xff]  ;;  %17775 = vst [vmem:[#allocation132_spill] sm:$0xff] %v15563_v21  ;;  %v5467_v7 = vadd.f32 %v15389_v17, %v17776_v35  ;;  %v10032_v50 = vld [vmem:[%s16887_s15 + $0xd8] sm:$0xff]  ;;  %v15573_v59 = vpop.eup %9808  ;;  %9824 = vpow2.f32 %v6156_v23  ;;  %v3010_v17 = vld [vmem:[%s16888_s2 + $0x1b0] sm:$0xff] }
 0x976   :  { %8978 = vmatpush3.msra.mxu0 %v10030_v48  ;;  %v10031_v16 = vld [vmem:[%s16887_s15 + $0x160] sm:$0xff]  ;;  %v5628_v26 = vadd.f32 %v15396_v25, %v17777_v4  ;;  %17778 = vst [vmem:[#allocation60_spill] sm:$0xff] %v15573_v59  ;;  %v5987_v48 = vadd.f32 %v5859_v42, %v3003_v40  ;;  %v5992_v53 = vadd.f32 %v5864_v39, %v3008_v41  ;;  %9826 = vpow2.f32 %v6160_v58  ;;  %v15581_v4 = vpop.f32.mrf.mxu0  ;;  %v10033_v23 = vld [vmem:[%s16887_s15 + $0x1d8] sm:$0xff] }
 0x977   :  { %9058 = vmatpush3.msra.mxu1 %v10031_v16  ;;  %v5738_v36 = vmul.f32 0.2, %v5626_v51  ;;  %8979 = vmatprep.subr.mxu0 %v10032_v50  ;;  %v6158_v34 = vmul.f32 1.442695, %v5985_v14  ;;  %v5737_v16 = vmul.f32 0.2, %v5467_v7  ;;  %v15586_v40 = vpop.eup %9810 }
 0x978   :  { %6961 = vmatprep.mubr.f32.mxu1 %v15563_v21  ;;  %6817 = vmatmul.mubr.f32.gmra.mxu0 %v15520_v57  ;;  %v5739_v35 = vmul.f32 0.2, %v5628_v26  ;;  %17779 = vst [vmem:[#allocation61_spill] sm:$0xff] %v15586_v40  ;;  %v6162_v41 = vmul.f32 1.442695, %v5987_v48  ;;  %v3011_v58 = vld [vmem:[%s16888_s2 + $0x1b8] sm:$0xff]  ;;  %v15604_v48 = vpop.eup %9812 }
 0x979   :  { %v5866_v25 = vmax.f32 %v5626_v51, %v5738_v36  ;;  %6962 = vmatmul.mubr.f32.gmra.mxu1 %v15535_v24  ;;  %9059 = vmatprep.subr.mxu1 %v10033_v23  ;;  %9828 = vpow2.f32 %v6158_v34  ;;  %v6172_v14 = vmul.f32 1.442695, %v5992_v53  ;;  %v3009_v51 = vld [vmem:[%s16888_s2 + $0x1a8] sm:$0xff]  ;;  %v15596_v36 = vpop.f32.mrf.mxu1  ;;  %v10034_v50 = vld [vmem:[%s16887_s15 + $0x58] sm:$0xff]  ;;  %v5865_v23 = vmax.f32 %v5467_v7, %v5737_v16  ;;  %v10037_v7 = vld [vmem:[%s16887_s15 + $0x1d0] sm:$0xff] }
 0x97a   :  { %v17780_v42 = vld [vmem:[#allocation75_spill] sm:$0xff]  ;;  %8980 = vmatpush3.msra.mxu0 %v10034_v50  ;;  %v10035_v34 = vld [vmem:[%s16887_s15 + $0x158] sm:$0xff]  ;;  %v5867_v24 = vmax.f32 %v5628_v26, %v5739_v35  ;;  %v17781_v57 = vld [vmem:[#allocation76_spill] sm:$0xff]  ;;  %9830 = vpow2.f32 %v6162_v41  ;;  %6821 = vmatprep.mubr.f32.mxu0 %v15604_v48 }
 0x97b   :  { %v5471_v39 = vadd.f32 %v15408_v52, %v17780_v42  ;;  %9060 = vmatpush3.msra.mxu1 %v10035_v34  ;;  %v5994_v53 = vadd.f32 %v5866_v25, %v3010_v17  ;;  %v5632_v52 = vadd.f32 %v15421_v43, %v17781_v57  ;;  %v10036_v42 = vld [vmem:[%s16887_s15 + $0xd0] sm:$0xff]  ;;  %v17783_v5 = vld [vmem:[#allocation78_spill] sm:$0xff]  ;;  %v15619_v43 = vpop.eup %9814  ;;  %9832 = vpow2.f32 %v6172_v14 }
 0x97c   :  { %8981 = vmatprep.subr.mxu0 %v10036_v42  ;;  %v17782_v21 = vld [vmem:[#allocation77_spill] sm:$0xff]  ;;  %v5634_v34 = vadd.f32 %v15441_v9, %v17783_v5  ;;  %9061 = vmatprep.subr.mxu1 %v10037_v7  ;;  %v5993_v26 = vadd.f32 %v5865_v23, %v3009_v51  ;;  %v5995_v17 = vadd.f32 %v5867_v24, %v3011_v58  ;;  %v15631_v24 = vpop.f32.mrf.mxu1  ;;  %v15636_v14 = vpop.eup %9816  ;;  %v17785_v23 = vld [vmem:[#allocation79_spill] sm:$0xff] }
 0x97d   :  { %v5744_v50 = vmul.f32 0.2, %v5471_v39  ;;  %v5473_v61 = vadd.f32 %v15438_v45, %v17782_v21  ;;  %v6176_v57 = vmul.f32 1.442695, %v5994_v53  ;;  %v3016_v45 = vld [vmem:[%s16888_s2 + $0x1e0] sm:$0xff]  ;;  %v15624_v21 = vpop.f32.mrf.mxu0  ;;  %6822 = vmatmul.mubr.f32.gmra.mxu0 %v15573_v59  ;;  %v10038_v9 = vld [vmem:[%s16887_s15 + $0x150] sm:$0xff]  ;;  %6966 = vmatprep.mubr.f32.mxu1 %v15619_v43  ;;  %v5477_v42 = vadd.f32 %v15464_v49, %v17785_v23  ;;  %v15650_v7 = vpop.eup %9818 }
 0x97e   :  { %9062 = vmatpush3.msra.mxu1 %v10038_v9  ;;  %v5746_v25 = vmul.f32 0.2, %v5632_v52  ;;  %v5747_v35 = vmul.f32 0.2, %v5634_v34  ;;  %v10039_v41 = vld [vmem:[%s16887_s15 + $0x50] sm:$0xff]  ;;  %17784 = vst [vmem:[#allocation58_spill] sm:$0xff] %v15636_v14 }
 0x97f   :  { %v5872_v5 = vmax.f32 %v5471_v39, %v5744_v50  ;;  %v5745_v16 = vmul.f32 0.2, %v5473_v61  ;;  %8982 = vmatpush3.msra.mxu0 %v10039_v41  ;;  %9834 = vpow2.f32 %v6176_v57  ;;  %v6174_v51 = vmul.f32 1.442695, %v5993_v26  ;;  %v3018_v39 = vld [vmem:[%s16888_s2 + $0x1f0] sm:$0xff]  ;;  %v3017_v53 = vld [vmem:[%s16888_s2 + $0x1e8] sm:$0xff]  ;;  %6967 = vmatmul.mubr.f32.gmra.mxu1 %v15586_v40 }
 0x980   :  { %v6178_v58 = vmul.f32 1.442695, %v5995_v17  ;;  %v10040_v50 = vld [vmem:[%s16887_s15 + $0xc8] sm:$0xff]  ;;  %17786 = vst [vmem:[#allocation109_spill] sm:$0xff] %v15650_v7  ;;  %v5874_v26 = vmax.f32 %v5632_v52, %v5746_v25  ;;  %v3019_v9 = vld [vmem:[%s16888_s2 + $0x1f8] sm:$0xff]  ;;  %v5875_v41 = vmax.f32 %v5634_v34, %v5747_v35  ;;  %v15662_v52 = vpop.f32.mrf.mxu0  ;;  %v10045_v35 = vld [vmem:[%s16887_s15 + $0x1c0] sm:$0xff] }
 0x981   :  { %8983 = vmatprep.subr.mxu0 %v10040_v50  ;;  %v6000_v57 = vadd.f32 %v5872_v5, %v3016_v45  ;;  %v5873_v17 = vmax.f32 %v5473_v61, %v5745_v16  ;;  %v10041_v49 = vld [vmem:[%s16887_s15 + $0x1c8] sm:$0xff]  ;;  %9836 = vpow2.f32 %v6174_v51  ;;  %v5752_v23 = vmul.f32 0.2, %v5477_v42  ;;  %v17788_v59 = vld [vmem:[#allocation81_spill] sm:$0xff]  ;;  %v15670_v5 = vpop.eup %9820  ;;  %v10044_v16 = vld [vmem:[%s16887_s15 + $0xc0] sm:$0xff] }
 0x982   :  { %9063 = vmatprep.subr.mxu1 %v10041_v49  ;;  %v17787_v40 = vld [vmem:[#allocation80_spill] sm:$0xff]  ;;  %v5479_v45 = vadd.f32 %v15510_v19, %v17788_v59  ;;  %17789 = vst [vmem:[#allocation110_spill] sm:$0xff] %v15670_v5  ;;  %9838 = vpow2.f32 %v6178_v58  ;;  %v3024_v19 = vld [vmem:[%s16888_s2 + $0x220] sm:$0xff]  ;;  %v15675_v59 = vpop.f32.mrf.mxu1  ;;  %v6003_v51 = vadd.f32 %v5875_v41, %v3019_v9  ;;  %6826 = vmatprep.mubr.f32.mxu0 %v15670_v5 }
 0x983   :  { %v5638_v50 = vadd.f32 %v15474_v44, %v17787_v40  ;;  %v10042_v61 = vld [vmem:[%s16887_s15 + $0x48] sm:$0xff]  ;;  %v6188_v25 = vmul.f32 1.442695, %v6000_v57  ;;  %v6002_v44 = vadd.f32 %v5874_v26, %v3018_v39  ;;  %v6001_v40 = vadd.f32 %v5873_v17, %v3017_v53  ;;  %v10046_v57 = vld [vmem:[%s16887_s15 + $0x40] sm:$0xff]  ;;  %v15687_v26 = vpop.eup %9822  ;;  %6827 = vmatmul.mubr.f32.gmra.mxu0 %v15636_v14 }
 0x984   :  { %8984 = vmatpush3.msra.mxu0 %v10042_v61  ;;  %v10043_v34 = vld [vmem:[%s16887_s15 + $0x148] sm:$0xff]  ;;  %v5880_v58 = vmax.f32 %v5477_v42, %v5752_v23  ;;  %v5753_v53 = vmul.f32 0.2, %v5479_v45  ;;  %17790 = vst [vmem:[#allocation115_spill] sm:$0xff] %v15687_v26  ;;  %v3026_v61 = vld [vmem:[%s16888_s2 + $0x230] sm:$0xff]  ;;  %v17791_v9 = vld [vmem:[#allocation82_spill] sm:$0xff]  ;;  %6971 = vmatprep.mubr.f32.mxu1 %v15687_v26 }
 0x985   :  { %9064 = vmatpush3.msra.mxu1 %v10043_v34  ;;  %8985 = vmatprep.subr.mxu0 %v10044_v16  ;;  %v5754_v39 = vmul.f32 0.2, %v5638_v50  ;;  %9840 = vpow2.f32 %v6188_v25  ;;  %v6192_v17 = vmul.f32 1.442695, %v6002_v44  ;;  %v6190_v49 = vmul.f32 1.442695, %v6001_v40  ;;  %v15701_v34 = vpop.eup %9824 }
 0x986   :  { %9065 = vmatprep.subr.mxu1 %v10045_v35  ;;  %8986 = vmatpush3.msra.mxu0 %v10046_v57  ;;  %v3025_v42 = vld [vmem:[%s16888_s2 + $0x228] sm:$0xff]  ;;  %v5640_v41 = vadd.f32 %v15518_v47, %v17791_v9  ;;  %v10047_v23 = vld [vmem:[%s16887_s15 + $0x140] sm:$0xff]  ;;  %17792 = vst [vmem:[#allocation59_spill] sm:$0xff] %v15701_v34  ;;  %v6194_v25 = vmul.f32 1.442695, %v6003_v51  ;;  %v6008_v44 = vadd.f32 %v5880_v58, %v3024_v19  ;;  %v15704_v35 = vpop.f32.mrf.mxu0  ;;  %v10048_v47 = vld [vmem:[%s16887_s15 + $0xb8] sm:$0xff]  ;;  %v15709_v57 = vpop.eup %9826 }
 0x987   :  { %9066 = vmatpush3.msra.mxu1 %v10047_v23  ;;  %v5882_v40 = vmax.f32 %v5638_v50, %v5754_v39  ;;  %v5881_v16 = vmax.f32 %v5479_v45, %v5753_v53  ;;  %8987 = vmatprep.subr.mxu0 %v10048_v47  ;;  %17793 = vst [vmem:[#allocation116_spill] sm:$0xff] %v15709_v57  ;;  %9842 = vpow2.f32 %v6192_v17  ;;  %v17794_v23 = vld [vmem:[#allocation83_spill] sm:$0xff]  ;;  %v17795_v51 = vld [vmem:[#allocation84_spill] sm:$0xff]  ;;  %v15715_v45 = vpop.f32.mrf.mxu1  ;;  %v10049_v19 = vld [vmem:[%s16887_s15 + $0x1b8] sm:$0xff]  ;;  %v15721_v58 = vpop.eup %9828 }
 0x988   :  { %v5755_v9 = vmul.f32 0.2, %v5640_v41  ;;  %v5483_v14 = vadd.f32 %v15545_v62, %v17794_v23  ;;  %v5644_v50 = vadd.f32 %v15555_v37, %v17795_v51  ;;  %6972 = vmatmul.mubr.f32.gmra.mxu1 %v15650_v7  ;;  %9067 = vmatprep.subr.mxu1 %v10049_v19  ;;  %17796 = vst [vmem:[#allocation117_spill] sm:$0xff] %v15721_v58  ;;  %9844 = vpow2.f32 %v6190_v49  ;;  %v3027_v62 = vld [vmem:[%s16888_s2 + $0x238] sm:$0xff]  ;;  %v3032_v51 = vld [vmem:[%s16888_s2 + $0x260] sm:$0xff]  ;;  %v15746_v19 = vpop.f32.mrf.mxu0  ;;  %v17802_v26 = vld [vmem:[#allocation88_spill] sm:$0xff] }
 0x989   :  { %v6204_v39 = vmul.f32 1.442695, %v6008_v44  ;;  %v6010_v53 = vadd.f32 %v5882_v40, %v3026_v61  ;;  %v6009_v17 = vadd.f32 %v5881_v16, %v3025_v42  ;;  %v10050_v37 = vld [vmem:[%s16887_s15 + $0x38] sm:$0xff]  ;;  %9846 = vpow2.f32 %v6194_v25  ;;  %6831 = vmatprep.mubr.f32.mxu0 %v15721_v58  ;;  %v10052_v61 = vld [vmem:[%s16887_s15 + $0xb0] sm:$0xff]  ;;  %v15736_v42 = vpop.eup %9830  ;;  %v15756_v58 = vpop.f32.mrf.mxu1  ;;  %v17806_v5 = vld [vmem:[#allocation91_spill] sm:$0xff] }
 0x98a   :  { %8988 = vmatpush3.msra.mxu0 %v10050_v37  ;;  %v10051_v47 = vld [vmem:[%s16887_s15 + $0x138] sm:$0xff]  ;;  %v5883_v23 = vmax.f32 %v5640_v41, %v5755_v9  ;;  %v5760_v49 = vmul.f32 0.2, %v5483_v14  ;;  %v5762_v44 = vmul.f32 0.2, %v5644_v50  ;;  %17797 = vst [vmem:[#allocation118_spill] sm:$0xff] %v15736_v42  ;;  %6976 = vmatprep.mubr.f32.mxu1 %v15736_v42 }
 0x98b   :  { %9068 = vmatpush3.msra.mxu1 %v10051_v47  ;;  %8989 = vmatprep.subr.mxu0 %v10052_v61  ;;  %9848 = vpow2.f32 %v6204_v39  ;;  %v6208_v40 = vmul.f32 1.442695, %v6010_v53  ;;  %v6206_v16 = vmul.f32 1.442695, %v6009_v17  ;;  %v3034_v41 = vld [vmem:[%s16888_s2 + $0x270] sm:$0xff]  ;;  %v15752_v53 = vpop.eup %9832  ;;  %v17800_v61 = vld [vmem:[#allocation86_spill] sm:$0xff] }
 0x98c   :  { %v17798_v25 = vld [vmem:[#allocation85_spill] sm:$0xff]  ;;  %6832 = vmatmul.mubr.f32.gmra.mxu0 %v15701_v34  ;;  %17799 = vst [vmem:[#allocation56_spill] sm:$0xff] %v15752_v53  ;;  %v6011_v17 = vadd.f32 %v5883_v23, %v3027_v62  ;;  %v5888_v37 = vmax.f32 %v5483_v14, %v5760_v49  ;;  %v5890_v47 = vmax.f32 %v5644_v50, %v5762_v44 }
 0x98d   :  { %v5485_v9 = vadd.f32 %v15581_v4, %v17798_v25  ;;  %v10053_v39 = vld [vmem:[%s16887_s15 + $0x1b0] sm:$0xff]  ;;  %v5646_v7 = vadd.f32 %v15596_v36, %v17800_v61  ;;  %9850 = vpow2.f32 %v6208_v40  ;;  %v17801_v25 = vld [vmem:[#allocation87_spill] sm:$0xff]  ;;  %6977 = vmatmul.mubr.f32.gmra.mxu1 %v15709_v57  ;;  %v15767_v36 = vpop.eup %9834  ;;  %v3035_v61 = vld [vmem:[%s16888_s2 + $0x278] sm:$0xff] }
 0x98e   :  { %9069 = vmatprep.subr.mxu1 %v10053_v39  ;;  %v5489_v34 = vadd.f32 %v15624_v21, %v17801_v25  ;;  %v5650_v39 = vadd.f32 %v15631_v24, %v17802_v26  ;;  %v10054_v14 = vld [vmem:[%s16887_s15 + $0x30] sm:$0xff]  ;;  %17803 = vst [vmem:[#allocation57_spill] sm:$0xff] %v15767_v36  ;;  %9852 = vpow2.f32 %v6206_v16  ;;  %v6210_v50 = vmul.f32 1.442695, %v6011_v17  ;;  %v3033_v21 = vld [vmem:[%s16888_s2 + $0x268] sm:$0xff] }
 0x98f   :  { %v5761_v4 = vmul.f32 0.2, %v5485_v9  ;;  %8990 = vmatpush3.msra.mxu0 %v10054_v14  ;;  %v6016_v62 = vadd.f32 %v5888_v37, %v3032_v51  ;;  %v6018_v23 = vadd.f32 %v5890_v47, %v3034_v41  ;;  %v10055_v24 = vld [vmem:[%s16887_s15 + $0x130] sm:$0xff]  ;;  %v10056_v26 = vld [vmem:[%s16887_s15 + $0xa8] sm:$0xff]  ;;  %v5763_v44 = vmul.f32 0.2, %v5646_v7  ;;  %v15778_v51 = vpop.f32.mrf.mxu0  ;;  %v15786_v37 = vpop.eup %9836 }
 0x990   :  { %9070 = vmatpush3.msra.mxu1 %v10055_v24  ;;  %8991 = vmatprep.subr.mxu0 %v10056_v26  ;;  %v5768_v40 = vmul.f32 0.2, %v5489_v34  ;;  %v5770_v16 = vmul.f32 0.2, %v5650_v39  ;;  %v10057_v41 = vld [vmem:[%s16887_s15 + $0x1a8] sm:$0xff]  ;;  %9854 = vpow2.f32 %v6210_v50  ;;  %v17804_v25 = vld [vmem:[#allocation89_spill] sm:$0xff]  ;;  %v15796_v24 = vpop.f32.mrf.mxu1 }
 0x991   :  { %v5889_v49 = vmax.f32 %v5485_v9, %v5761_v4  ;;  %9071 = vmatprep.subr.mxu1 %v10057_v41  ;;  %v10058_v17 = vld [vmem:[%s16887_s15 + $0x28] sm:$0xff]  ;;  %v6220_v47 = vmul.f32 1.442695, %v6016_v62  ;;  %v6224_v9 = vmul.f32 1.442695, %v6018_v23  ;;  %v3040_v4 = vld [vmem:[%s16888_s2 + $0x2a0] sm:$0xff]  ;;  %v5491_v14 = vadd.f32 %v15662_v52, %v17804_v25  ;;  %v15804_v62 = vpop.eup %9838  ;;  %6836 = vmatprep.mubr.f32.mxu0 %v15786_v37 }
 0x992   :  { %8992 = vmatpush3.msra.mxu0 %v10058_v17  ;;  %v10059_v26 = vld [vmem:[%s16887_s15 + $0x128] sm:$0xff]  ;;  %v10060_v50 = vld [vmem:[%s16887_s15 + $0xa0] sm:$0xff]  ;;  %v5891_v41 = vmax.f32 %v5646_v7, %v5763_v44  ;;  %v5896_v17 = vmax.f32 %v5489_v34, %v5768_v40  ;;  %v3042_v52 = vld [vmem:[%s16888_s2 + $0x2b0] sm:$0xff]  ;;  %v5898_v25 = vmax.f32 %v5650_v39, %v5770_v16  ;;  %6981 = vmatprep.mubr.f32.mxu1 %v15804_v62  ;;  %v15816_v7 = vpop.eup %9840  ;;  %v15821_v44 = vpop.f32.mrf.mxu0 }
 0x993   :  { %9072 = vmatpush3.msra.mxu1 %v10059_v26  ;;  %8993 = vmatprep.subr.mxu0 %v10060_v50  ;;  %v6017_v23 = vadd.f32 %v5889_v49, %v3033_v21  ;;  %9856 = vpow2.f32 %v6220_v47  ;;  %v5769_v57 = vmul.f32 0.2, %v5491_v14  ;;  %v17805_v26 = vld [vmem:[#allocation90_spill] sm:$0xff]  ;;  %v5495_v50 = vadd.f32 %v15704_v35, %v17806_v5  ;;  %17807 = vst [vmem:[#allocation121_spill] sm:$0xff] %v15816_v7  ;;  %v3041_v49 = vld [vmem:[%s16888_s2 + $0x2a8] sm:$0xff]  ;;  %v15827_v47 = vpop.f32.mrf.mxu1 }
 0x994   :  { %v5652_v42 = vadd.f32 %v15675_v59, %v17805_v26  ;;  %6837 = vmatmul.mubr.f32.gmra.mxu0 %v15752_v53  ;;  %9858 = vpow2.f32 %v6224_v9  ;;  %v6019_v21 = vadd.f32 %v5891_v41, %v3035_v61  ;;  %v6024_v39 = vadd.f32 %v5896_v17, %v3040_v4  ;;  %6982 = vmatmul.mubr.f32.gmra.mxu1 %v15767_v36  ;;  %v10061_v5 = vld [vmem:[%s16887_s15 + $0x1a0] sm:$0xff]  ;;  %v15835_v4 = vpop.eup %9842  ;;  %v17809_v17 = vld [vmem:[#allocation92_spill] sm:$0xff]  ;;  %v10065_v26 = vld [vmem:[%s16887_s15 + $0x198] sm:$0xff] }
 0x995   :  { %v6222_v34 = vmul.f32 1.442695, %v6017_v23  ;;  %9073 = vmatprep.subr.mxu1 %v10061_v5  ;;  %v6026_v59 = vadd.f32 %v5898_v25, %v3042_v52  ;;  %v5897_v35 = vmax.f32 %v5491_v14, %v5769_v57  ;;  %v5776_v16 = vmul.f32 0.2, %v5495_v50  ;;  %v10062_v9 = vld [vmem:[%s16887_s15 + $0x20] sm:$0xff]  ;;  %17808 = vst [vmem:[#allocation122_spill] sm:$0xff] %v15835_v4 }
 0x996   :  { %v5771_v40 = vmul.f32 0.2, %v5652_v42  ;;  %8994 = vmatpush3.msra.mxu0 %v10062_v9  ;;  %v10063_v61 = vld [vmem:[%s16887_s15 + $0x120] sm:$0xff]  ;;  %v6226_v23 = vmul.f32 1.442695, %v6019_v21  ;;  %v3043_v57 = vld [vmem:[%s16888_s2 + $0x2b8] sm:$0xff]  ;;  %v5656_v52 = vadd.f32 %v15715_v45, %v17809_v17 }
 0x997   :  { %9074 = vmatpush3.msra.mxu1 %v10063_v61  ;;  %9860 = vpow2.f32 %v6222_v34  ;;  %v6236_v41 = vmul.f32 1.442695, %v6024_v39  ;;  %v3048_v14 = vld [vmem:[%s16888_s2 + $0x2e0] sm:$0xff]  ;;  %v10064_v25 = vld [vmem:[%s16887_s15 + $0x98] sm:$0xff]  ;;  %v15851_v34 = vpop.eup %9844  ;;  %v6240_v21 = vmul.f32 1.442695, %v6026_v59  ;;  %v6025_v39 = vadd.f32 %v5897_v35, %v3041_v49 }
 0x998   :  { %8995 = vmatprep.subr.mxu0 %v10064_v25  ;;  %9075 = vmatprep.subr.mxu1 %v10065_v26  ;;  %17810 = vst [vmem:[#allocation101_spill] sm:$0xff] %v15851_v34  ;;  %v5899_v5 = vmax.f32 %v5652_v42, %v5771_v40  ;;  %v5904_v9 = vmax.f32 %v5495_v50, %v5776_v16  ;;  %v10066_v45 = vld [vmem:[%s16887_s15 + $0x18] sm:$0xff]  ;;  %v15859_v17 = vpop.eup %9846  ;;  %9862 = vpow2.f32 %v6226_v23  ;;  %v5778_v25 = vmul.f32 0.2, %v5656_v52  ;;  %v15865_v50 = vpop.f32.mrf.mxu0  ;;  %v10068_v35 = vld [vmem:[%s16887_s15 + $0x90] sm:$0xff] }
 0x999   :  { %8996 = vmatpush3.msra.mxu0 %v10066_v45  ;;  %v10067_v61 = vld [vmem:[%s16887_s15 + $0x118] sm:$0xff]  ;;  %17811 = vst [vmem:[#allocation102_spill] sm:$0xff] %v15859_v17  ;;  %6841 = vmatprep.mubr.f32.mxu0 %v15851_v34  ;;  %v15871_v40 = vpop.eup %9848  ;;  %9864 = vpow2.f32 %v6236_v41  ;;  %v6238_v16 = vmul.f32 1.442695, %v6025_v39  ;;  %v10069_v41 = vld [vmem:[%s16887_s15 + $0x190] sm:$0xff] }
 0x99a   :  { %9076 = vmatpush3.msra.mxu1 %v10067_v61  ;;  %v17812_v26 = vld [vmem:[#allocation93_spill] sm:$0xff]  ;;  %v17813_v49 = vld [vmem:[#allocation94_spill] sm:$0xff]  ;;  %8997 = vmatprep.subr.mxu0 %v10068_v35  ;;  %17814 = vst [vmem:[#allocation54_spill] sm:$0xff] %v15871_v40  ;;  %v6027_v23 = vadd.f32 %v5899_v5, %v3043_v57  ;;  %v6032_v45 = vadd.f32 %v5904_v9, %v3048_v14  ;;  %9866 = vpow2.f32 %v6240_v21  ;;  %v15884_v57 = vpop.eup %9850  ;;  %v3049_v5 = vld [vmem:[%s16888_s2 + $0x2e8] sm:$0xff] }
 0x99b   :  { %v5497_v59 = vadd.f32 %v15746_v19, %v17812_v26  ;;  %v5658_v42 = vadd.f32 %v15756_v58, %v17813_v49  ;;  %v3050_v19 = vld [vmem:[%s16888_s2 + $0x2f0] sm:$0xff]  ;;  %v15876_v58 = vpop.f32.mrf.mxu1  ;;  %6986 = vmatprep.mubr.f32.mxu1 %v15859_v17  ;;  %6842 = vmatmul.mubr.f32.gmra.mxu0 %v15816_v7  ;;  %v5906_v61 = vmax.f32 %v5656_v52, %v5778_v25  ;;  %9868 = vpow2.f32 %v6238_v16  ;;  %v3051_v52 = vld [vmem:[%s16888_s2 + $0x2f8] sm:$0xff]  ;;  %v17816_v21 = vld [vmem:[#allocation95_spill] sm:$0xff]  ;;  %v15900_v16 = vpop.eup %9852 }
 0x99c   :  { %6987 = vmatmul.mubr.f32.gmra.mxu1 %v15835_v4  ;;  %9077 = vmatprep.subr.mxu1 %v10069_v41  ;;  %17815 = vst [vmem:[#allocation105_spill] sm:$0xff] %v15884_v57  ;;  %v6242_v14 = vmul.f32 1.442695, %v6027_v23  ;;  %v6252_v39 = vmul.f32 1.442695, %v6032_v45  ;;  %v5501_v9 = vadd.f32 %v15778_v51, %v17816_v21  ;;  %v10070_v25 = vld [vmem:[%s16887_s15 + $0x10] sm:$0xff]  ;;  %v5508_v17 = vpop.f32.mrf.mxu0 }
 0x99d   :  { %v5777_v26 = vmul.f32 0.2, %v5497_v59  ;;  %v5779_v49 = vmul.f32 0.2, %v5658_v42  ;;  %8998 = vmatpush3.msra.mxu0 %v10070_v25  ;;  %v10071_v35 = vld [vmem:[%s16887_s15 + $0x110] sm:$0xff]  ;;  %17817 = vst [vmem:[#allocation106_spill] sm:$0xff] %v15900_v16  ;;  %v6034_v23 = vadd.f32 %v5906_v61, %v3050_v19  ;;  %v15911_v19 = vpop.f32.mrf.mxu1  ;;  %6846 = vmatprep.mubr.f32.mxu0 %v15900_v16 }
 0x99e   :  { %9078 = vmatpush3.msra.mxu1 %v10071_v35  ;;  %v17818_v4 = vld [vmem:[#allocation96_spill] sm:$0xff]  ;;  %9870 = vpow2.f32 %v6242_v14  ;;  %v5784_v21 = vmul.f32 0.2, %v5501_v9  ;;  %v17819_v25 = vld [vmem:[#allocation97_spill] sm:$0xff]  ;;  %v17820_v35 = vld [vmem:[#allocation98_spill] sm:$0xff] }
 0x99f   :  { %v5905_v45 = vmax.f32 %v5497_v59, %v5777_v26  ;;  %v5907_v41 = vmax.f32 %v5658_v42, %v5779_v49  ;;  %v5662_v7 = vadd.f32 %v15796_v24, %v17818_v4  ;;  %v10072_v51 = vld [vmem:[%s16887_s15 + $0x88] sm:$0xff]  ;;  %v5503_v36 = vadd.f32 %v15821_v44, %v17819_v25  ;;  %v15917_v4 = vpop.eup %9854  ;;  %v3056_v44 = vld [vmem:[%s16888_s2 + $0x320] sm:$0xff]  ;;  %6847 = vmatmul.mubr.f32.gmra.mxu0 %v15871_v40  ;;  %v5512_v25 = vpop.f32.mrf.mxu0 }
 0x9a0   :  { %8999 = vmatprep.subr.mxu0 %v10072_v51  ;;  %v5664_v34 = vadd.f32 %v15827_v47, %v17820_v35  ;;  %v10073_v24 = vld [vmem:[%s16887_s15 + $0x188] sm:$0xff]  ;;  %17821 = vst [vmem:[#allocation55_spill] sm:$0xff] %v15917_v4  ;;  %9872 = vpow2.f32 %v6252_v39  ;;  %v6256_v59 = vmul.f32 1.442695, %v6034_v23  ;;  %v5912_v26 = vmax.f32 %v5501_v9, %v5784_v21  ;;  %6991 = vmatprep.mubr.f32.mxu1 %v15917_v4  ;;  %v10076_v35 = vld [vmem:[%s16887_s15 + $0x80] sm:$0xff]  ;;  %v5673_v40 = vpop.f32.mrf.mxu1 }
 0x9a1   :  { %9079 = vmatprep.subr.mxu1 %v10073_v24  ;;  %v6033_v42 = vadd.f32 %v5905_v45, %v3049_v5  ;;  %v6035_v61 = vadd.f32 %v5907_v41, %v3051_v52  ;;  %v10074_v47 = vld [vmem:[%s16887_s15 + $0x108] sm:$0xff]  ;;  %v5786_v49 = vmul.f32 0.2, %v5662_v7  ;;  %v5785_v14 = vmul.f32 0.2, %v5503_v36  ;;  %v15930_v5 = vpop.eup %9856  ;;  %v3058_v45 = vld [vmem:[%s16888_s2 + $0x330] sm:$0xff]  ;;  %6992 = vmatmul.mubr.f32.gmra.mxu1 %v15884_v57 }
 0x9a2   :  { %9080 = vmatpush3.msra.mxu1 %v10074_v47  ;;  %v5787_v51 = vmul.f32 0.2, %v5664_v34  ;;  %v10075_v39 = vld [vmem:[%s16887_s15 + $0x8] sm:$0xff]  ;;  %9874 = vpow2.f32 %v6256_v59  ;;  %v15944_v24 = vpop.eup %9858  ;;  %v6040_v59 = vadd.f32 %v5912_v26, %v3056_v44  ;;  %v3059_v47 = vld [vmem:[%s16888_s2 + $0x338] sm:$0xff] }
 0x9a3   :  { %9000 = vmatpush3.msra.mxu0 %v10075_v39  ;;  %v6254_v52 = vmul.f32 1.442695, %v6033_v42  ;;  %v6258_v23 = vmul.f32 1.442695, %v6035_v61  ;;  %v3057_v9 = vld [vmem:[%s16888_s2 + $0x328] sm:$0xff]  ;;  %17823 = vst [vmem:[#allocation52_spill] sm:$0xff] %v15944_v24  ;;  %v5914_v42 = vmax.f32 %v5662_v7, %v5786_v49  ;;  %v5913_v61 = vmax.f32 %v5503_v36, %v5785_v14 }
 0x9a4   :  { %v17822_v41 = vld [vmem:[#allocation99_spill] sm:$0xff]  ;;  %9001 = vmatprep.subr.mxu0 %v10076_v35  ;;  %v5915_v39 = vmax.f32 %v5664_v34, %v5787_v51  ;;  %v17824_v57 = vld [vmem:[#allocation100_spill] sm:$0xff]  ;;  %v15961_v34 = vpop.eup %9860  ;;  %v6268_v26 = vmul.f32 1.442695, %v6040_v59  ;;  %v17831_v16 = vld [vmem:[#allocation114_spill] sm:$0xff] }
 0x9a5   :  { %v5507_v21 = vadd.f32 %v15865_v50, %v17822_v41  ;;  %v10077_v50 = vld [vmem:[%s16887_s15 + $0x180] sm:$0xff]  ;;  %9876 = vpow2.f32 %v6254_v52  ;;  %v5668_v35 = vadd.f32 %v15876_v58, %v17824_v57  ;;  %17826 = vst [vmem:[#allocation107_spill] sm:$0xff] %v15961_v34  ;;  %v6042_v49 = vadd.f32 %v5914_v42, %v3058_v45  ;;  %v10080_v58 = vld [vmem:[%s16887_s15 + $0x2f8] sm:$0xff]  ;;  %v5514_v45 = vpop.f32.mrf.mxu0  ;;  %6851 = vmatprep.mubr.f32.mxu0 %v15961_v34 }
 0x9a6   :  { %9081 = vmatprep.subr.mxu1 %v10077_v50  ;;  %v17825_v4 = vld [vmem:[#allocation103_spill] sm:$0xff]  ;;  %9878 = vpow2.f32 %v6258_v23  ;;  %v6041_v14 = vadd.f32 %v5913_v61, %v3057_v9  ;;  %v10081_v57 = vld [vmem:[%s16887_s15 + $0x3f8] sm:$0xff]  ;;  %v15973_v9 = vpop.eup %9862  ;;  %v3066_v61 = vld [vmem:[%s16888_s2 + $0x370] sm:$0xff]  ;;  %6852 = vmatmul.mubr.f32.gmra.mxu0 %v15930_v5  ;;  %v5674_v53 = vadd.f32 %v5673_v40, %v17831_v16 }
 0x9a7   :  { %v5792_v41 = vmul.f32 0.2, %v5507_v21  ;;  %v5509_v44 = vadd.f32 %v5508_v17, %v17825_v4  ;;  %v10078_v36 = vld [vmem:[%s16887_s15] sm:$0xff]  ;;  %v6043_v4 = vadd.f32 %v5915_v39, %v3059_v47  ;;  %v5794_v52 = vmul.f32 0.2, %v5668_v35  ;;  %v3065_v50 = vld [vmem:[%s16888_s2 + $0x368] sm:$0xff]  ;;  %v5675_v39 = vpop.f32.mrf.mxu1  ;;  %6996 = vmatprep.mubr.f32.mxu1 %v15973_v9 }
 0x9a8   :  { %9002 = vmatpush3.msra.mxu0 %v10078_v36  ;;  %v10079_v7 = vld [vmem:[%s16887_s15 + $0x100] sm:$0xff]  ;;  %9880 = vpow2.f32 %v6268_v26  ;;  %v6272_v59 = vmul.f32 1.442695, %v6042_v49  ;;  %v6270_v42 = vmul.f32 1.442695, %v6041_v14  ;;  %v17827_v47 = vld [vmem:[#allocation104_spill] sm:$0xff]  ;;  %6997 = vmatmul.mubr.f32.gmra.mxu1 %v15944_v24 }
 0x9a9   :  { %9082 = vmatpush3.msra.mxu1 %v10079_v7  ;;  %v3064_v17 = vld [vmem:[%s16888_s2 + $0x360] sm:$0xff]  ;;  %9131 = vmatprep.subr.mxu0 %v10080_v58  ;;  %v5920_v51 = vmax.f32 %v5507_v21, %v5792_v41  ;;  %v5793_v23 = vmul.f32 0.2, %v5509_v44  ;;  %v5670_v21 = vadd.f32 %v15911_v19, %v17827_v47  ;;  %v15984_v41 = vpop.eup %9864  ;;  %v6274_v36 = vmul.f32 1.442695, %v6043_v4 }
 0x9aa   :  { %9211 = vmatprep.subr.mxu1 %v10081_v57  ;;  %17828 = vst [vmem:[#allocation108_spill] sm:$0xff] %v15984_v41  ;;  %v5922_v26 = vmax.f32 %v5668_v35, %v5794_v52  ;;  %v15987_v14 = vpop.eup %9866  ;;  %9882 = vpow2.f32 %v6272_v59  ;;  %v17830_v57 = vld [vmem:[#allocation113_spill] sm:$0xff] }
 0x9ab   :  { %v6048_v7 = vadd.f32 %v5920_v51, %v3064_v17  ;;  %v5921_v49 = vmax.f32 %v5509_v44, %v5793_v23  ;;  %17829 = vst [vmem:[#allocation111_spill] sm:$0xff] %v15987_v14  ;;  %v5795_v58 = vmul.f32 0.2, %v5670_v21  ;;  %v5513_v34 = vadd.f32 %v5512_v25, %v17830_v57  ;;  %v15992_v19 = vpop.eup %9868  ;;  %v3067_v35 = vld [vmem:[%s16888_s2 + $0x378] sm:$0xff]  ;;  %v5518_v44 = vpop.f32.mrf.mxu0  ;;  %v3074_v57 = vld [vmem:[%s16888_s2 + $0x3b0] sm:$0xff] }
 0x9ac   :  { %9884 = vpow2.f32 %v6270_v42  ;;  %v6050_v4 = vadd.f32 %v5922_v26, %v3066_v61  ;;  %v5802_v23 = vmul.f32 0.2, %v5674_v53  ;;  %v5679_v25 = vpop.f32.mrf.mxu1  ;;  %6856 = vmatprep.mubr.f32.mxu0 %v15992_v19  ;;  %v15998_v40 = vpop.eup %9870  ;;  %v3072_v42 = vld [vmem:[%s16888_s2 + $0x3a0] sm:$0xff] }
 0x9ad   :  { %v6284_v47 = vmul.f32 1.442695, %v6048_v7  ;;  %v6049_v17 = vadd.f32 %v5921_v49, %v3065_v50  ;;  %9886 = vpow2.f32 %v6274_v36  ;;  %v5923_v51 = vmax.f32 %v5670_v21, %v5795_v58  ;;  %17832 = vst [vmem:[#allocation112_spill] sm:$0xff] %v15998_v40  ;;  %v17833_v61 = vld [vmem:[#allocation123_spill] sm:$0xff]  ;;  %6857 = vmatmul.mubr.f32.gmra.mxu0 %v15984_v41  ;;  %v16005_v36 = vpop.eup %9872  ;;  %v17834_v49 = vld [vmem:[#allocation124_spill] sm:$0xff]  ;;  %7001 = vmatprep.mubr.f32.mxu1 %v15998_v40  ;;  %v5520_v41 = vpop.f32.mrf.mxu0 }
 0x9ae   :  { %v5800_v52 = vmul.f32 0.2, %v5513_v34  ;;  %v6288_v16 = vmul.f32 1.442695, %v6050_v4  ;;  %v5515_v50 = vadd.f32 %v5514_v45, %v17833_v61  ;;  %v5930_v26 = vmax.f32 %v5674_v53, %v5802_v23  ;;  %v17835_v4 = vld [vmem:[#allocation133_spill] sm:$0xff]  ;;  %v17836_v45 = vld [vmem:[#allocation134_spill] sm:$0xff]  ;;  %7002 = vmatmul.mubr.f32.gmra.mxu1 %v15987_v14 }
 0x9af   :  { %9888 = vpow2.f32 %v6284_v47  ;;  %v6286_v59 = vmul.f32 1.442695, %v6049_v17  ;;  %v6051_v21 = vadd.f32 %v5923_v51, %v3067_v35  ;;  %v5676_v58 = vadd.f32 %v5675_v39, %v17834_v49  ;;  %v16015_v35 = vpop.eup %9874  ;;  %v3073_v39 = vld [vmem:[%s16888_s2 + $0x3a8] sm:$0xff]  ;;  %v5681_v49 = vpop.f32.mrf.mxu1 }
 0x9b0   :  { %v5928_v7 = vmax.f32 %v5513_v34, %v5800_v52  ;;  %9890 = vpow2.f32 %v6288_v16  ;;  %v5801_v47 = vmul.f32 0.2, %v5515_v50  ;;  %v5519_v17 = vadd.f32 %v5518_v44, %v17835_v4  ;;  %v3075_v4 = vld [vmem:[%s16888_s2 + $0x3b8] sm:$0xff]  ;;  %v17838_v40 = vld [vmem:[#allocation144_spill] sm:$0xff] }
 0x9b1   :  { %v5680_v61 = vadd.f32 %v5679_v25, %v17836_v45  ;;  %9892 = vpow2.f32 %v6286_v59  ;;  %v6290_v53 = vmul.f32 1.442695, %v6051_v21  ;;  %v5803_v52 = vmul.f32 0.2, %v5676_v58  ;;  %v3080_v59 = vld [vmem:[%s16888_s2 + $0x3e0] sm:$0xff] }
 0x9b2   :  { %v6056_v34 = vadd.f32 %v5928_v7, %v3072_v42  ;;  %v5929_v51 = vmax.f32 %v5515_v50, %v5801_v47  ;;  %v5808_v23 = vmul.f32 0.2, %v5519_v17  ;;  %v16020_v44 = vpop.eup %9876  ;;  %v6058_v25 = vadd.f32 %v5930_v26, %v3074_v57  ;;  %v17837_v42 = vld [vmem:[#allocation143_spill] sm:$0xff]  ;;  %v3082_v26 = vld [vmem:[%s16888_s2 + $0x3f0] sm:$0xff] }
 0x9b3   :  { %v5810_v16 = vmul.f32 0.2, %v5680_v61  ;;  %9894 = vpow2.f32 %v6290_v53  ;;  %v5521_v21 = vadd.f32 %v5520_v41, %v17837_v42  ;;  %v16029_v7 = vpop.eup %9878  ;;  %v5931_v47 = vmax.f32 %v5676_v58, %v5803_v52  ;;  %6861 = vmatprep.mubr.f32.mxu0 %v16020_v44 }
 0x9b4   :  { %v6057_v50 = vadd.f32 %v5929_v51, %v3073_v39  ;;  %v5936_v45 = vmax.f32 %v5519_v17, %v5808_v23  ;;  %v6300_v53 = vmul.f32 1.442695, %v6056_v34  ;;  %v5682_v24 = vadd.f32 %v5681_v49, %v17838_v40  ;;  %7006 = vmatprep.mubr.f32.mxu1 %v16029_v7  ;;  %6862 = vmatmul.mubr.f32.gmra.mxu0 %v16005_v36  ;;  %v3083_v49 = vld [vmem:[%s16888_s2 + $0x3f8] sm:$0xff] }
 0x9b5   :  { %v5938_v14 = vmax.f32 %v5680_v61, %v5810_v16  ;;  %v5809_v57 = vmul.f32 0.2, %v5521_v21  ;;  %v16038_v41 = vpop.eup %9880  ;;  %v6059_v58 = vadd.f32 %v5931_v47, %v3075_v4  ;;  %v3081_v61 = vld [vmem:[%s16888_s2 + $0x3e8] sm:$0xff]  ;;  %7007 = vmatmul.mubr.f32.gmra.mxu1 %v16015_v35  ;;  %v6304_v34 = vmul.f32 1.442695, %v6058_v25 }
 0x9b6   :  { %v6302_v39 = vmul.f32 1.442695, %v6057_v50  ;;  %v6064_v17 = vadd.f32 %v5936_v45, %v3080_v59  ;;  %v5811_v52 = vmul.f32 0.2, %v5682_v24 }
 0x9b7   :  { %v5937_v51 = vmax.f32 %v5521_v21, %v5809_v57  ;;  %v16044_v23 = vpop.eup %9882  ;;  %v6306_v40 = vmul.f32 1.442695, %v6059_v58  ;;  %v6066_v16 = vadd.f32 %v5938_v14, %v3082_v26 }
 0x9b8   :  { %9896 = vpow2.f32 %v6302_v39  ;;  %v5939_v42 = vmax.f32 %v5682_v24, %v5811_v52  ;;  %v6316_v25 = vmul.f32 1.442695, %v6064_v17 }
 0x9b9   :  { %v16049_v4 = vpop.eup %9884  ;;  %9898 = vpow2.f32 %v6300_v53  ;;  %v6065_v59 = vadd.f32 %v5937_v51, %v3081_v61  ;;  %v6320_v45 = vmul.f32 1.442695, %v6066_v16  ;;  %v10082_v16 = vld [vmem:[%s16887_s15 + $0x278] sm:$0xff] }
 0x9ba   :  { %v16051_v50 = vpop.eup %9886  ;;  %9900 = vpow2.f32 %v6306_v40  ;;  %6866 = vmatprep.mubr.f32.mxu0 %v16049_v4  ;;  %v6067_v14 = vadd.f32 %v5939_v42, %v3083_v49  ;;  %v10083_v49 = vld [vmem:[%s16887_s15 + $0x2f0] sm:$0xff] }
 0x9bb   :  { %9902 = vpow2.f32 %v6304_v34  ;;  %v6318_v47 = vmul.f32 1.442695, %v6065_v59  ;;  %7011 = vmatprep.mubr.f32.mxu1 %v16051_v50  ;;  %6867 = vmatmul.mubr.f32.gmra.mxu0 %v16038_v41 }
 0x9bc   :  { %v16054_v21 = vpop.eup %9888  ;;  %7012 = vmatmul.mubr.f32.gmra.mxu1 %v16044_v23  ;;  %v6322_v24 = vmul.f32 1.442695, %v6067_v14 }
 0x9bd   :  { %v16059_v53 = vpop.eup %9890  ;;  %9904 = vpow2.f32 %v6318_v47  ;;  %v10089_v47 = vld [vmem:[%s16887_s15 + $0x3e8] sm:$0xff] }
 0x9be   :  { %v16061_v26 = vpop.eup %9892  ;;  %9906 = vpow2.f32 %v6316_v25 }
 0x9bf   :  { %9908 = vpow2.f32 %v6322_v24  ;;  %6871 = vmatprep.mubr.f32.mxu0 %v16061_v26  ;;  %v17839_v24 = vld [vmem:[#allocation51_spill] sm:$0xff] }
 0x9c0   :  { %v16064_v57 = vpop.eup %9894  ;;  %9910 = vpow2.f32 %v6320_v45  ;;  %6872 = vmatmul.mubr.f32.gmra.mxu0 %v16054_v21 }
 0x9c1   :  { %7016 = vmatprep.mubr.f32.mxu1 %v16064_v57 }
 0x9c2   :  { %7017 = vmatmul.mubr.f32.gmra.mxu1 %v16059_v53 }
 0x9c5   :  { %v16069_v39 = vpop.eup %9896 }
 0x9c6   :  { %v16071_v58 = vpop.eup %9898  ;;  %6876 = vmatprep.mubr.f32.mxu0 %v16069_v39 }
 0x9c7   :  { %v16074_v17 = vpop.eup %9900  ;;  %6877 = vmatmul.mubr.f32.gmra.mxu0 %v16071_v58 }
 0x9c8   :  { %v16077_v61 = vpop.eup %9902  ;;  %7021 = vmatprep.mubr.f32.mxu1 %v16074_v17 }
 0x9c9   :  { %7022 = vmatmul.mubr.f32.gmra.mxu1 %v16077_v61 }
 0x9ca   :  { %v16081_v34 = vpop.eup %9904 }
 0x9cb   :  { %v16083_v51 = vpop.eup %9906  ;;  %6881 = vmatprep.mubr.f32.mxu0 %v16081_v34 }
 0x9cc   :  { %v16086_v52 = vpop.eup %9908  ;;  %6882 = vmatmul.mubr.f32.gmra.mxu0 %v16083_v51 }
 0x9cd   :  { %v16089_v40 = vpop.eup %9910  ;;  %7026 = vmatprep.mubr.f32.mxu1 %v16086_v52  ;;  %7096 = vmatprep.mubr.f32.mxu0 %v14717_v15  ;;  %v8683_v15 = vpop.f32.mrf.mxu0 }
 0x9ce   :  { %7027 = vmatmul.mubr.f32.gmra.mxu1 %v16089_v40 }
 0x9cf   :  { %7241 = vmatprep.mubr.f32.mxu1 %v14727_v54  ;;  %v8763_v54 = vpop.f32.mrf.mxu1 }
 0x9d0   :  { %7097 = vmatmul.mubr.f32.vlgmr.msra.gmra.mxu0 %v14701_v20  ;;  %v10084_v20 = vld [vmem:[%s16887_s15 + $0x378] sm:$0xff] }
 0x9d1   :  { %7101 = vmatprep.mubr.f32.mxu0 %v14770_v28  ;;  %9132 = vmatpush3.msra.mxu0 %v10082_v16  ;;  %v8684_v28 = vpop.f32.mrf.mxu0  ;;  %v8764_v42 = vpop.f32.mrf.mxu1 }
 0x9d2   :  { %7242 = vmatmul.mubr.f32.vlgmr.msra.gmra.mxu1 %v14714_v31  ;;  %9133 = vmatprep.subr.mxu0 %v10083_v49  ;;  %v10085_v31 = vld [vmem:[%s16887_s15 + $0x3f0] sm:$0xff]  ;;  %v8685_v59 = vadd.f32 %v8684_v28, %v8683_v15  ;;  %v8765_v25 = vadd.f32 %v8764_v42, %v8763_v54  ;;  %v17840_v15 = vld [vmem:[#allocation39_spill] sm:$0xff]  ;;  %v10095_v28 = vld [vmem:[%s16887_s15 + $0x2d8] sm:$0xff] }
 0x9d3   :  { %7246 = vmatprep.mubr.f32.mxu1 %v14774_v3  ;;  %9212 = vmatpush3.msra.mxu1 %v10084_v20  ;;  %v10086_v3 = vld [vmem:[%s16887_s15 + $0x270] sm:$0xff]  ;;  %v8686_v14 = vpop.f32.mrf.mxu0  ;;  %v8766_v45 = vpop.f32.mrf.mxu1 }
 0x9d4   :  { %7102 = vmatmul.mubr.f32.gmra.mxu0 %v14754_v10  ;;  %9213 = vmatprep.subr.mxu1 %v10085_v31  ;;  %v10087_v10 = vld [vmem:[%s16887_s15 + $0x2e8] sm:$0xff]  ;;  %v17841_v31 = vld [vmem:[#allocation42_spill] sm:$0xff] }
 0x9d5   :  { %7106 = vmatprep.mubr.f32.mxu0 %v14818_v38  ;;  %9134 = vmatpush3.msra.mxu0 %v10086_v3  ;;  %v10088_v38 = vld [vmem:[%s16887_s15 + $0x370] sm:$0xff]  ;;  %v8687_v16 = vpop.f32.mrf.mxu0  ;;  %v8767_v49 = vpop.f32.mrf.mxu1  ;;  %v17842_v3 = vld [vmem:[#allocation50_spill] sm:$0xff] }
 0x9d6   :  { %7247 = vmatmul.mubr.f32.gmra.mxu1 %v14759_v33  ;;  %9135 = vmatprep.subr.mxu0 %v10087_v10  ;;  %v16128_v33 = vadd.f32 %v8765_v25, %v8685_v59  ;;  %v8688_v20 = vadd.f32 %v8687_v16, %v8686_v14  ;;  %v8768_v54 = vadd.f32 %v8767_v49, %v8766_v45  ;;  %v10096_v59 = vld [vmem:[%s16887_s15 + $0x360] sm:$0xff]  ;;  %v17843_v10 = vld [vmem:[#allocation48_spill] sm:$0xff]  ;;  %v10097_v25 = vld [vmem:[%s16887_s15 + $0x3d8] sm:$0xff] }
 0x9d7   :  { %7251 = vmatprep.mubr.f32.mxu1 %v14830_v18  ;;  %9214 = vmatpush3.msra.mxu1 %v10088_v38  ;;  %v10090_v18 = vld [vmem:[%s16887_s15 + $0x268] sm:$0xff]  ;;  %v8689_v38 = vpop.f32.mrf.mxu0  ;;  %v10099_v45 = vld [vmem:[%s16887_s15 + $0x2d0] sm:$0xff]  ;;  %v10100_v16 = vld [vmem:[%s16887_s15 + $0x358] sm:$0xff] }
 0x9d8   :  { %7107 = vmatmul.mubr.f32.gmra.mxu0 %v14790_v30  ;;  %9215 = vmatprep.subr.mxu1 %v10089_v47  ;;  %v10091_v30 = vld [vmem:[%s16887_s15 + $0x2e0] sm:$0xff]  ;;  %v16158_v42 = vadd.f32 %v8768_v54, %v8688_v20  ;;  %v8769_v47 = vpop.f32.mrf.mxu1  ;;  %v10101_v20 = vld [vmem:[%s16887_s15 + $0x3d0] sm:$0xff] }
 0x9d9   :  { %7111 = vmatprep.mubr.f32.mxu0 %v14875_v55  ;;  %9136 = vmatpush3.msra.mxu0 %v10090_v18  ;;  %v10092_v55 = vld [vmem:[%s16887_s15 + $0x368] sm:$0xff]  ;;  %v17844_v18 = vld [vmem:[#allocation41_spill] sm:$0xff] }
 0x9da   :  { %7252 = vmatmul.mubr.f32.gmra.mxu1 %v14795_v6  ;;  %9137 = vmatprep.subr.mxu0 %v10091_v30  ;;  %v10093_v6 = vld [vmem:[%s16887_s15 + $0x3e0] sm:$0xff]  ;;  %v10098_v30 = vld [vmem:[%s16887_s15 + $0x258] sm:$0xff] }
 0x9db   :  { %7256 = vmatprep.mubr.f32.mxu1 %v14879_v22  ;;  %9216 = vmatpush3.msra.mxu1 %v10092_v55  ;;  %v10094_v22 = vld [vmem:[%s16887_s15 + $0x260] sm:$0xff]  ;;  %v8690_v55 = vpop.f32.mrf.mxu0  ;;  %v17848_v54 = vld [vmem:[#allocation29_spill] sm:$0xff] }
 0x9dc   :  { %7112 = vmatmul.mubr.f32.gmra.mxu0 %v17839_v24  ;;  %9217 = vmatprep.subr.mxu1 %v10093_v6  ;;  %v17845_v14 = vld [vmem:[#allocation47_spill] sm:$0xff]  ;;  %v8770_v24 = vpop.f32.mrf.mxu1  ;;  %v8691_v49 = vadd.f32 %v8690_v55, %v8689_v38 }
 0x9dd   :  { %7116 = vmatprep.mubr.f32.mxu0 %v17840_v15  ;;  %9138 = vmatpush3.msra.mxu0 %v10094_v22  ;;  %v17846_v6 = vld [vmem:[#allocation31_spill] sm:$0xff]  ;;  %v8771_v15 = vadd.f32 %v8770_v24, %v8769_v47  ;;  %v17847_v22 = vld [vmem:[#allocation49_spill] sm:$0xff] }
 0x9de   :  { %7257 = vmatmul.mubr.f32.gmra.mxu1 %v17841_v31  ;;  %9139 = vmatprep.subr.mxu0 %v10095_v28  ;;  %v10102_v31 = vld [vmem:[%s16887_s15 + $0x250] sm:$0xff]  ;;  %v17850_v38 = vld [vmem:[#allocation139_spill] sm:$0xff] }
 0x9df   :  { %7261 = vmatprep.mubr.f32.mxu1 %v17842_v3  ;;  %9218 = vmatpush3.msra.mxu1 %v10096_v59  ;;  %v16184_v28 = vadd.f32 %v8771_v15, %v8691_v49  ;;  %v17849_v3 = vld [vmem:[#allocation33_spill] sm:$0xff]  ;;  %v10103_v59 = vld [vmem:[%s16887_s15 + $0x2c8] sm:$0xff]  ;;  %v10107_v49 = vld [vmem:[%s16887_s15 + $0x2c0] sm:$0xff] }
 0x9e0   :  { %7117 = vmatmul.mubr.f32.gmra.mxu0 %v17843_v10  ;;  %9219 = vmatprep.subr.mxu1 %v10097_v25  ;;  %v8692_v10 = vpop.f32.mrf.mxu0  ;;  %v8772_v25 = vpop.f32.mrf.mxu1  ;;  %v10104_v47 = vld [vmem:[%s16887_s15 + $0x350] sm:$0xff]  ;;  %v10106_v55 = vld [vmem:[%s16887_s15 + $0x248] sm:$0xff] }
 0x9e1   :  { %7121 = vmatprep.mubr.f32.mxu0 %v17844_v18  ;;  %9140 = vmatpush3.msra.mxu0 %v10098_v30  ;;  %v17851_v18 = vld [vmem:[#allocation151_spill] sm:$0xff]  ;;  %v17853_v15 = vld [vmem:[#allocation145_spill] sm:$0xff] }
 0x9e2   :  { %7262 = vmatmul.mubr.f32.gmra.mxu1 %v17845_v14  ;;  %9141 = vmatprep.subr.mxu0 %v10099_v45  ;;  %v10105_v30 = vld [vmem:[%s16887_s15 + $0x3c8] sm:$0xff]  ;;  %v8693_v14 = vpop.f32.mrf.mxu0  ;;  %v8773_v45 = vpop.f32.mrf.mxu1 }
 0x9e3   :  { %7266 = vmatprep.mubr.f32.mxu1 %v17846_v6  ;;  %9220 = vmatpush3.msra.mxu1 %v10100_v16  ;;  %v8694_v24 = vadd.f32 %v8693_v14, %v8692_v10  ;;  %v8774_v6 = vadd.f32 %v8773_v45, %v8772_v25  ;;  %v17852_v16 = vld [vmem:[#allocation34_spill] sm:$0xff]  ;;  %v17855_v10 = vld [vmem:[#allocation32_spill] sm:$0xff] }
 0x9e4   :  { %7122 = vmatmul.mubr.f32.gmra.mxu0 %v17847_v22  ;;  %9221 = vmatprep.subr.mxu1 %v10101_v20  ;;  %v17854_v20 = vld [vmem:[#allocation140_spill] sm:$0xff]  ;;  %v10111_v25 = vld [vmem:[%s16887_s15 + $0x2b8] sm:$0xff] }
 0x9e5   :  { %7126 = vmatprep.mubr.f32.mxu0 %v17848_v54  ;;  %9142 = vmatpush3.msra.mxu0 %v10102_v31  ;;  %v16210_v22 = vadd.f32 %v8774_v6, %v8694_v24  ;;  %v10109_v54 = vld [vmem:[%s16887_s15 + $0x3c0] sm:$0xff]  ;;  %v8695_v31 = vpop.f32.mrf.mxu0  ;;  %v10115_v24 = vld [vmem:[%s16887_s15 + $0x2b0] sm:$0xff] }
 0x9e6   :  { %7267 = vmatmul.mubr.f32.gmra.mxu1 %v17849_v3  ;;  %9143 = vmatprep.subr.mxu0 %v10103_v59  ;;  %v10110_v3 = vld [vmem:[%s16887_s15 + $0x240] sm:$0xff]  ;;  %v8775_v59 = vpop.f32.mrf.mxu1 }
 0x9e7   :  { %7271 = vmatprep.mubr.f32.mxu1 %v17850_v38  ;;  %9222 = vmatpush3.msra.mxu1 %v10104_v47  ;;  %v8696_v38 = vpop.f32.mrf.mxu0  ;;  %v17856_v45 = vld [vmem:[#allocation30_spill] sm:$0xff]  ;;  %v17858_v6 = vld [vmem:[#allocation3_spill] sm:$0xff] }
 0x9e8   :  { %7127 = vmatmul.mubr.f32.gmra.mxu0 %v17851_v18  ;;  %9223 = vmatprep.subr.mxu1 %v10105_v30  ;;  %v8697_v47 = vadd.f32 %v8696_v38, %v8695_v31  ;;  %v8776_v18 = vpop.f32.mrf.mxu1  ;;  %v10113_v30 = vld [vmem:[%s16887_s15 + $0x3b8] sm:$0xff] }
 0x9e9   :  { %7131 = vmatprep.mubr.f32.mxu0 %v15074_v8  ;;  %9144 = vmatpush3.msra.mxu0 %v10106_v55  ;;  %v10108_v8 = vld [vmem:[%s16887_s15 + $0x348] sm:$0xff]  ;;  %v8777_v14 = vadd.f32 %v8776_v18, %v8775_v59  ;;  %v17857_v55 = vld [vmem:[#allocation146_spill] sm:$0xff] }
 0x9ea   :  { %7272 = vmatmul.mubr.f32.gmra.mxu1 %v17852_v16  ;;  %9145 = vmatprep.subr.mxu0 %v10107_v49  ;;  %v10116_v16 = vld [vmem:[%s16887_s15 + $0x338] sm:$0xff]  ;;  %v8698_v49 = vpop.f32.mrf.mxu0  ;;  %v17860_v59 = vld [vmem:[#allocation147_spill] sm:$0xff] }
 0x9eb   :  { %7276 = vmatprep.mubr.f32.mxu1 %v17853_v15  ;;  %9224 = vmatpush3.msra.mxu1 %v10108_v8  ;;  %v8778_v15 = vpop.f32.mrf.mxu1  ;;  %v17859_v8 = vld [vmem:[#allocation27_spill] sm:$0xff] }
 0x9ec   :  { %7132 = vmatmul.mubr.f32.gmra.mxu0 %v17854_v20  ;;  %9225 = vmatprep.subr.mxu1 %v10109_v54  ;;  %v10117_v20 = vld [vmem:[%s16887_s15 + $0x3b0] sm:$0xff]  ;;  %v8699_v31 = vpop.f32.mrf.mxu0 }
 0x9ed   :  { %7136 = vmatprep.mubr.f32.mxu0 %v15125_v2  ;;  %9146 = vmatpush3.msra.mxu0 %v10110_v3  ;;  %v10112_v2 = vld [vmem:[%s16887_s15 + $0x340] sm:$0xff]  ;;  %v10118_v54 = vld [vmem:[%s16887_s15 + $0x230] sm:$0xff]  ;;  %v8779_v3 = vpop.f32.mrf.mxu1 }
 0x9ee   :  { %7277 = vmatmul.mubr.f32.gmra.mxu1 %v17855_v10  ;;  %9147 = vmatprep.subr.mxu0 %v10111_v25  ;;  %v10119_v10 = vld [vmem:[%s16887_s15 + $0x2a8] sm:$0xff]  ;;  %v8700_v25 = vadd.f32 %v8699_v31, %v8698_v49  ;;  %v8780_v38 = vadd.f32 %v8779_v3, %v8778_v15  ;;  %v17865_v49 = vld [vmem:[#allocation150_spill] sm:$0xff] }
 0x9ef   :  { %7281 = vmatprep.mubr.f32.mxu1 %v15131_v60  ;;  %9226 = vmatpush3.msra.mxu1 %v10112_v2  ;;  %v10114_v60 = vld [vmem:[%s16887_s15 + $0x238] sm:$0xff]  ;;  %v17861_v2 = vld [vmem:[#allocation148_spill] sm:$0xff]  ;;  %v10125_v15 = vld [vmem:[%s16887_s15 + $0x3a0] sm:$0xff] }
 0x9f0   :  { %7137 = vmatmul.mubr.f32.gmra.mxu0 %v15098_v27  ;;  %9227 = vmatprep.subr.mxu1 %v10113_v30  ;;  %v16240_v27 = vadd.f32 %v8777_v14, %v8697_v47  ;;  %v10121_v47 = vld [vmem:[%s16887_s15 + $0x3a8] sm:$0xff]  ;;  %v16266_v18 = vadd.f32 %v8780_v38, %v8700_v25  ;;  %v8701_v14 = vpop.f32.mrf.mxu0  ;;  %v10126_v31 = vld [vmem:[%s16887_s15 + $0x220] sm:$0xff] }
 0x9f1   :  { %7141 = vmatprep.mubr.f32.mxu0 %v17856_v45  ;;  %9148 = vmatpush3.msra.mxu0 %v10114_v60  ;;  %v17862_v30 = vld [vmem:[#allocation28_spill] sm:$0xff]  ;;  %v17863_v45 = vld [vmem:[#allocation149_spill] sm:$0xff]  ;;  %v10123_v60 = vld [vmem:[%s16887_s15 + $0x2a0] sm:$0xff] }
 0x9f2   :  { %7282 = vmatmul.mubr.f32.gmra.mxu1 %v17857_v55  ;;  %9149 = vmatprep.subr.mxu0 %v10115_v24  ;;  %v8781_v55 = vpop.f32.mrf.mxu1  ;;  %v17864_v24 = vld [vmem:[#allocation130_spill] sm:$0xff]  ;;  %v17868_v25 = vld [vmem:[#allocation136_spill] sm:$0xff] }
 0x9f3   :  { %7286 = vmatprep.mubr.f32.mxu1 %v17858_v6  ;;  %9228 = vmatpush3.msra.mxu1 %v10116_v16  ;;  %v10124_v6 = vld [vmem:[%s16887_s15 + $0x328] sm:$0xff]  ;;  %v8702_v16 = vpop.f32.mrf.mxu0  ;;  %v10128_v38 = vld [vmem:[%s16887_s15 + $0x320] sm:$0xff] }
 0x9f4   :  { %7142 = vmatmul.mubr.f32.gmra.mxu0 %v17859_v8  ;;  %9229 = vmatprep.subr.mxu1 %v10117_v20  ;;  %v8703_v8 = vadd.f32 %v8702_v16, %v8701_v14  ;;  %v8782_v20 = vpop.f32.mrf.mxu1  ;;  %v10130_v14 = vld [vmem:[%s16887_s15 + $0x218] sm:$0xff] }
 0x9f5   :  { %7146 = vmatprep.mubr.f32.mxu0 %v15212_v13  ;;  %9150 = vmatpush3.msra.mxu0 %v10118_v54  ;;  %v10120_v13 = vld [vmem:[%s16887_s15 + $0x330] sm:$0xff]  ;;  %v17866_v54 = vld [vmem:[#allocation135_spill] sm:$0xff]  ;;  %v8783_v3 = vadd.f32 %v8782_v20, %v8781_v55 }
 0x9f6   :  { %7287 = vmatmul.mubr.f32.gmra.mxu1 %v17860_v59  ;;  %9151 = vmatprep.subr.mxu0 %v10119_v10  ;;  %v17867_v59 = vld [vmem:[#allocation129_spill] sm:$0xff] }
 0x9f7   :  { %7291 = vmatprep.mubr.f32.mxu1 %v15220_v46  ;;  %9230 = vmatpush3.msra.mxu1 %v10120_v13  ;;  %v10122_v46 = vld [vmem:[%s16887_s15 + $0x228] sm:$0xff]  ;;  %v10127_v10 = vld [vmem:[%s16887_s15 + $0x298] sm:$0xff]  ;;  %v16296_v13 = vadd.f32 %v8783_v3, %v8703_v8 }
 0x9f8   :  { %7147 = vmatmul.mubr.f32.gmra.mxu0 %v17861_v2  ;;  %9231 = vmatprep.subr.mxu1 %v10121_v47  ;;  %v17869_v2 = vld [vmem:[#allocation66_spill] sm:$0xff]  ;;  %v10135_v3 = vld [vmem:[%s16887_s15 + $0x288] sm:$0xff] }
 0x9f9   :  { %7151 = vmatprep.mubr.f32.mxu0 %v17862_v30  ;;  %9152 = vmatpush3.msra.mxu0 %v10122_v46  ;;  %v10129_v47 = vld [vmem:[%s16887_s15 + $0x398] sm:$0xff]  ;;  %v8704_v30 = vpop.f32.mrf.mxu0  ;;  %v8784_v46 = vpop.f32.mrf.mxu1 }
 0x9fa   :  { %7292 = vmatmul.mubr.f32.gmra.mxu1 %v17863_v45  ;;  %9153 = vmatprep.subr.mxu0 %v10123_v60  ;;  %v17870_v45 = vld [vmem:[#allocation67_spill] sm:$0xff]  ;;  %v10131_v60 = vld [vmem:[%s16887_s15 + $0x290] sm:$0xff] }
 0x9fb   :  { %7296 = vmatprep.mubr.f32.mxu1 %v17864_v24  ;;  %9232 = vmatpush3.msra.mxu1 %v10124_v6  ;;  %v8705_v55 = vpop.f32.mrf.mxu0  ;;  %v8785_v24 = vpop.f32.mrf.mxu1 }
 0x9fc   :  { %7152 = vmatmul.mubr.f32.gmra.mxu0 %v17865_v49  ;;  %9233 = vmatprep.subr.mxu1 %v10125_v15  ;;  %v8706_v6 = vadd.f32 %v8705_v55, %v8704_v30  ;;  %v8786_v16 = vadd.f32 %v8785_v24, %v8784_v46  ;;  %v17871_v49 = vld [vmem:[#allocation137_spill] sm:$0xff]  ;;  %v10138_v46 = vld [vmem:[%s16887_s15 + $0x208] sm:$0xff] }
 0x9fd   :  { %7156 = vmatprep.mubr.f32.mxu0 %v17866_v54  ;;  %9154 = vmatpush3.msra.mxu0 %v10126_v31  ;;  %v10133_v15 = vld [vmem:[%s16887_s15 + $0x390] sm:$0xff]  ;;  %v8707_v20 = vpop.f32.mrf.mxu0  ;;  %v8787_v54 = vpop.f32.mrf.mxu1  ;;  %v17872_v31 = vld [vmem:[#allocation138_spill] sm:$0xff] }
 0x9fe   :  { %7297 = vmatmul.mubr.f32.gmra.mxu1 %v17867_v59  ;;  %9155 = vmatprep.subr.mxu0 %v10127_v10  ;;  %v16322_v8 = vadd.f32 %v8786_v16, %v8706_v6  ;;  %v17873_v59 = vld [vmem:[#allocation64_spill] sm:$0xff]  ;;  %v17876_v6 = vld [vmem:[#allocation119_spill] sm:$0xff] }
 0x9ff   :  { %7301 = vmatprep.mubr.f32.mxu1 %v17868_v25  ;;  %9234 = vmatpush3.msra.mxu1 %v10128_v38  ;;  %v8708_v10 = vpop.f32.mrf.mxu0  ;;  %v8788_v25 = vpop.f32.mrf.mxu1  ;;  %v17874_v38 = vld [vmem:[#allocation141_spill] sm:$0xff]  ;;  %v10141_v16 = vld [vmem:[%s16887_s15 + $0x380] sm:$0xff] }
 0xa00   :  { %7157 = vmatmul.mubr.f32.gmra.mxu0 %v17869_v2  ;;  %9235 = vmatprep.subr.mxu1 %v10129_v47  ;;  %v10137_v2 = vld [vmem:[%s16887_s15 + $0x388] sm:$0xff]  ;;  %v8709_v47 = vadd.f32 %v8708_v10, %v8707_v20  ;;  %v8789_v30 = vadd.f32 %v8788_v25, %v8787_v54  ;;  %v17880_v10 = vld [vmem:[#allocation65_spill] sm:$0xff] }
 0xa01   :  { %7161 = vmatprep.mubr.f32.mxu0 %v15327_v63  ;;  %9156 = vmatpush3.msra.mxu0 %v10130_v14  ;;  %v10132_v63 = vld [vmem:[%s16887_s15 + $0x318] sm:$0xff]  ;;  %v8710_v14 = vpop.f32.mrf.mxu0  ;;  %v8790_v24 = vpop.f32.mrf.mxu1  ;;  %v17878_v54 = vld [vmem:[#allocation120_spill] sm:$0xff] }
 0xa02   :  { %7302 = vmatmul.mubr.f32.gmra.mxu1 %v17870_v45  ;;  %9157 = vmatprep.subr.mxu0 %v10131_v60  ;;  %v17875_v45 = vld [vmem:[#allocation142_spill] sm:$0xff]  ;;  %v16344_v55 = vadd.f32 %v8789_v30, %v8709_v47 }
 0xa03   :  { %7306 = vmatprep.mubr.f32.mxu1 %v15329_v1  ;;  %9236 = vmatpush3.msra.mxu1 %v10132_v63  ;;  %v10134_v1 = vld [vmem:[%s16887_s15 + $0x210] sm:$0xff]  ;;  %v10139_v60 = vld [vmem:[%s16887_s15 + $0x280] sm:$0xff]  ;;  %v8711_v63 = vpop.f32.mrf.mxu0 }
 0xa04   :  { %7162 = vmatmul.mubr.f32.gmra.mxu0 %v17871_v49  ;;  %9237 = vmatprep.subr.mxu1 %v10133_v15  ;;  %v8712_v49 = vadd.f32 %v8711_v63, %v8710_v14  ;;  %v8791_v15 = vpop.f32.mrf.mxu1  ;;  %v17884_v63 = vld [vmem:[#allocation132_spill] sm:$0xff] }
 0xa05   :  { %7166 = vmatprep.mubr.f32.mxu0 %v15358_v32  ;;  %9158 = vmatpush3.msra.mxu0 %v10134_v1  ;;  %v10136_v32 = vld [vmem:[%s16887_s15 + $0x310] sm:$0xff]  ;;  %v8792_v20 = vadd.f32 %v8791_v15, %v8790_v24 }
 0xa06   :  { %7307 = vmatmul.mubr.f32.gmra.mxu1 %v17872_v31  ;;  %9159 = vmatprep.subr.mxu0 %v10135_v3  ;;  %v17877_v1 = vld [vmem:[#allocation125_spill] sm:$0xff]  ;;  %v17879_v31 = vld [vmem:[#allocation126_spill] sm:$0xff]  ;;  %v8793_v25 = vpop.f32.mrf.mxu1 }
 0xa07   :  { %7311 = vmatprep.mubr.f32.mxu1 %v17873_v59  ;;  %9238 = vmatpush3.msra.mxu1 %v10136_v32  ;;  %v10143_v3 = vld [vmem:[%s16887_s15 + $0x300] sm:$0xff]  ;;  %v16363_v59 = vadd.f32 %v8792_v20, %v8712_v49  ;;  %v8713_v32 = vpop.f32.mrf.mxu0 }
 0xa08   :  { %7167 = vmatmul.mubr.f32.gmra.mxu0 %v17874_v38  ;;  %9239 = vmatprep.subr.mxu1 %v10137_v2  ;;  %v17881_v2 = vld [vmem:[#allocation62_spill] sm:$0xff]  ;;  %v8794_v30 = vpop.f32.mrf.mxu1 }
 0xa09   :  { %7171 = vmatprep.mubr.f32.mxu0 %v15402_v11  ;;  %9160 = vmatpush3.msra.mxu0 %v10138_v46  ;;  %v10140_v11 = vld [vmem:[%s16887_s15 + $0x308] sm:$0xff]  ;;  %v8714_v38 = vpop.f32.mrf.mxu0  ;;  %v8795_v46 = vadd.f32 %v8794_v30, %v8793_v25  ;;  %v17893_v30 = vld [vmem:[#allocation109_spill] sm:$0xff] }
 0xa0a   :  { %7312 = vmatmul.mubr.f32.gmra.mxu1 %v17875_v45  ;;  %9161 = vmatprep.subr.mxu0 %v10139_v60  ;;  %v8715_v47 = vadd.f32 %v8714_v38, %v8713_v32  ;;  %v17882_v45 = vld [vmem:[#allocation131_spill] sm:$0xff]  ;;  %v17891_v38 = vld [vmem:[#allocation58_spill] sm:$0xff] }
 0xa0b   :  { %7316 = vmatprep.mubr.f32.mxu1 %v15410_v29  ;;  %9240 = vmatpush3.msra.mxu1 %v10140_v11  ;;  %v10142_v29 = vld [vmem:[%s16887_s15 + $0x200] sm:$0xff]  ;;  %v8716_v14 = vpop.f32.mrf.mxu0  ;;  %v8796_v11 = vpop.f32.mrf.mxu1 }
 0xa0c   :  { %7172 = vmatmul.mubr.f32.gmra.mxu0 %v17876_v6  ;;  %9241 = vmatprep.subr.mxu1 %v10141_v16  ;;  %v17883_v60 = vld [vmem:[#allocation127_spill] sm:$0xff]  ;;  %v16372_v24 = vadd.f32 %v8795_v46, %v8715_v47  ;;  %v17885_v16 = vld [vmem:[#allocation128_spill] sm:$0xff] }
 0xa0d   :  { %7386 = vmatprep.mubr.f32.mxu0 %v17877_v1  ;;  %9162 = vmatpush3.msra.mxu0 %v10142_v29  ;;  %v8797_v49 = vpop.f32.mrf.mxu1  ;;  %v17887_v29 = vld [vmem:[#allocation60_spill] sm:$0xff]  ;;  %v17890_v25 = vld [vmem:[#allocation115_spill] sm:$0xff] }
 0xa0e   :  { %7317 = vmatmul.mubr.f32.gmra.mxu1 %v17878_v54  ;;  %v17888_v54 = vld [vmem:[#allocation110_spill] sm:$0xff] }
 0xa0f   :  { %7531 = vmatprep.mubr.f32.mxu1 %v17879_v31  ;;  %9242 = vmatpush3.msra.mxu1 %v10143_v3  ;;  %v17889_v3 = vld [vmem:[#allocation61_spill] sm:$0xff] }
 0xa10   :  { %7387 = vmatmul.mubr.f32.vlgmr.msra.gmra.mxu0 %v17880_v10  ;;  %v8799_v20 = vpop.f32.mrf.mxu1 }
 0xa11   :  { %7391 = vmatprep.mubr.f32.mxu0 %v15488_v12  ;;  %v8717_v12 = vpop.f32.mrf.mxu0 }
 0xa12   :  { %7532 = vmatmul.mubr.f32.vlgmr.msra.gmra.mxu1 %v17881_v2  ;;  %v8718_v6 = vadd.f32 %v8717_v12, %v8716_v14  ;;  %v8800_v10 = vpop.f32.mrf.mxu1  ;;  %v17892_v2 = vld [vmem:[#allocation117_spill] sm:$0xff]  ;;  %v17894_v14 = vld [vmem:[#allocation118_spill] sm:$0xff] }
 0xa13   :  { %7536 = vmatprep.mubr.f32.mxu1 %v15504_v0  ;;  %v8798_v0 = vadd.f32 %v8797_v49, %v8796_v11  ;;  %v8719_v1 = vpop.f32.mrf.mxu0 }
 0xa14   :  { %7392 = vmatmul.mubr.f32.gmra.mxu0 %v15454_v56  ;;  %v17886_v56 = vld [vmem:[#allocation63_spill] sm:$0xff] }
 0xa15   :  { %7396 = vmatprep.mubr.f32.mxu0 %v17882_v45  ;;  %v16379_v15 = vadd.f32 %v8798_v0, %v8718_v6  ;;  %v8720_v31 = vpop.f32.mrf.mxu0  ;;  %v17896_v6 = vld [vmem:[#allocation116_spill] sm:$0xff] }
 0xa16   :  { %7537 = vmatmul.mubr.f32.gmra.mxu1 %v17883_v60  ;;  %v8721_v32 = vadd.f32 %v8720_v31, %v8719_v1  ;;  %v8802_v46 = vpop.f32.mrf.mxu1  ;;  %v17895_v60 = vld [vmem:[#allocation59_spill] sm:$0xff]  ;;  %v17897_v0 = vld [vmem:[#allocation56_spill] sm:$0xff] }
 0xa17   :  { %7541 = vmatprep.mubr.f32.mxu1 %v17884_v63  ;;  %v8722_v47 = vpop.f32.mrf.mxu0 }
 0xa18   :  { %7397 = vmatmul.mubr.f32.gmra.mxu0 %v17885_v16  ;;  %v8803_v12 = vpop.f32.mrf.mxu1 }
 0xa19   :  { %7401 = vmatprep.mubr.f32.mxu0 %v15604_v48  ;;  %v8801_v48 = vadd.f32 %v8800_v10, %v8799_v20  ;;  %v8723_v45 = vpop.f32.mrf.mxu0  ;;  %v8804_v63 = vadd.f32 %v8803_v12, %v8802_v46  ;;  %v17902_v10 = vld [vmem:[#allocation106_spill] sm:$0xff] }
 0xa1a   :  { %7542 = vmatmul.mubr.f32.gmra.mxu1 %v17886_v56  ;;  %v8724_v11 = vadd.f32 %v8723_v45, %v8722_v47 }
 0xa1b   :  { %7546 = vmatprep.mubr.f32.mxu1 %v15619_v43  ;;  %v16387_v43 = vadd.f32 %v8801_v48, %v8721_v32  ;;  %v8725_v16 = vpop.f32.mrf.mxu0  ;;  %v17901_v32 = vld [vmem:[#allocation121_spill] sm:$0xff]  ;;  %v17903_v48 = vld [vmem:[#allocation122_spill] sm:$0xff] }
 0xa1c   :  { %7402 = vmatmul.mubr.f32.gmra.mxu0 %v17887_v29  ;;  %v16395_v49 = vadd.f32 %v8804_v63, %v8724_v11  ;;  %v17898_v29 = vld [vmem:[#allocation101_spill] sm:$0xff] }
 0xa1d   :  { %7406 = vmatprep.mubr.f32.mxu0 %v17888_v54  ;;  %v8805_v56 = vpop.f32.mrf.mxu1  ;;  %v8726_v1 = vpop.f32.mrf.mxu0  ;;  %v17899_v54 = vld [vmem:[#allocation57_spill] sm:$0xff] }
 0xa1e   :  { %7547 = vmatmul.mubr.f32.gmra.mxu1 %v17889_v3  ;;  %v8727_v20 = vadd.f32 %v8726_v1, %v8725_v16  ;;  %v17900_v3 = vld [vmem:[#allocation102_spill] sm:$0xff] }
 0xa1f   :  { %7551 = vmatprep.mubr.f32.mxu1 %v17890_v25  ;;  %v8806_v31 = vpop.f32.mrf.mxu1 }
 0xa20   :  { %7407 = vmatmul.mubr.f32.gmra.mxu0 %v17891_v38  ;;  %v17904_v38 = vld [vmem:[#allocation55_spill] sm:$0xff] }
 0xa21   :  { %7411 = vmatprep.mubr.f32.mxu0 %v17892_v2  ;;  %v8728_v25 = vpop.f32.mrf.mxu0 }
 0xa22   :  { %7552 = vmatmul.mubr.f32.gmra.mxu1 %v17893_v30  ;;  %v17905_v30 = vld [vmem:[#allocation54_spill] sm:$0xff] }
 0xa23   :  { %7556 = vmatprep.mubr.f32.mxu1 %v17894_v14  ;;  %v8729_v47 = vpop.f32.mrf.mxu0  ;;  %v17906_v14 = vld [vmem:[#allocation107_spill] sm:$0xff] }
 0xa24   :  { %7412 = vmatmul.mubr.f32.gmra.mxu0 %v17895_v60  ;;  %v8808_v2 = vpop.f32.mrf.mxu1  ;;  %v8730_v46 = vadd.f32 %v8729_v47, %v8728_v25  ;;  %v17907_v60 = vld [vmem:[#allocation105_spill] sm:$0xff] }
 0xa25   :  { %7416 = vmatprep.mubr.f32.mxu0 %v15786_v37  ;;  %v8807_v37 = vadd.f32 %v8806_v31, %v8805_v56  ;;  %v17908_v56 = vld [vmem:[#allocation52_spill] sm:$0xff] }
 0xa26   :  { %7557 = vmatmul.mubr.f32.gmra.mxu1 %v17896_v6  ;;  %v8809_v45 = vpop.f32.mrf.mxu1  ;;  %v17910_v31 = vld [vmem:[#allocation108_spill] sm:$0xff] }
 0xa27   :  { %7561 = vmatprep.mubr.f32.mxu1 %v15804_v62  ;;  %v16403_v62 = vadd.f32 %v8807_v37, %v8727_v20  ;;  %v8810_v11 = vadd.f32 %v8809_v45, %v8808_v2 }
 0xa28   :  { %7417 = vmatmul.mubr.f32.gmra.mxu0 %v17897_v0  ;;  %v8843_v12 = vpop.f32.mrf.mxu0 }
 0xa29   :  { %7421 = vmatprep.mubr.f32.mxu0 %v17898_v29  ;;  %v16412_v63 = vadd.f32 %v8810_v11, %v8730_v46  ;;  %v8923_v6 = vpop.f32.mrf.mxu1  ;;  %v17909_v29 = vld [vmem:[#allocation112_spill] sm:$0xff] }
 0xa2a   :  { %7562 = vmatmul.mubr.f32.gmra.mxu1 %v17899_v54  ;;  %v8844_v16 = vpop.f32.mrf.mxu0 }
 0xa2b   :  { %7566 = vmatprep.mubr.f32.mxu1 %v17900_v3  ;;  %v8845_v0 = vadd.f32 %v8844_v16, %v8843_v12  ;;  %v8924_v1 = vpop.f32.mrf.mxu1  ;;  %v17911_v3 = vld [vmem:[#allocation111_spill] sm:$0xff] }
 0xa2c   :  { %7422 = vmatmul.mubr.f32.gmra.mxu0 %v17901_v32  ;;  %v8925_v54 = vadd.f32 %v8924_v1, %v8923_v6 }
 0xa2d   :  { %7426 = vmatprep.mubr.f32.mxu0 %v17902_v10  ;;  %v6809_v20 = vadd.f32 %v8845_v0, %v16128_v33 }
 0xa2e   :  { %7567 = vmatmul.mubr.f32.gmra.mxu1 %v17903_v48 }
 0xa2f   :  { %7571 = vmatprep.mubr.f32.mxu1 %v17904_v38 }
 0xa30   :  { %7427 = vmatmul.mubr.f32.gmra.mxu0 %v17905_v30 }
 0xa31   :  { %7431 = vmatprep.mubr.f32.mxu0 %v17906_v14  ;;  %v8926_v37 = vpop.f32.mrf.mxu1 }
 0xa32   :  { %7572 = vmatmul.mubr.f32.gmra.mxu1 %v17907_v60 }
 0xa33   :  { %7576 = vmatprep.mubr.f32.mxu1 %v15973_v9  ;;  %v8846_v9 = vpop.f32.mrf.mxu0  ;;  %v8927_v10 = vpop.f32.mrf.mxu1 }
 0xa34   :  { %7432 = vmatmul.mubr.f32.gmra.mxu0 %v15930_v5  ;;  %v16420_v5 = vadd.f32 %v8925_v54, %v6809_v20  ;;  %v8928_v33 = vadd.f32 %v8927_v10, %v8926_v37 }
 0xa35   :  { %7436 = vmatprep.mubr.f32.mxu0 %v15992_v19  ;;  %v8847_v19 = vpop.f32.mrf.mxu0 }
 0xa36   :  { %7577 = vmatmul.mubr.f32.gmra.mxu1 %v17908_v56  ;;  %v8848_v32 = vadd.f32 %v8847_v19, %v8846_v9 }
 0xa37   :  { %7581 = vmatprep.mubr.f32.mxu1 %v17909_v29 }
 0xa38   :  { %7437 = vmatmul.mubr.f32.gmra.mxu0 %v17910_v31  ;;  %v8849_v25 = vpop.f32.mrf.mxu0 }
 0xa39   :  { %7441 = vmatprep.mubr.f32.mxu0 %v16020_v44  ;;  %v6814_v44 = vadd.f32 %v8848_v32, %v16158_v42 }
 0xa3a   :  { %7582 = vmatmul.mubr.f32.gmra.mxu1 %v17911_v3 }
 0xa3b   :  { %7586 = vmatprep.mubr.f32.mxu1 %v16029_v7  ;;  %v16430_v48 = vadd.f32 %v8928_v33, %v6814_v44  ;;  %v8929_v7 = vpop.f32.mrf.mxu1 }
 0xa3c   :  { %7442 = vmatmul.mubr.f32.gmra.mxu0 %v16005_v36  ;;  %v8850_v36 = vpop.f32.mrf.mxu0 }
 0xa3d   :  { %7446 = vmatprep.mubr.f32.mxu0 %v16049_v4  ;;  %v8851_v38 = vadd.f32 %v8850_v36, %v8849_v25  ;;  %v8930_v4 = vpop.f32.mrf.mxu1 }
 0xa3e   :  { %7587 = vmatmul.mubr.f32.gmra.mxu1 %v16015_v35  ;;  %v8931_v35 = vadd.f32 %v8930_v4, %v8929_v7  ;;  %v8852_v42 = vpop.f32.mrf.mxu0 }
 0xa3f   :  { %7591 = vmatprep.mubr.f32.mxu1 %v16051_v50  ;;  %v6819_v50 = vadd.f32 %v8851_v38, %v16184_v28 }
 0xa40   :  { %7447 = vmatmul.mubr.f32.gmra.mxu0 %v16038_v41  ;;  %v8853_v2 = vpop.f32.mrf.mxu0 }
 0xa41   :  { %7451 = vmatprep.mubr.f32.mxu0 %v16061_v26  ;;  %v16439_v41 = vadd.f32 %v8931_v35, %v6819_v50  ;;  %v8932_v26 = vpop.f32.mrf.mxu1 }
 0xa42   :  { %7592 = vmatmul.mubr.f32.gmra.mxu1 %v16044_v23  ;;  %v8854_v23 = vadd.f32 %v8853_v2, %v8852_v42 }
 0xa43   :  { %7596 = vmatprep.mubr.f32.mxu1 %v16064_v57  ;;  %v8933_v57 = vpop.f32.mrf.mxu1 }
 0xa44   :  { %7452 = vmatmul.mubr.f32.gmra.mxu0 %v16054_v21  ;;  %v6824_v21 = vadd.f32 %v8854_v23, %v16210_v22  ;;  %v8934_v28 = vadd.f32 %v8933_v57, %v8932_v26 }
 0xa45   :  { %7456 = vmatprep.mubr.f32.mxu0 %v16069_v39  ;;  %v8855_v39 = vpop.f32.mrf.mxu0 }
 0xa46   :  { %7597 = vmatmul.mubr.f32.gmra.mxu1 %v16059_v53  ;;  %v16447_v53 = vadd.f32 %v8934_v28, %v6824_v21 }
 0xa47   :  { %7601 = vmatprep.mubr.f32.mxu1 %v16074_v17  ;;  %v8856_v17 = vpop.f32.mrf.mxu0 }
 0xa48   :  { %7457 = vmatmul.mubr.f32.gmra.mxu0 %v16071_v58  ;;  %v8935_v47 = vpop.f32.mrf.mxu1  ;;  %v8857_v58 = vadd.f32 %v8856_v17, %v8855_v39  ;;  %v7753_v17 = vld [vmem:[%s16889_s17 + $0x38] sm:$0xff] }
 0xa49   :  { %7461 = vmatprep.mubr.f32.mxu0 %v16081_v34  ;;  %9419 = vmatprep.subr.mxu0 %v7753_v17 }
 0xa4a   :  { %7602 = vmatmul.mubr.f32.gmra.mxu1 %v16077_v61  ;;  %v8936_v30 = vpop.f32.mrf.mxu1  ;;  %v6829_v34 = vadd.f32 %v8857_v58, %v16240_v27  ;;  %9420 = vmatpush3.msra.mxu0 %v7753_v17 }
 0xa4b   :  { %7606 = vmatprep.mubr.f32.mxu1 %v16086_v52  ;;  %v8937_v46 = vadd.f32 %v8936_v30, %v8935_v47 }
 0xa4c   :  { %7462 = vmatmul.mubr.f32.gmra.mxu0 %v16083_v51  ;;  %v8858_v22 = vpop.f32.mrf.mxu0 }
 0xa4d   :  { %v16452_v14 = vadd.f32 %v8937_v46, %v6829_v34  ;;  %v8938_v61 = vpop.f32.mrf.mxu1 }
 0xa4e   :  { %7607 = vmatmul.mubr.f32.gmra.mxu1 %v16089_v40  ;;  %v8859_v45 = vpop.f32.mrf.mxu0 }
 0xa4f   :  { %v8860_v52 = vadd.f32 %v8859_v45, %v8858_v22  ;;  %v8939_v60 = vpop.f32.mrf.mxu1 }
 0xa50   :  { %v8940_v12 = vadd.f32 %v8939_v60, %v8938_v61 }
 0xa51   :  { %v6834_v11 = vadd.f32 %v8860_v52, %v16266_v18  ;;  %v7750_v52 = vld [vmem:[%s16889_s17 + $0x20] sm:$0xff] }
 0xa53   :  { %v16455_v51 = vadd.f32 %v8940_v12, %v6834_v11  ;;  %v7749_v12 = vld [vmem:[%s16889_s17 + $0x18] sm:$0xff] }
 0xa54   :  { %v8861_v6 = vpop.f32.mrf.mxu0  ;;  %v8941_v16 = vpop.f32.mrf.mxu1 }
 0xa55   :  { %17912 = vst [vmem:[#allocation53_spill] sm:$0xff] %v16455_v51 }
 0xa56   :  { %v8862_v40 = vpop.f32.mrf.mxu0  ;;  %v8942_v56 = vpop.f32.mrf.mxu1 }
 0xa57   :  { %v8863_v0 = vadd.f32 %v8862_v40, %v8861_v6  ;;  %v8943_v1 = vadd.f32 %v8942_v56, %v8941_v16 }
 0xa59   :  { %v6839_v27 = vadd.f32 %v8863_v0, %v16296_v13  ;;  %v7748_v0 = vld [vmem:[%s16889_s17 + $0x10] sm:$0xff] }
 0xa5b   :  { %v8864_v29 = vpop.f32.mrf.mxu0  ;;  %v16458_v20 = vadd.f32 %v8943_v1, %v6839_v27  ;;  %v7747_v27 = vld [vmem:[%s16889_s17 + $0x8] sm:$0xff] }
 0xa5c   :  { %v8944_v54 = vpop.f32.mrf.mxu1 }
 0xa5d   :  { %17913 = vst [vmem:[#allocation13_spill] sm:$0xff] %v16458_v20  ;;  %v8865_v31 = vpop.f32.mrf.mxu0 }
 0xa5e   :  { %v8866_v9 = vadd.f32 %v8865_v31, %v8864_v29  ;;  %v8945_v3 = vpop.f32.mrf.mxu1  ;;  %v7746_v31 = vld [vmem:[%s16889_s17] sm:$0xff] }
 0xa5f   :  { %v8946_v37 = vadd.f32 %v8945_v3, %v8944_v54  ;;  %v8867_v19 = vpop.f32.mrf.mxu0 }
 0xa60   :  { %v6844_v18 = vadd.f32 %v8866_v9, %v16322_v8 }
 0xa61   :  { %v8947_v10 = vpop.f32.mrf.mxu1  ;;  %v8868_v33 = vpop.f32.mrf.mxu0 }
 0xa62   :  { %v16461_v32 = vadd.f32 %v8946_v37, %v6844_v18  ;;  %v8869_v44 = vadd.f32 %v8868_v33, %v8867_v19 }
 0xa63   :  { %v8948_v25 = vpop.f32.mrf.mxu1 }
 0xa64   :  { %17914 = vst [vmem:[#allocation15_spill] sm:$0xff] %v16461_v32  ;;  %v6849_v7 = vadd.f32 %v8869_v44, %v16344_v55  ;;  %v8949_v13 = vadd.f32 %v8948_v25, %v8947_v10 }
 0xa66   :  { %v16464_v36 = vadd.f32 %v8949_v13, %v6849_v7  ;;  %v8870_v38 = vpop.f32.mrf.mxu0 }
 0xa68   :  { %17915 = vst [vmem:[#allocation22_spill] sm:$0xff] %v16464_v36  ;;  %v8950_v4 = vpop.f32.mrf.mxu1  ;;  %v8871_v35 = vpop.f32.mrf.mxu0 }
 0xa69   :  { %v8872_v50 = vadd.f32 %v8871_v35, %v8870_v38 }
 0xa6a   :  { %v8951_v42 = vpop.f32.mrf.mxu1 }
 0xa6b   :  { %v6854_v26 = vadd.f32 %v8872_v50, %v16363_v59  ;;  %v8952_v8 = vadd.f32 %v8951_v42, %v8950_v4  ;;  %v7752_v59 = vld [vmem:[%s16889_s17 + $0x30] sm:$0xff] }
 0xa6c   :  { %9421 = vmatprep.subr.mxu0 %v7752_v59 }
 0xa6d   :  { %v8873_v2 = vpop.f32.mrf.mxu0  ;;  %v16467_v23 = vadd.f32 %v8952_v8, %v6854_v26  ;;  %9422 = vmatpush3.msra.mxu0 %v7752_v59 }
 0xa6e   :  { %v8953_v57 = vpop.f32.mrf.mxu1 }
 0xa6f   :  { %17916 = vst [vmem:[#allocation21_spill] sm:$0xff] %v16467_v23  ;;  %v8874_v21 = vpop.f32.mrf.mxu0 }
 0xa70   :  { %v8875_v28 = vadd.f32 %v8874_v21, %v8873_v2  ;;  %v8954_v39 = vpop.f32.mrf.mxu1 }
 0xa71   :  { %v8955_v47 = vadd.f32 %v8954_v39, %v8953_v57 }
 0xa72   :  { %v6859_v55 = vadd.f32 %v8875_v28, %v16372_v24  ;;  %v7751_v24 = vld [vmem:[%s16889_s17 + $0x28] sm:$0xff] }
 0xa73   :  { %9423 = vmatprep.subr.mxu0 %v7751_v24 }
 0xa74   :  { %v16473_v58 = vadd.f32 %v8955_v47, %v6859_v55  ;;  %v8876_v30 = vpop.f32.mrf.mxu0  ;;  %9424 = vmatpush3.msra.mxu0 %v7751_v24 }
 0xa75   :  { %v8956_v34 = vpop.f32.mrf.mxu1  ;;  %9425 = vmatprep.subr.mxu0 %v7750_v52 }
 0xa76   :  { %17917 = vst [vmem:[#allocation12_spill] sm:$0xff] %v16473_v58  ;;  %v8877_v46 = vpop.f32.mrf.mxu0  ;;  %9426 = vmatpush3.msra.mxu0 %v7750_v52 }
 0xa77   :  { %v8878_v22 = vadd.f32 %v8877_v46, %v8876_v30  ;;  %v8957_v61 = vpop.f32.mrf.mxu1  ;;  %9427 = vmatprep.subr.mxu0 %v7749_v12 }
 0xa78   :  { %v8958_v45 = vadd.f32 %v8957_v61, %v8956_v34  ;;  %9428 = vmatpush3.msra.mxu0 %v7749_v12 }
 0xa79   :  { %v6864_v60 = vadd.f32 %v8878_v22, %v16379_v15  ;;  %9429 = vmatprep.subr.mxu0 %v7748_v0 }
 0xa7a   :  { %9430 = vmatpush3.msra.mxu0 %v7748_v0 }
 0xa7b   :  { %v8879_v11 = vpop.f32.mrf.mxu0  ;;  %v16488_v6 = vadd.f32 %v8958_v45, %v6864_v60  ;;  %9431 = vmatprep.subr.mxu0 %v7747_v27 }
 0xa7c   :  { %v8959_v16 = vpop.f32.mrf.mxu1  ;;  %9432 = vmatpush3.msra.mxu0 %v7747_v27 }
 0xa7d   :  { %17918 = vst [vmem:[#allocation10_spill] sm:$0xff] %v16488_v6  ;;  %v8880_v40 = vpop.f32.mrf.mxu0  ;;  %9433 = vmatprep.subr.mxu0 %v7746_v31 }
 0xa7e   :  { %v8881_v56 = vadd.f32 %v8880_v40, %v8879_v11  ;;  %v8960_v1 = vpop.f32.mrf.mxu1  ;;  %9434 = vmatpush3.msra.mxu0 %v7746_v31 }
 0xa7f   :  { %v8961_v15 = vadd.f32 %v8960_v1, %v8959_v16 }
 0xa80   :  { %v6869_v29 = vadd.f32 %v8881_v56, %v16387_v43  ;;  %v8882_v54 = vpop.f32.mrf.mxu0 }
 0xa82   :  { %v16500_v9 = vadd.f32 %v8961_v15, %v6869_v29  ;;  %v8962_v3 = vpop.f32.mrf.mxu1  ;;  %v8883_v37 = vpop.f32.mrf.mxu0 }
 0xa83   :  { %v8884_v18 = vadd.f32 %v8883_v37, %v8882_v54 }
 0xa84   :  { %17919 = vst [vmem:[#allocation11_spill] sm:$0xff] %v16500_v9  ;;  %v8963_v19 = vpop.f32.mrf.mxu1 }
 0xa85   :  { %v6874_v10 = vadd.f32 %v8884_v18, %v16395_v49  ;;  %v8964_v33 = vadd.f32 %v8963_v19, %v8962_v3 }
 0xa87   :  { %v16503_v44 = vadd.f32 %v8964_v33, %v6874_v10  ;;  %v8885_v43 = vpop.f32.mrf.mxu0 }
 0xa89   :  { %17920 = vst [vmem:[#allocation9_spill] sm:$0xff] %v16503_v44  ;;  %v8965_v25 = vpop.f32.mrf.mxu1  ;;  %v8886_v7 = vpop.f32.mrf.mxu0 }
 0xa8a   :  { %v8887_v13 = vadd.f32 %v8886_v7, %v8885_v43 }
 0xa8b   :  { %v8966_v38 = vpop.f32.mrf.mxu1 }
 0xa8c   :  { %v6879_v4 = vadd.f32 %v8887_v13, %v16403_v62  ;;  %v8967_v35 = vadd.f32 %v8966_v38, %v8965_v25  ;;  %v8888_v50 = vpop.f32.mrf.mxu0 }
 0xa8e   :  { %v16506_v42 = vadd.f32 %v8967_v35, %v6879_v4  ;;  %v8968_v26 = vpop.f32.mrf.mxu1  ;;  %v8889_v8 = vpop.f32.mrf.mxu0 }
 0xa8f   :  { %v8890_v2 = vadd.f32 %v8889_v8, %v8888_v50  ;;  %v24_v8 = vstv %s16890_s18 }
 0xa90   :  { %17921 = vst [vmem:[#allocation24_spill] sm:$0xff] %v16506_v42  ;;  %v8969_v57 = vpop.f32.mrf.mxu1  ;;  %v16508_v21 = vpop.f32.mrf.mxu0  ;;  %25 = vst [vmem:[#allocation2] sm:$0x1] %v24_v8 }
 0xa91   :  { %v6884_v49 = vadd.f32 %v8890_v2, %v16412_v63  ;;  %v8970_v28 = vadd.f32 %v8969_v57, %v8968_v26 }
 0xa92   :  { %v16511_v39 = vpop.f32.mrf.mxu1  ;;  %v16513_v55 = vpop.f32.mrf.mxu0 }
 0xa93   :  { %v16515_v47 = vadd.f32 %v8970_v28, %v6884_v49 }
 0xa94   :  { %v16517_v62 = vpop.f32.mrf.mxu1  ;;  %v16519_v17 = vpop.f32.mrf.mxu0 }
 0xa95   :  { %17922 = vst [vmem:[#allocation23_spill] sm:$0xff] %v16515_v47 }
 0xa96   :  { %v16521_v30 = vpop.f32.mrf.mxu1  ;;  %v16523_v59 = vpop.f32.mrf.mxu0 }
 0xa98   :  { %v16525_v34 = vpop.f32.mrf.mxu1  ;;  %v16527_v46 = vpop.f32.mrf.mxu0 }
 0xa9a   :  { %v16529_v63 = vpop.f32.mrf.mxu1  ;;  %v16531_v24 = vpop.f32.mrf.mxu0 }
 0xa9c   :  { %v16533_v22 = vpop.f32.mrf.mxu1  ;;  %v16535_v61 = vpop.f32.mrf.mxu0 }
 0xa9e   :  { %v16537_v45 = vpop.f32.mrf.mxu1  ;;  %v16539_v52 = vpop.f32.mrf.mxu0 }
 0xaa0   :  { %v16541_v60 = vpop.f32.mrf.mxu1  ;;  %v16543_v11 = vpop.f32.mrf.mxu0 }
 0xaa2   :  { %v16545_v12 = vpop.f32.mrf.mxu1  ;;  %v16547_v16 = vpop.f32.mrf.mxu0 }
 0xaa4   :  { %v16549_v40 = vpop.f32.mrf.mxu1  ;;  %v16551_v0 = vpop.f32.mrf.mxu0 }
 0xaa6   :  { %v16553_v56 = vpop.f32.mrf.mxu1  ;;  %v16555_v1 = vpop.f32.mrf.mxu0 }
 0xaa8   :  { %v16557_v15 = vpop.f32.mrf.mxu1  ;;  %v16559_v27 = vpop.f32.mrf.mxu0 }
 0xaaa   :  { %v16561_v29 = vpop.f32.mrf.mxu1  ;;  %v16563_v54 = vpop.f32.mrf.mxu0 }
 0xaac   :  { %v16565_v31 = vpop.f32.mrf.mxu1  ;;  %v16567_v3 = vpop.f32.mrf.mxu0 }
 0xaae   :  { %v16569_v37 = vpop.f32.mrf.mxu1  ;;  %v16571_v18 = vpop.f32.mrf.mxu0 }
 0xab0   :  { %v16573_v19 = vpop.f32.mrf.mxu1  ;;  %v16575_v10 = vpop.f32.mrf.mxu0 }
 0xab2   :  { %v16577_v33 = vpop.f32.mrf.mxu1  ;;  %v16579_v43 = vpop.f32.mrf.mxu0 }
 0xab4   :  { %v16581_v25 = vpop.f32.mrf.mxu1  ;;  %v16583_v7 = vpop.f32.mrf.mxu0 }
 0xab6   :  { %v16585_v13 = vpop.f32.mrf.mxu1  ;;  %v16587_v38 = vpop.f32.mrf.mxu0 }
 0xab8   :  { %v16589_v4 = vpop.f32.mrf.mxu1  ;;  %v16591_v35 = vpop.f32.mrf.mxu0 }
 0xaba   :  { %v16593_v50 = vpop.f32.mrf.mxu1  ;;  %v16595_v26 = vpop.f32.mrf.mxu0 }
 0xabc   :  { %v16600_v2 = vpop.f32.mrf.mxu1  ;;  %v16602_v57 = vpop.f32.mrf.mxu0 }
 0xabe   :  { %v16604_v49 = vpop.f32.mrf.mxu1  ;;  %v16606_v28 = vpop.f32.mrf.mxu0 }
 0xabf   :  { %17923 = vst [vmem:[#allocation8_spill] sm:$0xff] %v16604_v49  ;;  %17924 = vst [vmem:[#allocation6_spill] sm:$0xff] %v16606_v28 }
 0xac0   :  { %v16608_v47 = vpop.f32.mrf.mxu1  ;;  %v16610_v42 = vpop.f32.mrf.mxu0 }
 0xac1   :  { %17925 = vst [vmem:[#allocation7_spill] sm:$0xff] %v16608_v47  ;;  %17926 = vst [vmem:[#allocation4_spill] sm:$0xff] %v16610_v42 }
 0xac2   :  { %v16612_v44 = vpop.f32.mrf.mxu1  ;;  %v16614_v9 = vpop.f32.mrf.mxu0 }
 0xac3   :  { %17927 = vst [vmem:[#allocation26_spill] sm:$0xff] %v16612_v44  ;;  %17928 = vst [vmem:[#allocation25_spill] sm:$0xff] %v16614_v9 }
 0xac4   :  { %v16616_v6 = vpop.f32.mrf.mxu1  ;;  %v16618_v58 = vpop.f32.mrf.mxu0 }
 0xac5   :  { %17929 = vst [vmem:[#allocation5_spill] sm:$0xff] %v16616_v6  ;;  %17930 = vst [vmem:[#allocation14_spill] sm:$0xff] %v16618_v58 }
 0xac6   :  { %v16620_v23 = vpop.f32.mrf.mxu1  ;;  %v16622_v36 = vpop.f32.mrf.mxu0 }
 0xac7   :  { %17931 = vst [vmem:[#allocation16_spill] sm:$0xff] %v16620_v23  ;;  %17932 = vst [vmem:[#allocation19_spill] sm:$0xff] %v16622_v36  ;;  %v9005_v23 = vadd.f32 %v16513_v55, %v16508_v21  ;;  %v9091_v55 = vadd.f32 %v16533_v22, %v16529_v63 }
 0xac8   :  { %v16624_v8 = vpop.f32.mrf.mxu1  ;;  %v16626_v32 = vpop.f32.mrf.mxu0 }
 0xac9   :  { %17933 = vst [vmem:[#allocation20_spill] sm:$0xff] %v16624_v8  ;;  %17934 = vst [vmem:[#allocation17_spill] sm:$0xff] %v16626_v32  ;;  %v9085_v8 = vadd.f32 %v16517_v62, %v16511_v39  ;;  %v9011_v39 = vadd.f32 %v16531_v24, %v16527_v46  ;;  %v9097_v24 = vadd.f32 %v16549_v40, %v16545_v12 }
 0xaca   :  { %v16628_v20 = vpop.f32.mrf.mxu1  ;;  %v16630_v51 = vpop.f32.mrf.mxu0 }
 0xacb   :  { %17935 = vst [vmem:[#allocation36_spill] sm:$0xff] %v16628_v20  ;;  %17936 = vst [vmem:[#allocation18_spill] sm:$0xff] %v16630_v51  ;;  %v7244_v51 = vadd.f32 %v9085_v8, %v9005_v23 }
 0xacc   :  { %v16632_v42 = vpop.f32.mrf.mxu1  ;;  %v16634_v44 = vpop.f32.mrf.mxu0 }
 0xacd   :  { %17937 = vst [vmem:[#allocation38_spill] sm:$0xff] %v16632_v42  ;;  %17938 = vst [vmem:[#allocation35_spill] sm:$0xff] %v16634_v44  ;;  %v9008_v42 = vadd.f32 %v16523_v59, %v16519_v17 }
 0xace   :  { %v16636_v9 = vpop.f32.mrf.mxu1  ;;  %v16638_v6 = vpop.f32.mrf.mxu0 }
 0xacf   :  { %17939 = vst [vmem:[#allocation44_spill] sm:$0xff] %v16636_v9  ;;  %17940 = vst [vmem:[#allocation37_spill] sm:$0xff] %v16638_v6  ;;  %v9088_v9 = vadd.f32 %v16525_v34, %v16521_v30 }
 0xad0   :  { %v16644_v36 = vpop.f32.mrf.mxu1  ;;  %v9163_v32 = vpop.f32.mrf.mxu0 }
 0xad1   :  { %17941 = vst [vmem:[#allocation43_spill] sm:$0xff] %v16644_v36  ;;  %v7249_v23 = vadd.f32 %v9088_v9, %v9008_v42 }
 0xad2   :  { %v9243_v20 = vpop.f32.mrf.mxu1  ;;  %v9164_v58 = vpop.f32.mrf.mxu0 }
 0xad3   :  { %v9165_v44 = vadd.f32 %v9164_v58, %v9163_v32  ;;  %v7254_v58 = vadd.f32 %v9091_v55, %v9011_v39 }
 0xad4   :  { %v9244_v6 = vpop.f32.mrf.mxu1  ;;  %v9166_v47 = vpop.f32.mrf.mxu0 }
 0xad5   :  { %v7389_v49 = vadd.f32 %v9165_v44, %v7244_v51  ;;  %v9245_v21 = vadd.f32 %v9244_v6, %v9243_v20  ;;  %v9014_v20 = vadd.f32 %v16539_v52, %v16535_v61  ;;  %v9094_v6 = vadd.f32 %v16541_v60, %v16537_v45 }
 0xad6   :  { %v9246_v62 = vpop.f32.mrf.mxu1  ;;  %v9167_v36 = vpop.f32.mrf.mxu0 }
 0xad7   :  { %v7534_v8 = vadd.f32 %v9245_v21, %v7389_v49  ;;  %v9168_v28 = vadd.f32 %v9167_v36, %v9166_v47  ;;  %v9017_v47 = vadd.f32 %v16547_v16, %v16543_v11  ;;  %v9100_v11 = vadd.f32 %v16557_v15, %v16553_v56 }
 0xad8   :  { %v9247_v17 = vpop.f32.mrf.mxu1  ;;  %v9169_v59 = vpop.f32.mrf.mxu0 }
 0xad9   :  { %9912 = vrcp.f32 %v7534_v8  ;;  %v7394_v30 = vadd.f32 %v9168_v28, %v7249_v23  ;;  %v9248_v32 = vadd.f32 %v9247_v17, %v9246_v62  ;;  %v7259_v28 = vadd.f32 %v9094_v6, %v9014_v20 }
 0xada   :  { %v9249_v34 = vpop.f32.mrf.mxu1  ;;  %v9170_v51 = vpop.f32.mrf.mxu0  ;;  %v7264_v55 = vadd.f32 %v9097_v24, %v9017_v47  ;;  %v9020_v8 = vadd.f32 %v16555_v1, %v16551_v0  ;;  %v16673_v0 = vld [vmem:[%s16891_s16] ss:$0 sm:$0xff]  ;;  %v9106_v47 = vadd.f32 %v16573_v19, %v16569_v37  ;;  %v9109_v37 = vadd.f32 %v16581_v25, %v16577_v33 }
 0xadb   :  { %v7539_v44 = vadd.f32 %v9248_v32, %v7394_v30  ;;  %v9171_v46 = vadd.f32 %v9170_v51, %v9169_v59  ;;  %v9032_v33 = vadd.f32 %v16587_v38, %v16583_v7 }
 0xadc   :  { %v9250_v63 = vpop.f32.mrf.mxu1  ;;  %v9172_v9 = vpop.f32.mrf.mxu0  ;;  %v7269_v56 = vadd.f32 %v9100_v11, %v9020_v8 }
 0xadd   :  { %9914 = vrcp.f32 %v7539_v44  ;;  %v7399_v36 = vadd.f32 %v9171_v46, %v7254_v58  ;;  %v9251_v42 = vadd.f32 %v9250_v63, %v9249_v34  ;;  %v9023_v58 = vadd.f32 %v16563_v54, %v16559_v27 }
 0xade   :  { %v9252_v22 = vpop.f32.mrf.mxu1  ;;  %v9173_v49 = vpop.f32.mrf.mxu0  ;;  %v9103_v34 = vadd.f32 %v16565_v31, %v16561_v29 }
 0xadf   :  { %v7544_v61 = vadd.f32 %v9251_v42, %v7399_v36  ;;  %v9174_v52 = vadd.f32 %v9173_v49, %v9172_v9  ;;  %v9026_v9 = vadd.f32 %v16571_v18, %v16567_v3  ;;  %v9029_v18 = vadd.f32 %v16579_v43, %v16575_v10 }
 0xae0   :  { %v9253_v21 = vpop.f32.mrf.mxu1  ;;  %v9175_v45 = vpop.f32.mrf.mxu0  ;;  %v7274_v31 = vadd.f32 %v9103_v34, %v9023_v58  ;;  %v9035_v58 = vadd.f32 %v16595_v26, %v16591_v35  ;;  %v9115_v34 = vadd.f32 %v16600_v2, %v16593_v50 }
 0xae1   :  { %9916 = vrcp.f32 %v7544_v61  ;;  %v7404_v60 = vadd.f32 %v9174_v52, %v7259_v28  ;;  %v9254_v39 = vadd.f32 %v9253_v21, %v9252_v22  ;;  %v7284_v10 = vadd.f32 %v9109_v37, %v9029_v18  ;;  %v17948_v37 = vld [vmem:[#allocation26_spill] sm:$0xff] }
 0xae2   :  { %v9255_v62 = vpop.f32.mrf.mxu1  ;;  %v9176_v23 = vpop.f32.mrf.mxu0 }
 0xae3   :  { %v7549_v12 = vadd.f32 %v9254_v39, %v7404_v60  ;;  %v9177_v16 = vadd.f32 %v9176_v23, %v9175_v45  ;;  %v7279_v60 = vadd.f32 %v9106_v47, %v9026_v9 }
 0xae4   :  { %v9256_v40 = vpop.f32.mrf.mxu1  ;;  %v9178_v17 = vpop.f32.mrf.mxu0 }
 0xae5   :  { %9918 = vrcp.f32 %v7549_v12  ;;  %v7409_v59 = vadd.f32 %v9177_v16, %v7264_v55  ;;  %v9257_v30 = vadd.f32 %v9256_v40, %v9255_v62 }
 0xae6   :  { %v9913_v32 = vpop.eup %9912  ;;  %v9258_v51 = vpop.f32.mrf.mxu1 }
 0xae7   :  { %v9179_v20 = vpop.f32.mrf.mxu0  ;;  %v7554_v1 = vadd.f32 %v9257_v30, %v7409_v59  ;;  %v7628_v6 = vmul.f32 %v9913_v32, %v16420_v5  ;;  %v9112_v59 = vadd.f32 %v16589_v4, %v16585_v13 }
 0xae8   :  { %v9180_v15 = vadd.f32 %v9179_v20, %v9178_v17  ;;  %v9259_v44 = vpop.f32.mrf.mxu1 }
 0xae9   :  { %v9181_v46 = vpop.f32.mrf.mxu0  ;;  %9920 = vrcp.f32 %v7554_v1  ;;  %v9260_v27 = vadd.f32 %v9259_v44, %v9258_v51  ;;  %v16677_v54 = vadd.f32 %v16673_v0, %v7628_v6 }
 0xaea   :  { %v7414_v63 = vadd.f32 %v9180_v15, %v7269_v56  ;;  %v9915_v29 = vpop.eup %9914  ;;  %v9261_v36 = vpop.f32.mrf.mxu1 }
 0xaeb   :  { %v9182_v42 = vpop.f32.mrf.mxu0  ;;  %v7629_v5 = vmul.f32 %v9915_v29, %v16430_v48  ;;  %v7682_v61 = vmul.f32 1.442695, %v16677_v54  ;;  %vm7666_vm4 = vcmp.gt.f32.partialorder %v16677_v54, 0.0 }
 0xaec   :  { %v7559_v24 = vadd.f32 %v9260_v27, %v7414_v63  ;;  %v9183_v22 = vadd.f32 %v9182_v42, %v9181_v46  ;;  %v9262_v49 = vpop.f32.mrf.mxu1  ;;  %v7294_v46 = vadd.f32 %v9115_v34, %v9035_v58  ;;  %v17944_v42 = vld [vmem:[#allocation7_spill] sm:$0xff] }
 0xaed   :  { %v9184_v28 = vpop.f32.mrf.mxu0  ;;  %v9263_v21 = vadd.f32 %v9262_v49, %v9261_v36  ;;  %v16686_v45 = vadd.f32 %v16673_v0, %v7629_v5  ;;  %v17943_v36 = vld [vmem:[#allocation8_spill] sm:$0xff] }
 0xaee   :  { %9922 = vrcp.f32 %v7559_v24  ;;  %v7419_v52 = vadd.f32 %v9183_v22, %v7274_v31  ;;  %v9917_v3 = vpop.eup %9916  ;;  %v9264_v48 = vpop.f32.mrf.mxu1  ;;  %v17942_v31 = vld [vmem:[#allocation6_spill] sm:$0xff]  ;;  %v9118_v47 = vadd.f32 %v17944_v42, %v17943_v36  ;;  %v17958_v36 = vld [vmem:[#allocation36_spill] sm:$0xff] }
 0xaef   :  { %v9185_v19 = vpop.f32.mrf.mxu0  ;;  %9924 = vpow2.f32 %v7682_v61  ;;  %v7684_v62 = vmul.f32 1.442695, %v16686_v45  ;;  %v7630_v11 = vmul.f32 %v9917_v3, %v16439_v41  ;;  %v9038_v9 = vadd.f32 %v17942_v31, %v16602_v57  ;;  %v17947_v3 = vld [vmem:[#allocation53_spill] sm:$0xff]  ;;  %v17957_v31 = vld [vmem:[#allocation15_spill] sm:$0xff]  ;;  %v17959_v42 = vld [vmem:[#allocation38_spill] sm:$0xff] }
 0xaf0   :  { %v7564_v39 = vadd.f32 %v9263_v21, %v7419_v52  ;;  %v9186_v55 = vadd.f32 %v9185_v19, %v9184_v28  ;;  %v9265_v23 = vpop.f32.mrf.mxu1  ;;  %v17945_v28 = vld [vmem:[#allocation4_spill] sm:$0xff]  ;;  %vm7667_vm5 = vcmp.gt.f32.partialorder %v16686_v45, 0.0 }
 0xaf1   :  { %v9187_v8 = vpop.f32.mrf.mxu0  ;;  %v9266_v16 = vadd.f32 %v9265_v23, %v9264_v48  ;;  %v16697_v17 = vadd.f32 %v16673_v0, %v7630_v11  ;;  %v17949_v48 = vld [vmem:[#allocation5_spill] sm:$0xff] }
 0xaf2   :  { %9926 = vrcp.f32 %v7564_v39  ;;  %v7424_v12 = vadd.f32 %v9186_v55, %v7279_v60  ;;  %v9919_v40 = vpop.eup %9918  ;;  %v9267_v43 = vpop.f32.mrf.mxu1  ;;  %v9121_v57 = vadd.f32 %v17949_v48, %v17948_v37 }
 0xaf3   :  { %v9188_v25 = vpop.f32.mrf.mxu0  ;;  %9928 = vpow2.f32 %v7684_v62  ;;  %v7631_v41 = vmul.f32 %v9919_v40, %v16447_v53  ;;  %v7686_v51 = vmul.f32 1.442695, %v16697_v17  ;;  %v7289_v53 = vadd.f32 %v9112_v59, %v9032_v33 }
 0xaf4   :  { %v7569_v30 = vadd.f32 %v9266_v16, %v7424_v12  ;;  %v9189_v32 = vadd.f32 %v9188_v25, %v9187_v8  ;;  %v9268_v7 = vpop.f32.mrf.mxu1  ;;  %v7299_v33 = vadd.f32 %v9118_v47, %v9038_v9  ;;  %v9127_v47 = vadd.f32 %v17959_v42, %v17958_v36  ;;  %v17966_v42 = vld [vmem:[#allocation12_spill] sm:$0xff] }
 0xaf5   :  { %v9190_v38 = vpop.f32.mrf.mxu0  ;;  %v9269_v56 = vadd.f32 %v9268_v7, %v9267_v43  ;;  %v16708_v1 = vadd.f32 %v16673_v0, %v7631_v41  ;;  %v17951_v41 = vld [vmem:[#allocation19_spill] sm:$0xff]  ;;  %vm7668_vm6 = vcmp.gt.f32.partialorder %v16697_v17, 0.0 }
 0xaf6   :  { %9930 = vrcp.f32 %v7569_v30  ;;  %v7429_v20 = vadd.f32 %v9189_v32, %v7284_v10  ;;  %v9921_v13 = vpop.eup %9920  ;;  %v9270_v4 = vpop.f32.mrf.mxu1  ;;  %v17950_v32 = vld [vmem:[#allocation14_spill] sm:$0xff] }
 0xaf7   :  { %v9191_v15 = vpop.f32.mrf.mxu0  ;;  %9932 = vpow2.f32 %v7686_v51  ;;  %v7688_v26 = vmul.f32 1.442695, %v16708_v1  ;;  %v7632_v44 = vmul.f32 %v9921_v13, %v16452_v14  ;;  %v17946_v14 = vld [vmem:[#allocation25_spill] sm:$0xff]  ;;  %v9044_v58 = vadd.f32 %v17951_v41, %v17950_v32 }
 0xaf8   :  { %v7574_v6 = vadd.f32 %v9269_v56, %v7429_v20  ;;  %v9192_v35 = vadd.f32 %v9191_v15, %v9190_v38  ;;  %v9271_v50 = vpop.f32.mrf.mxu1  ;;  %v9041_v61 = vadd.f32 %v17946_v14, %v17945_v28  ;;  %v17952_v51 = vld [vmem:[#allocation13_spill] sm:$0xff]  ;;  %v17954_v15 = vld [vmem:[#allocation20_spill] sm:$0xff]  ;;  %vm7669_vm7 = vcmp.gt.f32.partialorder %v16708_v1, 0.0 }
 0xaf9   :  { %v9193_v2 = vpop.f32.mrf.mxu0  ;;  %v9272_v27 = vadd.f32 %v9271_v50, %v9270_v4  ;;  %v16717_v22 = vadd.f32 %v16673_v0, %v7632_v44  ;;  %v17953_v4 = vld [vmem:[#allocation16_spill] sm:$0xff]  ;;  %v17955_v44 = vld [vmem:[#allocation17_spill] sm:$0xff] }
 0xafa   :  { %9934 = vrcp.f32 %v7574_v6  ;;  %v7434_v63 = vadd.f32 %v9192_v35, %v7289_v53  ;;  %v9273_v5 = vpop.f32.mrf.mxu1  ;;  %v7304_v30 = vadd.f32 %v9121_v57, %v9041_v61  ;;  %v9124_v53 = vadd.f32 %v17954_v15, %v17953_v4 }
 0xafb   :  { %v9923_v29 = vpop.eup %9922  ;;  %v9194_v24 = vpop.f32.mrf.mxu0  ;;  %9936 = vpow2.f32 %v7688_v26  ;;  %v7690_v55 = vmul.f32 1.442695, %v16717_v22  ;;  %vm7670_vm8 = vcmp.gt.f32.partialorder %v16717_v22, 0.0 }
 0xafc   :  { %v9925_v49 = vpop.eup %9924  ;;  %v7579_v52 = vadd.f32 %v9272_v27, %v7434_v63  ;;  %v9195_v21 = vadd.f32 %v9194_v24, %v9193_v2  ;;  %v7633_v18 = vmul.f32 %v9923_v29, %v17947_v3  ;;  %v9274_v19 = vpop.f32.mrf.mxu1  ;;  %v7309_v48 = vadd.f32 %v9124_v53, %v9044_v58  ;;  %v17963_v58 = vld [vmem:[#allocation44_spill] sm:$0xff] }
 0xafd   :  { %v9196_v60 = vpop.f32.mrf.mxu0  ;;  %v8234_v39 = vadd.f32 -1.0, %v9925_v49  ;;  %v9275_v23 = vadd.f32 %v9274_v19, %v9273_v5 }
 0xafe   :  { %9938 = vrcp.f32 %v7579_v52  ;;  %v7439_v62 = vadd.f32 %v9195_v21, %v7294_v46  ;;  %v16727_v8 = vadd.f32 %v16673_v0, %v7633_v18  ;;  %v9276_v12 = vpop.f32.mrf.mxu1  ;;  %v17956_v46 = vld [vmem:[#allocation18_spill] sm:$0xff] }
 0xaff   :  { %v9927_v11 = vpop.eup %9926  ;;  %v9197_v16 = vpop.f32.mrf.mxu0  ;;  %v7730_v40 = vsel %vm7666_vm4, %v16677_v54, %v8234_v39  ;;  %9940 = vpow2.f32 %v7690_v55  ;;  %v9047_v63 = vadd.f32 %v17956_v46, %v17955_v44 }
 0xb00   :  { %v9929_v10 = vpop.eup %9928  ;;  %v7584_v43 = vadd.f32 %v9275_v23, %v7439_v62  ;;  %v9198_v25 = vadd.f32 %v9197_v16, %v9196_v60  ;;  %9435 = vmatprep.mubr.msk.f32.mxu0 %vm3381_vm0, %v7730_v40  ;;  %v7692_v59 = vmul.f32 1.442695, %v16727_v8  ;;  %v9277_v34 = vpop.f32.mrf.mxu1  ;;  %v7634_v20 = vmul.f32 %v9927_v11, %v17952_v51  ;;  %v17960_v11 = vld [vmem:[#allocation22_spill] sm:$0xff] }
 0xb01   :  { %v9199_v7 = vpop.f32.mrf.mxu0  ;;  %v8235_v38 = vadd.f32 -1.0, %v9929_v10  ;;  %v9278_v56 = vadd.f32 %v9277_v34, %v9276_v12  ;;  %v7314_v39 = vadd.f32 %v9127_v47, %v9047_v63  ;;  %v17961_v10 = vld [vmem:[#allocation35_spill] sm:$0xff]  ;;  %vm7671_vm9 = vcmp.gt.f32.partialorder %v16727_v8, 0.0 }
 0xb02   :  { %9942 = vrcp.f32 %v7584_v43  ;;  %v7444_v54 = vadd.f32 %v9198_v25, %v7299_v33  ;;  %v9279_v6 = vpop.f32.mrf.mxu1  ;;  %v16740_v50 = vadd.f32 %v16673_v0, %v7634_v20  ;;  %v17962_v33 = vld [vmem:[#allocation37_spill] sm:$0xff]  ;;  %v17964_v34 = vld [vmem:[#allocation43_spill] sm:$0xff] }
 0xb03   :  { %v9931_v13 = vpop.eup %9930  ;;  %v9200_v35 = vpop.f32.mrf.mxu0  ;;  %v7731_v26 = vsel %vm7667_vm5, %v16686_v45, %v8235_v38  ;;  %9944 = vpow2.f32 %v7692_v59  ;;  %v9050_v43 = vadd.f32 %v17962_v33, %v17961_v10  ;;  %v17965_v20 = vld [vmem:[#allocation21_spill] sm:$0xff]  ;;  %vm7954_vm5 = vcmask 7168  }
 0xb04   :  { %v9933_v2 = vpop.eup %9932  ;;  %v7589_v27 = vadd.f32 %v9278_v56, %v7444_v54  ;;  %v9201_v29 = vadd.f32 %v9200_v35, %v9199_v7  ;;  %9436 = vmatmul.mubr.msk.f32.vlgmr.msra.gmra.mxu0 %vm3381_vm0, %v7731_v26  ;;  %v7635_v9 = vmul.f32 %v9931_v13, %v17957_v31  ;;  %v9280_v5 = vpop.f32.mrf.mxu1  ;;  %v7694_v49 = vmul.f32 1.442695, %v16740_v50 }
 0xb05   :  { %v9202_v24 = vpop.f32.mrf.mxu0  ;;  %v8236_v45 = vadd.f32 -1.0, %v9933_v2  ;;  %v9281_v14 = vadd.f32 %v9280_v5, %v9279_v6  ;;  %v9130_v7 = vadd.f32 %v17964_v34, %v17963_v58  ;;  %vm7672_vm10 = vcmp.gt.f32.partialorder %v16740_v50, 0.0 }
 0xb06   :  { %9946 = vrcp.f32 %v7589_v27  ;;  %v7449_v28 = vadd.f32 %v9201_v29, %v7304_v30  ;;  %v16751_v61 = vadd.f32 %v16673_v0, %v7635_v9  ;;  %v9282_v21 = vpop.f32.mrf.mxu1 }
 0xb07   :  { %v9935_v52 = vpop.eup %9934  ;;  %v9203_v3 = vpop.f32.mrf.mxu0  ;;  %v7732_v18 = vsel %vm7668_vm6, %v16697_v17, %v8236_v45  ;;  %9948 = vpow2.f32 %v7694_v49  ;;  %v7319_v63 = vadd.f32 %v9130_v7, %v9050_v43 }
 0xb08   :  { %v9937_v37 = vpop.eup %9936  ;;  %v7594_v57 = vadd.f32 %v9281_v14, %v7449_v28  ;;  %v9204_v19 = vadd.f32 %v9203_v3, %v9202_v24  ;;  %9438 = vmatprep.mubr.msk.f32.mxu0 %vm3381_vm0, %v7732_v18  ;;  %v7696_v60 = vmul.f32 1.442695, %v16751_v61  ;;  %v9283_v55 = vpop.f32.mrf.mxu1  ;;  %v7636_v12 = vmul.f32 %v9935_v52, %v17960_v11  ;;  %v17967_v52 = vld [vmem:[#allocation10_spill] sm:$0xff] }
 0xb09   :  { %v9205_v62 = vpop.f32.mrf.mxu0  ;;  %v8237_v23 = vadd.f32 -1.0, %v9937_v37  ;;  %v9284_v40 = vadd.f32 %v9283_v55, %v9282_v21  ;;  %vm7673_vm11 = vcmp.gt.f32.partialorder %v16751_v61, 0.0 }
 0xb0a   :  { %9950 = vrcp.f32 %v7594_v57  ;;  %v7454_v16 = vadd.f32 %v9204_v19, %v7309_v48  ;;  %v9285_v25 = vpop.f32.mrf.mxu1  ;;  %v16762_v32 = vadd.f32 %v16673_v0, %v7636_v12 }
 0xb0b   :  { %v9939_v17 = vpop.eup %9938  ;;  %v9206_v59 = vpop.f32.mrf.mxu0  ;;  %v7733_v30 = vsel %vm7669_vm7, %v16708_v1, %v8237_v23  ;;  %9952 = vpow2.f32 %v7696_v60  ;;  %v17968_v60 = vld [vmem:[#allocation11_spill] sm:$0xff] }
 0xb0c   :  { %v9941_v41 = vpop.eup %9940  ;;  %v7599_v38 = vadd.f32 %v9284_v40, %v7454_v16  ;;  %v9207_v51 = vadd.f32 %v9206_v59, %v9205_v62  ;;  %9439 = vmatmul.mubr.msk.f32.gmra.mxu0 %vm3381_vm0, %v7733_v30  ;;  %v7637_v54 = vmul.f32 %v9939_v17, %v17965_v20  ;;  %v9286_v56 = vpop.f32.mrf.mxu1  ;;  %v7698_v1 = vmul.f32 1.442695, %v16762_v32  ;;  %v17969_v16 = vld [vmem:[#allocation9_spill] sm:$0xff] }
 0xb0d   :  { %v9208_v13 = vpop.f32.mrf.mxu0  ;;  %v8238_v4 = vadd.f32 -1.0, %v9941_v41  ;;  %v9287_v53 = vadd.f32 %v9286_v56, %v9285_v25  ;;  %vm7674_vm12 = vcmp.gt.f32.partialorder %v16762_v32, 0.0 }
 0xb0e   :  { %9954 = vrcp.f32 %v7599_v38  ;;  %v7459_v15 = vadd.f32 %v9207_v51, %v7314_v39  ;;  %v16771_v6 = vadd.f32 %v16673_v0, %v7637_v54  ;;  %v9288_v26 = vpop.f32.mrf.mxu1 }
 0xb0f   :  { %v9943_v35 = vpop.eup %9942  ;;  %v9209_v2 = vpop.f32.mrf.mxu0  ;;  %v7734_v44 = vsel %vm7670_vm8, %v16717_v22, %v8238_v4  ;;  %9956 = vpow2.f32 %v7698_v1 }
 0xb10   :  { %v9945_v46 = vpop.eup %9944  ;;  %v7604_v27 = vadd.f32 %v9287_v53, %v7459_v15  ;;  %v9210_v29 = vadd.f32 %v9209_v2, %v9208_v13  ;;  %9441 = vmatprep.mubr.msk.f32.mxu0 %vm3381_vm0, %v7734_v44  ;;  %v7700_v31 = vmul.f32 1.442695, %v16771_v6  ;;  %v9289_v9 = vpop.f32.mrf.mxu1  ;;  %v7638_v47 = vmul.f32 %v9943_v35, %v17966_v42 }
 0xb11   :  { %v8239_v36 = vadd.f32 -1.0, %v9945_v46  ;;  %v9290_v24 = vadd.f32 %v9289_v9, %v9288_v26  ;;  %vm7675_vm13 = vcmp.gt.f32.partialorder %v16771_v6, 0.0 }
 0xb12   :  { %9958 = vrcp.f32 %v7604_v27  ;;  %v7464_v5 = vadd.f32 %v9210_v29, %v7319_v63  ;;  %v7660_v49 = vadd.f32 %v16673_v0, %v7638_v47 }
 0xb13   :  { %v9947_v45 = vpop.eup %9946  ;;  %v7735_v22 = vsel %vm7671_vm9, %v16727_v8, %v8239_v36  ;;  %9960 = vpow2.f32 %v7700_v31  ;;  %v8250_v36 = vld [vmem:[#allocation2] ss:$0 sm:$0xff] }
 0xb14   :  { %v9949_v28 = vpop.eup %9948  ;;  %v7609_v14 = vadd.f32 %v9290_v24, %v7464_v5  ;;  %9442 = vmatmul.mubr.msk.f32.gmra.mxu0 %vm3381_vm0, %v7735_v22  ;;  %v7639_v21 = vmul.f32 %v9947_v45, %v17967_v52  ;;  %v7702_v18 = vmul.f32 1.442695, %v7660_v49  ;;  %vm7676_vm14 = vcmp.gt.f32.partialorder %v7660_v49, 0.0 }
 0xb15   :  { %v8240_v3 = vadd.f32 -1.0, %v9949_v28 }
 0xb16   :  { %9962 = vrcp.f32 %v7609_v14  ;;  %v7661_v37 = vadd.f32 %v16673_v0, %v7639_v21 }
 0xb17   :  { %v9951_v48 = vpop.eup %9950  ;;  %v7736_v57 = vsel %vm7672_vm10, %v16740_v50, %v8240_v3  ;;  %9964 = vpow2.f32 %v7702_v18 }
 0xb18   :  { %v9953_v8 = vpop.eup %9952  ;;  %9444 = vmatprep.mubr.msk.f32.mxu0 %vm3381_vm0, %v7736_v57  ;;  %v7704_v19 = vmul.f32 1.442695, %v7661_v37  ;;  %v7640_v39 = vmul.f32 %v9951_v48, %v17968_v60  ;;  %vm7677_vm15 = vcmp.gt.f32.partialorder %v7661_v37, 0.0 }
 0xb19   :  { %v8241_v55 = vadd.f32 -1.0, %v9953_v8 }
 0xb1a   :  { %9966 = vpow2.f32 %v7704_v19  ;;  %v7662_v62 = vadd.f32 %v16673_v0, %v7640_v39 }
 0xb1b   :  { %v9955_v23 = vpop.eup %9954  ;;  %v7737_v11 = vsel %vm7673_vm11, %v16751_v61, %v8241_v55  ;;  %v17970_v61 = vld [vmem:[#allocation24_spill] sm:$0xff] }
 0xb1c   :  { %v9957_v12 = vpop.eup %9956  ;;  %9445 = vmatmul.mubr.msk.f32.gmra.mxu0 %vm3381_vm0, %v7737_v11  ;;  %v7706_v50 = vmul.f32 1.442695, %v7662_v62  ;;  %v7641_v40 = vmul.f32 %v9955_v23, %v17969_v16  ;;  %vm7678_vm1 = vcmp.gt.f32.partialorder %v7662_v62, 0.0 }
 0xb1d   :  { %v8242_v17 = vadd.f32 -1.0, %v9957_v12 }
 0xb1e   :  { %9968 = vpow2.f32 %v7706_v50  ;;  %v7663_v10 = vadd.f32 %v16673_v0, %v7641_v40 }
 0xb1f   :  { %v9959_v33 = vpop.eup %9958  ;;  %v7738_v43 = vsel %vm7674_vm12, %v16762_v32, %v8242_v17  ;;  %v17971_v32 = vld [vmem:[#allocation23_spill] sm:$0xff] }
 0xb20   :  { %v9961_v25 = vpop.eup %9960  ;;  %9447 = vmatprep.mubr.msk.f32.mxu0 %vm3381_vm0, %v7738_v43  ;;  %v7708_v59 = vmul.f32 1.442695, %v7663_v10  ;;  %v7642_v30 = vmul.f32 %v9959_v33, %v17970_v61  ;;  %vm7679_vm2 = vcmp.gt.f32.partialorder %v7663_v10, 0.0 }
 0xb21   :  { %v8243_v41 = vadd.f32 -1.0, %v9961_v25 }
 0xb22   :  { %9970 = vpow2.f32 %v7708_v59  ;;  %v7664_v58 = vadd.f32 %v16673_v0, %v7642_v30 }
 0xb23   :  { %v9963_v34 = vpop.eup %9962  ;;  %v7739_v7 = vsel %vm7675_vm13, %v16771_v6, %v8243_v41 }
 0xb24   :  { %v9965_v38 = vpop.eup %9964  ;;  %9448 = vmatmul.mubr.msk.f32.gmra.mxu0 %vm3381_vm0, %v7739_v7  ;;  %v7710_v51 = vmul.f32 1.442695, %v7664_v58  ;;  %v7643_v20 = vmul.f32 %v9963_v34, %v17971_v32  ;;  %vm7680_vm3 = vcmp.gt.f32.partialorder %v7664_v58, 0.0 }
 0xb25   :  { %v8244_v54 = vadd.f32 -1.0, %v9965_v38 }
 0xb26   :  { %9972 = vpow2.f32 %v7710_v51  ;;  %v7665_v56 = vadd.f32 %v16673_v0, %v7643_v20 }
 0xb27   :  { %v9967_v13 = vpop.eup %9966  ;;  %v7740_v4 = vsel %vm7676_vm14, %v7660_v49, %v8244_v54 }
 0xb28   :  { %9450 = vmatprep.mubr.msk.f32.mxu0 %vm3381_vm0, %v7740_v4  ;;  %v8245_v1 = vadd.f32 -1.0, %v9967_v13  ;;  %v7712_v15 = vmul.f32 1.442695, %v7665_v56  ;;  %vm7681_vm4 = vcmp.gt.f32.partialorder %v7665_v56, 0.0 }
 0xb2a   :  { %v7741_v53 = vsel %vm7677_vm15, %v7661_v37, %v8245_v1  ;;  %9974 = vpow2.f32 %v7712_v15 }
 0xb2b   :  { %v9969_v6 = vpop.eup %9968  ;;  %9451 = vmatmul.mubr.msk.f32.gmra.mxu0 %vm3381_vm0, %v7741_v53 }
 0xb2c   :  { %v8246_v35 = vadd.f32 -1.0, %v9969_v6 }
 0xb2e   :  { %v7742_v26 = vsel %vm7678_vm1, %v7662_v62, %v8246_v35 }
 0xb2f   :  { %v9971_v2 = vpop.eup %9970  ;;  %9453 = vmatprep.mubr.msk.f32.mxu0 %vm3381_vm0, %v7742_v26 }
 0xb30   :  { %v8247_v44 = vadd.f32 -1.0, %v9971_v2 }
 0xb32   :  { %v7743_v0 = vsel %vm7679_vm2, %v7663_v10, %v8247_v44 }
 0xb33   :  { %v9973_v46 = vpop.eup %9972  ;;  %9454 = vmatmul.mubr.msk.f32.gmra.mxu0 %vm3381_vm0, %v7743_v0 }
 0xb34   :  { %v8248_v63 = vadd.f32 -1.0, %v9973_v46 }
 0xb36   :  { %v7744_v27 = vsel %vm7680_vm3, %v7664_v58, %v8248_v63 }
 0xb37   :  { %v9975_v29 = vpop.eup %9974  ;;  %9456 = vmatprep.mubr.msk.f32.mxu0 %vm3381_vm0, %v7744_v27 }
 0xb38   :  { %v8249_v31 = vadd.f32 -1.0, %v9975_v29 }
 0xb3a   :  { %v7745_v9 = vsel %vm7681_vm4, %v7665_v56, %v8249_v31 }
 0xb3b   :  { %9457 = vmatmul.mubr.msk.f32.gmra.mxu0 %vm3381_vm0, %v7745_v9 }
 0xbc4   :  { %v9437_v42 = vpop.f32.mrf.mxu0 }
 0xbc5   :  { %v7881_v47 = vadd.f32 %v9437_v42, %v8250_v36 }
 0xbc6   :  { %v7875_v5 = vpop.f32.mrf.mxu0 }
 0xbc7   :  { %7956 = vst.msk [vmem:[%s16892_s19 + $0x8] sm:$0xff] %vm7954_vm5, %v7881_v47  ;;  %v7876_v24 = vadd.f32 %v8250_v36, %v7875_v5 }
 0xbc9   :  { %7955 = vst.msk [vmem:[%s16892_s19] sm:$0xff] %vm7954_vm5, %v7876_v24 }
 0xbcc   :  { %v9440_v45 = vpop.f32.mrf.mxu0 }
 0xbcd   :  { %v7891_v22 = vadd.f32 %v9440_v45, %v8250_v36 }
 0xbce   :  { %v7885_v49 = vpop.f32.mrf.mxu0 }
 0xbcf   :  { %7958 = vst.msk [vmem:[%s16892_s19 + $0x18] sm:$0xff] %vm7954_vm5, %v7891_v22  ;;  %v7886_v28 = vadd.f32 %v8250_v36, %v7885_v49 }
 0xbd1   :  { %7957 = vst.msk [vmem:[%s16892_s19 + $0x10] sm:$0xff] %vm7954_vm5, %v7886_v28 }
 0xbd4   :  { %v9443_v14 = vpop.f32.mrf.mxu0 }
 0xbd5   :  { %v7901_v52 = vadd.f32 %v9443_v14, %v8250_v36 }
 0xbd6   :  { %v7895_v21 = vpop.f32.mrf.mxu0 }
 0xbd7   :  { %7960 = vst.msk [vmem:[%s16892_s19 + $0x28] sm:$0xff] %vm7954_vm5, %v7901_v52  ;;  %v7896_v3 = vadd.f32 %v8250_v36, %v7895_v21 }
 0xbd9   :  { %7959 = vst.msk [vmem:[%s16892_s19 + $0x20] sm:$0xff] %vm7954_vm5, %v7896_v3 }
 0xbdc   :  { %v9446_v18 = vpop.f32.mrf.mxu0 }
 0xbdd   :  { %v7911_v37 = vadd.f32 %v9446_v18, %v8250_v36 }
 0xbde   :  { %v7905_v48 = vpop.f32.mrf.mxu0 }
 0xbdf   :  { %7962 = vst.msk [vmem:[%s16892_s19 + $0x38] sm:$0xff] %vm7954_vm5, %v7911_v37  ;;  %v7906_v57 = vadd.f32 %v8250_v36, %v7905_v48 }
 0xbe1   :  { %7961 = vst.msk [vmem:[%s16892_s19 + $0x30] sm:$0xff] %vm7954_vm5, %v7906_v57 }
 0xbe4   :  { %v9449_v8 = vpop.f32.mrf.mxu0 }
 0xbe5   :  { %v7921_v19 = vadd.f32 %v9449_v8, %v8250_v36 }
 0xbe6   :  { %v7915_v60 = vpop.f32.mrf.mxu0 }
 0xbe7   :  { %7964 = vst.msk [vmem:[%s16892_s19 + $0x48] sm:$0xff] %vm7954_vm5, %v7921_v19  ;;  %v7916_v39 = vadd.f32 %v8250_v36, %v7915_v60 }
 0xbe9   :  { %7963 = vst.msk [vmem:[%s16892_s19 + $0x40] sm:$0xff] %vm7954_vm5, %v7916_v39 }
 0xbeb   :  { %v9452_v55 = vpop.f32.mrf.mxu0 }
 0xbec   :  { %v7931_v62 = vadd.f32 %v9452_v55, %v8250_v36 }
 0xbed   :  { %v7925_v23 = vpop.f32.mrf.mxu0 }
 0xbee   :  { %7966 = vst.msk [vmem:[%s16892_s19 + $0x58] sm:$0xff] %vm7954_vm5, %v7931_v62  ;;  %v7926_v11 = vadd.f32 %v8250_v36, %v7925_v23 }
 0xbf0   :  { %7965 = vst.msk [vmem:[%s16892_s19 + $0x50] sm:$0xff] %vm7954_vm5, %v7926_v11 }
 0xbf3   :  { %v9455_v12 = vpop.f32.mrf.mxu0 }
 0xbf4   :  { %v7941_v50 = vadd.f32 %v9455_v12, %v8250_v36 }
 0xbf5   :  { %v7935_v16 = vpop.f32.mrf.mxu0 }
 0xbf6   :  { %7968 = vst.msk [vmem:[%s16892_s19 + $0x68] sm:$0xff] %vm7954_vm5, %v7941_v50  ;;  %v7936_v40 = vadd.f32 %v8250_v36, %v7935_v16 }
 0xbf8   :  { %7967 = vst.msk [vmem:[%s16892_s19 + $0x60] sm:$0xff] %vm7954_vm5, %v7936_v40 }
 0xbfb   :  { %v9458_v17 = vpop.f32.mrf.mxu0 }
 0xbfc   :  { %v7951_v10 = vadd.f32 %v9458_v17, %v8250_v36 }
 0xbfd   :  { %v7945_v33 = vpop.f32.mrf.mxu0 }
 0xbfe   :  { %7970 = vst.msk [vmem:[%s16892_s19 + $0x78] sm:$0xff] %vm7954_vm5, %v7951_v10  ;;  %v7946_v43 = vadd.f32 %v8250_v36, %v7945_v33 }
 0xc00   :  { %7969 = vst.msk [vmem:[%s16892_s19 + $0x70] sm:$0xff] %vm7954_vm5, %v7946_v43 }

</bundles_post_ra>
